<compile_context>
chip_gen: v7x
topology: tpu7x:2x2x1
jax: 0.10.0
libtpu: 0.0.40
codegen_flags: <defaults>
</compile_context>

<pallas_src>
import functools

import jax
import jax.numpy as jnp
from jax.experimental import pallas as pl
from jax.experimental.pallas import tpu as pltpu

LRELU_SLOPE = 0.2


def _lrelu(x):
    return jnp.where(x >= 0, x, LRELU_SLOPE * x)


# ----------------------------------------------------------------------------
# Fully fused generator kernel
#   grid step 0          : 4 head layers (latent->128->256->512->1024) -> VMEM carry
#   grid steps 0..R-1    : residual blocks, carry updated in VMEM scratch
#   grid steps R..R+T-1  : final layer output tile (1024 -> tn) + LeakyReLU + Tanh
# ----------------------------------------------------------------------------
def _gen_kernel(z_ref,
                hw0_ref, hb0_ref, hw1_ref, hb1_ref,
                hw2_ref, hb2_ref, hw3_ref, hb3_ref,
                w1_ref, b1_ref, w2_ref, b2_ref,
                wf_ref, bf_ref,
                o_ref,
                carry_ref,
                *, n_res):
    i = pl.program_id(0)

    # ---- phase 0 (step 0 only): fused head, seed the VMEM-resident carry ----
    @pl.when(i == 0)
    def _head():
        h = z_ref[...]
        for w_ref, b_ref in ((hw0_ref, hb0_ref), (hw1_ref, hb1_ref),
                             (hw2_ref, hb2_ref), (hw3_ref, hb3_ref)):
            h = _lrelu(jnp.dot(h.astype(jnp.bfloat16), w_ref[...],
                               preferred_element_type=jnp.float32) + b_ref[...])
        carry_ref[...] = h

    # ---- phase 1 (steps < n_res): residual trunk, weights streamed per step ----
    @pl.when(i < n_res)
    def _res():
        xf = carry_ref[...]                                   # f32 carry in VMEM
        h = _lrelu(jnp.dot(xf.astype(jnp.bfloat16), w1_ref[0],
                           preferred_element_type=jnp.float32) + b1_ref[0])
        y = jnp.dot(h.astype(jnp.bfloat16), w2_ref[0],
                    preferred_element_type=jnp.float32) + b2_ref[0]
        carry_ref[...] = _lrelu(xf + y)                       # residual add in f32

    # ---- phase 2 (steps >= n_res): final layer tile + LeakyReLU + Tanh ----
    @pl.when(i >= n_res)
    def _tail():
        y = jnp.dot(carry_ref[...].astype(jnp.bfloat16), wf_ref[...],
                    preferred_element_type=jnp.float32) + bf_ref[...]
        o_ref[...] = jnp.tanh(_lrelu(y))


def _pick_tile(n, cap=512):
    """Largest lane-dense (multiple of 128) divisor of n that is <= cap."""
    if n <= cap and n % 128 == 0:
        return n
    t = cap
    while t >= 128:
        if n % t == 0:
            return t
        t -= 128
    return n


def generator_forward(z, params, *, img_shape, trunk_buffers=3):
    B, _ = z.shape
    C, H, W = img_shape
    out_dim = C * H * W

    (hw0, hb0), (hw1, hb1), (hw2, hb2), (hw3, hb3) = params["blocks"]
    w1s, b1s = params["res_w1"], params["res_b1"]
    w2s, b2s = params["res_w2"], params["res_b2"]
    wf, bf = params["final"]

    n_res = w1s.shape[0]
    D = w1s.shape[-1]                      # trunk width (1024)
    tn = _pick_tile(out_dim)               # lane-dense final-layer tile
    n_tail = out_dim // tn
    grid = (n_res + n_tail,)

    def const_spec(shape):
        # Whole-array block, same block every step -> DMA'd once, stays resident.
        return pl.BlockSpec(shape, lambda i, _s=len(shape): (0,) * _s)

    wkw = {}
    if trunk_buffers is not None:
        wkw["pipeline_mode"] = pl.Buffered(trunk_buffers)

    def trunk_w_spec():
        return pl.BlockSpec((1, D, D),
                            lambda i: (jnp.minimum(i, n_res - 1), 0, 0), **wkw)

    def trunk_b_spec():
        return pl.BlockSpec((1, 1, D),
                            lambda i: (jnp.minimum(i, n_res - 1), 0, 0))

    def tail_idx(i):
        return (0, jnp.maximum(i - n_res, 0))

    out = pl.pallas_call(
        functools.partial(_gen_kernel, n_res=n_res),
        out_shape=jax.ShapeDtypeStruct((B, out_dim), jnp.float32),
        grid_spec=pltpu.PrefetchScalarGridSpec(
            num_scalar_prefetch=0,
            grid=grid,
            in_specs=[
                const_spec(z.shape),
                const_spec(hw0.shape), const_spec(hb0.shape),
                const_spec(hw1.shape), const_spec(hb1.shape),
                const_spec(hw2.shape), const_spec(hb2.shape),
                const_spec(hw3.shape), const_spec(hb3.shape),
                trunk_w_spec(), trunk_b_spec(),     # w1s, b1s
                trunk_w_spec(), trunk_b_spec(),     # w2s, b2s
                pl.BlockSpec((D, tn), tail_idx),    # final weight tile
                pl.BlockSpec((1, tn), tail_idx),    # final bias tile
            ],
            out_specs=pl.BlockSpec((B, tn), tail_idx),
            scratch_shapes=[pltpu.VMEM((B, D), jnp.float32)],   # resident carry
        ),
        compiler_params=pltpu.CompilerParams(
            dimension_semantics=("arbitrary",),     # sequential carry dependency
            vmem_limit_bytes=32 * 1024 * 1024,      # headroom above v5e 16 MiB default
        ),
    )(z, hw0, hb0, hw1, hb1, hw2, hb2, hw3, hb3,
      w1s, b1s, w2s, b2s, wf, bf)

    return out.reshape(B, C, H, W)          # img.view(B, *img_shape)


# ----------------------------------------------------------------------------
# Parameters (deterministic, synthetic; BN affine + seeded noise folded at init)
# ----------------------------------------------------------------------------
def init_params(key, latent_dim, img_shape, *, n_res=6, level=0.1, seed=0):
    C, H, W = img_shape
    out_dim = C * H * W

    def layer(k, din, dout, lseed, normalize=True):
        kw, kb, kg, kbt = jax.random.split(k, 4)
        w = jax.random.normal(kw, (din, dout), jnp.float32) * (1.0 / din ** 0.5)
        b = 0.01 * jax.random.normal(kb, (1, dout), jnp.float32)
        if normalize:
            gamma = 1.0 + 0.1 * jax.random.normal(kg, (1, dout), jnp.float32)
            beta = 0.01 * jax.random.normal(kbt, (1, dout), jnp.float32)
        else:
            gamma = jnp.ones((1, dout), jnp.float32)
            beta = jnp.zeros((1, dout), jnp.float32)
        # TODO(synk): NoiseLayer noise semantics unknown; fixed seeded Gaussian noise of
        # magnitude `level` folded into the effective bias (deterministic forward).
        eps = jax.random.normal(jax.random.PRNGKey(lseed), (1, dout), jnp.float32)
        w_eff = (w * gamma).astype(jnp.bfloat16)
        b_eff = (b * gamma + beta + level * eps).astype(jnp.float32)
        return w_eff, b_eff

    keys = iter(jax.random.split(key, 4 + 2 * n_res + 1))
    p = {}

    cfg = [(latent_dim, 128, False), (128, 256, True),
           (256, 512, True), (512, 1024, True)]
    p["blocks"] = [layer(next(keys), di, do, seed + 7 * idx, normalize=nm)
                   for idx, (di, do, nm) in enumerate(cfg)]

    w1s, b1s, w2s, b2s = [], [], [], []
    for r in range(n_res):
        w1, b1 = layer(next(keys), 1024, 1024, seed + 100 + r)
        w2, b2 = layer(next(keys), 1024, 1024, seed + 200 + r)
        w1s.append(w1); b1s.append(b1); w2s.append(w2); b2s.append(b2)
    p["res_w1"] = jnp.stack(w1s)
    p["res_b1"] = jnp.stack(b1s)
    p["res_w2"] = jnp.stack(w2s)
    p["res_b2"] = jnp.stack(b2s)

    p["final"] = layer(next(keys), 1024, out_dim, seed + 300)
    return p


# ----------------------------------------------------------------------------
if __name__ == "__main__":
    # Hidden widths 128/256/512/1024 are hardcoded in the module; latent/img_size small.
    latent_dim = 64
    img_size = 32
    channels = 3                      # non-MNIST dataset -> 3 output channels
    batch = 2
    img_shape = (channels, img_size, img_size)

    root = jax.random.PRNGKey(0)
    params = init_params(root, latent_dim, img_shape)
    z = jax.random.normal(jax.random.fold_in(root, 999),
                          (batch, latent_dim), jnp.float32)

    def run(trunk_buffers):
        fwd = jax.jit(functools.partial(generator_forward, img_shape=img_shape,
                                        trunk_buffers=trunk_buffers))
        return jax.block_until_ready(fwd(z, params))

    try:
        img = run(3)                  # triple-buffered trunk weight stream
    except Exception:                 # fallback: default double buffering
        img = run(None)

    assert img.shape == (batch, channels, img_size, img_size), img.shape
    assert img.dtype == jnp.float32
    assert bool(jnp.all(jnp.isfinite(img)))
    assert bool(jnp.all(jnp.abs(img) <= 1.0 + 1e-6))   # final Tanh range
    print("KERNEL_OK")
</pallas_src>

<mosaic_0001>
module attributes {stable_mosaic.version = 11 : i64} {
  func.func @_gen_kernel(%arg0: i32, %arg1: memref<2x64xf32, #tpu.memory_space<vmem>>, %arg2: memref<64x128xbf16, #tpu.memory_space<vmem>>, %arg3: memref<1x128xf32, #tpu.memory_space<vmem>>, %arg4: memref<128x256xbf16, #tpu.memory_space<vmem>>, %arg5: memref<1x256xf32, #tpu.memory_space<vmem>>, %arg6: memref<256x512xbf16, #tpu.memory_space<vmem>>, %arg7: memref<1x512xf32, #tpu.memory_space<vmem>>, %arg8: memref<512x1024xbf16, #tpu.memory_space<vmem>>, %arg9: memref<1x1024xf32, #tpu.memory_space<vmem>>, %arg10: memref<1x1024x1024xbf16, #tpu.memory_space<vmem>>, %arg11: memref<1x1x1024xf32, #tpu.memory_space<vmem>>, %arg12: memref<1x1024x1024xbf16, #tpu.memory_space<vmem>>, %arg13: memref<1x1x1024xf32, #tpu.memory_space<vmem>>, %arg14: memref<1024x512xbf16, #tpu.memory_space<vmem>>, %arg15: memref<1x512xf32, #tpu.memory_space<vmem>>, %arg16: memref<2x512xf32, #tpu.memory_space<vmem>>, %arg17: memref<2x1024xf32, #tpu.memory_space<vmem>>) attributes {dimension_semantics = [#tpu.dimension_semantics<arbitrary>], iteration_bounds = array<i64: 12>, scalar_prefetch = 0 : i64, scratch_operands = 1 : i64, tpu.core_type = #tpu.core_type<tc>, window_params = [{pipeline_mode = #tpu.pipeline_mode<synchronous>, transform_indices = @transform_0, window_bounds = array<i64: 2, 64>}, {pipeline_mode = #tpu.pipeline_mode<synchronous>, transform_indices = @transform_1, window_bounds = array<i64: 64, 128>}, {pipeline_mode = #tpu.pipeline_mode<synchronous>, transform_indices = @transform_2, window_bounds = array<i64: 1, 128>}, {pipeline_mode = #tpu.pipeline_mode<synchronous>, transform_indices = @transform_3, window_bounds = array<i64: 128, 256>}, {pipeline_mode = #tpu.pipeline_mode<synchronous>, transform_indices = @transform_4, window_bounds = array<i64: 1, 256>}, {pipeline_mode = #tpu.pipeline_mode<synchronous>, transform_indices = @transform_5, window_bounds = array<i64: 256, 512>}, {pipeline_mode = #tpu.pipeline_mode<synchronous>, transform_indices = @transform_6, window_bounds = array<i64: 1, 512>}, {pipeline_mode = #tpu.pipeline_mode<synchronous>, transform_indices = @transform_7, window_bounds = array<i64: 512, 1024>}, {pipeline_mode = #tpu.pipeline_mode<synchronous>, transform_indices = @transform_8, window_bounds = array<i64: 1, 1024>}, {transform_indices = @transform_9, window_bounds = array<i64: 1, 1024, 1024>}, {transform_indices = @transform_10, window_bounds = array<i64: 1, 1, 1024>}, {transform_indices = @transform_11, window_bounds = array<i64: 1, 1024, 1024>}, {transform_indices = @transform_12, window_bounds = array<i64: 1, 1, 1024>}, {transform_indices = @transform_13, window_bounds = array<i64: 1024, 512>}, {transform_indices = @transform_14, window_bounds = array<i64: 1, 512>}, {transform_indices = @transform_15, window_bounds = array<i64: 2, 512>}]} {
    %c0_i32 = arith.constant 0 : i32
    %0 = arith.cmpi eq, %arg0, %c0_i32 : i32
    %1 = arith.extui %0 : i1 to i32
    %c0_i32_0 = arith.constant 0 : i32
    %2 = arith.cmpi ne, %1, %c0_i32_0 : i32
    scf.if %2 {
      %c0 = arith.constant 0 : index
      %c0_4 = arith.constant 0 : index
      %9 = vector.load %arg1[%c0, %c0_4] : memref<2x64xf32, #tpu.memory_space<vmem>>, vector<2x64xf32>
      %10 = arith.truncf %9 : vector<2x64xf32> to vector<2x64xbf16>
      %c0_5 = arith.constant 0 : index
      %c0_6 = arith.constant 0 : index
      %11 = vector.load %arg2[%c0_5, %c0_6] : memref<64x128xbf16, #tpu.memory_space<vmem>>, vector<64x128xbf16>
      %cst = arith.constant dense<0.000000e+00> : vector<2x128xf32>
      %12 = tpu.matmul %10, %11, %cst {dimension_numbers = #tpu.dot_dimension_numbers<[1], [0], [0], [1], [0, 0, 1, 1], [], []>} : vector<2x64xbf16>, vector<64x128xbf16>, vector<2x128xf32> -> vector<2x128xf32>
      %c0_7 = arith.constant 0 : index
      %c0_8 = arith.constant 0 : index
      %13 = vector.load %arg3[%c0_7, %c0_8] : memref<1x128xf32, #tpu.memory_space<vmem>>, vector<1x128xf32>
      %14 = vector.broadcast %13 : vector<1x128xf32> to vector<2x128xf32>
      %15 = arith.addf %12, %14 : vector<2x128xf32>
      %cst_9 = arith.constant 0.000000e+00 : f32
      %16 = vector.broadcast %cst_9 : f32 to vector<2x128xf32>
      %17 = arith.cmpf oge, %15, %16 : vector<2x128xf32>
      %cst_10 = arith.constant 2.000000e-01 : f32
      %18 = vector.broadcast %cst_10 : f32 to vector<2x128xf32>
      %19 = arith.mulf %18, %15 : vector<2x128xf32>
      %20 = arith.select %17, %15, %19 : vector<2x128xi1>, vector<2x128xf32>
      %21 = arith.truncf %20 : vector<2x128xf32> to vector<2x128xbf16>
      %c0_11 = arith.constant 0 : index
      %c0_12 = arith.constant 0 : index
      %22 = vector.load %arg4[%c0_11, %c0_12] : memref<128x256xbf16, #tpu.memory_space<vmem>>, vector<128x256xbf16>
      %cst_13 = arith.constant dense<0.000000e+00> : vector<2x256xf32>
      %23 = tpu.matmul %21, %22, %cst_13 {dimension_numbers = #tpu.dot_dimension_numbers<[1], [0], [0], [1], [0, 0, 1, 1], [], []>} : vector<2x128xbf16>, vector<128x256xbf16>, vector<2x256xf32> -> vector<2x256xf32>
      %c0_14 = arith.constant 0 : index
      %c0_15 = arith.constant 0 : index
      %24 = vector.load %arg5[%c0_14, %c0_15] : memref<1x256xf32, #tpu.memory_space<vmem>>, vector<1x256xf32>
      %25 = vector.broadcast %24 : vector<1x256xf32> to vector<2x256xf32>
      %26 = arith.addf %23, %25 : vector<2x256xf32>
      %cst_16 = arith.constant 0.000000e+00 : f32
      %27 = vector.broadcast %cst_16 : f32 to vector<2x256xf32>
      %28 = arith.cmpf oge, %26, %27 : vector<2x256xf32>
      %cst_17 = arith.constant 2.000000e-01 : f32
      %29 = vector.broadcast %cst_17 : f32 to vector<2x256xf32>
      %30 = arith.mulf %29, %26 : vector<2x256xf32>
      %31 = arith.select %28, %26, %30 : vector<2x256xi1>, vector<2x256xf32>
      %32 = arith.truncf %31 : vector<2x256xf32> to vector<2x256xbf16>
      %c0_18 = arith.constant 0 : index
      %c0_19 = arith.constant 0 : index
      %33 = vector.load %arg6[%c0_18, %c0_19] : memref<256x512xbf16, #tpu.memory_space<vmem>>, vector<256x512xbf16>
      %cst_20 = arith.constant dense<0.000000e+00> : vector<2x512xf32>
      %34 = tpu.matmul %32, %33, %cst_20 {dimension_numbers = #tpu.dot_dimension_numbers<[1], [0], [0], [1], [0, 0, 1, 1], [], []>} : vector<2x256xbf16>, vector<256x512xbf16>, vector<2x512xf32> -> vector<2x512xf32>
      %c0_21 = arith.constant 0 : index
      %c0_22 = arith.constant 0 : index
      %35 = vector.load %arg7[%c0_21, %c0_22] : memref<1x512xf32, #tpu.memory_space<vmem>>, vector<1x512xf32>
      %36 = vector.broadcast %35 : vector<1x512xf32> to vector<2x512xf32>
      %37 = arith.addf %34, %36 : vector<2x512xf32>
      %cst_23 = arith.constant 0.000000e+00 : f32
      %38 = vector.broadcast %cst_23 : f32 to vector<2x512xf32>
      %39 = arith.cmpf oge, %37, %38 : vector<2x512xf32>
      %cst_24 = arith.constant 2.000000e-01 : f32
      %40 = vector.broadcast %cst_24 : f32 to vector<2x512xf32>
      %41 = arith.mulf %40, %37 : vector<2x512xf32>
      %42 = arith.select %39, %37, %41 : vector<2x512xi1>, vector<2x512xf32>
      %43 = arith.truncf %42 : vector<2x512xf32> to vector<2x512xbf16>
      %c0_25 = arith.constant 0 : index
      %c0_26 = arith.constant 0 : index
      %44 = vector.load %arg8[%c0_25, %c0_26] : memref<512x1024xbf16, #tpu.memory_space<vmem>>, vector<512x1024xbf16>
      %cst_27 = arith.constant dense<0.000000e+00> : vector<2x1024xf32>
      %45 = tpu.matmul %43, %44, %cst_27 {dimension_numbers = #tpu.dot_dimension_numbers<[1], [0], [0], [1], [0, 0, 1, 1], [], []>} : vector<2x512xbf16>, vector<512x1024xbf16>, vector<2x1024xf32> -> vector<2x1024xf32>
      %c0_28 = arith.constant 0 : index
      %c0_29 = arith.constant 0 : index
      %46 = vector.load %arg9[%c0_28, %c0_29] : memref<1x1024xf32, #tpu.memory_space<vmem>>, vector<1x1024xf32>
      %47 = vector.broadcast %46 : vector<1x1024xf32> to vector<2x1024xf32>
      %48 = arith.addf %45, %47 : vector<2x1024xf32>
      %cst_30 = arith.constant 0.000000e+00 : f32
      %49 = vector.broadcast %cst_30 : f32 to vector<2x1024xf32>
      %50 = arith.cmpf oge, %48, %49 : vector<2x1024xf32>
      %cst_31 = arith.constant 2.000000e-01 : f32
      %51 = vector.broadcast %cst_31 : f32 to vector<2x1024xf32>
      %52 = arith.mulf %51, %48 : vector<2x1024xf32>
      %53 = arith.select %50, %48, %52 : vector<2x1024xi1>, vector<2x1024xf32>
      %c0_32 = arith.constant 0 : index
      %c0_33 = arith.constant 0 : index
      %54 = vector.load %arg17[%c0_32, %c0_33] : memref<2x1024xf32, #tpu.memory_space<vmem>>, vector<2x1024xf32>
      tpu.vector_store %arg17[%c0_32, %c0_33], %53 {strides = array<i32>} : memref<2x1024xf32, #tpu.memory_space<vmem>>, vector<2x1024xf32>,
    } else {
    }
    %c6_i32 = arith.constant 6 : i32
    %3 = arith.cmpi slt, %arg0, %c6_i32 : i32
    %4 = arith.extui %3 : i1 to i32
    %c0_i32_1 = arith.constant 0 : i32
    %5 = arith.cmpi ne, %4, %c0_i32_1 : i32
    scf.if %5 {
      %c0 = arith.constant 0 : index
      %c0_4 = arith.constant 0 : index
      %9 = vector.load %arg17[%c0, %c0_4] : memref<2x1024xf32, #tpu.memory_space<vmem>>, vector<2x1024xf32>
      %10 = arith.truncf %9 : vector<2x1024xf32> to vector<2x1024xbf16>
      %c0_5 = arith.constant 0 : index
      %c0_6 = arith.constant 0 : index
      %c0_7 = arith.constant 0 : index
      %11 = vector.load %arg10[%c0_5, %c0_6, %c0_7] : memref<1x1024x1024xbf16, #tpu.memory_space<vmem>>, vector<1x1024x1024xbf16>
      %12 = vector.shape_cast %11 : vector<1x1024x1024xbf16> to vector<1024x1024xbf16>
      %cst = arith.constant dense<0.000000e+00> : vector<2x1024xf32>
      %13 = tpu.matmul %10, %12, %cst {dimension_numbers = #tpu.dot_dimension_numbers<[1], [0], [0], [1], [0, 0, 1, 1], [], []>} : vector<2x1024xbf16>, vector<1024x1024xbf16>, vector<2x1024xf32> -> vector<2x1024xf32>
      %c0_8 = arith.constant 0 : index
      %c0_9 = arith.constant 0 : index
      %c0_10 = arith.constant 0 : index
      %14 = vector.load %arg11[%c0_8, %c0_9, %c0_10] : memref<1x1x1024xf32, #tpu.memory_space<vmem>>, vector<1x1x1024xf32>
      %15 = vector.shape_cast %14 : vector<1x1x1024xf32> to vector<1x1024xf32>
      %16 = vector.broadcast %15 : vector<1x1024xf32> to vector<2x1024xf32>
      %17 = arith.addf %13, %16 : vector<2x1024xf32>
      %cst_11 = arith.constant 0.000000e+00 : f32
      %18 = vector.broadcast %cst_11 : f32 to vector<2x1024xf32>
      %19 = arith.cmpf oge, %17, %18 : vector<2x1024xf32>
      %cst_12 = arith.constant 2.000000e-01 : f32
      %20 = vector.broadcast %cst_12 : f32 to vector<2x1024xf32>
      %21 = arith.mulf %20, %17 : vector<2x1024xf32>
      %22 = arith.select %19, %17, %21 : vector<2x1024xi1>, vector<2x1024xf32>
      %23 = arith.truncf %22 : vector<2x1024xf32> to vector<2x1024xbf16>
      %c0_13 = arith.constant 0 : index
      %c0_14 = arith.constant 0 : index
      %c0_15 = arith.constant 0 : index
      %24 = vector.load %arg12[%c0_13, %c0_14, %c0_15] : memref<1x1024x1024xbf16, #tpu.memory_space<vmem>>, vector<1x1024x1024xbf16>
      %25 = vector.shape_cast %24 : vector<1x1024x1024xbf16> to vector<1024x1024xbf16>
      %cst_16 = arith.constant dense<0.000000e+00> : vector<2x1024xf32>
      %26 = tpu.matmul %23, %25, %cst_16 {dimension_numbers = #tpu.dot_dimension_numbers<[1], [0], [0], [1], [0, 0, 1, 1], [], []>} : vector<2x1024xbf16>, vector<1024x1024xbf16>, vector<2x1024xf32> -> vector<2x1024xf32>
      %c0_17 = arith.constant 0 : index
      %c0_18 = arith.constant 0 : index
      %c0_19 = arith.constant 0 : index
      %27 = vector.load %arg13[%c0_17, %c0_18, %c0_19] : memref<1x1x1024xf32, #tpu.memory_space<vmem>>, vector<1x1x1024xf32>
      %28 = vector.shape_cast %27 : vector<1x1x1024xf32> to vector<1x1024xf32>
      %29 = vector.broadcast %28 : vector<1x1024xf32> to vector<2x1024xf32>
      %30 = arith.addf %26, %29 : vector<2x1024xf32>
      %31 = arith.addf %9, %30 : vector<2x1024xf32>
      %cst_20 = arith.constant 0.000000e+00 : f32
      %32 = vector.broadcast %cst_20 : f32 to vector<2x1024xf32>
      %33 = arith.cmpf oge, %31, %32 : vector<2x1024xf32>
      %cst_21 = arith.constant 2.000000e-01 : f32
      %34 = vector.broadcast %cst_21 : f32 to vector<2x1024xf32>
      %35 = arith.mulf %34, %31 : vector<2x1024xf32>
      %36 = arith.select %33, %31, %35 : vector<2x1024xi1>, vector<2x1024xf32>
      %c0_22 = arith.constant 0 : index
      %c0_23 = arith.constant 0 : index
      %37 = vector.load %arg17[%c0_22, %c0_23] : memref<2x1024xf32, #tpu.memory_space<vmem>>, vector<2x1024xf32>
      tpu.vector_store %arg17[%c0_22, %c0_23], %36 {strides = array<i32>} : memref<2x1024xf32, #tpu.memory_space<vmem>>, vector<2x1024xf32>,
    } else {
    }
    %c6_i32_2 = arith.constant 6 : i32
    %6 = arith.cmpi sge, %arg0, %c6_i32_2 : i32
    %7 = arith.extui %6 : i1 to i32
    %c0_i32_3 = arith.constant 0 : i32
    %8 = arith.cmpi ne, %7, %c0_i32_3 : i32
    scf.if %8 {
      %c0 = arith.constant 0 : index
      %c0_4 = arith.constant 0 : index
      %9 = vector.load %arg17[%c0, %c0_4] : memref<2x1024xf32, #tpu.memory_space<vmem>>, vector<2x1024xf32>
      %10 = arith.truncf %9 : vector<2x1024xf32> to vector<2x1024xbf16>
      %c0_5 = arith.constant 0 : index
      %c0_6 = arith.constant 0 : index
      %11 = vector.load %arg14[%c0_5, %c0_6] : memref<1024x512xbf16, #tpu.memory_space<vmem>>, vector<1024x512xbf16>
      %cst = arith.constant dense<0.000000e+00> : vector<2x512xf32>
      %12 = tpu.matmul %10, %11, %cst {dimension_numbers = #tpu.dot_dimension_numbers<[1], [0], [0], [1], [0, 0, 1, 1], [], []>} : vector<2x1024xbf16>, vector<1024x512xbf16>, vector<2x512xf32> -> vector<2x512xf32>
      %c0_7 = arith.constant 0 : index
      %c0_8 = arith.constant 0 : index
      %13 = vector.load %arg15[%c0_7, %c0_8] : memref<1x512xf32, #tpu.memory_space<vmem>>, vector<1x512xf32>
      %14 = vector.broadcast %13 : vector<1x512xf32> to vector<2x512xf32>
      %15 = arith.addf %12, %14 : vector<2x512xf32>
      %cst_9 = arith.constant 0.000000e+00 : f32
      %16 = vector.broadcast %cst_9 : f32 to vector<2x512xf32>
      %17 = arith.cmpf oge, %15, %16 : vector<2x512xf32>
      %cst_10 = arith.constant 2.000000e-01 : f32
      %18 = vector.broadcast %cst_10 : f32 to vector<2x512xf32>
      %19 = arith.mulf %18, %15 : vector<2x512xf32>
      %20 = arith.select %17, %15, %19 : vector<2x512xi1>, vector<2x512xf32>
      %21 = math.tanh %20 : vector<2x512xf32>
      %c0_11 = arith.constant 0 : index
      %c0_12 = arith.constant 0 : index
      %22 = vector.load %arg16[%c0_11, %c0_12] : memref<2x512xf32, #tpu.memory_space<vmem>>, vector<2x512xf32>
      tpu.vector_store %arg16[%c0_11, %c0_12], %21 {strides = array<i32>} : memref<2x512xf32, #tpu.memory_space<vmem>>, vector<2x512xf32>,
    } else {
    }
    return
  }
  func.func @transform_0(%arg0: i32) -> (i32, i32) {
    %c0_i32 = arith.constant 0 : i32
    %c0_i32_0 = arith.constant 0 : i32
    %c0_i32_1 = arith.constant 0 : i32
    return %c0_i32, %c0_i32_0 : i32, i32
  }
  func.func @transform_1(%arg0: i32) -> (i32, i32) {
    %c0_i32 = arith.constant 0 : i32
    %c0_i32_0 = arith.constant 0 : i32
    %c0_i32_1 = arith.constant 0 : i32
    return %c0_i32, %c0_i32_0 : i32, i32
  }
  func.func @transform_2(%arg0: i32) -> (i32, i32) {
    %c0_i32 = arith.constant 0 : i32
    %c0_i32_0 = arith.constant 0 : i32
    %c0_i32_1 = arith.constant 0 : i32
    return %c0_i32, %c0_i32_0 : i32, i32
  }
  func.func @transform_3(%arg0: i32) -> (i32, i32) {
    %c0_i32 = arith.constant 0 : i32
    %c0_i32_0 = arith.constant 0 : i32
    %c0_i32_1 = arith.constant 0 : i32
    return %c0_i32, %c0_i32_0 : i32, i32
  }
  func.func @transform_4(%arg0: i32) -> (i32, i32) {
    %c0_i32 = arith.constant 0 : i32
    %c0_i32_0 = arith.constant 0 : i32
    %c0_i32_1 = arith.constant 0 : i32
    return %c0_i32, %c0_i32_0 : i32, i32
  }
  func.func @transform_5(%arg0: i32) -> (i32, i32) {
    %c0_i32 = arith.constant 0 : i32
    %c0_i32_0 = arith.constant 0 : i32
    %c0_i32_1 = arith.constant 0 : i32
    return %c0_i32, %c0_i32_0 : i32, i32
  }
  func.func @transform_6(%arg0: i32) -> (i32, i32) {
    %c0_i32 = arith.constant 0 : i32
    %c0_i32_0 = arith.constant 0 : i32
    %c0_i32_1 = arith.constant 0 : i32
    return %c0_i32, %c0_i32_0 : i32, i32
  }
  func.func @transform_7(%arg0: i32) -> (i32, i32) {
    %c0_i32 = arith.constant 0 : i32
    %c0_i32_0 = arith.constant 0 : i32
    %c0_i32_1 = arith.constant 0 : i32
    return %c0_i32, %c0_i32_0 : i32, i32
  }
  func.func @transform_8(%arg0: i32) -> (i32, i32) {
    %c0_i32 = arith.constant 0 : i32
    %c0_i32_0 = arith.constant 0 : i32
    %c0_i32_1 = arith.constant 0 : i32
    return %c0_i32, %c0_i32_0 : i32, i32
  }
  func.func @transform_9(%arg0: i32) -> (i32, i32, i32) {
    %c5_i32 = arith.constant 5 : i32
    %0 = arith.minsi %arg0, %c5_i32 : i32
    %c0_i32 = arith.constant 0 : i32
    %c0_i32_0 = arith.constant 0 : i32
    %c0_i32_1 = arith.constant 0 : i32
    return %0, %c0_i32, %c0_i32_0 : i32, i32, i32
  }
  func.func @transform_10(%arg0: i32) -> (i32, i32, i32) {
    %c5_i32 = arith.constant 5 : i32
    %0 = arith.minsi %arg0, %c5_i32 : i32
    %c0_i32 = arith.constant 0 : i32
    %c0_i32_0 = arith.constant 0 : i32
    %c0_i32_1 = arith.constant 0 : i32
    return %0, %c0_i32, %c0_i32_0 : i32, i32, i32
  }
  func.func @transform_11(%arg0: i32) -> (i32, i32, i32) {
    %c5_i32 = arith.constant 5 : i32
    %0 = arith.minsi %arg0, %c5_i32 : i32
    %c0_i32 = arith.constant 0 : i32
    %c0_i32_0 = arith.constant 0 : i32
    %c0_i32_1 = arith.constant 0 : i32
    return %0, %c0_i32, %c0_i32_0 : i32, i32, i32
  }
  func.func @transform_12(%arg0: i32) -> (i32, i32, i32) {
    %c5_i32 = arith.constant 5 : i32
    %0 = arith.minsi %arg0, %c5_i32 : i32
    %c0_i32 = arith.constant 0 : i32
    %c0_i32_0 = arith.constant 0 : i32
    %c0_i32_1 = arith.constant 0 : i32
    return %0, %c0_i32, %c0_i32_0 : i32, i32, i32
  }
  func.func @transform_13(%arg0: i32) -> (i32, i32) {
    %c6_i32 = arith.constant 6 : i32
    %0 = arith.subi %arg0, %c6_i32 : i32
    %c0_i32 = arith.constant 0 : i32
    %1 = arith.maxsi %0, %c0_i32 : i32
    %c0_i32_0 = arith.constant 0 : i32
    %c0_i32_1 = arith.constant 0 : i32
    return %c0_i32_0, %1 : i32, i32
  }
  func.func @transform_14(%arg0: i32) -> (i32, i32) {
    %c6_i32 = arith.constant 6 : i32
    %0 = arith.subi %arg0, %c6_i32 : i32
    %c0_i32 = arith.constant 0 : i32
    %1 = arith.maxsi %0, %c0_i32 : i32
    %c0_i32_0 = arith.constant 0 : i32
    %c0_i32_1 = arith.constant 0 : i32
    return %c0_i32_0, %1 : i32, i32
  }
  func.func @transform_15(%arg0: i32) -> (i32, i32) {
    %c6_i32 = arith.constant 6 : i32
    %0 = arith.subi %arg0, %c6_i32 : i32
    %c0_i32 = arith.constant 0 : i32
    %1 = arith.maxsi %0, %c0_i32 : i32
    %c0_i32_0 = arith.constant 0 : i32
    %c0_i32_1 = arith.constant 0 : i32
    return %c0_i32_0, %1 : i32, i32
  }
}

</mosaic_0001>

<bundles_post_ra>
// kernel: generator_forward.1
= control target key start
LH: loop header
LB: loop body
LE: loop exit
PB: predicated region body
PF: predicated region fallthrough
CT: control target
= control target key end

     0   :  { %s19011_s0 = inlined_call_operand.hbm [shape: f32[2,64], index: 0, kind: input, shape index: {}]   ;;  %s19012_s1 = inlined_call_operand.hbm [shape: bf16[64,128], index: 1, kind: input, shape index: {}]   ;;  %s19013_s2 = inlined_call_operand.hbm [shape: f32[1,128], index: 2, kind: input, shape index: {}]   ;;  %s19014_s3 = inlined_call_operand.hbm [shape: bf16[128,256], index: 3, kind: input, shape index: {}]   ;;  %s19015_s4 = inlined_call_operand.hbm [shape: f32[1,256], index: 4, kind: input, shape index: {}]   ;;  %s19016_s5 = inlined_call_operand.hbm [shape: bf16[256,512], index: 5, kind: input, shape index: {}]   ;;  %s19017_s6 = inlined_call_operand.hbm [shape: f32[1,512], index: 6, kind: input, shape index: {}]   ;;  %s19018_s7 = inlined_call_operand.hbm [shape: bf16[512,1024], index: 7, kind: input, shape index: {}]   ;;  %s19019_s8 = inlined_call_operand.hbm [shape: f32[1,1024], index: 8, kind: input, shape index: {}]   ;;  %s19020_s9 = inlined_call_operand.hbm [shape: bf16[6,1024,1024], index: 9, kind: input, shape index: {}]   ;;  %s19021_s10 = inlined_call_operand.hbm [shape: f32[6,1,1024], index: 10, kind: input, shape index: {}]   ;;  %s19022_s11 = inlined_call_operand.hbm [shape: bf16[6,1024,1024], index: 11, kind: input, shape index: {}]   ;;  %s19023_s12 = inlined_call_operand.hbm [shape: f32[6,1,1024], index: 12, kind: input, shape index: {}]   ;;  %s19024_s13 = inlined_call_operand.hbm [shape: bf16[1024,3072], index: 13, kind: input, shape index: {}]   ;;  %s19025_s14 = inlined_call_operand.hbm [shape: f32[1,3072], index: 14, kind: input, shape index: {}]   ;;  %s19026_s15 = inlined_call_operand.vmem [shape: f32[2,3072], index: 15, kind: output, shape index: {}]  }
   0x1   :  { %19069 = sst [smem:[#allocation39_spill]] %s19011_s0 }
   0x2   :  { %19070 = sst [smem:[#allocation40_spill]] %s19012_s1 }
   0x3   :  { %19071 = sst [smem:[#allocation41_spill]] %s19013_s2 }
   0x4   :  { %19072 = sst [smem:[#allocation42_spill]] %s19014_s3 }
   0x5   :  { %19073 = sst [smem:[#allocation43_spill]] %s19015_s4 }
   0x6   :  { %19074 = sst [smem:[#allocation44_spill]] %s19016_s5 }
   0x7   :  { %19075 = sst [smem:[#allocation45_spill]] %s19017_s6 }
   0x8   :  { %19076 = sst [smem:[#allocation46_spill]] %s19018_s7 }
   0x9   :  { %19077 = sst [smem:[#allocation47_spill]] %s19019_s8 }
   0xa   :  { %19078 = sst [smem:[#allocation48_spill]] %s19020_s9 }
   0xb   :  { %19079 = sst [smem:[#allocation49_spill]] %s19021_s10 }
   0xc   :  { %19080 = sst [smem:[#allocation50_spill]] %s19022_s11 }
   0xd   :  { %19081 = sst [smem:[#allocation51_spill]] %s19023_s12 }
   0xe   :  { %19082 = sst [smem:[#allocation52_spill]] %s19024_s13 }
   0xf   :  { %19083 = sst [smem:[#allocation53_spill]] %s19025_s14 }
  0x10   :  { %19084 = sst [smem:[#allocation54_spill]] %s19026_s15 }
  0x11   :  { %20 = vsyncpa [#allocation4], 0 }
  0x12   :  { %21 = vsyncpa [#allocation6], 0 }
  0x13   :  { %22 = vsyncpa [#allocation9], 0 }
  0x14   :  { %23 = vsyncpa [#allocation12], 0 }
  0x15   :  { %24 = vsyncpa [#allocation15], 0 }
  0x16   :  { %25 = vsyncpa [#allocation18], 0 }
  0x17   :  { %27 = vsyncpa [#allocation18 + $0x1], 0 }
  0x18   :  { %28 = vsyncpa [#allocation21], 0 }
  0x19   :  { %30 = vsyncpa [#allocation21 + $0x1], 0 }
  0x1a   :  { %31 = vsyncpa [#allocation24], 0 }
  0x1b   :  { %33 = vsyncpa [#allocation24 + $0x1], 0  ;;  %s16782_s18 = smov 0   ;;  %s16784_s19 = smov 0  }
  0x1c   :  { %s16786_s20 = smov 0   ;;  %s16788_s21 = smov 0  }
  0x1d   :  { %s16790_s22 = smov 0   ;;  %s16792_s23 = smov 0  }
  0x1e   :  { %s16794_s24 = smov 0  }
  0x1f LB: > { %19085 = sst [smem:[#allocation34_spill]] %s16662_s22  ;;  %s16672_s25 = smov [#allocation5]   ;;  %s16670_s24 = sphi %s16794_s24, %s19162_s24   ;;  %s16666_s23 = sphi %s16792_s23, %s19161_s23   ;;  %s16662_s22 = sphi %s16790_s22, %s19160_s22   ;;  %s16658_s21 = sphi %s16788_s21, %s19155_s21   ;;  %s16654_s20 = sphi %s16786_s20, %s19159_s20   ;;  %s16650_s19 = sphi %s16784_s19, %s19158_s19   ;;  %s16646_s18 = sphi %s16782_s18, %s19157_s18  }
  0x20   : > { %s472_s26 = sshll.u32 %s16672_s25, 4  ;;  %s16818_s27 = sadd.s32 4294967295, %s16670_s24   ;;  %s16824_s26 = int_to_ptr.vmem [resolvable:$true] %s472_s26 }
  0x21   : > { %p13571_p0 = scmp.ge.s32.totalorder %s16670_s24, 1  ;;  %p19036_p1 = scmp.eq.s32.totalorder %s16818_s27, 0 }
  0x22   : > { %p449_p2 = scmp.lt.s32.totalorder %s16670_s24, 13  ;;  %s16673_s29 = smov [#allocation8]  }
  0x23   : > { %s496_s30 = sshll.u32 %s16673_s29, 4  ;;  %s16674_s17 = smov [#allocation11]   ;;  %s16838_s30 = int_to_ptr.vmem [resolvable:$true] %s496_s30 }
  0x24   : > { %p16826_p4 = pnand %p13571_p0, %p449_p2  ;;  %s16840_s25 = sshll.u32 %s16674_s17, 4  ;;  %s521_s25 = int_to_ptr.vmem [resolvable:$true] %s16840_s25 }
  0x25   : > { %s19089_s1 = sld [smem:[#allocation40_spill]] }
  0x26   : > { %s19086_s28 = scalar_select %p16826_p4, 1, 0 }
  0x27   : > { %p15483_p5 = pneg %p16826_p4 }
  0x28   : > { %19087 = sst [smem:[#allocation35_spill]] %s19086_s28 }
  0x29   : > { %p16834_p6 = pnand %p15483_p5, %p19036_p1 }
  0x2b   : > { %s19088_s16 = scalar_select %p16834_p6, 1, 0 }
  0x2c   : > { %s16152_s12 = scalar_lea.hbm %s19089_s1, 512  ;;  %p16850_p8 = pneg %p16834_p6 }
  0x2d   : > { %p16153_p7 = scmp.ne.s32.totalorder %s19089_s1, %s16152_s12  ;;  %p16159_p11 = scmp.lt.u32.totalorder %s16152_s12, %s19089_s1 }
  0x2e   : > { %s19090_s29 = scalar_select %p16850_p8, 1, 0 }
  0x2f   : > { %p16155_p9 = pnand %p16850_p8, %p16153_p7 }
  0x31   : > { %p16156_p10 = pneg %p16155_p9 }
  0x33   : > { %p16161_p12 = pnand %p16159_p11, %p16156_p10 }
  0x35   : > { %16164 = shalt.err (!%p16161_p12)
}
  0x36   : > { %s16165_s10 = scalar_lea.vmem %s16824_s26, 512  ;;  %p16173_p5 = scmp.lt.s32.totalorder %s16824_s26, %s16824_s26 }
  0x37   : > { %p16166_p13 = scmp.ne.s32.totalorder %s16824_s26, %s16165_s10  ;;  %p16174_p3 = scmp.lt.s32.totalorder %s16165_s10, %s16165_s10 }
  0x39   : > { %p16168_p0 = pnand %p16166_p13, %p16850_p8  ;;  %p16175_p7 = por %p16174_p3, %p16173_p5 }
  0x3b   : > { %p16169_p2 = pneg %p16168_p0 }
  0x3d   : > { %p16176_p9 = pnand %p16175_p7, %p16169_p2 }
  0x3f   : > { %16179 = shalt.err (!%p16176_p9)
}
  0x40   : > { %s16675_s14 = smov 64   ;;  %s16676_s8 = smov 4  }
  0x41   : > { %15489 = dma.hbm_to_vmem [thread:$0]  (!%p16834_p6), %s19089_s1, 512, %s16824_s26, [#allocation6], %s16675_s14, %s16675_s14, %s16676_s8  }
  0x42   : > { %s19091_s3 = sld [smem:[#allocation42_spill]] }
  0x48   : > { %s16180_s6 = scalar_lea.hbm %s19091_s3, 2048 }
  0x49   : > { %p16181_p3 = scmp.ne.s32.totalorder %s19091_s3, %s16180_s6  ;;  %p16187_p12 = scmp.lt.u32.totalorder %s16180_s6, %s19091_s3 }
  0x4b   : > { %p16183_p10 = pnand %p16181_p3, %p16850_p8 }
  0x4d   : > { %p16184_p11 = pneg %p16183_p10 }
  0x4f   : > { %p16189_p13 = pnand %p16187_p12, %p16184_p11 }
  0x51   : > { %16192 = shalt.err (!%p16189_p13)
}
  0x52   : > { %s16193_s26 = scalar_lea.vmem %s16838_s30, 2048  ;;  %p16201_p7 = scmp.lt.s32.totalorder %s16838_s30, %s16838_s30 }
  0x53   : > { %p16194_p0 = scmp.ne.s32.totalorder %s16838_s30, %s16193_s26  ;;  %p16202_p9 = scmp.lt.s32.totalorder %s16193_s26, %s16193_s26 }
  0x55   : > { %p16196_p2 = pnand %p16194_p0, %p16850_p8  ;;  %p16203_p3 = por %p16202_p9, %p16201_p7 }
  0x57   : > { %p16197_p5 = pneg %p16196_p2 }
  0x59   : > { %p16204_p10 = pnand %p16203_p3, %p16197_p5 }
  0x5b   : > { %16207 = shalt.err (!%p16204_p10)
}
  0x5c   : > { %s16677_s2 = smov 128   ;;  %s16678_s0 = smov 8  }
  0x5d   : > { %15495 = dma.hbm_to_vmem [thread:$0]  (!%p16834_p6), %s19091_s3, 2048, %s16838_s30, [#allocation9], %s16677_s2, %s16677_s2, %s16678_s0  }
  0x5e   : > { %s19092_s5 = sld [smem:[#allocation44_spill]] }
  0x64   : > { %s16208_s12 = scalar_lea.hbm %s19092_s5, 8192 }
  0x65   : > { %p16209_p11 = scmp.ne.s32.totalorder %s19092_s5, %s16208_s12  ;;  %p16215_p0 = scmp.lt.u32.totalorder %s16208_s12, %s19092_s5 }
  0x67   : > { %p16211_p12 = pnand %p16209_p11, %p16850_p8 }
  0x69   : > { %p16212_p13 = pneg %p16211_p12 }
  0x6b   : > { %p16217_p2 = pnand %p16215_p0, %p16212_p13 }
  0x6d   : > { %16220 = shalt.err (!%p16217_p2)
}
  0x6e   : > { %s16221_s26 = scalar_lea.vmem %s521_s25, 8192  ;;  %p16229_p3 = scmp.lt.s32.totalorder %s521_s25, %s521_s25 }
  0x6f   : > { %p16222_p5 = scmp.ne.s32.totalorder %s521_s25, %s16221_s26  ;;  %p16230_p10 = scmp.lt.s32.totalorder %s16221_s26, %s16221_s26 }
  0x71   : > { %p16224_p7 = pnand %p16222_p5, %p16850_p8  ;;  %p16231_p1 = por %p16230_p10, %p16229_p3 }
  0x73   : > { %p16225_p9 = pneg %p16224_p7 }
  0x75   : > { %p16232_p4 = pnand %p16231_p1, %p16225_p9 }
  0x77   : > { %16235 = shalt.err (!%p16232_p4)
}
  0x78   : > { %s19038_s30 = smov 256   ;;  %s19039_s2 = smov 16  }
  0x79   : > { %15501 = dma.hbm_to_vmem [thread:$0]  (!%p16834_p6), %s19092_s5, 8192, %s521_s25, [#allocation12], %s19038_s30, %s19038_s30, %s19039_s2  }
  0x7a   : > { %s16681_s6 = smov [#allocation14]   ;;  %s19093_s7 = sld [smem:[#allocation46_spill]] }
  0x7b   : > { %s544_s14 = sshll.u32 %s16681_s6, 4  ;;  %s545_s14 = int_to_ptr.vmem [resolvable:$true] %s544_s14 }
  0x80   : > { %s16236_s15 = scalar_lea.hbm %s19093_s7, 32768 }
  0x81   : > { %p16237_p1 = scmp.ne.s32.totalorder %s19093_s7, %s16236_s15  ;;  %p16243_p12 = scmp.lt.u32.totalorder %s16236_s15, %s19093_s7 }
  0x83   : > { %p16239_p4 = pnand %p16237_p1, %p16850_p8 }
  0x85   : > { %p16240_p11 = pneg %p16239_p4 }
  0x87   : > { %p16245_p13 = pnand %p16243_p12, %p16240_p11 }
  0x89   : > { %16248 = shalt.err (!%p16245_p13)
}
  0x8a   : > { %s16249_s25 = scalar_lea.vmem %s545_s14, 32768  ;;  %p16257_p7 = scmp.lt.s32.totalorder %s545_s14, %s545_s14 }
  0x8b   : > { %p16250_p0 = scmp.ne.s32.totalorder %s545_s14, %s16249_s25  ;;  %p16258_p9 = scmp.lt.s32.totalorder %s16249_s25, %s16249_s25 }
  0x8d   : > { %p16252_p2 = pnand %p16250_p0, %p16850_p8  ;;  %p16259_p3 = por %p16258_p9, %p16257_p7 }
  0x8f   : > { %p16253_p5 = pneg %p16252_p2 }
  0x91   : > { %p16260_p10 = pnand %p16259_p3, %p16253_p5 }
  0x93   : > { %16263 = shalt.err (!%p16260_p10)
}
  0x94   : > { %s19040_s0 = smov 512   ;;  %s19043_s4 = smov 32  }
  0x95   : > { %15507 = dma.hbm_to_vmem [thread:$0]  (!%p16834_p6), %s19093_s7, 32768, %s545_s14, [#allocation15], %s19040_s0, %s19040_s0, %s19043_s4  }
  0x96   : > { %s16938_s12 = sadd.s32 1, %s16670_s24   ;;  %p232_p1 = scmp.lt.s32.totalorder %s16670_s24, 5 }
  0x97   : > { %p234_p4 = scmp.lt.s32.totalorder %s16938_s12, 5  ;;  %s239_s15 = sadd.s32 1, %s16666_s23 }
  0x98   : > { %s16944_s28 = scalar_select %p232_p1, %s16670_s24, 5 }
  0x99   : > { %s235_s17 = scalar_select %p234_p4, %s16938_s12, 5 }
  0x9a   : > { %p246_p11 = scmp.ne.s32.totalorder %s16666_s23, %s16662_s22  ;;  %p19046_p12 = scmp.eq.s32.totalorder %s16670_s24, 0 }
  0x9b   : > { %s236_s10 = ssub.s32 %s16944_s28, %s235_s17  ;;  %p252_p13 = scmp.ne.s32.totalorder %s16662_s22, %s16658_s21 }
  0x9c   : > { %p237_p0 = scmp.eq.s32.totalorder %s236_s10, 0  ;;  %p248_p2 = por %p19046_p12, %p246_p11 }
  0x9d   : > { %p19094_p5 = scmp.eq.s32.totalorder %s16818_s27, 0  ;;  %p19045_p9 = scmp.lt.s32.totalorder %s16670_s24, 12 }
  0x9e   : > { %s16963_s26 = scalar_select %p237_p0, %s16666_s23, %s239_s15  }
  0x9f   : > { %p16957_p7 = por %p19094_p5, %p252_p13  ;;  %s16966_s25 = sand.u32 1, %s16670_s24  }
  0xa0   : > { %19097 = sst [smem:[#allocation37_spill]] %s16963_s26  ;;  %s19042_s6 = sand.u32 1, %s16666_s23  }
  0xa1   : > { %s19095_s14 = scalar_select %p16957_p7, 1, 0 }
  0xa2   : > { %s16971_s8 = sshll.u32 %s19042_s6, 12  ;;  %s15248_s21 = sshll.u32 %s16944_s28, 16 }
  0xa3   : > { %19096 = sst [smem:[#allocation36_spill]] %s19095_s14  ;;  %s19098_s9 = sld [smem:[#allocation48_spill]] }
  0xa4   : > { %s573_s15 = scalar_lea.vmem [#allocation17], %s16971_s8  ;;  %p16984_p3 = pnand %p19045_p9, %p248_p2 }
  0xa5   : > { %s582_s2 = sshll.u32 %s573_s15, 4  ;;  %s19100_s11 = sld [smem:[#allocation50_spill]]  ;;  %s16980_s2 = int_to_ptr.vmem [resolvable:$true] %s582_s2 }
  0xa6   : > { %s19099_s0 = scalar_select %p16984_p3, 1, 0 }
  0xa7   : > { %s19060_s10 = scalar_lea.sflag [#allocation18], %s16966_s25  ;;  %p16998_p1 = pneg %p16984_p3 }
  0xa9   : > { %s16977_s30 = scalar_lea.hbm %s19098_s9, %s15248_s21  ;;  %s16269_s7 = scalar_lea.hbm %s19098_s9, 393216 }
  0xaa   : > { %s16264_s1 = scalar_lea.hbm %s16977_s30, 65536  ;;  %p16270_p13 = scmp.lt.u32.totalorder %s16977_s30, %s19098_s9 }
  0xab   : > { %s16991_s17 = scalar_lea.hbm %s19100_s11, %s15248_s21  ;;  %p16265_p10 = scmp.ne.s32.totalorder %s16977_s30, %s16264_s1 }
  0xac   : > { %s19101_s3 = scalar_select %p16998_p1, 1, 0 }
  0xad   : > { %p16267_p4 = pnand %p16998_p1, %p16265_p10  ;;  %p16271_p0 = scmp.lt.u32.totalorder %s16269_s7, %s16264_s1 }
  0xae   : > { %p16273_p5 = scmp.lt.u32.totalorder %s16264_s1, %s16977_s30 }
  0xaf   : > { %p16268_p11 = pneg %p16267_p4  ;;  %p16272_p2 = por %p16271_p0, %p16270_p13 }
  0xb1   : > { %p16274_p9 = por %p16273_p5, %p16272_p2 }
  0xb3   : > { %p16275_p12 = pnand %p16274_p9, %p16268_p11 }
  0xb5   : > { %16278 = shalt.err (!%p16275_p12)
}
  0xb6   : > { %s16279_s21 = scalar_lea.vmem %s16980_s2, 65536  ;;  %s16684_s5 = smov [#allocation17]  }
  0xb7   : > { %p16280_p10 = scmp.ne.s32.totalorder %s16980_s2, %s16279_s21  ;;  %s16284_s15 = sshll.u32 %s16684_s5, 4  ;;  %s16285_s15 = int_to_ptr.vmem [resolvable:$false] %s16284_s15 }
  0xb8   : > { %s16286_s4 = scalar_lea.vmem %s16285_s15, 131072  ;;  %p16287_p6 = scmp.lt.s32.totalorder %s16980_s2, %s16285_s15 }
  0xb9   : > { %p16282_p4 = pnand %p16280_p10, %p16998_p1  ;;  %p16288_p8 = scmp.lt.s32.totalorder %s16286_s4, %s16279_s21 }
  0xbb   : > { %p16283_p7 = pneg %p16282_p4  ;;  %p16289_p13 = por %p16288_p8, %p16287_p6 }
  0xbd   : > { %p16290_p0 = pnand %p16289_p13, %p16283_p7 }
  0xbf   : > { %16293 = shalt.err (!%p16290_p0)
}
  0xc0   : > { %s19102_s1 = smov 32   ;;  %s19103_s7 = smov 512  }
  0xc1   : > { %15514 = dma.hbm_to_vmem [thread:$0]  (!%p16984_p3), %s16977_s30, 65536, %s16980_s2, %s19060_s10, %s19103_s7, %s19103_s7, %s19102_s1  }
  0xc2   : > { %s617_s6 = scalar_lea.vmem [#allocation20], %s16971_s8  ;;  %s19058_s5 = scalar_lea.sflag [#allocation21], %s16966_s25 }
  0xc3   : > { %s626_s21 = sshll.u32 %s617_s6, 4  ;;  %s16294_s15 = scalar_lea.hbm %s16991_s17, 65536  ;;  %s17027_s21 = int_to_ptr.vmem [resolvable:$true] %s626_s21 }
  0xc4   : > { %p16295_p6 = scmp.ne.s32.totalorder %s16991_s17, %s16294_s15  ;;  %s16299_s26 = scalar_lea.hbm %s19100_s11, 393216 }
  0xc5   : > { %p16300_p7 = scmp.lt.u32.totalorder %s16991_s17, %s19100_s11  ;;  %p16301_p9 = scmp.lt.u32.totalorder %s16299_s26, %s16294_s15 }
  0xc6   : > { %p16297_p8 = pnand %p16295_p6, %p16998_p1  ;;  %p16303_p2 = scmp.lt.u32.totalorder %s16294_s15, %s16991_s17 }
  0xc7   : > { %p16302_p11 = por %p16301_p9, %p16300_p7 }
  0xc8   : > { %p16298_p12 = pneg %p16297_p8 }
  0xc9   : > { %p16304_p5 = por %p16303_p2, %p16302_p11 }
  0xcb   : > { %p16305_p10 = pnand %p16304_p5, %p16298_p12 }
  0xcd   : > { %16308 = shalt.err (!%p16305_p10)
}
  0xce   : > { %s16309_s30 = scalar_lea.vmem %s17027_s21, 65536  ;;  %s16685_s9 = smov [#allocation20]  }
  0xcf   : > { %p16310_p4 = scmp.ne.s32.totalorder %s17027_s21, %s16309_s30  ;;  %s16314_s2 = sshll.u32 %s16685_s9, 4  ;;  %s16315_s2 = int_to_ptr.vmem [resolvable:$false] %s16314_s2 }
  0xd0   : > { %s16316_s22 = scalar_lea.vmem %s16315_s2, 131072  ;;  %p16317_p6 = scmp.lt.s32.totalorder %s17027_s21, %s16315_s2 }
  0xd1   : > { %p16312_p13 = pnand %p16310_p4, %p16998_p1  ;;  %p16318_p8 = scmp.lt.s32.totalorder %s16316_s22, %s16309_s30 }
  0xd3   : > { %p16313_p0 = pneg %p16312_p13  ;;  %p16319_p7 = por %p16318_p8, %p16317_p6 }
  0xd5   : > { %p16320_p9 = pnand %p16319_p7, %p16313_p0 }
  0xd7   : > { %16323 = shalt.err (!%p16320_p9)
}
  0xd8   : > { %15520 = dma.hbm_to_vmem [thread:$0]  (!%p16984_p3), %s16991_s17, 65536, %s17027_s21, %s19058_s5, %s19103_s7, %s19103_s7, %s19102_s1  }
  0xd9   : > { %s13565_s14 = sadd.s32 4294967290, %s16670_s24  ;;  %s13566_s26 = sadd.s32 4294967290, %s16938_s12 }
  0xda   : > { %p353_p12 = scmp.gt.s32.totalorder %s13565_s14, 0  ;;  %p356_p11 = scmp.gt.s32.totalorder %s13566_s26, 0 }
  0xdb   : > { %s361_s8 = sadd.s32 1, %s16654_s20  ;;  %p368_p2 = scmp.ne.s32.totalorder %s16654_s20, %s16650_s19 }
  0xdc   : > { %s19164_s14 = smov (!%p353_p12, %s13565_s14), 0  ;;  %s19166_s26 = smov (!%p356_p11, %s13566_s26), 0 }
  0xdd   : > { %p19104_p5 = scmp.eq.s32.totalorder %s16670_s24, 0  ;;  %p374_p4 = scmp.ne.s32.totalorder %s16650_s19, %s16646_s18 }
  0xde   : > { %s358_s6 = ssub.s32 %s19164_s14, %s19166_s26  ;;  %p19105_p0 = scmp.eq.s32.totalorder %s16818_s27, 0 }
  0xdf   : > { %p370_p10 = por %p368_p2, %p19104_p5  ;;  %p359_p13 = scmp.eq.s32.totalorder %s358_s6, 0 }
  0xe0   : > { %p17070_p6 = por %p374_p4, %p19105_p0  ;;  %s19059_s1 = sand.u32 1, %s16654_s20  }
  0xe1   : > { %s15252_s7 = sshll.u32 %s19164_s14, 8  ;;  %s13594_s15 = sshll.u32 %s19059_s1, 11 }
  0xe2   : > { %s19106_s17 = scalar_select %p17070_p6, 1, 0 }
  0xe3   : > { %s17077_s21 = scalar_select %p359_p13, %s16654_s20, %s361_s8  }
  0xe4   : > { %s19108_s13 = sld [smem:[#allocation52_spill]]  ;;  %p19109_p8 = scmp.lt.s32.totalorder %s16670_s24, 12 }
  0xe5   : > { %19107 = sst [smem:[#allocation38_spill]] %s17077_s21  ;;  %s661_s2 = scalar_lea.vmem [#allocation23], %s13594_s15 }
  0xe6   : > { %p17088_p7 = pnand %p19109_p8, %p370_p10  ;;  %s671_s22 = sshll.u32 %s661_s2, 4  ;;  %s17092_s22 = int_to_ptr.vmem [resolvable:$true] %s671_s22 }
  0xe7   : > { %s19066_s26 = scalar_lea.sflag [#allocation24], %s16966_s25 }
  0xe8   : > { %s19110_s18 = scalar_select %p17088_p7, 1, 0 }
  0xe9   : > { %p19061_p12 = pneg %p17088_p7 }
  0xea   : > { %s17084_s9 = scalar_lea.hbm %s19108_s13, %s15252_s7  ;;  %s16329_s7 = scalar_lea.hbm %s19108_s13, 196608 }
  0xeb   : > { %s16324_s8 = scalar_lea.hbm %s17084_s9, 32768  ;;  %p16330_p5 = scmp.lt.u32.totalorder %s17084_s9, %s19108_s13 }
  0xec   : > { %p16325_p9 = scmp.ne.s32.totalorder %s17084_s9, %s16324_s8  ;;  %p16331_p10 = scmp.lt.u32.totalorder %s16329_s7, %s16324_s8 }
  0xed   : > { %p16333_p13 = scmp.lt.u32.totalorder %s16324_s8, %s17084_s9 }
  0xee   : > { %p16327_p11 = pnand %p19061_p12, %p16325_p9  ;;  %p16332_p4 = por %p16331_p10, %p16330_p5 }
  0xf0   : > { %p16328_p2 = pneg %p16327_p11  ;;  %p16334_p0 = por %p16333_p13, %p16332_p4 }
  0xf2   : > { %p16335_p8 = pnand %p16334_p0, %p16328_p2 }
  0xf4   : > { %16338 = shalt.err (!%p16335_p8)
}
  0xf5   : > { %s16339_s15 = scalar_lea.vmem %s17092_s22, 32768  ;;  %s16686_s2 = smov [#allocation23]  }
  0xf6   : > { %p16340_p9 = scmp.ne.s32.totalorder %s17092_s22, %s16339_s15  ;;  %s16344_s24 = sshll.u32 %s16686_s2, 4  ;;  %s16345_s24 = int_to_ptr.vmem [resolvable:$false] %s16344_s24 }
  0xf7   : > { %s16346_s6 = scalar_lea.vmem %s16345_s24, 65536  ;;  %p16347_p3 = scmp.lt.s32.totalorder %s17092_s22, %s16345_s24 }
  0xf8   : > { %p16342_p11 = pnand %p16340_p9, %p19061_p12  ;;  %p16348_p5 = scmp.lt.s32.totalorder %s16346_s6, %s16339_s15 }
  0xfa   : > { %p16343_p6 = pneg %p16342_p11  ;;  %p16349_p10 = por %p16348_p5, %p16347_p3 }
  0xfc   : > { %p16350_p4 = pnand %p16349_p10, %p16343_p6 }
  0xfe   : > { %16353 = shalt.err (!%p16350_p4)
}
  0xff   : > { %s16687_s8 = smov 1536   ;;  %s19111_s7 = smov 16  }
 0x100   : > { %s19112_s4 = smov 256   ;;  %s16688_s30 = smov [#allocation3]  }
 0x101   : > { %15526 = dma.hbm_to_vmem [thread:$0]  (!%p17088_p7), %s17084_s9, 32768, %s17092_s22, %s19066_s26, %s16687_s8, %s19112_s4, %s19111_s7  }
 0x102   : > { %s462_s2 = sshll.u32 %s16688_s30, 4  ;;  %s16689_s5 = smov [#allocation7]   ;;  %s463_s2 = int_to_ptr.vmem [resolvable:$true] %s462_s2 }
 0x103   : > { %s486_s1 = sshll.u32 %s16689_s5, 4  ;;  %s19113_s6 = sld [smem:[#allocation39_spill]]  ;;  %s17124_s1 = int_to_ptr.vmem [resolvable:$true] %s486_s1 }
 0x104   : > { %p19114_p6 = scmp.ne.s32.totalorder %s19090_s29, 0 }
 0x109   : > { %s16354_s10 = scalar_lea.hbm %s19113_s6, 32 }
 0x10a   : > { %p16355_p3 = scmp.ne.s32.totalorder %s19113_s6, %s16354_s10  ;;  %p16361_p0 = scmp.lt.u32.totalorder %s16354_s10, %s19113_s6 }
 0x10c   : > { %p16357_p2 = pnand %p16355_p3, %p19114_p6 }
 0x10e   : > { %p16358_p13 = pneg %p16357_p2 }
 0x110   : > { %p16363_p8 = pnand %p16361_p0, %p16358_p13 }
 0x112   : > { %16366 = shalt.err (!%p16363_p8)
}
 0x113   : > { %s16367_s5 = scalar_lea.vmem %s463_s2, 32  ;;  %p16375_p10 = scmp.lt.s32.totalorder %s463_s2, %s463_s2 }
 0x114   : > { %p16368_p9 = scmp.ne.s32.totalorder %s463_s2, %s16367_s5  ;;  %p16376_p4 = scmp.lt.s32.totalorder %s16367_s5, %s16367_s5 }
 0x116   : > { %p16370_p11 = pnand %p16368_p9, %p19114_p6  ;;  %p16377_p12 = por %p16376_p4, %p16375_p10 }
 0x118   : > { %p16371_p5 = pneg %p16370_p11 }
 0x11a   : > { %p16378_p7 = pnand %p16377_p12, %p16371_p5 }
 0x11c   : > { %16381 = shalt.err (!%p16378_p7)
}
 0x11d   : > { %p19115_p3 = scmp.ne.s32.totalorder %s19088_s16, 0  ;;  %s19116_s22 = sld [smem:[#allocation41_spill]] }
 0x11f   : > { %15486 = dma.hbm_to_vmem [thread:$0]  (!%p19115_p3), %s19113_s6, 32, %s463_s2, [#allocation4]  }
 0x123   : > { %s19117_s8 = smov %s19116_s22  ;;  %s16382_s7 = scalar_lea.hbm %s19116_s22, 16 }
 0x124   : > { %p16383_p2 = scmp.ne.s32.totalorder %s19117_s8, %s16382_s7  ;;  %p16389_p7 = scmp.lt.u32.totalorder %s16382_s7, %s19117_s8 }
 0x126   : > { %p16385_p13 = pnand %p16383_p2, %p19114_p6 }
 0x128   : > { %p16386_p0 = pneg %p16385_p13 }
 0x12a   : > { %p16391_p12 = pnand %p16389_p7, %p16386_p0 }
 0x12c   : > { %16394 = shalt.err (!%p16391_p12)
}
 0x12d   : > { %s16395_s2 = scalar_lea.vmem %s17124_s1, 16  ;;  %s16402_s9 = scalar_lea.vmem %s17124_s1, 32 }
 0x12e   : > { %p16396_p8 = scmp.ne.s32.totalorder %s17124_s1, %s16395_s2  ;;  %p16403_p5 = scmp.lt.s32.totalorder %s17124_s1, %s17124_s1 }
 0x12f   : > { %p16404_p10 = scmp.lt.s32.totalorder %s16402_s9, %s16395_s2 }
 0x130   : > { %p16398_p9 = pnand %p16396_p8, %p19114_p6 }
 0x131   : > { %p16405_p4 = por %p16404_p10, %p16403_p5 }
 0x132   : > { %p16399_p11 = pneg %p16398_p9 }
 0x134   : > { %p16406_p2 = pnand %p16405_p4, %p16399_p11 }
 0x136   : > { %16409 = shalt.err (!%p16406_p2)
}
 0x137   : > { %15492 = dma.hbm_to_vmem [thread:$0]  (!%p19115_p3), %s19117_s8, 16, %s17124_s1, [#allocation6]  }
 0x138   : > { %s16690_s13 = smov [#allocation10]   ;;  %s16691_s21 = smov [#allocation13]  }
 0x139   : > { %s510_s10 = sshll.u32 %s16690_s13, 4  ;;  %s534_s22 = sshll.u32 %s16691_s21, 4  ;;  %s511_s10 = int_to_ptr.vmem [resolvable:$true] %s510_s10  ;;  %s17168_s22 = int_to_ptr.vmem [resolvable:$true] %s534_s22 }
 0x13a   : > { %s19118_s30 = sld [smem:[#allocation43_spill]] }
 0x140   : > { %s16410_s15 = scalar_lea.hbm %s19118_s30, 32 }
 0x141   : > { %p16411_p13 = scmp.ne.s32.totalorder %s19118_s30, %s16410_s15  ;;  %p16417_p12 = scmp.lt.u32.totalorder %s16410_s15, %s19118_s30 }
 0x143   : > { %p16413_p0 = pnand %p16411_p13, %p19114_p6 }
 0x145   : > { %p16414_p7 = pneg %p16413_p0 }
 0x147   : > { %p16419_p8 = pnand %p16417_p12, %p16414_p7 }
 0x149   : > { %16422 = shalt.err (!%p16419_p8)
}
 0x14a   : > { %s16423_s5 = scalar_lea.vmem %s511_s10, 32  ;;  %p16431_p10 = scmp.lt.s32.totalorder %s511_s10, %s511_s10 }
 0x14b   : > { %p16424_p9 = scmp.ne.s32.totalorder %s511_s10, %s16423_s5  ;;  %p16432_p4 = scmp.lt.s32.totalorder %s16423_s5, %s16423_s5 }
 0x14d   : > { %p16426_p11 = pnand %p16424_p9, %p19114_p6  ;;  %p16433_p2 = por %p16432_p4, %p16431_p10 }
 0x14f   : > { %p16427_p5 = pneg %p16426_p11 }
 0x151   : > { %p16434_p1 = pnand %p16433_p2, %p16427_p5 }
 0x153   : > { %16437 = shalt.err (!%p16434_p1)
}
 0x154   : > { %15498 = dma.hbm_to_vmem [thread:$0]  (!%p19115_p3), %s19118_s30, 32, %s511_s10, [#allocation9]  }
 0x155   : > { %s19119_s4 = sld [smem:[#allocation45_spill]] }
 0x15b   : > { %s16438_s15 = scalar_lea.hbm %s19119_s4, 64 }
 0x15c   : > { %p16439_p13 = scmp.ne.s32.totalorder %s19119_s4, %s16438_s15  ;;  %p16445_p1 = scmp.lt.u32.totalorder %s16438_s15, %s19119_s4 }
 0x15e   : > { %p16441_p0 = pnand %p16439_p13, %p19114_p6 }
 0x160   : > { %p16442_p7 = pneg %p16441_p0 }
 0x162   : > { %p16447_p12 = pnand %p16445_p1, %p16442_p7 }
 0x164   : > { %16450 = shalt.err (!%p16447_p12)
}
 0x165   : > { %s16451_s10 = scalar_lea.vmem %s17168_s22, 64  ;;  %p16459_p5 = scmp.lt.s32.totalorder %s17168_s22, %s17168_s22 }
 0x166   : > { %p16452_p8 = scmp.ne.s32.totalorder %s17168_s22, %s16451_s10  ;;  %p16460_p10 = scmp.lt.s32.totalorder %s16451_s10, %s16451_s10 }
 0x168   : > { %p16454_p9 = pnand %p16452_p8, %p19114_p6  ;;  %p16461_p4 = por %p16460_p10, %p16459_p5 }
 0x16a   : > { %p16455_p11 = pneg %p16454_p9 }
 0x16c   : > { %p16462_p2 = pnand %p16461_p4, %p16455_p11 }
 0x16e   : > { %16465 = shalt.err (!%p16462_p2)
}
 0x16f   : > { %15504 = dma.hbm_to_vmem [thread:$0]  (!%p19115_p3), %s19119_s4, 64, %s17168_s22, [#allocation12]  }
 0x170   : > { %s19120_s13 = sand.u32 1, %s16666_s23   ;;  %s16692_s7 = smov [#allocation16]  }
 0x171   : > { %s17213_s21 = sshll.u32 %s19120_s13, 3  ;;  %s558_s15 = sshll.u32 %s16692_s7, 4  ;;  %s559_s15 = int_to_ptr.vmem [resolvable:$true] %s558_s15 }
 0x172   : > { %s15249_s24 = sshll.u32 %s16944_s28, 7  ;;  %s19121_s1 = sld [smem:[#allocation47_spill]] }
 0x178   : > { %s16466_s10 = scalar_lea.hbm %s19121_s1, 128 }
 0x179   : > { %p16467_p13 = scmp.ne.s32.totalorder %s19121_s1, %s16466_s10  ;;  %p16473_p1 = scmp.lt.u32.totalorder %s16466_s10, %s19121_s1 }
 0x17b   : > { %p16469_p0 = pnand %p16467_p13, %p19114_p6 }
 0x17d   : > { %p16470_p7 = pneg %p16469_p0 }
 0x17f   : > { %p16475_p12 = pnand %p16473_p1, %p16470_p7 }
 0x181   : > { %16478 = shalt.err (!%p16475_p12)
}
 0x182   : > { %s16479_s11 = scalar_lea.vmem %s559_s15, 128  ;;  %p16487_p5 = scmp.lt.s32.totalorder %s559_s15, %s559_s15 }
 0x183   : > { %p16480_p8 = scmp.ne.s32.totalorder %s559_s15, %s16479_s11  ;;  %p16488_p10 = scmp.lt.s32.totalorder %s16479_s11, %s16479_s11 }
 0x185   : > { %p16482_p9 = pnand %p16480_p8, %p19114_p6  ;;  %p16489_p4 = por %p16488_p10, %p16487_p5 }
 0x187   : > { %p16483_p11 = pneg %p16482_p9 }
 0x189   : > { %p16490_p2 = pnand %p16489_p4, %p16483_p11 }
 0x18b   : > { %16493 = shalt.err (!%p16490_p2)
}
 0x18c   : > { %15510 = dma.hbm_to_vmem [thread:$0]  (!%p19115_p3), %s19121_s1, 128, %s559_s15, [#allocation15]  }
 0x18d   : > { %s19122_s29 = sld [smem:[#allocation49_spill]]  ;;  %s596_s9 = scalar_lea.vmem [#allocation19], %s17213_s21 }
 0x18e   : > { %s606_s10 = sshll.u32 %s596_s9, 4  ;;  %p19123_p13 = scmp.ne.s32.totalorder %s19101_s3, 0  ;;  %s607_s10 = int_to_ptr.vmem [resolvable:$true] %s606_s10 }
 0x193   : > { %s17239_s2 = scalar_lea.hbm %s19122_s29, %s15249_s24  ;;  %s16499_s22 = scalar_lea.hbm %s19122_s29, 768 }
 0x194   : > { %s16494_s16 = scalar_lea.hbm %s17239_s2, 128  ;;  %p16500_p3 = scmp.lt.u32.totalorder %s17239_s2, %s19122_s29 }
 0x195   : > { %p16495_p6 = scmp.ne.s32.totalorder %s17239_s2, %s16494_s16  ;;  %p16501_p1 = scmp.lt.u32.totalorder %s16499_s22, %s16494_s16 }
 0x196   : > { %p16503_p8 = scmp.lt.u32.totalorder %s16494_s16, %s17239_s2 }
 0x197   : > { %p16497_p0 = pnand %p16495_p6, %p19123_p13  ;;  %p16502_p12 = por %p16501_p1, %p16500_p3 }
 0x199   : > { %p16498_p7 = pneg %p16497_p0  ;;  %p16504_p9 = por %p16503_p8, %p16502_p12 }
 0x19b   : > { %p16505_p11 = pnand %p16504_p9, %p16498_p7 }
 0x19d   : > { %16508 = shalt.err (!%p16505_p11)
}
 0x19e   : > { %s16509_s6 = scalar_lea.vmem %s607_s10, 128  ;;  %s16693_s13 = smov [#allocation19]  }
 0x19f   : > { %p16510_p5 = scmp.ne.s32.totalorder %s607_s10, %s16509_s6  ;;  %s16514_s7 = sshll.u32 %s16693_s13, 4  ;;  %s16515_s7 = int_to_ptr.vmem [resolvable:$false] %s16514_s7 }
 0x1a0   : > { %s16516_s9 = scalar_lea.vmem %s16515_s7, 256  ;;  %p16517_p2 = scmp.lt.s32.totalorder %s607_s10, %s16515_s7 }
 0x1a1   : > { %p16512_p10 = pnand %p16510_p5, %p19123_p13  ;;  %p16518_p6 = scmp.lt.s32.totalorder %s16516_s9, %s16509_s6 }
 0x1a3   : > { %p16513_p4 = pneg %p16512_p10  ;;  %p16519_p0 = por %p16518_p6, %p16517_p2 }
 0x1a5   : > { %p16520_p1 = pnand %p16519_p0, %p16513_p4 }
 0x1a7   : > { %16523 = shalt.err (!%p16520_p1)
}
 0x1a8   : > { %p19124_p3 = scmp.ne.s32.totalorder %s19099_s0, 0  ;;  %s19125_s16 = scalar_lea.sflag [#allocation18], %s16966_s25 }
 0x1a9   : > { %s19126_s22 = sld [smem:[#allocation51_spill]]  ;;  %s640_s6 = scalar_lea.vmem [#allocation22], %s17213_s21 }
 0x1aa   : > { %15517 = dma.hbm_to_vmem [thread:$0]  (!%p19124_p3), %s17239_s2, 128, %s607_s10, %s19125_s16  }
 0x1ab   : > { %s650_s13 = sshll.u32 %s640_s6, 4  ;;  %s19128_s7 = sand.u32 1, %s16654_s20   ;;  %s651_s13 = int_to_ptr.vmem [resolvable:$true] %s650_s13 }
 0x1ac   : > { %s17271_s9 = sshll.u32 %s19128_s7, 2 }
 0x1af   : > { %s19127_s11 = smov %s19126_s22  ;;  %s17266_s26 = scalar_lea.hbm %s19126_s22, %s15249_s24 }
 0x1b0   : > { %s16524_s1 = scalar_lea.hbm %s17266_s26, 128  ;;  %s16529_s24 = scalar_lea.hbm %s19127_s11, 768 }
 0x1b1   : > { %p16525_p7 = scmp.ne.s32.totalorder %s17266_s26, %s16524_s1  ;;  %p16530_p9 = scmp.lt.u32.totalorder %s17266_s26, %s19127_s11 }
 0x1b2   : > { %p16531_p11 = scmp.lt.u32.totalorder %s16529_s24, %s16524_s1  ;;  %p16533_p10 = scmp.lt.u32.totalorder %s16524_s1, %s17266_s26 }
 0x1b3   : > { %p16527_p12 = pnand %p16525_p7, %p19123_p13 }
 0x1b4   : > { %p16532_p5 = por %p16531_p11, %p16530_p9 }
 0x1b5   : > { %p16528_p8 = pneg %p16527_p12 }
 0x1b6   : > { %p16534_p4 = por %p16533_p10, %p16532_p5 }
 0x1b8   : > { %p16535_p2 = pnand %p16534_p4, %p16528_p8 }
 0x1ba   : > { %16538 = shalt.err (!%p16535_p2)
}
 0x1bb   : > { %s16539_s21 = scalar_lea.vmem %s651_s13, 128  ;;  %s16694_s5 = smov [#allocation22]  }
 0x1bc   : > { %p16540_p6 = scmp.ne.s32.totalorder %s651_s13, %s16539_s21  ;;  %s16544_s15 = sshll.u32 %s16694_s5, 4  ;;  %s16545_s15 = int_to_ptr.vmem [resolvable:$false] %s16544_s15 }
 0x1bd   : > { %s16546_s22 = scalar_lea.vmem %s16545_s15, 256  ;;  %p16547_p7 = scmp.lt.s32.totalorder %s651_s13, %s16545_s15 }
 0x1be   : > { %p16542_p0 = pnand %p16540_p6, %p19123_p13  ;;  %p16548_p12 = scmp.lt.s32.totalorder %s16546_s22, %s16539_s21 }
 0x1c0   : > { %p16543_p1 = pneg %p16542_p0  ;;  %p16549_p3 = por %p16548_p12, %p16547_p7 }
 0x1c2   : > { %p16550_p9 = pnand %p16549_p3, %p16543_p1 }
 0x1c4   : > { %16553 = shalt.err (!%p16550_p9)
}
 0x1c5   : > { %p19129_p11 = scmp.ne.s32.totalorder %s19099_s0, 0  ;;  %s19130_s1 = scalar_lea.sflag [#allocation21], %s16966_s25 }
 0x1c6   : > { %s15253_s3 = sshll.u32 %s19164_s14, 6  ;;  %s19131_s28 = sld [smem:[#allocation53_spill]] }
 0x1c7   : > { %15523 = dma.hbm_to_vmem [thread:$0]  (!%p19129_p11), %s17266_s26, 128, %s651_s13, %s19130_s1  }
 0x1c8   : > { %s685_s24 = scalar_lea.vmem [#allocation25], %s17271_s9  ;;  %p19132_p3 = scmp.ne.s32.totalorder %s19110_s18, 0 }
 0x1c9   : > { %s696_s10 = sshll.u32 %s685_s24, 4  ;;  %s697_s10 = int_to_ptr.vmem [resolvable:$true] %s696_s10 }
 0x1ca   : > { %p19133_p8 = pneg %p19132_p3 }
 0x1cc   : > { %s17296_s2 = scalar_lea.hbm %s19131_s28, %s15253_s3  ;;  %s16559_s13 = scalar_lea.hbm %s19131_s28, 384 }
 0x1cd   : > { %s16554_s0 = scalar_lea.hbm %s17296_s2, 64  ;;  %p16560_p4 = scmp.lt.u32.totalorder %s17296_s2, %s19131_s28 }
 0x1ce   : > { %p16555_p13 = scmp.ne.s32.totalorder %s17296_s2, %s16554_s0  ;;  %p16561_p2 = scmp.lt.u32.totalorder %s16559_s13, %s16554_s0 }
 0x1cf   : > { %p16563_p0 = scmp.lt.u32.totalorder %s16554_s0, %s17296_s2 }
 0x1d0   : > { %p16557_p5 = pnand %p16555_p13, %p19133_p8  ;;  %p16562_p6 = por %p16561_p2, %p16560_p4 }
 0x1d2   : > { %p16558_p10 = pneg %p16557_p5  ;;  %p16564_p1 = por %p16563_p0, %p16562_p6 }
 0x1d4   : > { %p16565_p7 = pnand %p16564_p1, %p16558_p10 }
 0x1d6   : > { %16568 = shalt.err (!%p16565_p7)
}
 0x1d7   : > { %s16569_s9 = scalar_lea.vmem %s697_s10, 64  ;;  %p19134_p9 = pmov %p19133_p8 }
 0x1d8   : > { %p16570_p12 = scmp.ne.s32.totalorder %s697_s10, %s16569_s9  ;;  %s16695_s5 = smov [#allocation25]  }
 0x1d9   : > { %s16574_s15 = sshll.u32 %s16695_s5, 4  ;;  %s16575_s15 = int_to_ptr.vmem [resolvable:$false] %s16574_s15 }
 0x1da   : > { %p16572_p11 = pnand %p16570_p12, %p19134_p9  ;;  %s16576_s22 = scalar_lea.vmem %s16575_s15, 128 }
 0x1db   : > { %p16577_p8 = scmp.lt.s32.totalorder %s697_s10, %s16575_s15  ;;  %p16578_p5 = scmp.lt.s32.totalorder %s16576_s22, %s16569_s9 }
 0x1dc   : > { %p16573_p13 = pneg %p16572_p11 }
 0x1dd   : > { %p16579_p2 = por %p16578_p5, %p16577_p8 }
 0x1df   : > { %p16580_p4 = pnand %p16579_p2, %p16573_p13 }
 0x1e1   : > { %16583 = shalt.err (!%p16580_p4)
}
 0x1e2   : > { %s19135_s1 = scalar_lea.sflag [#allocation24], %s16966_s25  ;;  %s19136_s3 = sld [smem:[#allocation35_spill]] }
 0x1e3   : > { %15529 = dma.hbm_to_vmem [thread:$0]  (!%p19132_p3), %s17296_s2, 64, %s697_s10, %s19135_s1  }
 0x1e8   : > { %p19137_p10 = scmp.ne.s32.totalorder %s19136_s3, 0 }
 0x1e9   : > { %p19138_p6 = scmp.eq.s32.totalorder (!%p19137_p10), %s16818_s27, 0 }
 0x1ea   : > { %705 = sbr.rel (%p19137_p10) target bundleno = 3410 (0xd52), region = 80 }
 0x1f1   : > { %16613 = dma.done.wait (%p19138_p6), [#allocation4], 32   ;;  %p19139_p0 = pmov %p19138_p6 }
 0x1f3   : > { %16615 = vsyncadd (%p19139_p0), [#allocation4], 4294967264  ;;  %p19140_p1 = pmov %p19139_p0 }
 0x1f4   : > { %p19141_p7 = pmov %p19139_p0 }
 0x1f5   : > { %16617 = dma.done.wait (%p19140_p1), [#allocation6], 528  }
 0x1f6   : > { %16619 = vsyncadd (%p19141_p7), [#allocation6], 4294966768  ;;  %p19142_p12 = pmov %p19139_p0 }
 0x1f7   : > { %p19143_p3 = pmov %p19139_p0 }
 0x1f8   : > { %16621 = dma.done.wait (%p19142_p12), [#allocation9], 2080  }
 0x1f9   : > { %16623 = vsyncadd (%p19143_p3), [#allocation9], 4294965216  ;;  %p19144_p9 = pmov %p19139_p0 }
 0x1fa   : > { %p19145_p11 = pmov %p19139_p0 }
 0x1fb   : > { %16625 = dma.done.wait (%p19144_p9), [#allocation12], 8256  }
 0x1fc   : > { %16627 = vsyncadd (%p19145_p11), [#allocation12], 4294959040  ;;  %p19146_p13 = pmov %p19139_p0 }
 0x1fd   : > { %p19147_p8 = pmov %p19139_p0 }
 0x1fe   : > { %16629 = dma.done.wait (%p19146_p13), [#allocation15], 32896  }
 0x1ff   : > { %16631 = vsyncadd (%p19147_p8), [#allocation15], 4294934400  ;;  %s19148_s25 = sld [smem:[#allocation34_spill]]  ;;  %s19149_s18 = sld [smem:[#allocation36_spill]] }
 0x200   : > { %s743_s6 = sand.u32 1, %s16818_s27  }
 0x201   : > { %s744_s24 = scalar_lea.sflag [#allocation18], %s743_s6 }
 0x205   : > { %s745_s7 = sand.u32 1, %s19148_s25   ;;  %p19150_p5 = scmp.ne.s32.totalorder %s19149_s18, 0 }
 0x206   : > { %s13612_s2 = sshll.u32 %s745_s7, 12 }
 0x207   : > { %s17344_s10 = scalar_lea.vmem [#allocation17], %s13612_s2 }
 0x208   : > { %16633 = dma.done.wait (%p19150_p5), %s744_s24, 65664  }
 0x209   : > { %16635 = vsyncadd (%p19150_p5), %s744_s24, 4294901632  ;;  %s17350_s0 = sshll.u32 %s745_s7, 3  ;;  %s762_s14 = scalar_lea.sflag [#allocation21], %s743_s6 }
 0x20a   : > { %s756_s26 = scalar_lea.vmem [#allocation19], %s17350_s0  ;;  %s17353_s13 = scalar_lea.vmem [#allocation20], %s13612_s2 }
 0x20b   : > { %16637 = dma.done.wait (%p19150_p5), %s762_s14, 65664  }
 0x20c   : > { %16639 = vsyncadd (%p19150_p5), %s762_s14, 4294901632  ;;  %s781_s16 = sand.u32 1, %s16650_s19   ;;  %s774_s9 = scalar_lea.vmem [#allocation22], %s17350_s0 }
 0x20d   : > { %s13616_s21 = sshll.u32 %s781_s16, 11  ;;  %s780_s5 = scalar_lea.sflag [#allocation24], %s743_s6 }
 0x20e   : > { %s17361_s15 = scalar_lea.vmem [#allocation23], %s13616_s21  ;;  %p19151_p2 = scmp.ne.s32.totalorder %s19106_s17, 0 }
 0x210   : > { %16641 = dma.done.wait (%p19151_p2), %s780_s5, 32832  }
 0x211   : > { %16643 = vsyncadd (%p19151_p2), %s780_s5, 4294934464  ;;  %s17367_s22 = sshll.u32 %s781_s16, 2  ;;  %s13618_s1 = sadd.s32 4294967290, %s16818_s27 }
 0x212   : > { %p884_p4 = scmp.gt.s32.totalorder %s13618_s1, 0  ;;  %s19152_s7 = sld [smem:[#allocation54_spill]] }
 0x213   : > { %s792_s24 = scalar_lea.vmem [#allocation25], %s17367_s22  ;;  %p19153_p6 = scmp.ne.s32.totalorder %s16818_s27, 0 }
 0x214   : > { %s19168_s1 = smov (!%p884_p4, %s13618_s1), 0  ;;  %v15629_v0 = vld [vmem:[#allocation5] sm:$0xff] (!%p19153_p6)   ;;  %v16696_v1 = vmov (!%p19153_p6), 0.0   ;;  %v15630_v2 = vld [vmem:[#allocation5 + $0x8] sm:$0xff] (!%p19153_p6)   ;;  %vm16697_vm0 = vmmov (!%p19153_p6), 0   ;;  %v15631_v5 = vld [vmem:[#allocation5 + $0x10] sm:$0xff] (!%p19153_p6)  }
 0x215   : > { %s13619_s3 = sshll.u32 %s19168_s1, 2  ;;  %899 = sbr.rel (%p19153_p6) target bundleno = 1628 (0x65c), region = 144  ;;  %15259 = vmatprep.subr.bf16.mxu0 (!%p19153_p6), %v16696_v1  ;;  %15267 = vmatprep.mubr.msk.bf16.mxu0 (!%p19153_p6), %vm16697_vm0, %v16696_v1  ;;  %v15633_v3 = vld [vmem:[#allocation8 + $0x4] ss:$8 sps:$4 sm:$0xff] (!%p19153_p6)   ;;  %v15635_v4 = vld [vmem:[#allocation8] ss:$8 sps:$4 sm:$0xff] (!%p19153_p6)  }
 0x216   : > { %p887_p10 = scmp.lt.s32.totalorder %s13619_s3, 23  ;;  %15260 = vmatpush3.bf16.msra.mxu0 (!%p19153_p6), %v15629_v0  ;;  %v15636_v6 = vld [vmem:[#allocation8 + $0x14] ss:$8 sps:$4 sm:$0xff] (!%p19153_p6)   ;;  %1097 = vmatprep.subr.bf16.mxu1 (!%p19153_p6), %v15633_v3  ;;  %v15638_v7 = vld [vmem:[#allocation8 + $0x10] ss:$8 sps:$4 sm:$0xff] (!%p19153_p6)   ;;  %vm941_vm1 = vcmask (!%p19153_p6), 523264  }
 0x217   : > { %15261 = vmatprep.subr.bf16.mxu0 (!%p19153_p6), %v16696_v1  ;;  %1098 = vmatpush1.bf16.msra.mxu1 (!%p19153_p6), %v15635_v4  ;;  %v15639_v8 = vld [vmem:[#allocation8 + $0x24] ss:$8 sps:$4 sm:$0xff] (!%p19153_p6)   ;;  %v15632_v9 = vld [vmem:[#allocation5 + $0x18] sm:$0xff] (!%p19153_p6)   ;;  %v15641_v11 = vld [vmem:[#allocation8 + $0x20] ss:$8 sps:$4 sm:$0xff] (!%p19153_p6)   ;;  %v16698_v23 = vmov (!%p19153_p6), 0  }
 0x218   : > { %s19170_s3 = smov (!%p887_p10, %s13619_s3), 23  ;;  %1099 = vmatprep.subr.bf16.mxu1 (!%p19153_p6), %v15636_v6  ;;  %v900_v10 = vld [vmem:[#allocation3] sm:$0x3] (!%p19153_p6)  ;;  %v15644_v14 = vld [vmem:[#allocation8 + $0x30] ss:$8 sps:$4 sm:$0xff] (!%p19153_p6)   ;;  %1129 = vmatprep.mubr.bf16.mxu1 (!%p19153_p6), %v16698_v23 }
 0x219   : > { %s13620_s25 = sshll.u32 %s19170_s3, 1  ;;  %v15642_v12 = vld [vmem:[#allocation8 + $0x34] ss:$8 sps:$4 sm:$0xff] (!%p19153_p6)   ;;  %v901_v13 = vpack.c.bf16 (!%p19153_p6), %v900_v10, %v900_v10  ;;  %v15645_v15 = vld [vmem:[#allocation8 + $0x44] ss:$8 sps:$4 sm:$0xff] (!%p19153_p6)  }
 0x21a   : > { %s17373_s2 = scalar_lea.vmem %s19152_s7, %s13620_s25  ;;  %15262 = vmatpush3.bf16.msra.mxu0 (!%p19153_p6), %v15630_v2  ;;  %v15647_v16 = vld [vmem:[#allocation8 + $0x40] ss:$8 sps:$4 sm:$0xff] (!%p19153_p6)   ;;  %v15648_v17 = vld [vmem:[#allocation8 + $0x54] ss:$8 sps:$4 sm:$0xff] (!%p19153_p6)   ;;  %v15650_v18 = vld [vmem:[#allocation8 + $0x50] ss:$8 sps:$4 sm:$0xff] (!%p19153_p6)  }
 0x21b   : > { %15263 = vmatprep.subr.bf16.mxu0 (!%p19153_p6), %v16696_v1  ;;  %1100 = vmatpush1.bf16.msra.mxu1 (!%p19153_p6), %v15638_v7  ;;  %v15651_v19 = vld [vmem:[#allocation8 + $0x64] ss:$8 sps:$4 sm:$0xff] (!%p19153_p6)   ;;  %v15653_v20 = vld [vmem:[#allocation8 + $0x60] ss:$8 sps:$4 sm:$0xff] (!%p19153_p6)   ;;  %v15654_v21 = vld [vmem:[#allocation8 + $0x74] ss:$8 sps:$4 sm:$0xff] (!%p19153_p6)  }
 0x21c   : > { %1101 = vmatprep.subr.bf16.mxu1 %v15639_v8  ;;  %v15656_v22 = vld [vmem:[#allocation8 + $0x70] ss:$8 sps:$4 sm:$0xff]   ;;  %v13622_v53 = vld [vmem:[#allocation7] ss:$0 sm:$0xff] }
 0x21d   : > { %v15657_v24 = vld [vmem:[#allocation11] ss:$16 sps:$4 sm:$0xff]   ;;  %v15659_v25 = vld [vmem:[#allocation11 + $0x4] ss:$16 sps:$4 sm:$0xff]   ;;  %v15662_v26 = vld [vmem:[#allocation11 + $0xc] ss:$16 sps:$4 sm:$0xff]  }
 0x21e   : > { %15264 = vmatpush3.bf16.msra.mxu0 %v15631_v5  ;;  %v15665_v27 = vld [vmem:[#allocation11 + $0x24] ss:$16 sps:$4 sm:$0xff]   ;;  %v15663_v28 = vld [vmem:[#allocation11 + $0x20] ss:$16 sps:$4 sm:$0xff]   ;;  %v15660_v61 = vld [vmem:[#allocation11 + $0x8] ss:$16 sps:$4 sm:$0xff]  }
 0x21f   : > { %15265 = vmatprep.subr.bf16.mxu0 %v16696_v1  ;;  %1102 = vmatpush1.bf16.msra.mxu1 %v15641_v11  ;;  %v15671_v29 = vld [vmem:[#allocation11 + $0x44] ss:$16 sps:$4 sm:$0xff]   ;;  %v15669_v30 = vld [vmem:[#allocation11 + $0x40] ss:$16 sps:$4 sm:$0xff]   ;;  %v15668_v63 = vld [vmem:[#allocation11 + $0x2c] ss:$16 sps:$4 sm:$0xff]  }
 0x220   : > { %1103 = vmatprep.subr.bf16.mxu1 %v15642_v12  ;;  %v15677_v31 = vld [vmem:[#allocation11 + $0x64] ss:$16 sps:$4 sm:$0xff]   ;;  %v15675_v32 = vld [vmem:[#allocation11 + $0x60] ss:$16 sps:$4 sm:$0xff]   ;;  %v15666_v0 = vld [vmem:[#allocation11 + $0x28] ss:$16 sps:$4 sm:$0xff]  }
 0x221   : > { %v15683_v33 = vld [vmem:[#allocation11 + $0x84] ss:$16 sps:$4 sm:$0xff]   ;;  %v15681_v34 = vld [vmem:[#allocation11 + $0x80] ss:$16 sps:$4 sm:$0xff]   ;;  %v15674_v1 = vld [vmem:[#allocation11 + $0x4c] ss:$16 sps:$4 sm:$0xff]  }
 0x222   : > { %15266 = vmatpush3.bf16.msra.mxu0 %v15632_v9  ;;  %v15689_v35 = vld [vmem:[#allocation11 + $0xa4] ss:$16 sps:$4 sm:$0xff]   ;;  %v15687_v36 = vld [vmem:[#allocation11 + $0xa0] ss:$16 sps:$4 sm:$0xff]   ;;  %v15672_v2 = vld [vmem:[#allocation11 + $0x48] ss:$16 sps:$4 sm:$0xff]  }
 0x223   : > { %1104 = vmatpush1.bf16.msra.mxu1 %v15644_v14  ;;  %1552 = vmatprep.subr.bf16.mxu0 %v15659_v25  ;;  %v15695_v37 = vld [vmem:[#allocation11 + $0xc4] ss:$16 sps:$4 sm:$0xff]   ;;  %v15693_v38 = vld [vmem:[#allocation11 + $0xc0] ss:$16 sps:$4 sm:$0xff]   ;;  %v15680_v3 = vld [vmem:[#allocation11 + $0x6c] ss:$16 sps:$4 sm:$0xff]  }
 0x224   : > { %1105 = vmatprep.subr.bf16.mxu1 %v15645_v15  ;;  %v15701_v39 = vld [vmem:[#allocation11 + $0xe4] ss:$16 sps:$4 sm:$0xff]   ;;  %v15699_v40 = vld [vmem:[#allocation11 + $0xe0] ss:$16 sps:$4 sm:$0xff]   ;;  %v15678_v4 = vld [vmem:[#allocation11 + $0x68] ss:$16 sps:$4 sm:$0xff]  }
 0x225   : > { %15268 = vmatmul.mubr.msk.bf16.vlgmr.msra.gmra.mrb[0].mxu0 %vm941_vm1, %v901_v13  ;;  %v15707_v41 = vld [vmem:[#allocation11 + $0x104] ss:$16 sps:$4 sm:$0xff]   ;;  %v15705_v42 = vld [vmem:[#allocation11 + $0x100] ss:$16 sps:$4 sm:$0xff]   ;;  %v15686_v5 = vld [vmem:[#allocation11 + $0x8c] ss:$16 sps:$4 sm:$0xff]  }
 0x226   : > { %1553 = vmatpush1.bf16.msra.mxu0 %v15657_v24  ;;  %v15713_v43 = vld [vmem:[#allocation11 + $0x124] ss:$16 sps:$4 sm:$0xff]   ;;  %v15711_v44 = vld [vmem:[#allocation11 + $0x120] ss:$16 sps:$4 sm:$0xff]   ;;  %v15684_v6 = vld [vmem:[#allocation11 + $0x88] ss:$16 sps:$4 sm:$0xff]  }
 0x227   : > { %1106 = vmatpush1.bf16.msra.mxu1 %v15647_v16  ;;  %1554 = vmatprep.subr.bf16.mxu0 %v15665_v27  ;;  %v15719_v45 = vld [vmem:[#allocation11 + $0x144] ss:$16 sps:$4 sm:$0xff]   ;;  %v15717_v46 = vld [vmem:[#allocation11 + $0x140] ss:$16 sps:$4 sm:$0xff]   ;;  %v15692_v7 = vld [vmem:[#allocation11 + $0xac] ss:$16 sps:$4 sm:$0xff]  }
 0x228   : > { %1107 = vmatprep.subr.bf16.mxu1 %v15648_v17  ;;  %v15725_v47 = vld [vmem:[#allocation11 + $0x164] ss:$16 sps:$4 sm:$0xff]   ;;  %v15723_v48 = vld [vmem:[#allocation11 + $0x160] ss:$16 sps:$4 sm:$0xff]   ;;  %v15690_v8 = vld [vmem:[#allocation11 + $0xa8] ss:$16 sps:$4 sm:$0xff]  }
 0x229   : > { %v15731_v49 = vld [vmem:[#allocation11 + $0x184] ss:$16 sps:$4 sm:$0xff]   ;;  %v15729_v50 = vld [vmem:[#allocation11 + $0x180] ss:$16 sps:$4 sm:$0xff]   ;;  %v15698_v9 = vld [vmem:[#allocation11 + $0xcc] ss:$16 sps:$4 sm:$0xff]  }
 0x22a   : > { %1555 = vmatpush1.bf16.msra.mxu0 %v15663_v28  ;;  %v15737_v51 = vld [vmem:[#allocation11 + $0x1a4] ss:$16 sps:$4 sm:$0xff]   ;;  %v15735_v52 = vld [vmem:[#allocation11 + $0x1a0] ss:$16 sps:$4 sm:$0xff]   ;;  %v15696_v10 = vld [vmem:[#allocation11 + $0xc8] ss:$16 sps:$4 sm:$0xff]  }
 0x22b   : > { %1108 = vmatpush1.bf16.msra.mxu1 %v15650_v18  ;;  %1556 = vmatprep.subr.bf16.mxu0 %v15671_v29  ;;  %v15704_v11 = vld [vmem:[#allocation11 + $0xec] ss:$16 sps:$4 sm:$0xff]   ;;  %v15702_v12 = vld [vmem:[#allocation11 + $0xe8] ss:$16 sps:$4 sm:$0xff]   ;;  %v15743_v25 = vld [vmem:[#allocation11 + $0x1c4] ss:$16 sps:$4 sm:$0xff]  }
 0x22c   : > { %1109 = vmatprep.subr.bf16.mxu1 %v15651_v19  ;;  %v15710_v13 = vld [vmem:[#allocation11 + $0x10c] ss:$16 sps:$4 sm:$0xff]   ;;  %v15708_v14 = vld [vmem:[#allocation11 + $0x108] ss:$16 sps:$4 sm:$0xff]   ;;  %v15741_v27 = vld [vmem:[#allocation11 + $0x1c0] ss:$16 sps:$4 sm:$0xff]  }
 0x22d   : > { %v15716_v15 = vld [vmem:[#allocation11 + $0x12c] ss:$16 sps:$4 sm:$0xff]   ;;  %v15714_v16 = vld [vmem:[#allocation11 + $0x128] ss:$16 sps:$4 sm:$0xff]   ;;  %v15749_v29 = vld [vmem:[#allocation11 + $0x1e4] ss:$16 sps:$4 sm:$0xff]  }
 0x22e   : > { %1557 = vmatpush1.bf16.msra.mxu0 %v15669_v30  ;;  %v15722_v17 = vld [vmem:[#allocation11 + $0x14c] ss:$16 sps:$4 sm:$0xff]   ;;  %v15720_v18 = vld [vmem:[#allocation11 + $0x148] ss:$16 sps:$4 sm:$0xff]  }
 0x22f   : > { %1110 = vmatpush1.bf16.msra.mxu1 %v15653_v20  ;;  %1558 = vmatprep.subr.bf16.mxu0 %v15677_v31  ;;  %v15728_v19 = vld [vmem:[#allocation11 + $0x16c] ss:$16 sps:$4 sm:$0xff]   ;;  %v15726_v20 = vld [vmem:[#allocation11 + $0x168] ss:$16 sps:$4 sm:$0xff]   ;;  %v15747_v31 = vld [vmem:[#allocation11 + $0x1e0] ss:$16 sps:$4 sm:$0xff]  }
 0x230   : > { %1111 = vmatprep.subr.bf16.mxu1 %v15654_v21  ;;  %v15734_v21 = vld [vmem:[#allocation11 + $0x18c] ss:$16 sps:$4 sm:$0xff]   ;;  %v15738_v24 = vld [vmem:[#allocation11 + $0x1a8] ss:$16 sps:$4 sm:$0xff]  }
 0x231   : > { %v15740_v23 = vld [vmem:[#allocation11 + $0x1ac] ss:$16 sps:$4 sm:$0xff]   ;;  %v15744_v28 = vld [vmem:[#allocation11 + $0x1c8] ss:$16 sps:$4 sm:$0xff]  }
 0x232   : > { %1559 = vmatpush1.bf16.msra.mxu0 %v15675_v32  ;;  %v15752_v30 = vld [vmem:[#allocation11 + $0x1ec] ss:$16 sps:$4 sm:$0xff]   ;;  %v15750_v32 = vld [vmem:[#allocation11 + $0x1e8] ss:$16 sps:$4 sm:$0xff]  }
 0x233   : > { %1112 = vmatpush1.bf16.msra.mxu1 %v15656_v22  ;;  %1560 = vmatprep.subr.bf16.mxu0 %v15683_v33  ;;  %v15732_v22 = vld [vmem:[#allocation11 + $0x188] ss:$16 sps:$4 sm:$0xff]  }
 0x234   : > { %1593 = vmatprep.subr.bf16.mxu1 %v15662_v26  ;;  %v15746_v26 = vld [vmem:[#allocation11 + $0x1cc] ss:$16 sps:$4 sm:$0xff]   ;;  %v1650_v33 = vld [vmem:[#allocation14] sm:$0xff] }
 0x236   : > { %1561 = vmatpush1.bf16.msra.mxu0 %v15681_v34  ;;  %v1654_v34 = vld [vmem:[#allocation14 + $0x20] sm:$0xff] }
 0x237   : > { %1562 = vmatprep.subr.bf16.mxu0 %v15689_v35  ;;  %v1651_v35 = vld [vmem:[#allocation14 + $0x8] sm:$0xff] }
 0x23a   : > { %1563 = vmatpush1.bf16.msra.mxu0 %v15687_v36  ;;  %v13708_v36 = vcombine.low %v1650_v33, %v1654_v34 }
 0x23b   : > { %1564 = vmatprep.subr.bf16.mxu0 %v15695_v37  ;;  %v13709_v37 = vcombine.high %v1650_v33, %v1654_v34  ;;  %v1698_v34 = vld [vmem:[#allocation14 + $0x180] sm:$0xff] }
 0x23e   : > { %1565 = vmatpush1.bf16.msra.mxu0 %v15693_v38  ;;  %v1655_v38 = vld [vmem:[#allocation14 + $0x28] sm:$0xff] }
 0x23f   : > { %1566 = vmatprep.subr.bf16.mxu0 %v15701_v39  ;;  %v13710_v39 = vcombine.low %v1651_v35, %v1655_v38 }
 0x242   : > { %1567 = vmatpush1.bf16.msra.mxu0 %v15699_v40  ;;  %v13711_v40 = vcombine.high %v1651_v35, %v1655_v38  ;;  %v1702_v35 = vld [vmem:[#allocation14 + $0x1a0] sm:$0xff] }
 0x243   : > { %1568 = vmatprep.subr.bf16.mxu0 %v15707_v41  ;;  %v1007_v41 = vlaneseq }
 0x246   : > { %1569 = vmatpush1.bf16.msra.mxu0 %v15705_v42  ;;  %v17378_v42 = vshrl.u32 %v1007_v41, 7 }
 0x247   : > { %1570 = vmatprep.subr.bf16.mxu0 %v15713_v43 }
 0x248   : > { %v17381_v43 = vsub.s32 0, %v17378_v42 }
 0x24a   : > { %1571 = vmatpush1.bf16.msra.mxu0 %v15711_v44  ;;  %v1005_v44 = vld [vmem:[#allocation10] sm:$0x3] }
 0x24b   : > { %1572 = vmatprep.subr.bf16.mxu0 %v15719_v45  ;;  %v17384_v45 = vsub.s32 1, %v17378_v42 }
 0x24e   : > { %1573 = vmatpush1.bf16.msra.mxu0 %v15717_v46  ;;  %v1010_v46 = vrot.slane %v1005_v44, %v17381_v43 }
 0x24f   : > { %1574 = vmatprep.subr.bf16.mxu0 %v15725_v47  ;;  %v1014_v47 = vrot.slane %v1005_v44, %v17384_v45  ;;  %v1706_v44 = vld [vmem:[#allocation14 + $0x1c0] sm:$0xff] }
 0x252   : > { %1575 = vmatpush1.bf16.msra.mxu0 %v15723_v48 }
 0x253   : > { %1576 = vmatprep.subr.bf16.mxu0 %v15731_v49 }
 0x256   : > { %1577 = vmatpush1.bf16.msra.mxu0 %v15729_v50 }
 0x257   : > { %1578 = vmatprep.subr.bf16.mxu0 %v15737_v51 }
 0x25a   : > { %1579 = vmatpush1.bf16.msra.mxu0 %v15735_v52 }
 0x25b   : > { %1580 = vmatprep.subr.bf16.mxu0 %v15743_v25 }
 0x25e   : > { %1581 = vmatpush1.bf16.msra.mxu0 %v15741_v27  ;;  %v1694_v27 = vld [vmem:[#allocation14 + $0x160] sm:$0xff] }
 0x25f   : > { %1582 = vmatprep.subr.bf16.mxu0 %v15749_v29  ;;  %v1695_v29 = vld [vmem:[#allocation14 + $0x168] sm:$0xff] }
 0x262   : > { %1583 = vmatpush1.bf16.msra.mxu0 %v15747_v31 }
 0x263   : > { %3228 = vmatprep.subr.bf16.mxu0 %v13709_v37  ;;  %v1703_v37 = vld [vmem:[#allocation14 + $0x1a8] sm:$0xff] }
 0x2f8   : > { %v979_v54 = vpop.f32.mrb[0].mxu0 }
 0x2f9   : > { %v980_v55 = vadd.f32 %v13622_v53, %v979_v54  ;;  %v15269_v56 = vpop.f32.mrb[1].mxu0 }
 0x2fa   : > { %v982_v57 = vpop.f32.mrb[2].mxu0  ;;  %v1658_v56 = vld [vmem:[#allocation14 + $0x40] sm:$0xff] }
 0x2fb   : > { %vm985_vm2 = vcmp.ge.f32.partialorder %v980_v55, 0.0  ;;  %v986_v58 = vmul.f32 0.2, %v980_v55  ;;  %v15270_v59 = vpop.f32.mrb[3].mxu0 }
 0x2fc   : > { %v1659_v59 = vld [vmem:[#allocation14 + $0x48] sm:$0xff] }
 0x2fd   : > { %v987_v60 = vsel %vm985_vm2, %v980_v55, %v986_v58  ;;  %v1662_v58 = vld [vmem:[#allocation14 + $0x60] sm:$0xff] }
 0x2fe   : > { %v988_v62 = vpack.c.bf16 %v987_v60, %v987_v60  ;;  %v1663_v60 = vld [vmem:[#allocation14 + $0x68] sm:$0xff] }
 0x300   : > { %1130 = vmatmul.mubr.bf16.vlgmr.msra.gmra.mrb[0].mxu1 %v988_v62 }
 0x301   : > { %1594 = vmatpush1.bf16.msra.mxu1 %v15660_v61 }
 0x302   : > { %1595 = vmatprep.subr.bf16.mxu1 %v15668_v63 }
 0x305   : > { %1596 = vmatpush1.bf16.msra.mxu1 %v15666_v0  ;;  %v13717_v0 = vcombine.high %v1658_v56, %v1662_v58 }
 0x306   : > { %1597 = vmatprep.subr.bf16.mxu1 %v15674_v1  ;;  %v13719_v1 = vcombine.high %v1659_v59, %v1663_v60 }
 0x309   : > { %1598 = vmatpush1.bf16.msra.mxu1 %v15672_v2  ;;  %v1666_v2 = vld [vmem:[#allocation14 + $0x80] sm:$0xff] }
 0x30a   : > { %1599 = vmatprep.subr.bf16.mxu1 %v15680_v3  ;;  %v1670_v3 = vld [vmem:[#allocation14 + $0xa0] sm:$0xff] }
 0x30d   : > { %1600 = vmatpush1.bf16.msra.mxu1 %v15678_v4  ;;  %v1667_v4 = vld [vmem:[#allocation14 + $0x88] sm:$0xff] }
 0x30e   : > { %1601 = vmatprep.subr.bf16.mxu1 %v15686_v5  ;;  %v1671_v5 = vld [vmem:[#allocation14 + $0xa8] sm:$0xff] }
 0x311   : > { %1602 = vmatpush1.bf16.msra.mxu1 %v15684_v6  ;;  %v13716_v6 = vcombine.low %v1658_v56, %v1662_v58  ;;  %v1719_v56 = vld [vmem:[#allocation14 + $0x228] sm:$0xff] }
 0x312   : > { %1603 = vmatprep.subr.bf16.mxu1 %v15692_v7  ;;  %v13718_v7 = vcombine.low %v1659_v59, %v1663_v60 }
 0x315   : > { %1604 = vmatpush1.bf16.msra.mxu1 %v15690_v8  ;;  %v13725_v8 = vcombine.high %v1666_v2, %v1670_v3 }
 0x316   : > { %1605 = vmatprep.subr.bf16.mxu1 %v15698_v9  ;;  %v13727_v9 = vcombine.high %v1667_v4, %v1671_v5 }
 0x319   : > { %1606 = vmatpush1.bf16.msra.mxu1 %v15696_v10  ;;  %v1674_v10 = vld [vmem:[#allocation14 + $0xc0] sm:$0xff] }
 0x31a   : > { %1607 = vmatprep.subr.bf16.mxu1 %v15704_v11  ;;  %v1678_v11 = vld [vmem:[#allocation14 + $0xe0] sm:$0xff] }
 0x31d   : > { %1608 = vmatpush1.bf16.msra.mxu1 %v15702_v12  ;;  %v1675_v12 = vld [vmem:[#allocation14 + $0xc8] sm:$0xff] }
 0x31e   : > { %1609 = vmatprep.subr.bf16.mxu1 %v15710_v13  ;;  %v1679_v13 = vld [vmem:[#allocation14 + $0xe8] sm:$0xff] }
 0x321   : > { %1610 = vmatpush1.bf16.msra.mxu1 %v15708_v14  ;;  %v13724_v14 = vcombine.low %v1666_v2, %v1670_v3 }
 0x322   : > { %1611 = vmatprep.subr.bf16.mxu1 %v15716_v15  ;;  %v13726_v15 = vcombine.low %v1667_v4, %v1671_v5  ;;  %v1730_v5 = vld [vmem:[#allocation14 + $0x280] sm:$0xff] }
 0x325   : > { %1612 = vmatpush1.bf16.msra.mxu1 %v15714_v16  ;;  %v13733_v16 = vcombine.high %v1674_v10, %v1678_v11 }
 0x326   : > { %1613 = vmatprep.subr.bf16.mxu1 %v15722_v17  ;;  %v13735_v17 = vcombine.high %v1675_v12, %v1679_v13 }
 0x329   : > { %1614 = vmatpush1.bf16.msra.mxu1 %v15720_v18  ;;  %v1682_v18 = vld [vmem:[#allocation14 + $0x100] sm:$0xff] }
 0x32a   : > { %1615 = vmatprep.subr.bf16.mxu1 %v15728_v19  ;;  %v1686_v19 = vld [vmem:[#allocation14 + $0x120] sm:$0xff] }
 0x32d   : > { %1616 = vmatpush1.bf16.msra.mxu1 %v15726_v20  ;;  %v1683_v20 = vld [vmem:[#allocation14 + $0x108] sm:$0xff] }
 0x32e   : > { %1617 = vmatprep.subr.bf16.mxu1 %v15734_v21  ;;  %v1687_v21 = vld [vmem:[#allocation14 + $0x128] sm:$0xff] }
 0x32f   : > { %v13743_v25 = vcombine.high %v1683_v20, %v1687_v21  ;;  %v13742_v31 = vcombine.low %v1683_v20, %v1687_v21  ;;  %v1746_v21 = vld [vmem:[#allocation14 + $0x300] sm:$0xff] }
 0x331   : > { %1618 = vmatpush1.bf16.msra.mxu1 %v15732_v22  ;;  %v13732_v22 = vcombine.low %v1674_v10, %v1678_v11 }
 0x332   : > { %1619 = vmatprep.subr.bf16.mxu1 %v15740_v23  ;;  %v13734_v23 = vcombine.low %v1675_v12, %v1679_v13  ;;  %v1738_v13 = vld [vmem:[#allocation14 + $0x2c0] sm:$0xff] }
 0x335   : > { %1620 = vmatpush1.bf16.msra.mxu1 %v15738_v24  ;;  %v13741_v24 = vcombine.high %v1682_v18, %v1686_v19 }
 0x336   : > { %1621 = vmatprep.subr.bf16.mxu1 %v15746_v26  ;;  %v1690_v26 = vld [vmem:[#allocation14 + $0x140] sm:$0xff] }
 0x337   : > { %v13748_v38 = vcombine.low %v1690_v26, %v1694_v27 }
 0x339   : > { %1622 = vmatpush1.bf16.msra.mxu1 %v15744_v28  ;;  %v1691_v28 = vld [vmem:[#allocation14 + $0x148] sm:$0xff] }
 0x33a   : > { %1623 = vmatprep.subr.bf16.mxu1 %v15752_v30  ;;  %v13740_v30 = vcombine.low %v1682_v18, %v1686_v19  ;;  %v13751_v33 = vcombine.high %v1691_v28, %v1695_v29 }
 0x33d   : > { %1624 = vmatpush1.bf16.msra.mxu1 %v15750_v32  ;;  %v13749_v32 = vcombine.high %v1690_v26, %v1694_v27 }
 0x33e   : > { %3310 = vmatprep.subr.bf16.mxu1 %v13711_v40  ;;  %v13757_v40 = vcombine.high %v1698_v34, %v1702_v35 }
 0x3d3   : > { %v1131_v48 = vpop.f32.mrb[0].mxu1 }
 0x3d4   : > { %v1132_v49 = vadd.f32 %v1131_v48, %v1010_v46  ;;  %v1133_v50 = vpop.f32.mrb[1].mxu1  ;;  %v1710_v46 = vld [vmem:[#allocation14 + $0x1e0] sm:$0xff]  ;;  %v1711_v48 = vld [vmem:[#allocation14 + $0x1e8] sm:$0xff] }
 0x3d5   : > { %v1134_v51 = vadd.f32 %v1133_v50, %v1014_v47  ;;  %v1135_v52 = vpop.f32.mrb[2].mxu1  ;;  %v1707_v47 = vld [vmem:[#allocation14 + $0x1c8] sm:$0xff] }
 0x3d6   : > { %vm1138_vm3 = vcmp.ge.f32.partialorder %v1132_v49, 0.0  ;;  %v1140_v53 = vmul.f32 0.2, %v1132_v49  ;;  %v1136_v54 = vpop.f32.mrb[3].mxu1  ;;  %v13767_v52 = vcombine.high %v1707_v47, %v1711_v48  ;;  %v13766_v58 = vcombine.low %v1707_v47, %v1711_v48 }
 0x3d7   : > { %vm1139_vm4 = vcmp.ge.f32.partialorder %v1134_v51, 0.0  ;;  %v1141_v55 = vmul.f32 0.2, %v1134_v51  ;;  %v1718_v54 = vld [vmem:[#allocation14 + $0x220] sm:$0xff] }
 0x3d8   : > { %v1142_v57 = vsel %vm1138_vm3, %v1132_v49, %v1140_v53  ;;  %v13756_v49 = vcombine.low %v1698_v34, %v1702_v35  ;;  %v1714_v53 = vld [vmem:[#allocation14 + $0x200] sm:$0xff] }
 0x3d9   : > { %v1143_v61 = vsel %vm1139_vm4, %v1134_v51, %v1141_v55  ;;  %v1144_v63 = vpack.c.bf16 %v1142_v57, %v1142_v57  ;;  %v13765_v51 = vcombine.high %v1706_v44, %v1710_v46  ;;  %v1715_v55 = vld [vmem:[#allocation14 + $0x208] sm:$0xff]  ;;  %v13764_v57 = vcombine.low %v1706_v44, %v1710_v46 }
 0x3da   : > { %v1145_v62 = vpack.c.bf16 %v1143_v61, %v1143_v61  ;;  %v13773_v59 = vcombine.high %v1714_v53, %v1718_v54  ;;  %v13775_v60 = vcombine.high %v1715_v55, %v1719_v56  ;;  %v1722_v61 = vld [vmem:[#allocation14 + $0x240] sm:$0xff]  ;;  %v13774_v2 = vcombine.low %v1715_v55, %v1719_v56  ;;  %v1767_v46 = vld [vmem:[#allocation14 + $0x3a8] sm:$0xff] }
 0x3dc   : > { %1584 = vmatprep.mubr.bf16.mxu0 %v1145_v62  ;;  %1625 = vmatprep.mubr.bf16.mxu1 %v1145_v62  ;;  %v1726_v62 = vld [vmem:[#allocation14 + $0x260] sm:$0xff] }
 0x3dd   : > { %1585 = vmatmul.mubr.bf16.vlgmr.msra.gmra.mrb[4].mxu0 %v1144_v63  ;;  %1626 = vmatmul.mubr.bf16.vlgmr.msra.gmra.mrb[4].mxu1 %v1144_v63  ;;  %v1723_v63 = vld [vmem:[#allocation14 + $0x248] sm:$0xff]  ;;  %v13781_v3 = vcombine.high %v1722_v61, %v1726_v62 }
 0x3de   : > { %3229 = vmatpush1.bf16.msra.mxu0 %v13708_v36  ;;  %3311 = vmatpush1.bf16.msra.mxu1 %v13710_v39  ;;  %v1699_v36 = vld [vmem:[#allocation14 + $0x188] sm:$0xff]  ;;  %v13750_v39 = vcombine.low %v1691_v28, %v1695_v29  ;;  %v1754_v29 = vld [vmem:[#allocation14 + $0x340] sm:$0xff] }
 0x3df   : > { %3230 = vmatprep.subr.bf16.mxu0 %v13717_v0  ;;  %3312 = vmatprep.subr.bf16.mxu1 %v13719_v1  ;;  %v13759_v41 = vcombine.high %v1699_v36, %v1703_v37  ;;  %v13758_v50 = vcombine.low %v1699_v36, %v1703_v37  ;;  %v1727_v0 = vld [vmem:[#allocation14 + $0x268] sm:$0xff]  ;;  %v13772_v1 = vcombine.low %v1714_v53, %v1718_v54 }
 0x3e0   : > { %v13783_v4 = vcombine.high %v1723_v63, %v1727_v0  ;;  %v13782_v10 = vcombine.low %v1723_v63, %v1727_v0  ;;  %v1775_v54 = vld [vmem:[#allocation14 + $0x3e8] sm:$0xff] }
 0x3e1   : > { %v1783_v63 = vld [vmem:[#allocation14 + $0x428] sm:$0xff] }
 0x3e2   : > { %3231 = vmatpush1.bf16.msra.mxu0 %v13716_v6  ;;  %3313 = vmatpush1.bf16.msra.mxu1 %v13718_v7  ;;  %v1734_v6 = vld [vmem:[#allocation14 + $0x2a0] sm:$0xff]  ;;  %v1731_v7 = vld [vmem:[#allocation14 + $0x288] sm:$0xff] }
 0x3e3   : > { %3232 = vmatprep.subr.bf16.mxu0 %v13725_v8  ;;  %3314 = vmatprep.subr.bf16.mxu1 %v13727_v9  ;;  %v1735_v8 = vld [vmem:[#allocation14 + $0x2a8] sm:$0xff]  ;;  %v13780_v9 = vcombine.low %v1722_v61, %v1726_v62  ;;  %v13789_v11 = vcombine.high %v1730_v5, %v1734_v6 }
 0x3e4   : > { %v13791_v12 = vcombine.high %v1731_v7, %v1735_v8  ;;  %v13790_v18 = vcombine.low %v1731_v7, %v1735_v8 }
 0x3e6   : > { %3233 = vmatpush1.bf16.msra.mxu0 %v13724_v14  ;;  %3315 = vmatpush1.bf16.msra.mxu1 %v13726_v15  ;;  %v1742_v14 = vld [vmem:[#allocation14 + $0x2e0] sm:$0xff]  ;;  %v1739_v15 = vld [vmem:[#allocation14 + $0x2c8] sm:$0xff] }
 0x3e7   : > { %3234 = vmatprep.subr.bf16.mxu0 %v13733_v16  ;;  %3316 = vmatprep.subr.bf16.mxu1 %v13735_v17  ;;  %v1743_v16 = vld [vmem:[#allocation14 + $0x2e8] sm:$0xff]  ;;  %v13788_v17 = vcombine.low %v1730_v5, %v1734_v6  ;;  %v13797_v19 = vcombine.high %v1738_v13, %v1742_v14 }
 0x3e8   : > { %v13799_v20 = vcombine.high %v1739_v15, %v1743_v16  ;;  %v13798_v26 = vcombine.low %v1739_v15, %v1743_v16 }
 0x3ea   : > { %3235 = vmatpush1.bf16.msra.mxu0 %v13732_v22  ;;  %3317 = vmatpush1.bf16.msra.mxu1 %v13734_v23  ;;  %v1750_v22 = vld [vmem:[#allocation14 + $0x320] sm:$0xff]  ;;  %v1747_v23 = vld [vmem:[#allocation14 + $0x308] sm:$0xff] }
 0x3eb   : > { %3236 = vmatprep.subr.bf16.mxu0 %v13741_v24  ;;  %3318 = vmatprep.subr.bf16.mxu1 %v13743_v25  ;;  %v1751_v24 = vld [vmem:[#allocation14 + $0x328] sm:$0xff]  ;;  %v13796_v25 = vcombine.low %v1738_v13, %v1742_v14  ;;  %v13805_v27 = vcombine.high %v1746_v21, %v1750_v22 }
 0x3ec   : > { %v13807_v28 = vcombine.high %v1747_v23, %v1751_v24  ;;  %v13806_v34 = vcombine.low %v1747_v23, %v1751_v24  ;;  %v1790_v24 = vld [vmem:[#allocation14 + $0x460] sm:$0xff] }
 0x3ee   : > { %3237 = vmatpush1.bf16.msra.mxu0 %v13740_v30  ;;  %3319 = vmatpush1.bf16.msra.mxu1 %v13742_v31  ;;  %v1758_v30 = vld [vmem:[#allocation14 + $0x360] sm:$0xff]  ;;  %v1755_v31 = vld [vmem:[#allocation14 + $0x348] sm:$0xff] }
 0x3ef   : > { %3238 = vmatprep.subr.bf16.mxu0 %v13749_v32  ;;  %3320 = vmatprep.subr.bf16.mxu1 %v13751_v33  ;;  %v1759_v32 = vld [vmem:[#allocation14 + $0x368] sm:$0xff]  ;;  %v13804_v33 = vcombine.low %v1746_v21, %v1750_v22  ;;  %v13813_v35 = vcombine.high %v1754_v29, %v1758_v30  ;;  %v13812_v37 = vcombine.low %v1754_v29, %v1758_v30  ;;  %v1786_v22 = vld [vmem:[#allocation14 + $0x440] sm:$0xff] }
 0x3f0   : > { %v13815_v36 = vcombine.high %v1755_v31, %v1759_v32  ;;  %v1794_v30 = vld [vmem:[#allocation14 + $0x480] sm:$0xff] }
 0x3f2   : > { %3239 = vmatpush1.bf16.msra.mxu0 %v13748_v38  ;;  %3321 = vmatpush1.bf16.msra.mxu1 %v13750_v39  ;;  %v13814_v38 = vcombine.low %v1755_v31, %v1759_v32  ;;  %v1762_v39 = vld [vmem:[#allocation14 + $0x380] sm:$0xff]  ;;  %v13845_v31 = vcombine.high %v1786_v22, %v1790_v24 }
 0x3f3   : > { %3240 = vmatprep.subr.bf16.mxu0 %v13757_v40  ;;  %3322 = vmatprep.subr.bf16.mxu1 %v13759_v41  ;;  %v1766_v40 = vld [vmem:[#allocation14 + $0x3a0] sm:$0xff]  ;;  %v1763_v41 = vld [vmem:[#allocation14 + $0x388] sm:$0xff] }
 0x3f4   : > { %v13821_v44 = vcombine.high %v1762_v39, %v1766_v40  ;;  %v13820_v47 = vcombine.low %v1762_v39, %v1766_v40  ;;  %v13822_v48 = vcombine.low %v1763_v41, %v1767_v46 }
 0x3f6   : > { %3241 = vmatpush1.bf16.msra.mxu0 %v13756_v49  ;;  %3323 = vmatpush1.bf16.msra.mxu1 %v13758_v50  ;;  %v13823_v49 = vcombine.high %v1763_v41, %v1767_v46  ;;  %v1770_v50 = vld [vmem:[#allocation14 + $0x3c0] sm:$0xff]  ;;  %v1803_v46 = vld [vmem:[#allocation14 + $0x4c8] sm:$0xff] }
 0x3f7   : > { %3242 = vmatprep.subr.bf16.mxu0 %v13765_v51  ;;  %3324 = vmatprep.subr.bf16.mxu1 %v13767_v52  ;;  %v1774_v51 = vld [vmem:[#allocation14 + $0x3e0] sm:$0xff]  ;;  %v1771_v52 = vld [vmem:[#allocation14 + $0x3c8] sm:$0xff] }
 0x3f8   : > { %v13829_v53 = vcombine.high %v1770_v50, %v1774_v51  ;;  %v13828_v55 = vcombine.low %v1770_v50, %v1774_v51  ;;  %v13830_v56 = vcombine.low %v1771_v52, %v1775_v54  ;;  %v1802_v41 = vld [vmem:[#allocation14 + $0x4c0] sm:$0xff] }
 0x3fa   : > { %3243 = vmatpush1.bf16.msra.mxu0 %v13764_v57  ;;  %3325 = vmatpush1.bf16.msra.mxu1 %v13766_v58  ;;  %v13831_v57 = vcombine.high %v1771_v52, %v1775_v54  ;;  %v1778_v58 = vld [vmem:[#allocation14 + $0x400] sm:$0xff]  ;;  %v1811_v54 = vld [vmem:[#allocation14 + $0x508] sm:$0xff] }
 0x3fb   : > { %3244 = vmatprep.subr.bf16.mxu0 %v13773_v59  ;;  %3326 = vmatprep.subr.bf16.mxu1 %v13775_v60  ;;  %v1782_v59 = vld [vmem:[#allocation14 + $0x420] sm:$0xff]  ;;  %v1779_v60 = vld [vmem:[#allocation14 + $0x408] sm:$0xff] }
 0x3fc   : > { %v13836_v61 = vcombine.low %v1778_v58, %v1782_v59  ;;  %v13837_v62 = vcombine.high %v1778_v58, %v1782_v59  ;;  %v13838_v0 = vcombine.low %v1779_v60, %v1783_v63  ;;  %v1810_v52 = vld [vmem:[#allocation14 + $0x500] sm:$0xff] }
 0x3fe   : > { %3245 = vmatpush1.bf16.msra.mxu0 %v13772_v1  ;;  %3327 = vmatpush1.bf16.msra.mxu1 %v13774_v2  ;;  %v13839_v1 = vcombine.high %v1779_v60, %v1783_v63  ;;  %v17388_v2 = vld [vmem:[#allocation13] sm:$0xf]  ;;  %v1818_v60 = vld [vmem:[#allocation14 + $0x540] sm:$0xff]  ;;  %v1823_v63 = vld [vmem:[#allocation14 + $0x568] sm:$0xff] }
 0x3ff   : > { %3246 = vmatprep.subr.bf16.mxu0 %v13781_v3  ;;  %3328 = vmatprep.subr.bf16.mxu1 %v13783_v4  ;;  %v1226_v3 = vsub.s32 3, %v17378_v42  ;;  %v1215_v4 = vrot.slane %v17388_v2, %v17381_v43  ;;  %v1219_v5 = vrot.slane %v17388_v2, %v17384_v45 }
 0x401   : > { %v1227_v6 = vrot.slane %v17388_v2, %v1226_v3 }
 0x402   : > { %3247 = vmatpush1.bf16.msra.mxu0 %v13780_v9  ;;  %3329 = vmatpush1.bf16.msra.mxu1 %v13782_v10 }
 0x403   : > { %3248 = vmatprep.subr.bf16.mxu0 %v13789_v11  ;;  %3330 = vmatprep.subr.bf16.mxu1 %v13791_v12 }
 0x406   : > { %3249 = vmatpush1.bf16.msra.mxu0 %v13788_v17  ;;  %3331 = vmatpush1.bf16.msra.mxu1 %v13790_v18 }
 0x407   : > { %3250 = vmatprep.subr.bf16.mxu0 %v13797_v19  ;;  %3332 = vmatprep.subr.bf16.mxu1 %v13799_v20 }
 0x40a   : > { %3251 = vmatpush1.bf16.msra.mxu0 %v13796_v25  ;;  %3333 = vmatpush1.bf16.msra.mxu1 %v13798_v26  ;;  %v1787_v25 = vld [vmem:[#allocation14 + $0x448] sm:$0xff] }
 0x40b   : > { %3252 = vmatprep.subr.bf16.mxu0 %v13805_v27  ;;  %3334 = vmatprep.subr.bf16.mxu1 %v13807_v28  ;;  %v1791_v26 = vld [vmem:[#allocation14 + $0x468] sm:$0xff] }
 0x40c   : > { %v13847_v32 = vcombine.high %v1787_v25, %v1791_v26 }
 0x40e   : > { %3253 = vmatpush1.bf16.msra.mxu0 %v13804_v33  ;;  %3335 = vmatpush1.bf16.msra.mxu1 %v13806_v34  ;;  %v1798_v33 = vld [vmem:[#allocation14 + $0x4a0] sm:$0xff]  ;;  %v1795_v34 = vld [vmem:[#allocation14 + $0x488] sm:$0xff] }
 0x40f   : > { %3254 = vmatprep.subr.bf16.mxu0 %v13813_v35  ;;  %3336 = vmatprep.subr.bf16.mxu1 %v13815_v36  ;;  %v1799_v35 = vld [vmem:[#allocation14 + $0x4a8] sm:$0xff]  ;;  %v13853_v39 = vcombine.high %v1794_v30, %v1798_v33 }
 0x410   : > { %v13855_v40 = vcombine.high %v1795_v34, %v1799_v35 }
 0x412   : > { %3255 = vmatpush1.bf16.msra.mxu0 %v13812_v37  ;;  %3337 = vmatpush1.bf16.msra.mxu1 %v13814_v38  ;;  %v13844_v37 = vcombine.low %v1786_v22, %v1790_v24  ;;  %v13846_v38 = vcombine.low %v1787_v25, %v1791_v26  ;;  %v1846_v24 = vld [vmem:[#allocation14 + $0x620] sm:$0xff]  ;;  %v1843_v25 = vld [vmem:[#allocation14 + $0x608] sm:$0xff] }
 0x413   : > { %3256 = vmatprep.subr.bf16.mxu0 %v13821_v44  ;;  %3338 = vmatprep.subr.bf16.mxu1 %v13823_v49  ;;  %v1806_v44 = vld [vmem:[#allocation14 + $0x4e0] sm:$0xff]  ;;  %v13854_v49 = vcombine.low %v1795_v34, %v1799_v35  ;;  %v1847_v26 = vld [vmem:[#allocation14 + $0x628] sm:$0xff] }
 0x414   : > { %v13861_v50 = vcombine.high %v1802_v41, %v1806_v44  ;;  %v1854_v34 = vld [vmem:[#allocation14 + $0x660] sm:$0xff]  ;;  %v1851_v35 = vld [vmem:[#allocation14 + $0x648] sm:$0xff] }
 0x416   : > { %3257 = vmatpush1.bf16.msra.mxu0 %v13820_v47  ;;  %3339 = vmatpush1.bf16.msra.mxu1 %v13822_v48  ;;  %v1807_v47 = vld [vmem:[#allocation14 + $0x4e8] sm:$0xff]  ;;  %v13852_v48 = vcombine.low %v1794_v30, %v1798_v33  ;;  %v1850_v33 = vld [vmem:[#allocation14 + $0x640] sm:$0xff] }
 0x417   : > { %3258 = vmatprep.subr.bf16.mxu0 %v13829_v53  ;;  %3340 = vmatprep.subr.bf16.mxu1 %v13831_v57  ;;  %v13863_v51 = vcombine.high %v1803_v46, %v1807_v47  ;;  %v1814_v53 = vld [vmem:[#allocation14 + $0x520] sm:$0xff]  ;;  %v13862_v57 = vcombine.low %v1803_v46, %v1807_v47  ;;  %v1859_v47 = vld [vmem:[#allocation14 + $0x688] sm:$0xff] }
 0x418   : > { %v13869_v58 = vcombine.high %v1810_v52, %v1814_v53  ;;  %v1862_v46 = vld [vmem:[#allocation14 + $0x6a0] sm:$0xff] }
 0x41a   : > { %3259 = vmatpush1.bf16.msra.mxu0 %v13828_v55  ;;  %3341 = vmatpush1.bf16.msra.mxu1 %v13830_v56  ;;  %v1815_v55 = vld [vmem:[#allocation14 + $0x528] sm:$0xff]  ;;  %v13860_v56 = vcombine.low %v1802_v41, %v1806_v44  ;;  %v1858_v44 = vld [vmem:[#allocation14 + $0x680] sm:$0xff] }
 0x41b   : > { %3269 = vmatprep.subr.bf16.mxu0 %v13837_v62  ;;  %3351 = vmatprep.subr.bf16.mxu1 %v13839_v1  ;;  %v13871_v59 = vcombine.high %v1811_v54, %v1815_v55  ;;  %v1819_v62 = vld [vmem:[#allocation14 + $0x548] sm:$0xff]  ;;  %v13870_v1 = vcombine.low %v1811_v54, %v1815_v55  ;;  %v1870_v54 = vld [vmem:[#allocation14 + $0x6e0] sm:$0xff] }
 0x41c   : > { %v1867_v55 = vld [vmem:[#allocation14 + $0x6c8] sm:$0xff] }
 0x4b0   : > { %v1586_v7 = vpop.f32.mrb[4].mxu0  ;;  %v17398_v8 = vpop.f32.mrb[4].mxu1 }
 0x4b1   : > { %v1587_v9 = vadd.f32 %v1586_v7, %v1215_v4  ;;  %v1588_v10 = vpop.f32.mrb[5].mxu0  ;;  %v1629_v11 = vpop.f32.mrb[5].mxu1  ;;  %v1830_v7 = vld [vmem:[#allocation14 + $0x5a0] sm:$0xff] }
 0x4b2   : > { %v1589_v12 = vadd.f32 %v1588_v10, %v1219_v5  ;;  %v1630_v13 = vadd.f32 %v1629_v11, %v1227_v6  ;;  %v1590_v14 = vpop.f32.mrb[6].mxu0  ;;  %v1631_v15 = vpop.f32.mrb[6].mxu1  ;;  %v13879_v5 = vcombine.high %v1819_v62, %v1823_v63  ;;  %v1826_v6 = vld [vmem:[#allocation14 + $0x580] sm:$0xff]  ;;  %v1831_v10 = vld [vmem:[#allocation14 + $0x5a8] sm:$0xff] }
 0x4b3   : > { %vm1634_vm5 = vcmp.ge.f32.partialorder %v1587_v9, 0.0  ;;  %v1638_v16 = vmul.f32 0.2, %v1587_v9  ;;  %v1591_v20 = vpop.f32.mrb[7].mxu0  ;;  %v1632_v21 = vpop.f32.mrb[7].mxu1  ;;  %v1834_v15 = vld [vmem:[#allocation14 + $0x5c0] sm:$0xff] }
 0x4b4   : > { %vm1635_vm6 = vcmp.ge.f32.partialorder %v1589_v12, 0.0  ;;  %v1639_v17 = vmul.f32 0.2, %v1589_v12  ;;  %vm1637_vm7 = vcmp.ge.f32.partialorder %v1630_v13, 0.0  ;;  %v1641_v18 = vmul.f32 0.2, %v1630_v13 }
 0x4b5   : > { %v1642_v19 = vsel %vm1634_vm5, %v1587_v9, %v1638_v16  ;;  %v1827_v9 = vld [vmem:[#allocation14 + $0x588] sm:$0xff]  ;;  %v1838_v16 = vld [vmem:[#allocation14 + $0x5e0] sm:$0xff] }
 0x4b6   : > { %v1643_v23 = vsel %vm1635_vm6, %v1589_v12, %v1639_v17  ;;  %v1645_v28 = vsel %vm1637_vm7, %v1630_v13, %v1641_v18  ;;  %v17402_v29 = vpack.c.bf16 %v1642_v19, %v1642_v19  ;;  %v13878_v12 = vcombine.low %v1819_v62, %v1823_v63  ;;  %v1835_v17 = vld [vmem:[#allocation14 + $0x5c8] sm:$0xff]  ;;  %v1878_v62 = vld [vmem:[#allocation14 + $0x720] sm:$0xff] }
 0x4b7   : > { %v17400_v27 = vpack.c.bf16 %v1643_v23, %v1643_v23  ;;  %v17406_v36 = vpack.c.bf16 %v1645_v28, %v1645_v28  ;;  %v13885_v13 = vcombine.high %v1826_v6, %v1830_v7  ;;  %v13887_v14 = vcombine.high %v1827_v9, %v1831_v10  ;;  %v1839_v18 = vld [vmem:[#allocation14 + $0x5e8] sm:$0xff]  ;;  %v1842_v23 = vld [vmem:[#allocation14 + $0x600] sm:$0xff] }
 0x4b8   : > { %v13884_v19 = vcombine.low %v1826_v6, %v1830_v7  ;;  %v13886_v20 = vcombine.low %v1827_v9, %v1831_v10  ;;  %v13893_v21 = vcombine.high %v1834_v15, %v1838_v16  ;;  %v13895_v22 = vcombine.high %v1835_v17, %v1839_v18  ;;  %v1875_v63 = vld [vmem:[#allocation14 + $0x708] sm:$0xff]  ;;  %v1882_v7 = vld [vmem:[#allocation14 + $0x740] sm:$0xff] }
 0x4b9   : > { %3260 = vmatprep.mubr.bf16.mxu0 %v17400_v27  ;;  %3342 = vmatprep.mubr.bf16.mxu1 %v17400_v27  ;;  %v13892_v28 = vcombine.low %v1834_v15, %v1838_v16  ;;  %v13894_v30 = vcombine.low %v1835_v17, %v1839_v18  ;;  %v1222_v9 = vsub.s32 2, %v17378_v42  ;;  %v1886_v10 = vld [vmem:[#allocation14 + $0x760] sm:$0xff] }
 0x4ba   : > { %3261 = vmatmul.mubr.bf16.vlgmr.msra.gmra.mrb[8].mxu0 %v17402_v29  ;;  %3343 = vmatmul.mubr.bf16.vlgmr.msra.gmra.mrb[8].mxu1 %v17402_v29  ;;  %v13941_v15 = vcombine.high %v1882_v7, %v1886_v10  ;;  %v1890_v17 = vld [vmem:[#allocation14 + $0x780] sm:$0xff] }
 0x4bb   : > { %3270 = vmatpush1.bf16.msra.mxu0 %v13836_v61  ;;  %3352 = vmatpush1.bf16.msra.mxu1 %v13838_v0  ;;  %v1822_v61 = vld [vmem:[#allocation14 + $0x560] sm:$0xff]  ;;  %v13868_v0 = vcombine.low %v1810_v52, %v1814_v53  ;;  %v1223_v18 = vrot.slane %v17388_v2, %v1222_v9 }
 0x4bc   : > { %3301 = vmatprep.mubr.bf16.mxu0 %v17406_v36  ;;  %3383 = vmatprep.mubr.bf16.mxu1 %v17406_v36  ;;  %v13877_v4 = vcombine.high %v1818_v60, %v1822_v61  ;;  %v13876_v11 = vcombine.low %v1818_v60, %v1822_v61  ;;  %v1866_v53 = vld [vmem:[#allocation14 + $0x6c0] sm:$0xff] }
 0x4bd   : > { %3271 = vmatprep.subr.bf16.mxu0 %v13845_v31  ;;  %3353 = vmatprep.subr.bf16.mxu1 %v13847_v32  ;;  %v13901_v31 = vcombine.high %v1842_v23, %v1846_v24  ;;  %v13903_v32 = vcombine.high %v1843_v25, %v1847_v26  ;;  %v1874_v61 = vld [vmem:[#allocation14 + $0x700] sm:$0xff] }
 0x4bf   : > { %3272 = vmatpush1.bf16.msra.mxu0 %v13844_v37  ;;  %3354 = vmatpush1.bf16.msra.mxu1 %v13846_v38  ;;  %v1855_v37 = vld [vmem:[#allocation14 + $0x668] sm:$0xff]  ;;  %v13900_v38 = vcombine.low %v1842_v23, %v1846_v24 }
 0x4c0   : > { %3273 = vmatprep.subr.bf16.mxu0 %v13853_v39  ;;  %3355 = vmatprep.subr.bf16.mxu1 %v13855_v40  ;;  %v13902_v39 = vcombine.low %v1843_v25, %v1847_v26  ;;  %v13909_v40 = vcombine.high %v1850_v33, %v1854_v34  ;;  %v13911_v41 = vcombine.high %v1851_v35, %v1855_v37  ;;  %v1898_v26 = vld [vmem:[#allocation14 + $0x7c0] sm:$0xff] }
 0x4c3   : > { %3274 = vmatpush1.bf16.msra.mxu0 %v13852_v48  ;;  %3356 = vmatpush1.bf16.msra.mxu1 %v13854_v49  ;;  %v1863_v48 = vld [vmem:[#allocation14 + $0x6a8] sm:$0xff]  ;;  %v13908_v49 = vcombine.low %v1850_v33, %v1854_v34 }
 0x4c4   : > { %3275 = vmatprep.subr.bf16.mxu0 %v13861_v50  ;;  %3357 = vmatprep.subr.bf16.mxu1 %v13863_v51  ;;  %v13910_v50 = vcombine.low %v1851_v35, %v1855_v37  ;;  %v13917_v51 = vcombine.high %v1858_v44, %v1862_v46  ;;  %v13919_v52 = vcombine.high %v1859_v47, %v1863_v48  ;;  %v1652_v37 = vld [vmem:[#allocation14 + $0x10] sm:$0xff] }
 0x4c7   : > { %3276 = vmatpush1.bf16.msra.mxu0 %v13860_v56  ;;  %3358 = vmatpush1.bf16.msra.mxu1 %v13862_v57  ;;  %v1871_v56 = vld [vmem:[#allocation14 + $0x6e8] sm:$0xff]  ;;  %v13916_v57 = vcombine.low %v1858_v44, %v1862_v46 }
 0x4c8   : > { %3277 = vmatprep.subr.bf16.mxu0 %v13869_v58  ;;  %3359 = vmatprep.subr.bf16.mxu1 %v13871_v59  ;;  %v13918_v58 = vcombine.low %v1859_v47, %v1863_v48  ;;  %v13925_v59 = vcombine.high %v1866_v53, %v1870_v54  ;;  %v13927_v60 = vcombine.high %v1867_v55, %v1871_v56 }
 0x4cb   : > { %3278 = vmatpush1.bf16.msra.mxu0 %v13868_v0  ;;  %3360 = vmatpush1.bf16.msra.mxu1 %v13870_v1  ;;  %v1879_v0 = vld [vmem:[#allocation14 + $0x728] sm:$0xff]  ;;  %v13924_v1 = vcombine.low %v1866_v53, %v1870_v54 }
 0x4cc   : > { %3279 = vmatprep.subr.bf16.mxu0 %v13877_v4  ;;  %3361 = vmatprep.subr.bf16.mxu1 %v13879_v5  ;;  %v13926_v4 = vcombine.low %v1867_v55, %v1871_v56  ;;  %v13933_v5 = vcombine.high %v1874_v61, %v1878_v62  ;;  %v13935_v6 = vcombine.high %v1875_v63, %v1879_v0 }
 0x4cf   : > { %3280 = vmatpush1.bf16.msra.mxu0 %v13876_v11  ;;  %3362 = vmatpush1.bf16.msra.mxu1 %v13878_v12  ;;  %v1883_v11 = vld [vmem:[#allocation14 + $0x748] sm:$0xff] }
 0x4d0   : > { %3281 = vmatprep.subr.bf16.mxu0 %v13885_v13  ;;  %3363 = vmatprep.subr.bf16.mxu1 %v13887_v14  ;;  %v1887_v12 = vld [vmem:[#allocation14 + $0x768] sm:$0xff]  ;;  %v13932_v13 = vcombine.low %v1874_v61, %v1878_v62  ;;  %v13934_v14 = vcombine.low %v1875_v63, %v1879_v0  ;;  %v1673_v61 = vld [vmem:[#allocation14 + $0xb8] sm:$0xff] }
 0x4d1   : > { %v13943_v16 = vcombine.high %v1883_v11, %v1887_v12  ;;  %v13942_v23 = vcombine.low %v1883_v11, %v1887_v12 }
 0x4d3   : > { %3282 = vmatpush1.bf16.msra.mxu0 %v13884_v19  ;;  %3364 = vmatpush1.bf16.msra.mxu1 %v13886_v20  ;;  %v1894_v19 = vld [vmem:[#allocation14 + $0x7a0] sm:$0xff]  ;;  %v1891_v20 = vld [vmem:[#allocation14 + $0x788] sm:$0xff] }
 0x4d4   : > { %3283 = vmatprep.subr.bf16.mxu0 %v13893_v21  ;;  %3365 = vmatprep.subr.bf16.mxu1 %v13895_v22  ;;  %v1895_v21 = vld [vmem:[#allocation14 + $0x7a8] sm:$0xff]  ;;  %v13940_v22 = vcombine.low %v1882_v7, %v1886_v10  ;;  %v13949_v24 = vcombine.high %v1890_v17, %v1894_v19  ;;  %v13948_v2 = vcombine.low %v1890_v17, %v1894_v19  ;;  %v1681_v7 = vld [vmem:[#allocation14 + $0xf8] sm:$0xff] }
 0x4d5   : > { %v13951_v25 = vcombine.high %v1891_v20, %v1895_v21  ;;  %v13950_v33 = vcombine.low %v1891_v20, %v1895_v21  ;;  %v1692_v21 = vld [vmem:[#allocation14 + $0x150] sm:$0xff] }
 0x4d7   : > { %3284 = vmatpush1.bf16.msra.mxu0 %v13892_v28  ;;  %3366 = vmatpush1.bf16.msra.mxu1 %v13894_v30  ;;  %v1628_v28 = vadd.f32 %v17398_v8, %v1223_v18  ;;  %v1902_v30 = vld [vmem:[#allocation14 + $0x7e0] sm:$0xff] }
 0x4d8   : > { %3285 = vmatprep.subr.bf16.mxu0 %v13901_v31  ;;  %3367 = vmatprep.subr.bf16.mxu1 %v13903_v32  ;;  %v1899_v31 = vld [vmem:[#allocation14 + $0x7c8] sm:$0xff]  ;;  %v13957_v34 = vcombine.high %v1898_v26, %v1902_v30  ;;  %v13956_v8 = vcombine.low %v1898_v26, %v1902_v30 }
 0x4d9   : > { %v1903_v32 = vld [vmem:[#allocation14 + $0x7e8] sm:$0xff]  ;;  %vm1636_vm8 = vcmp.ge.f32.partialorder %v1628_v28, 0.0 }
 0x4da   : > { %v13959_v35 = vcombine.high %v1899_v31, %v1903_v32  ;;  %v13958_v44 = vcombine.low %v1899_v31, %v1903_v32  ;;  %v1700_v31 = vld [vmem:[#allocation14 + $0x190] sm:$0xff] }
 0x4db   : > { %3286 = vmatpush1.bf16.msra.mxu0 %v13900_v38  ;;  %3368 = vmatpush1.bf16.msra.mxu1 %v13902_v39  ;;  %v1640_v38 = vmul.f32 0.2, %v1628_v28  ;;  %v1656_v39 = vld [vmem:[#allocation14 + $0x30] sm:$0xff] }
 0x4dc   : > { %3287 = vmatprep.subr.bf16.mxu0 %v13909_v40  ;;  %3369 = vmatprep.subr.bf16.mxu1 %v13911_v41  ;;  %v1653_v40 = vld [vmem:[#allocation14 + $0x18] sm:$0xff]  ;;  %v13713_v46 = vcombine.high %v1652_v37, %v1656_v39  ;;  %v13712_v53 = vcombine.low %v1652_v37, %v1656_v39  ;;  %v1704_v32 = vld [vmem:[#allocation14 + $0x1b0] sm:$0xff] }
 0x4dd   : > { %v1657_v41 = vld [vmem:[#allocation14 + $0x38] sm:$0xff]  ;;  %v1644_v48 = vsel %vm1636_vm8, %v1628_v28, %v1640_v38  ;;  %v13761_v37 = vcombine.high %v1700_v31, %v1704_v32  ;;  %v1708_v39 = vld [vmem:[#allocation14 + $0x1d0] sm:$0xff] }
 0x4de   : > { %v13715_v47 = vcombine.high %v1653_v40, %v1657_v41  ;;  %v17417_v54 = vpack.c.bf16 %v1644_v48, %v1644_v48  ;;  %v13714_v55 = vcombine.low %v1653_v40, %v1657_v41  ;;  %v1712_v40 = vld [vmem:[#allocation14 + $0x1f0] sm:$0xff]  ;;  %v1709_v41 = vld [vmem:[#allocation14 + $0x1d8] sm:$0xff] }
 0x4df   : > { %3288 = vmatpush1.bf16.msra.mxu0 %v13908_v49  ;;  %3370 = vmatpush1.bf16.msra.mxu1 %v13910_v50  ;;  %v1660_v49 = vld [vmem:[#allocation14 + $0x50] sm:$0xff] }
 0x4e0   : > { %3289 = vmatprep.subr.bf16.mxu0 %v13917_v51  ;;  %3371 = vmatprep.subr.bf16.mxu1 %v13919_v52  ;;  %v1664_v50 = vld [vmem:[#allocation14 + $0x70] sm:$0xff]  ;;  %v1661_v51 = vld [vmem:[#allocation14 + $0x58] sm:$0xff] }
 0x4e1   : > { %v1665_v52 = vld [vmem:[#allocation14 + $0x78] sm:$0xff]  ;;  %v13721_v56 = vcombine.high %v1660_v49, %v1664_v50  ;;  %v13720_v62 = vcombine.low %v1660_v49, %v1664_v50  ;;  %v1716_v49 = vld [vmem:[#allocation14 + $0x210] sm:$0xff] }
 0x4e2   : > { %v13722_v63 = vcombine.low %v1661_v51, %v1665_v52  ;;  %v1720_v50 = vld [vmem:[#allocation14 + $0x230] sm:$0xff] }
 0x4e3   : > { %3290 = vmatpush1.bf16.msra.mxu0 %v13916_v57  ;;  %3372 = vmatpush1.bf16.msra.mxu1 %v13918_v58  ;;  %v13723_v57 = vcombine.high %v1661_v51, %v1665_v52  ;;  %v1668_v58 = vld [vmem:[#allocation14 + $0x90] sm:$0xff]  ;;  %v1717_v51 = vld [vmem:[#allocation14 + $0x218] sm:$0xff] }
 0x4e4   : > { %3291 = vmatprep.subr.bf16.mxu0 %v13925_v59  ;;  %3373 = vmatprep.subr.bf16.mxu1 %v13927_v60  ;;  %v1672_v59 = vld [vmem:[#allocation14 + $0xb0] sm:$0xff]  ;;  %v1669_v60 = vld [vmem:[#allocation14 + $0x98] sm:$0xff] }
 0x4e5   : > { %v13729_v0 = vcombine.high %v1668_v58, %v1672_v59  ;;  %v13728_v10 = vcombine.low %v1668_v58, %v1672_v59  ;;  %v13730_v11 = vcombine.low %v1669_v60, %v1673_v61  ;;  %v1721_v52 = vld [vmem:[#allocation14 + $0x238] sm:$0xff]  ;;  %v1724_v58 = vld [vmem:[#allocation14 + $0x250] sm:$0xff] }
 0x4e6   : > { %v1728_v59 = vld [vmem:[#allocation14 + $0x270] sm:$0xff] }
 0x4e7   : > { %3292 = vmatpush1.bf16.msra.mxu0 %v13924_v1  ;;  %3374 = vmatpush1.bf16.msra.mxu1 %v13926_v4  ;;  %v13731_v1 = vcombine.high %v1669_v60, %v1673_v61  ;;  %v1676_v4 = vld [vmem:[#allocation14 + $0xd0] sm:$0xff]  ;;  %v1725_v60 = vld [vmem:[#allocation14 + $0x258] sm:$0xff] }
 0x4e8   : > { %3293 = vmatprep.subr.bf16.mxu0 %v13933_v5  ;;  %3375 = vmatprep.subr.bf16.mxu1 %v13935_v6  ;;  %v1680_v5 = vld [vmem:[#allocation14 + $0xf0] sm:$0xff]  ;;  %v1677_v6 = vld [vmem:[#allocation14 + $0xd8] sm:$0xff] }
 0x4e9   : > { %v13737_v12 = vcombine.high %v1676_v4, %v1680_v5  ;;  %v13736_v17 = vcombine.low %v1676_v4, %v1680_v5  ;;  %v13738_v18 = vcombine.low %v1677_v6, %v1681_v7  ;;  %v1729_v61 = vld [vmem:[#allocation14 + $0x278] sm:$0xff]  ;;  %v1732_v4 = vld [vmem:[#allocation14 + $0x290] sm:$0xff] }
 0x4ea   : > { %v1736_v5 = vld [vmem:[#allocation14 + $0x2b0] sm:$0xff] }
 0x4eb   : > { %3294 = vmatpush1.bf16.msra.mxu0 %v13932_v13  ;;  %3376 = vmatpush1.bf16.msra.mxu1 %v13934_v14  ;;  %v13739_v13 = vcombine.high %v1677_v6, %v1681_v7  ;;  %v1684_v14 = vld [vmem:[#allocation14 + $0x110] sm:$0xff]  ;;  %v1733_v6 = vld [vmem:[#allocation14 + $0x298] sm:$0xff] }
 0x4ec   : > { %3295 = vmatprep.subr.bf16.mxu0 %v13941_v15  ;;  %3377 = vmatprep.subr.bf16.mxu1 %v13943_v16  ;;  %v1688_v15 = vld [vmem:[#allocation14 + $0x130] sm:$0xff]  ;;  %v1689_v16 = vld [vmem:[#allocation14 + $0x138] sm:$0xff] }
 0x4ed   : > { %v13745_v19 = vcombine.high %v1684_v14, %v1688_v15  ;;  %v1737_v7 = vld [vmem:[#allocation14 + $0x2b8] sm:$0xff] }
 0x4ef   : > { %3296 = vmatpush1.bf16.msra.mxu0 %v13940_v22  ;;  %3378 = vmatpush1.bf16.msra.mxu1 %v13942_v23  ;;  %v1696_v22 = vld [vmem:[#allocation14 + $0x170] sm:$0xff]  ;;  %v1693_v23 = vld [vmem:[#allocation14 + $0x158] sm:$0xff] }
 0x4f0   : > { %3297 = vmatprep.subr.bf16.mxu0 %v13949_v24  ;;  %3379 = vmatprep.subr.bf16.mxu1 %v13951_v25  ;;  %v1697_v24 = vld [vmem:[#allocation14 + $0x178] sm:$0xff]  ;;  %v13744_v25 = vcombine.low %v1684_v14, %v1688_v15  ;;  %v13753_v28 = vcombine.high %v1692_v21, %v1696_v22  ;;  %v1740_v14 = vld [vmem:[#allocation14 + $0x2d0] sm:$0xff] }
 0x4f1   : > { %v13755_v30 = vcombine.high %v1693_v23, %v1697_v24  ;;  %v1744_v15 = vld [vmem:[#allocation14 + $0x2f0] sm:$0xff] }
 0x4f3   : > { %3298 = vmatpush1.bf16.msra.mxu0 %v13948_v2  ;;  %3380 = vmatpush1.bf16.msra.mxu1 %v13950_v33  ;;  %v1701_v2 = vld [vmem:[#allocation14 + $0x198] sm:$0xff] }
 0x4f4   : > { %3299 = vmatprep.subr.bf16.mxu0 %v13957_v34  ;;  %3381 = vmatprep.subr.bf16.mxu1 %v13959_v35  ;;  %v1705_v33 = vld [vmem:[#allocation14 + $0x1b8] sm:$0xff]  ;;  %v13752_v34 = vcombine.low %v1692_v21, %v1696_v22  ;;  %v13754_v35 = vcombine.low %v1693_v23, %v1697_v24  ;;  %v1748_v21 = vld [vmem:[#allocation14 + $0x310] sm:$0xff] }
 0x4f5   : > { %v13763_v38 = vcombine.high %v1701_v2, %v1705_v33  ;;  %v1752_v22 = vld [vmem:[#allocation14 + $0x330] sm:$0xff]  ;;  %v1749_v23 = vld [vmem:[#allocation14 + $0x318] sm:$0xff] }
 0x4f6   : > { %v1753_v24 = vld [vmem:[#allocation14 + $0x338] sm:$0xff] }
 0x4f7   : > { %3300 = vmatpush1.bf16.msra.mxu0 %v13956_v8  ;;  %3382 = vmatpush1.bf16.msra.mxu1 %v13958_v44  ;;  %v1713_v8 = vld [vmem:[#allocation14 + $0x1f8] sm:$0xff]  ;;  %v13760_v44 = vcombine.low %v1700_v31, %v1704_v32  ;;  %v1756_v31 = vld [vmem:[#allocation14 + $0x350] sm:$0xff] }
 0x4f8   : > { %3392 = vmatprep.subr.bf16.mxu0 %v13713_v46  ;;  %3474 = vmatprep.subr.bf16.mxu1 %v13715_v47  ;;  %v13762_v46 = vcombine.low %v1701_v2, %v1705_v33  ;;  %v13769_v47 = vcombine.high %v1708_v39, %v1712_v40  ;;  %v13771_v48 = vcombine.high %v1709_v41, %v1713_v8  ;;  %v1760_v32 = vld [vmem:[#allocation14 + $0x370] sm:$0xff]  ;;  %v1757_v2 = vld [vmem:[#allocation14 + $0x358] sm:$0xff] }
 0x4f9   : > { %v1761_v33 = vld [vmem:[#allocation14 + $0x378] sm:$0xff] }
 0x4fa   : > { %3302 = vmatmul.mubr.bf16.vlgmr.msra.gmra.mrb[8].mxu0 %v17417_v54  ;;  %3384 = vmatmul.mubr.bf16.vlgmr.msra.gmra.mrb[8].mxu1 %v17417_v54 }
 0x4fb   : > { %3393 = vmatpush1.bf16.msra.mxu0 %v13712_v53  ;;  %3424 = vmatprep.mubr.bf16.mxu0 %v17400_v27  ;;  %v13768_v53 = vcombine.low %v1708_v39, %v1712_v40  ;;  %v1764_v39 = vld [vmem:[#allocation14 + $0x390] sm:$0xff] }
 0x4fc   : > { %3475 = vmatpush1.bf16.msra.mxu1 %v13714_v55  ;;  %3506 = vmatprep.mubr.bf16.mxu1 %v17400_v27  ;;  %v1685_v27 = vld [vmem:[#allocation14 + $0x118] sm:$0xff]  ;;  %v13770_v55 = vcombine.low %v1709_v41, %v1713_v8  ;;  %v1768_v40 = vld [vmem:[#allocation14 + $0x3b0] sm:$0xff] }
 0x4fd   : > { %3394 = vmatprep.subr.bf16.mxu0 %v13721_v56  ;;  %3476 = vmatprep.subr.bf16.mxu1 %v13723_v57  ;;  %v13747_v20 = vcombine.high %v1685_v27, %v1689_v16  ;;  %v13746_v26 = vcombine.low %v1685_v27, %v1689_v16  ;;  %v13777_v56 = vcombine.high %v1716_v49, %v1720_v50  ;;  %v1741_v27 = vld [vmem:[#allocation14 + $0x2d8] sm:$0xff] }
 0x4fe   : > { %v13779_v57 = vcombine.high %v1717_v51, %v1721_v52  ;;  %v1745_v16 = vld [vmem:[#allocation14 + $0x2f8] sm:$0xff] }
 0x4ff   : > { %3395 = vmatpush1.bf16.msra.mxu0 %v13720_v62  ;;  %v13776_v62 = vcombine.low %v1716_v49, %v1720_v50  ;;  %v1765_v41 = vld [vmem:[#allocation14 + $0x398] sm:$0xff]  ;;  %v1772_v49 = vld [vmem:[#allocation14 + $0x3d0] sm:$0xff] }
 0x500   : > { %3477 = vmatpush1.bf16.msra.mxu1 %v13722_v63  ;;  %3396 = vmatprep.subr.bf16.mxu0 %v13729_v0  ;;  %v13778_v63 = vcombine.low %v1717_v51, %v1721_v52  ;;  %v13785_v0 = vcombine.high %v1724_v58, %v1728_v59  ;;  %v1769_v8 = vld [vmem:[#allocation14 + $0x3b8] sm:$0xff]  ;;  %v1776_v50 = vld [vmem:[#allocation14 + $0x3f0] sm:$0xff] }
 0x501   : > { %3478 = vmatprep.subr.bf16.mxu1 %v13731_v1  ;;  %v13787_v1 = vcombine.high %v1725_v60, %v1729_v61  ;;  %v1773_v51 = vld [vmem:[#allocation14 + $0x3d8] sm:$0xff] }
 0x502   : > { %v1777_v52 = vld [vmem:[#allocation14 + $0x3f8] sm:$0xff] }
 0x503   : > { %3397 = vmatpush1.bf16.msra.mxu0 %v13728_v10  ;;  %v13784_v10 = vcombine.low %v1724_v58, %v1728_v59  ;;  %v1780_v58 = vld [vmem:[#allocation14 + $0x410] sm:$0xff] }
 0x504   : > { %3479 = vmatpush1.bf16.msra.mxu1 %v13730_v11  ;;  %3398 = vmatprep.subr.bf16.mxu0 %v13737_v12  ;;  %v13786_v11 = vcombine.low %v1725_v60, %v1729_v61  ;;  %v13793_v12 = vcombine.high %v1732_v4, %v1736_v5  ;;  %v1784_v59 = vld [vmem:[#allocation14 + $0x430] sm:$0xff]  ;;  %v1781_v60 = vld [vmem:[#allocation14 + $0x418] sm:$0xff] }
 0x505   : > { %3480 = vmatprep.subr.bf16.mxu1 %v13739_v13  ;;  %v13795_v13 = vcombine.high %v1733_v6, %v1737_v7  ;;  %v1785_v61 = vld [vmem:[#allocation14 + $0x438] sm:$0xff] }
 0x507   : > { %3399 = vmatpush1.bf16.msra.mxu0 %v13736_v17  ;;  %v13792_v17 = vcombine.low %v1732_v4, %v1736_v5  ;;  %v1788_v4 = vld [vmem:[#allocation14 + $0x450] sm:$0xff] }
 0x508   : > { %3481 = vmatpush1.bf16.msra.mxu1 %v13738_v18  ;;  %3400 = vmatprep.subr.bf16.mxu0 %v13745_v19  ;;  %v13794_v18 = vcombine.low %v1733_v6, %v1737_v7  ;;  %v13801_v19 = vcombine.high %v1740_v14, %v1744_v15  ;;  %v1792_v5 = vld [vmem:[#allocation14 + $0x470] sm:$0xff]  ;;  %v13840_v6 = vcombine.low %v1780_v58, %v1784_v59  ;;  %v1789_v7 = vld [vmem:[#allocation14 + $0x458] sm:$0xff] }
 0x509   : > { %3482 = vmatprep.subr.bf16.mxu1 %v13747_v20  ;;  %v13803_v20 = vcombine.high %v1741_v27, %v1745_v16 }
 0x50b   : > { %3401 = vmatpush1.bf16.msra.mxu0 %v13744_v25  ;;  %v13800_v25 = vcombine.low %v1740_v14, %v1744_v15  ;;  %v1800_v14 = vld [vmem:[#allocation14 + $0x4b0] sm:$0xff] }
 0x50c   : > { %3483 = vmatpush1.bf16.msra.mxu1 %v13746_v26  ;;  %3402 = vmatprep.subr.bf16.mxu0 %v13753_v28  ;;  %v13802_v26 = vcombine.low %v1741_v27, %v1745_v16  ;;  %v13809_v28 = vcombine.high %v1748_v21, %v1752_v22  ;;  %v1797_v27 = vld [vmem:[#allocation14 + $0x498] sm:$0xff] }
 0x50d   : > { %3484 = vmatprep.subr.bf16.mxu1 %v13755_v30  ;;  %v13811_v30 = vcombine.high %v1749_v23, %v1753_v24  ;;  %v1801_v16 = vld [vmem:[#allocation14 + $0x4b8] sm:$0xff] }
 0x50f   : > { %3403 = vmatpush1.bf16.msra.mxu0 %v13752_v34  ;;  %v13808_v34 = vcombine.low %v1748_v21, %v1752_v22  ;;  %v1804_v21 = vld [vmem:[#allocation14 + $0x4d0] sm:$0xff] }
 0x510   : > { %3485 = vmatpush1.bf16.msra.mxu1 %v13754_v35  ;;  %3404 = vmatprep.subr.bf16.mxu0 %v13761_v37  ;;  %v13810_v35 = vcombine.low %v1749_v23, %v1753_v24  ;;  %v13817_v37 = vcombine.high %v1756_v31, %v1760_v32  ;;  %v1808_v22 = vld [vmem:[#allocation14 + $0x4f0] sm:$0xff]  ;;  %v1805_v23 = vld [vmem:[#allocation14 + $0x4d8] sm:$0xff] }
 0x511   : > { %3486 = vmatprep.subr.bf16.mxu1 %v13763_v38  ;;  %v13819_v38 = vcombine.high %v1757_v2, %v1761_v33  ;;  %v1809_v24 = vld [vmem:[#allocation14 + $0x4f8] sm:$0xff] }
 0x513   : > { %3405 = vmatpush1.bf16.msra.mxu0 %v13760_v44  ;;  %v13816_v44 = vcombine.low %v1756_v31, %v1760_v32  ;;  %v1816_v31 = vld [vmem:[#allocation14 + $0x530] sm:$0xff]  ;;  %v1813_v32 = vld [vmem:[#allocation14 + $0x518] sm:$0xff] }
 0x514   : > { %3487 = vmatpush1.bf16.msra.mxu1 %v13762_v46  ;;  %3406 = vmatprep.subr.bf16.mxu0 %v13769_v47  ;;  %v13818_v46 = vcombine.low %v1757_v2, %v1761_v33  ;;  %v13825_v47 = vcombine.high %v1764_v39, %v1768_v40  ;;  %v1817_v2 = vld [vmem:[#allocation14 + $0x538] sm:$0xff]  ;;  %v13866_v33 = vcombine.low %v1805_v23, %v1809_v24 }
 0x515   : > { %3488 = vmatprep.subr.bf16.mxu1 %v13771_v48  ;;  %v13827_v48 = vcombine.high %v1765_v41, %v1769_v8 }
 0x517   : > { %3407 = vmatpush1.bf16.msra.mxu0 %v13768_v53  ;;  %v13824_v53 = vcombine.low %v1764_v39, %v1768_v40  ;;  %v1821_v39 = vld [vmem:[#allocation14 + $0x558] sm:$0xff] }
 0x518   : > { %3489 = vmatpush1.bf16.msra.mxu1 %v13770_v55  ;;  %3408 = vmatprep.subr.bf16.mxu0 %v13777_v56  ;;  %v13826_v55 = vcombine.low %v1765_v41, %v1769_v8  ;;  %v13833_v56 = vcombine.high %v1772_v49, %v1776_v50  ;;  %v1825_v40 = vld [vmem:[#allocation14 + $0x578] sm:$0xff]  ;;  %v13874_v8 = vcombine.low %v1813_v32, %v1817_v2 }
 0x519   : > { %3490 = vmatprep.subr.bf16.mxu1 %v13779_v57  ;;  %v13835_v57 = vcombine.high %v1773_v51, %v1777_v52 }
 0x51b   : > { %3409 = vmatpush1.bf16.msra.mxu0 %v13776_v62  ;;  %v13832_v62 = vcombine.low %v1772_v49, %v1776_v50  ;;  %v1829_v49 = vld [vmem:[#allocation14 + $0x598] sm:$0xff] }
 0x51c   : > { %3491 = vmatpush1.bf16.msra.mxu1 %v13778_v63  ;;  %3410 = vmatprep.subr.bf16.mxu0 %v13785_v0  ;;  %v13834_v63 = vcombine.low %v1773_v51, %v1777_v52  ;;  %v13841_v0 = vcombine.high %v1780_v58, %v1784_v59  ;;  %v1833_v50 = vld [vmem:[#allocation14 + $0x5b8] sm:$0xff]  ;;  %v13882_v52 = vcombine.low %v1821_v39, %v1825_v40 }
 0x51d   : > { %3492 = vmatprep.subr.bf16.mxu1 %v13787_v1  ;;  %v13843_v1 = vcombine.high %v1781_v60, %v1785_v61  ;;  %v1837_v58 = vld [vmem:[#allocation14 + $0x5d8] sm:$0xff] }
 0x51e   : > { %v1841_v59 = vld [vmem:[#allocation14 + $0x5f8] sm:$0xff] }
 0x51f   : > { %3411 = vmatpush1.bf16.msra.mxu0 %v13784_v10  ;;  %v1793_v10 = vld [vmem:[#allocation14 + $0x478] sm:$0xff] }
 0x520   : > { %3493 = vmatpush1.bf16.msra.mxu1 %v13786_v11  ;;  %3412 = vmatprep.subr.bf16.mxu0 %v13793_v12  ;;  %v13842_v11 = vcombine.low %v1781_v60, %v1785_v61  ;;  %v13849_v12 = vcombine.high %v1788_v4, %v1792_v5  ;;  %v13851_v15 = vcombine.high %v1789_v7, %v1793_v10 }
 0x521   : > { %3494 = vmatprep.subr.bf16.mxu1 %v13795_v13  ;;  %v1796_v13 = vld [vmem:[#allocation14 + $0x490] sm:$0xff]  ;;  %v13890_v61 = vcombine.low %v1829_v49, %v1833_v50 }
 0x523   : > { %3413 = vmatpush1.bf16.msra.mxu0 %v13792_v17  ;;  %v13848_v17 = vcombine.low %v1788_v4, %v1792_v5  ;;  %v1845_v4 = vld [vmem:[#allocation14 + $0x618] sm:$0xff] }
 0x524   : > { %3495 = vmatpush1.bf16.msra.mxu1 %v13794_v18  ;;  %3414 = vmatprep.subr.bf16.mxu0 %v13801_v19  ;;  %v13850_v18 = vcombine.low %v1789_v7, %v1793_v10  ;;  %v13857_v19 = vcombine.high %v1796_v13, %v1800_v14  ;;  %v1849_v5 = vld [vmem:[#allocation14 + $0x638] sm:$0xff]  ;;  %v13898_v7 = vcombine.low %v1837_v58, %v1841_v59 }
 0x525   : > { %3496 = vmatprep.subr.bf16.mxu1 %v13803_v20  ;;  %v13859_v20 = vcombine.high %v1797_v27, %v1801_v16 }
 0x527   : > { %3415 = vmatpush1.bf16.msra.mxu0 %v13800_v25  ;;  %v13856_v25 = vcombine.low %v1796_v13, %v1800_v14  ;;  %v1856_v13 = vld [vmem:[#allocation14 + $0x670] sm:$0xff]  ;;  %v1853_v14 = vld [vmem:[#allocation14 + $0x658] sm:$0xff] }
 0x528   : > { %3497 = vmatpush1.bf16.msra.mxu1 %v13802_v26  ;;  %3416 = vmatprep.subr.bf16.mxu0 %v13809_v28  ;;  %v13865_v26 = vcombine.high %v1804_v21, %v1808_v22  ;;  %v13867_v28 = vcombine.high %v1805_v23, %v1809_v24 }
 0x529   : > { %3498 = vmatprep.subr.bf16.mxu1 %v13811_v30  ;;  %v1812_v30 = vld [vmem:[#allocation14 + $0x510] sm:$0xff] }
 0x52a   : > { %v13872_v41 = vcombine.low %v1812_v30, %v1816_v31 }
 0x52b   : > { %3417 = vmatpush1.bf16.msra.mxu0 %v13808_v34  ;;  %v13873_v34 = vcombine.high %v1812_v30, %v1816_v31  ;;  %v1869_v30 = vld [vmem:[#allocation14 + $0x6d8] sm:$0xff] }
 0x52c   : > { %3499 = vmatpush1.bf16.msra.mxu1 %v13810_v35  ;;  %3418 = vmatprep.subr.bf16.mxu0 %v13817_v37  ;;  %v13875_v35 = vcombine.high %v1813_v32, %v1817_v2  ;;  %v1820_v37 = vld [vmem:[#allocation14 + $0x550] sm:$0xff]  ;;  %v1873_v31 = vld [vmem:[#allocation14 + $0x6f8] sm:$0xff] }
 0x52d   : > { %3500 = vmatprep.subr.bf16.mxu1 %v13819_v38  ;;  %v1824_v38 = vld [vmem:[#allocation14 + $0x570] sm:$0xff] }
 0x52e   : > { %v13880_v51 = vcombine.low %v1820_v37, %v1824_v38 }
 0x52f   : > { %3419 = vmatpush1.bf16.msra.mxu0 %v13816_v44  ;;  %v13881_v44 = vcombine.high %v1820_v37, %v1824_v38  ;;  %v1877_v37 = vld [vmem:[#allocation14 + $0x718] sm:$0xff] }
 0x530   : > { %3501 = vmatpush1.bf16.msra.mxu1 %v13818_v46  ;;  %3420 = vmatprep.subr.bf16.mxu0 %v13825_v47  ;;  %v13883_v46 = vcombine.high %v1821_v39, %v1825_v40  ;;  %v1828_v47 = vld [vmem:[#allocation14 + $0x590] sm:$0xff]  ;;  %v1881_v38 = vld [vmem:[#allocation14 + $0x738] sm:$0xff]  ;;  %v13930_v40 = vcombine.low %v1869_v30, %v1873_v31 }
 0x531   : > { %3502 = vmatprep.subr.bf16.mxu1 %v13827_v48  ;;  %v1832_v48 = vld [vmem:[#allocation14 + $0x5b0] sm:$0xff] }
 0x532   : > { %v13888_v60 = vcombine.low %v1828_v47, %v1832_v48 }
 0x533   : > { %3421 = vmatpush1.bf16.msra.mxu0 %v13824_v53  ;;  %v13889_v53 = vcombine.high %v1828_v47, %v1832_v48  ;;  %v1885_v47 = vld [vmem:[#allocation14 + $0x758] sm:$0xff] }
 0x534   : > { %3503 = vmatpush1.bf16.msra.mxu1 %v13826_v55  ;;  %3422 = vmatprep.subr.bf16.mxu0 %v13833_v56  ;;  %v13891_v55 = vcombine.high %v1829_v49, %v1833_v50  ;;  %v1836_v56 = vld [vmem:[#allocation14 + $0x5d0] sm:$0xff]  ;;  %v1889_v48 = vld [vmem:[#allocation14 + $0x778] sm:$0xff]  ;;  %v13938_v50 = vcombine.low %v1877_v37, %v1881_v38 }
 0x535   : > { %3504 = vmatprep.subr.bf16.mxu1 %v13835_v57  ;;  %v1840_v57 = vld [vmem:[#allocation14 + $0x5f0] sm:$0xff] }
 0x537   : > { %3423 = vmatpush1.bf16.msra.mxu0 %v13832_v62  ;;  %v13897_v62 = vcombine.high %v1836_v56, %v1840_v57 }
 0x538   : > { %3505 = vmatpush1.bf16.msra.mxu1 %v13834_v63  ;;  %3433 = vmatprep.subr.bf16.mxu0 %v13841_v0  ;;  %v13899_v63 = vcombine.high %v1837_v58, %v1841_v59  ;;  %v1844_v0 = vld [vmem:[#allocation14 + $0x610] sm:$0xff]  ;;  %v13946_v59 = vcombine.low %v1885_v47, %v1889_v48 }
 0x539   : > { %3515 = vmatprep.subr.bf16.mxu1 %v13843_v1  ;;  %v1848_v1 = vld [vmem:[#allocation14 + $0x630] sm:$0xff] }
 0x53a   : > { %3425 = vmatmul.mubr.bf16.vlgmr.msra.gmra.mrb[12].mxu0 %v17402_v29  ;;  %v13905_v10 = vcombine.high %v1844_v0, %v1848_v1 }
 0x53b   : > { %3507 = vmatmul.mubr.bf16.vlgmr.msra.gmra.mrb[12].mxu1 %v17402_v29  ;;  %3434 = vmatpush1.bf16.msra.mxu0 %v13840_v6  ;;  %v13858_v29 = vcombine.low %v1797_v27, %v1801_v16  ;;  %v13896_v6 = vcombine.low %v1836_v56, %v1840_v57  ;;  %v13904_v27 = vcombine.low %v1844_v0, %v1848_v1  ;;  %v1893_v56 = vld [vmem:[#allocation14 + $0x798] sm:$0xff] }
 0x53c   : > { %3465 = vmatprep.mubr.bf16.mxu0 %v17406_v36  ;;  %3516 = vmatpush1.bf16.msra.mxu1 %v13842_v11  ;;  %v13907_v11 = vcombine.high %v1845_v4, %v1849_v5  ;;  %v13906_v16 = vcombine.low %v1845_v4, %v1849_v5  ;;  %v1897_v57 = vld [vmem:[#allocation14 + $0x7b8] sm:$0xff] }
 0x53d   : > { %3547 = vmatprep.mubr.bf16.mxu1 %v17406_v36  ;;  %3435 = vmatprep.subr.bf16.mxu0 %v13849_v12  ;;  %v13864_v36 = vcombine.low %v1804_v21, %v1808_v22  ;;  %v1852_v12 = vld [vmem:[#allocation14 + $0x650] sm:$0xff]  ;;  %v1861_v21 = vld [vmem:[#allocation14 + $0x698] sm:$0xff]  ;;  %v13954_v5 = vcombine.low %v1893_v56, %v1897_v57 }
 0x53e   : > { %3517 = vmatprep.subr.bf16.mxu1 %v13851_v15  ;;  %v1857_v15 = vld [vmem:[#allocation14 + $0x678] sm:$0xff]  ;;  %v13912_v23 = vcombine.low %v1852_v12, %v1856_v13 }
 0x53f   : > { %3436 = vmatpush1.bf16.msra.mxu0 %v13848_v17  ;;  %v13913_v17 = vcombine.high %v1852_v12, %v1856_v13  ;;  %v1865_v22 = vld [vmem:[#allocation14 + $0x6b8] sm:$0xff]  ;;  %v13914_v24 = vcombine.low %v1853_v14, %v1857_v15  ;;  %v1906_v12 = vld [vmem:[#allocation16] sm:$0xff] }
 0x540   : > { %3518 = vmatpush1.bf16.msra.mxu1 %v13850_v18  ;;  %3437 = vmatprep.subr.bf16.mxu0 %v13857_v19  ;;  %v13915_v18 = vcombine.high %v1853_v14, %v1857_v15  ;;  %v1860_v19 = vld [vmem:[#allocation14 + $0x690] sm:$0xff]  ;;  %v13922_v2 = vcombine.low %v1861_v21, %v1865_v22  ;;  %v1901_v0 = vld [vmem:[#allocation14 + $0x7d8] sm:$0xff]  ;;  %v1911_v13 = vrot.slane %v1906_v12, %v17381_v43  ;;  %v16699_v15 = vmov 1983009808  }
 0x541   : > { %3519 = vmatprep.subr.bf16.mxu1 %v13859_v20  ;;  %v1864_v20 = vld [vmem:[#allocation14 + $0x6b0] sm:$0xff]  ;;  %v1905_v1 = vld [vmem:[#allocation14 + $0x7f8] sm:$0xff]  ;;  %v1919_v14 = vrot.slane %v1906_v12, %v1222_v9 }
 0x542   : > { %v13920_v32 = vcombine.low %v1860_v19, %v1864_v20 }
 0x543   : > { %3438 = vmatpush1.bf16.msra.mxu0 %v13856_v25  ;;  %v13921_v25 = vcombine.high %v1860_v19, %v1864_v20 }
 0x544   : > { %3520 = vmatpush1.bf16.msra.mxu1 %v13858_v29  ;;  %3439 = vmatprep.subr.bf16.mxu0 %v13865_v26  ;;  %v13923_v29 = vcombine.high %v1861_v21, %v1865_v22  ;;  %v1868_v26 = vld [vmem:[#allocation14 + $0x6d0] sm:$0xff] }
 0x545   : > { %3521 = vmatprep.subr.bf16.mxu1 %v13867_v28  ;;  %v1872_v28 = vld [vmem:[#allocation14 + $0x6f0] sm:$0xff] }
 0x546   : > { %v13928_v39 = vcombine.low %v1868_v26, %v1872_v28 }
 0x547   : > { %3440 = vmatpush1.bf16.msra.mxu0 %v13864_v36  ;;  %v13929_v36 = vcombine.high %v1868_v26, %v1872_v28 }
 0x548   : > { %3522 = vmatpush1.bf16.msra.mxu1 %v13866_v33  ;;  %3441 = vmatprep.subr.bf16.mxu0 %v13873_v34  ;;  %v13931_v33 = vcombine.high %v1869_v30, %v1873_v31  ;;  %v1876_v34 = vld [vmem:[#allocation14 + $0x710] sm:$0xff] }
 0x549   : > { %3523 = vmatprep.subr.bf16.mxu1 %v13875_v35  ;;  %v1880_v35 = vld [vmem:[#allocation14 + $0x730] sm:$0xff] }
 0x54a   : > { %v13936_v49 = vcombine.low %v1876_v34, %v1880_v35 }
 0x54b   : > { %3442 = vmatpush1.bf16.msra.mxu0 %v13872_v41  ;;  %v13937_v41 = vcombine.high %v1876_v34, %v1880_v35 }
 0x54c   : > { %3524 = vmatpush1.bf16.msra.mxu1 %v13874_v8  ;;  %3443 = vmatprep.subr.bf16.mxu0 %v13881_v44  ;;  %v13939_v8 = vcombine.high %v1877_v37, %v1881_v38  ;;  %v1884_v44 = vld [vmem:[#allocation14 + $0x750] sm:$0xff] }
 0x54d   : > { %3525 = vmatprep.subr.bf16.mxu1 %v13883_v46  ;;  %v1888_v46 = vld [vmem:[#allocation14 + $0x770] sm:$0xff] }
 0x54e   : > { %v13944_v58 = vcombine.low %v1884_v44, %v1888_v46 }
 0x54f   : > { %3444 = vmatpush1.bf16.msra.mxu0 %v13880_v51  ;;  %v13945_v51 = vcombine.high %v1884_v44, %v1888_v46  ;;  %v1938_v44 = vsub.s32 7, %v17378_v42 }
 0x550   : > { %3526 = vmatpush1.bf16.msra.mxu1 %v13882_v52  ;;  %3445 = vmatprep.subr.bf16.mxu0 %v13889_v53  ;;  %v13947_v52 = vcombine.high %v1885_v47, %v1889_v48  ;;  %v1892_v53 = vld [vmem:[#allocation14 + $0x790] sm:$0xff] }
 0x551   : > { %3527 = vmatprep.subr.bf16.mxu1 %v13891_v55  ;;  %v1896_v55 = vld [vmem:[#allocation14 + $0x7b0] sm:$0xff] }
 0x552   : > { %v13952_v4 = vcombine.low %v1892_v53, %v1896_v55 }
 0x553   : > { %3446 = vmatpush1.bf16.msra.mxu0 %v13888_v60  ;;  %v13953_v60 = vcombine.high %v1892_v53, %v1896_v55 }
 0x554   : > { %3528 = vmatpush1.bf16.msra.mxu1 %v13890_v61  ;;  %3447 = vmatprep.subr.bf16.mxu0 %v13897_v62  ;;  %v13955_v61 = vcombine.high %v1893_v56, %v1897_v57  ;;  %v1900_v62 = vld [vmem:[#allocation14 + $0x7d0] sm:$0xff] }
 0x555   : > { %3529 = vmatprep.subr.bf16.mxu1 %v13899_v63  ;;  %v1904_v63 = vld [vmem:[#allocation14 + $0x7f0] sm:$0xff] }
 0x557   : > { %3448 = vmatpush1.bf16.msra.mxu0 %v13896_v6  ;;  %v13961_v6 = vcombine.high %v1900_v62, %v1904_v63 }
 0x558   : > { %3530 = vmatpush1.bf16.msra.mxu1 %v13898_v7  ;;  %3449 = vmatprep.subr.bf16.mxu0 %v13905_v10  ;;  %v13963_v7 = vcombine.high %v1901_v0, %v1905_v1  ;;  %v13960_v10 = vcombine.low %v1900_v62, %v1904_v63 }
 0x559   : > { %3531 = vmatprep.subr.bf16.mxu1 %v13907_v11  ;;  %v13962_v11 = vcombine.low %v1901_v0, %v1905_v1 }
 0x55b   : > { %3450 = vmatpush1.bf16.msra.mxu0 %v13904_v27  ;;  %v3591_v27 = vunpack.c.l.s4 %v16699_v15 }
 0x55c   : > { %3532 = vmatpush1.bf16.msra.mxu1 %v13906_v16  ;;  %3451 = vmatprep.subr.bf16.mxu0 %v13913_v17  ;;  %v1915_v16 = vrot.slane %v1906_v12, %v17384_v45  ;;  %v1923_v17 = vrot.slane %v1906_v12, %v1226_v3 }
 0x55d   : > { %3533 = vmatprep.subr.bf16.mxu1 %v13915_v18 }
 0x55f   : > { %3452 = vmatpush1.bf16.msra.mxu0 %v13912_v23  ;;  %v3592_v23 = vunpack.c.0.s8 %v3591_v27 }
 0x560   : > { %3534 = vmatpush1.bf16.msra.mxu1 %v13914_v24  ;;  %3453 = vmatprep.subr.bf16.mxu0 %v13921_v25 }
 0x561   : > { %3535 = vmatprep.subr.bf16.mxu1 %v13923_v29  ;;  %v3595_v31 = vsub.s32 %v3592_v23, %v17378_v42 }
 0x563   : > { %3454 = vmatpush1.bf16.msra.mxu0 %v13920_v32 }
 0x564   : > { %3536 = vmatpush1.bf16.msra.mxu1 %v13922_v2  ;;  %3455 = vmatprep.subr.bf16.mxu0 %v13929_v36 }
 0x565   : > { %3537 = vmatprep.subr.bf16.mxu1 %v13931_v33 }
 0x567   : > { %3456 = vmatpush1.bf16.msra.mxu0 %v13928_v39 }
 0x568   : > { %3538 = vmatpush1.bf16.msra.mxu1 %v13930_v40  ;;  %3457 = vmatprep.subr.bf16.mxu0 %v13937_v41  ;;  %v1926_v40 = vsub.s32 4, %v17378_v42  ;;  %v1934_v41 = vsub.s32 6, %v17378_v42 }
 0x569   : > { %3539 = vmatprep.subr.bf16.mxu1 %v13939_v8  ;;  %v1930_v8 = vsub.s32 5, %v17378_v42 }
 0x56a   : > { %v1927_v46 = vrot.slane %v1906_v12, %v1926_v40  ;;  %v1935_v47 = vrot.slane %v1906_v12, %v1934_v41 }
 0x56b   : > { %3458 = vmatpush1.bf16.msra.mxu0 %v13936_v49  ;;  %v1931_v48 = vrot.slane %v1906_v12, %v1930_v8  ;;  %v1939_v49 = vrot.slane %v1906_v12, %v1938_v44 }
 0x56c   : > { %3540 = vmatpush1.bf16.msra.mxu1 %v13938_v50  ;;  %3459 = vmatprep.subr.bf16.mxu0 %v13945_v51 }
 0x56d   : > { %3541 = vmatprep.subr.bf16.mxu1 %v13947_v52 }
 0x56f   : > { %3460 = vmatpush1.bf16.msra.mxu0 %v13944_v58 }
 0x570   : > { %3542 = vmatpush1.bf16.msra.mxu1 %v13946_v59  ;;  %3461 = vmatprep.subr.bf16.mxu0 %v13953_v60 }
 0x571   : > { %3543 = vmatprep.subr.bf16.mxu1 %v13955_v61 }
 0x573   : > { %3462 = vmatpush1.bf16.msra.mxu0 %v13952_v4 }
 0x574   : > { %3544 = vmatpush1.bf16.msra.mxu1 %v13954_v5  ;;  %3463 = vmatprep.subr.bf16.mxu0 %v13961_v6 }
 0x575   : > { %3545 = vmatprep.subr.bf16.mxu1 %v13963_v7 }
 0x577   : > { %3464 = vmatpush1.bf16.msra.mxu0 %v13960_v10 }
 0x578   : > { %3546 = vmatpush1.bf16.msra.mxu1 %v13962_v11 }
 0x57a   : > { %3466 = vmatmul.mubr.bf16.vlgmr.msra.gmra.mrb[12].mxu0 %v17417_v54 }
 0x57b   : > { %3548 = vmatmul.mubr.bf16.vlgmr.msra.gmra.mrb[12].mxu1 %v17417_v54 }
 0x5cd   : > { %v3303_v18 = vpop.f32.mrb[8].mxu0  ;;  %v3385_v19 = vpop.f32.mrb[8].mxu1 }
 0x5ce   : > { %v15271_v20 = vadd.f32 %v3303_v18, %v1911_v13  ;;  %v15273_v21 = vadd.f32 %v3385_v19, %v1919_v14  ;;  %v3305_v22 = vpop.f32.mrb[9].mxu0  ;;  %v3387_v54 = vpop.f32.mrb[9].mxu1 }
 0x5cf   : > { %v15272_v24 = vadd.f32 %v3305_v22, %v1915_v16  ;;  %v15274_v25 = vadd.f32 %v3387_v54, %v1923_v17  ;;  %v3307_v43 = vpop.f32.mrb[10].mxu0  ;;  %v3389_v29 = vpop.f32.mrb[10].mxu1 }
 0x5d0   : > { %vm3556_vm9 = vcmp.ge.f32.partialorder %v15271_v20, 0.0  ;;  %v3564_v9 = vmul.f32 0.2, %v15271_v20  ;;  %vm3558_vm10 = vcmp.ge.f32.partialorder %v15273_v21, 0.0  ;;  %v3566_v26 = vmul.f32 0.2, %v15273_v21 }
 0x5d1   : > { %vm3557_vm11 = vcmp.ge.f32.partialorder %v15272_v24, 0.0  ;;  %v3565_v45 = vmul.f32 0.2, %v15272_v24  ;;  %vm3559_vm12 = vcmp.ge.f32.partialorder %v15274_v25, 0.0  ;;  %v3567_v28 = vmul.f32 0.2, %v15274_v25 }
 0x5d2   : > { %v3572_v3 = vsel %vm3556_vm9, %v15271_v20, %v3564_v9  ;;  %v3574_v30 = vsel %vm3558_vm10, %v15273_v21, %v3566_v26  ;;  %v3308_v32 = vpop.f32.mrb[11].mxu0  ;;  %v3390_v2 = vpop.f32.mrb[11].mxu1 }
 0x5d3   : > { %v3573_v36 = vsel %vm3557_vm11, %v15272_v24, %v3565_v45  ;;  %v3575_v33 = vsel %vm3559_vm12, %v15274_v25, %v3567_v28 }
 0x5d4   : > { %v3588_v34 = vcombine.low %v3572_v3, %v3573_v36  ;;  %v3589_v35 = vcombine.low %v3574_v30, %v3575_v33 }
 0x5d6   : > { %v3596_v37 = vrot.slane %v3588_v34, %v3595_v31  ;;  %v3603_v38 = vrot.slane %v3589_v35, %v3595_v31 }
 0x5d8   : > { %v3604_v39 = vcombine.low %v3596_v37, %v3603_v38 }
 0x5da   : > { %3624 = vst [vmem:[#allocation2] sm:$0xff] %v3604_v39 }
 0x64d   : > { %v3467_v50 = vpop.f32.mrb[12].mxu0 }
 0x64e   : > { %v15275_v51 = vadd.f32 %v3467_v50, %v1927_v46  ;;  %v3549_v52 = vpop.f32.mrb[12].mxu1  ;;  %v3469_v53 = vpop.f32.mrb[13].mxu0 }
 0x64f   : > { %v15277_v55 = vadd.f32 %v3549_v52, %v1935_v47  ;;  %v15276_v56 = vadd.f32 %v3469_v53, %v1931_v48  ;;  %v3551_v57 = vpop.f32.mrb[13].mxu1  ;;  %v3471_v58 = vpop.f32.mrb[14].mxu0 }
 0x650   : > { %vm3560_vm13 = vcmp.ge.f32.partialorder %v15275_v51, 0.0  ;;  %v3568_v59 = vmul.f32 0.2, %v15275_v51  ;;  %v15278_v60 = vadd.f32 %v3551_v57, %v1939_v49  ;;  %v3553_v61 = vpop.f32.mrb[14].mxu1  ;;  %v3472_v62 = vpop.f32.mrb[15].mxu0 }
 0x651   : > { %vm3562_vm14 = vcmp.ge.f32.partialorder %v15277_v55, 0.0  ;;  %v3570_v63 = vmul.f32 0.2, %v15277_v55  ;;  %vm3561_vm15 = vcmp.ge.f32.partialorder %v15276_v56, 0.0  ;;  %v3569_v42 = vmul.f32 0.2, %v15276_v56 }
 0x652   : > { %v3576_v0 = vsel %vm3560_vm13, %v15275_v51, %v3568_v59  ;;  %vm3563_vm0 = vcmp.ge.f32.partialorder %v15278_v60, 0.0  ;;  %v3571_v1 = vmul.f32 0.2, %v15278_v60  ;;  %v3554_v4 = vpop.f32.mrb[15].mxu1 }
 0x653   : > { %v3578_v5 = vsel %vm3562_vm14, %v15277_v55, %v3570_v63  ;;  %v3577_v6 = vsel %vm3561_vm15, %v15276_v56, %v3569_v42 }
 0x654   : > { %v3605_v7 = vcombine.low %v3576_v0, %v3577_v6  ;;  %v3579_v10 = vsel %vm3563_vm0, %v15278_v60, %v3571_v1 }
 0x655   : > { %v3606_v11 = vcombine.low %v3578_v5, %v3579_v10 }
 0x656   : > { %v3613_v12 = vrot.slane %v3605_v7, %v3595_v31 }
 0x657   : > { %v3620_v13 = vrot.slane %v3606_v11, %v3595_v31 }
 0x659   : > { %v3621_v14 = vcombine.low %v3613_v12, %v3620_v13 }
 0x65b   : > { %3625 = vst [vmem:[#allocation2 + $0x8] sm:$0xff] %v3621_v14 }
 0x65c PF: > { %p13964_p0 = scmp.ge.s32.totalorder %s16818_s27, 6 }
 0x65d   : > { %v3684_v15 = vld [vmem:[%s17344_s10] sm:$0xff] (!%p13964_p0)  ;;  %v3685_v16 = vld [vmem:[%s17344_s10 + $0x8] sm:$0xff] (!%p13964_p0)  ;;  %v16700_v41 = vmov (!%p13964_p0), 1983009808   ;;  %v3638_v44 = vlaneseq (!%p13964_p0) }
 0x65e   : > { %3629 = sbr.rel (%p13964_p0) target bundleno = 2914 (0xb62), region = 148  ;;  %v3688_v27 = vld [vmem:[%s17344_s10 + $0x20] sm:$0xff] (!%p13964_p0)  ;;  %v3689_v18 = vld [vmem:[%s17344_s10 + $0x28] sm:$0xff] (!%p13964_p0)  ;;  %v3636_v8 = vunpack.c.l.s4 (!%p13964_p0), %v16700_v41 }
 0x65f   : > { %v13966_v17 = vcombine.high (!%p13964_p0), %v3684_v15, %v3688_v27  ;;  %v13965_v19 = vcombine.low (!%p13964_p0), %v3684_v15, %v3688_v27  ;;  %v3692_v20 = vld [vmem:[%s17344_s10 + $0x40] sm:$0xff] (!%p13964_p0)  ;;  %v13968_v22 = vcombine.high (!%p13964_p0), %v3685_v16, %v3689_v18  ;;  %v13967_v23 = vcombine.low (!%p13964_p0), %v3685_v16, %v3689_v18  ;;  %v3693_v24 = vld [vmem:[%s17344_s10 + $0x48] sm:$0xff] (!%p13964_p0) }
 0x660   : > { %v3696_v21 = vld [vmem:[%s17344_s10 + $0x60] sm:$0xff] (!%p13964_p0)  ;;  %v3697_v25 = vld [vmem:[%s17344_s10 + $0x68] sm:$0xff] (!%p13964_p0)  ;;  %v3637_v55 = vunpack.c.0.s8 (!%p13964_p0), %v3636_v8  ;;  %v17463_v56 = vshrl.u32 (!%p13964_p0), %v3638_v44, 7 }
 0x661   : > { %v13974_v54 = vcombine.high (!%p13964_p0), %v3692_v20, %v3696_v21  ;;  %v3700_v43 = vld [vmem:[%s17344_s10 + $0x80] sm:$0xff] (!%p13964_p0)  ;;  %6798 = vmatprep.subr.bf16.mxu0 (!%p13964_p0), %v13966_v17  ;;  %v13976_v29 = vcombine.high (!%p13964_p0), %v3693_v24, %v3697_v25  ;;  %v3701_v26 = vld [vmem:[%s17344_s10 + $0x88] sm:$0xff] (!%p13964_p0)  ;;  %6962 = vmatprep.subr.bf16.mxu1 (!%p13964_p0), %v13968_v22  ;;  %v13973_v28 = vcombine.low (!%p13964_p0), %v3692_v20, %v3696_v21 }
 0x662   : > { %v3704_v9 = vld [vmem:[%s17344_s10 + $0xa0] sm:$0xff] (!%p13964_p0)  ;;  %v3705_v45 = vld [vmem:[%s17344_s10 + $0xa8] sm:$0xff] (!%p13964_p0)  ;;  %6799 = vmatpush1.bf16.msra.mxu0 (!%p13964_p0), %v13965_v19  ;;  %6963 = vmatpush1.bf16.msra.mxu1 (!%p13964_p0), %v13967_v23  ;;  %v13975_v3 = vcombine.low (!%p13964_p0), %v3693_v24, %v3697_v25  ;;  %v17470_v0 = vsub.s32 (!%p13964_p0), %v3637_v55, %v17463_v56 }
 0x663   : > { %6800 = vmatprep.subr.bf16.mxu0 (!%p13964_p0), %v13974_v54  ;;  %v13982_v30 = vcombine.high (!%p13964_p0), %v3700_v43, %v3704_v9  ;;  %6964 = vmatprep.subr.bf16.mxu1 (!%p13964_p0), %v13976_v29  ;;  %v13984_v31 = vcombine.high (!%p13964_p0), %v3701_v26, %v3705_v45  ;;  %v3708_v32 = vld [vmem:[%s17344_s10 + $0xc0] sm:$0xff] (!%p13964_p0)  ;;  %v3709_v36 = vld [vmem:[%s17344_s10 + $0xc8] sm:$0xff] (!%p13964_p0)  ;;  %v13981_v34 = vcombine.low (!%p13964_p0), %v3700_v43, %v3704_v9 }
 0x664   : > { %v3712_v2 = vld [vmem:[%s17344_s10 + $0xe0] sm:$0xff] (!%p13964_p0)  ;;  %v3713_v33 = vld [vmem:[%s17344_s10 + $0xe8] sm:$0xff] (!%p13964_p0)  ;;  %v13983_v35 = vcombine.low (!%p13964_p0), %v3701_v26, %v3705_v45 }
 0x665   : > { %v13990_v37 = vcombine.high %v3708_v32, %v3712_v2  ;;  %v13992_v38 = vcombine.high %v3709_v36, %v3713_v33  ;;  %v3716_v39 = vld [vmem:[%s17344_s10 + $0x100] sm:$0xff]  ;;  %v3717_v46 = vld [vmem:[%s17344_s10 + $0x108] sm:$0xff]  ;;  %v13989_v48 = vcombine.low %v3708_v32, %v3712_v2  ;;  %v13991_v49 = vcombine.low %v3709_v36, %v3713_v33 }
 0x666   : > { %6801 = vmatpush1.bf16.msra.mxu0 %v13973_v28  ;;  %6965 = vmatpush1.bf16.msra.mxu1 %v13975_v3  ;;  %v3720_v40 = vld [vmem:[%s17344_s10 + $0x120] sm:$0xff]  ;;  %v3721_v47 = vld [vmem:[%s17344_s10 + $0x128] sm:$0xff] }
 0x667   : > { %6802 = vmatprep.subr.bf16.mxu0 %v13982_v30  ;;  %6966 = vmatprep.subr.bf16.mxu1 %v13984_v31  ;;  %v13998_v50 = vcombine.high %v3716_v39, %v3720_v40  ;;  %v14000_v51 = vcombine.high %v3717_v46, %v3721_v47  ;;  %v3724_v52 = vld [vmem:[%s17344_s10 + $0x140] sm:$0xff]  ;;  %v3725_v57 = vld [vmem:[%s17344_s10 + $0x148] sm:$0xff]  ;;  %v13997_v59 = vcombine.low %v3716_v39, %v3720_v40 }
 0x668   : > { %v3728_v53 = vld [vmem:[%s17344_s10 + $0x160] sm:$0xff]  ;;  %v3729_v58 = vld [vmem:[%s17344_s10 + $0x168] sm:$0xff]  ;;  %v13999_v60 = vcombine.low %v3717_v46, %v3721_v47 }
 0x669   : > { %v14006_v61 = vcombine.high %v3724_v52, %v3728_v53  ;;  %v14008_v62 = vcombine.high %v3725_v57, %v3729_v58  ;;  %v3732_v63 = vld [vmem:[%s17344_s10 + $0x180] sm:$0xff]  ;;  %v3733_v1 = vld [vmem:[%s17344_s10 + $0x188] sm:$0xff]  ;;  %v14005_v5 = vcombine.low %v3724_v52, %v3728_v53  ;;  %v14007_v6 = vcombine.low %v3725_v57, %v3729_v58 }
 0x66a   : > { %6803 = vmatpush1.bf16.msra.mxu0 %v13981_v34  ;;  %6967 = vmatpush1.bf16.msra.mxu1 %v13983_v35  ;;  %v3736_v42 = vld [vmem:[%s17344_s10 + $0x1a0] sm:$0xff]  ;;  %v3737_v4 = vld [vmem:[%s17344_s10 + $0x1a8] sm:$0xff] }
 0x66b   : > { %6804 = vmatprep.subr.bf16.mxu0 %v13990_v37  ;;  %6968 = vmatprep.subr.bf16.mxu1 %v13992_v38  ;;  %v14014_v7 = vcombine.high %v3732_v63, %v3736_v42  ;;  %v17474_v10 = vld [vmem:[#allocation2] sm:$0xff]  ;;  %v14016_v11 = vcombine.high %v3733_v1, %v3737_v4  ;;  %v3741_v15 = vld [vmem:[%s17344_s10 + $0x1c8] sm:$0xff]  ;;  %v14013_v16 = vcombine.low %v3732_v63, %v3736_v42 }
 0x66c   : > { %v3740_v12 = vld [vmem:[%s17344_s10 + $0x1c0] sm:$0xff]  ;;  %v17480_v14 = vrot.slane %v17474_v10, %v17470_v0  ;;  %v3745_v27 = vld [vmem:[%s17344_s10 + $0x1e8] sm:$0xff]  ;;  %v14015_v18 = vcombine.low %v3733_v1, %v3737_v4 }
 0x66d   : > { %v3744_v13 = vld [vmem:[%s17344_s10 + $0x1e0] sm:$0xff]  ;;  %v14024_v20 = vcombine.high %v3741_v15, %v3745_v27  ;;  %v3749_v54 = vld [vmem:[%s17344_s10 + $0x208] sm:$0xff]  ;;  %v14023_v43 = vcombine.low %v3741_v15, %v3745_v27 }
 0x66e   : > { %6805 = vmatpush1.bf16.msra.mxu0 %v13989_v48  ;;  %6969 = vmatpush1.bf16.msra.mxu1 %v13991_v49  ;;  %v3649_v17 = vcombine.high %v17480_v14, %v17480_v14  ;;  %v14022_v19 = vcombine.high %v3740_v12, %v3744_v13  ;;  %v3748_v21 = vld [vmem:[%s17344_s10 + $0x200] sm:$0xff]  ;;  %v3753_v24 = vld [vmem:[%s17344_s10 + $0x228] sm:$0xff]  ;;  %v14021_v25 = vcombine.low %v3740_v12, %v3744_v13 }
 0x66f   : > { %6806 = vmatprep.subr.bf16.mxu0 %v13998_v50  ;;  %6970 = vmatprep.subr.bf16.mxu1 %v14000_v51  ;;  %v3752_v22 = vld [vmem:[%s17344_s10 + $0x220] sm:$0xff]  ;;  %v14032_v9 = vcombine.high %v3749_v54, %v3753_v24  ;;  %v3757_v28 = vld [vmem:[%s17344_s10 + $0x248] sm:$0xff]  ;;  %v14031_v31 = vcombine.low %v3749_v54, %v3753_v24 }
 0x670   : > { %v17488_v23 = vpack.c.bf16 %v3649_v17, %v3649_v17  ;;  %v14030_v29 = vcombine.high %v3748_v21, %v3752_v22  ;;  %v3756_v26 = vld [vmem:[%s17344_s10 + $0x240] sm:$0xff]  ;;  %v3761_v3 = vld [vmem:[%s17344_s10 + $0x268] sm:$0xff]  ;;  %v14029_v30 = vcombine.low %v3748_v21, %v3752_v22 }
 0x671   : > { %v3760_v45 = vld [vmem:[%s17344_s10 + $0x260] sm:$0xff]  ;;  %v14040_v2 = vcombine.high %v3757_v28, %v3761_v3  ;;  %v3765_v34 = vld [vmem:[%s17344_s10 + $0x288] sm:$0xff]  ;;  %v14039_v38 = vcombine.low %v3757_v28, %v3761_v3 }
 0x672   : > { %6807 = vmatpush1.bf16.msra.mxu0 %v13997_v59  ;;  %6971 = vmatpush1.bf16.msra.mxu1 %v13999_v60  ;;  %v14038_v32 = vcombine.high %v3756_v26, %v3760_v45  ;;  %v3764_v36 = vld [vmem:[%s17344_s10 + $0x280] sm:$0xff]  ;;  %v3769_v35 = vld [vmem:[%s17344_s10 + $0x2a8] sm:$0xff]  ;;  %v14037_v37 = vcombine.low %v3756_v26, %v3760_v45 }
 0x673   : > { %6808 = vmatprep.subr.bf16.mxu0 %v14006_v61  ;;  %6972 = vmatprep.subr.bf16.mxu1 %v14008_v62  ;;  %v3768_v33 = vld [vmem:[%s17344_s10 + $0x2a0] sm:$0xff]  ;;  %v14048_v40 = vcombine.high %v3765_v34, %v3769_v35  ;;  %v3773_v44 = vld [vmem:[%s17344_s10 + $0x2c8] sm:$0xff]  ;;  %v14047_v48 = vcombine.low %v3765_v34, %v3769_v35 }
 0x674   : > { %6830 = vmatprep.mubr.bf16.mxu0 %v17488_v23  ;;  %6994 = vmatprep.mubr.bf16.mxu1 %v17488_v23  ;;  %v14046_v39 = vcombine.high %v3764_v36, %v3768_v33  ;;  %v3772_v41 = vld [vmem:[%s17344_s10 + $0x2c0] sm:$0xff]  ;;  %v3777_v46 = vld [vmem:[%s17344_s10 + $0x2e8] sm:$0xff]  ;;  %v14045_v47 = vcombine.low %v3764_v36, %v3768_v33  ;;  %v17537_v33 = vpack.c.bf16 %v17480_v14, %v17480_v14 }
 0x675   : > { %v3776_v8 = vld [vmem:[%s17344_s10 + $0x2e0] sm:$0xff]  ;;  %v14056_v50 = vcombine.high %v3773_v44, %v3777_v46  ;;  %v3781_v53 = vld [vmem:[%s17344_s10 + $0x308] sm:$0xff]  ;;  %v14055_v58 = vcombine.low %v3773_v44, %v3777_v46 }
 0x676   : > { %6809 = vmatpush1.bf16.msra.mxu0 %v14005_v5  ;;  %6973 = vmatpush1.bf16.msra.mxu1 %v14007_v6  ;;  %v14054_v49 = vcombine.high %v3772_v41, %v3776_v8  ;;  %v3780_v51 = vld [vmem:[%s17344_s10 + $0x300] sm:$0xff]  ;;  %v3785_v55 = vld [vmem:[%s17344_s10 + $0x328] sm:$0xff]  ;;  %v14053_v57 = vcombine.low %v3772_v41, %v3776_v8 }
 0x677   : > { %6810 = vmatprep.subr.bf16.mxu0 %v14014_v7  ;;  %6974 = vmatprep.subr.bf16.mxu1 %v14016_v11  ;;  %v3784_v52 = vld [vmem:[%s17344_s10 + $0x320] sm:$0xff]  ;;  %v14064_v60 = vcombine.high %v3781_v53, %v3785_v55  ;;  %v3789_v63 = vld [vmem:[%s17344_s10 + $0x348] sm:$0xff]  ;;  %v14063_v4 = vcombine.low %v3781_v53, %v3785_v55 }
 0x678   : > { %v14062_v59 = vcombine.high %v3780_v51, %v3784_v52  ;;  %v3788_v61 = vld [vmem:[%s17344_s10 + $0x340] sm:$0xff]  ;;  %v3793_v42 = vld [vmem:[%s17344_s10 + $0x368] sm:$0xff]  ;;  %v14061_v1 = vcombine.low %v3780_v51, %v3784_v52 }
 0x679   : > { %v3792_v62 = vld [vmem:[%s17344_s10 + $0x360] sm:$0xff]  ;;  %v14072_v6 = vcombine.high %v3789_v63, %v3793_v42  ;;  %v3797_v12 = vld [vmem:[%s17344_s10 + $0x388] sm:$0xff]  ;;  %v14071_v27 = vcombine.low %v3789_v63, %v3793_v42 }
 0x67a   : > { %6811 = vmatpush1.bf16.msra.mxu0 %v14013_v16  ;;  %6975 = vmatpush1.bf16.msra.mxu1 %v14015_v18  ;;  %v14070_v5 = vcombine.high %v3788_v61, %v3792_v62  ;;  %v3796_v7 = vld [vmem:[%s17344_s10 + $0x380] sm:$0xff]  ;;  %v3801_v13 = vld [vmem:[%s17344_s10 + $0x3a8] sm:$0xff]  ;;  %v14069_v15 = vcombine.low %v3788_v61, %v3792_v62 }
 0x67b   : > { %6812 = vmatprep.subr.bf16.mxu0 %v14022_v19  ;;  %6976 = vmatprep.subr.bf16.mxu1 %v14024_v20  ;;  %v3800_v11 = vld [vmem:[%s17344_s10 + $0x3a0] sm:$0xff]  ;;  %v14080_v17 = vcombine.high %v3797_v12, %v3801_v13  ;;  %v3634_v20 = vcombine.high %v17474_v10, %v17474_v10  ;;  %v3805_v21 = vld [vmem:[%s17344_s10 + $0x3c8] sm:$0xff]  ;;  %v14079_v24 = vcombine.low %v3797_v12, %v3801_v13 }
 0x67c   : > { %v14078_v16 = vcombine.high %v3796_v7, %v3800_v11  ;;  %v3804_v18 = vld [vmem:[%s17344_s10 + $0x3c0] sm:$0xff]  ;;  %v3809_v22 = vld [vmem:[%s17344_s10 + $0x3e8] sm:$0xff]  ;;  %v14077_v54 = vcombine.low %v3796_v7, %v3800_v11 }
 0x67d   : > { %v3808_v19 = vld [vmem:[%s17344_s10 + $0x3e0] sm:$0xff]  ;;  %v17527_v26 = vrot.slane %v3634_v20, %v17470_v0  ;;  %v3813_v10 = vld [vmem:[%s17344_s10 + $0x408] sm:$0xff]  ;;  %v14087_v3 = vcombine.low %v3805_v21, %v3809_v22 }
 0x67e   : > { %6813 = vmatpush1.bf16.msra.mxu0 %v14021_v25  ;;  %6977 = vmatpush1.bf16.msra.mxu1 %v14023_v43  ;;  %v14086_v25 = vcombine.high %v3804_v18, %v3808_v19  ;;  %v14088_v43 = vcombine.high %v3805_v21, %v3809_v22  ;;  %v3817_v45 = vld [vmem:[%s17344_s10 + $0x428] sm:$0xff]  ;;  %v14085_v28 = vcombine.low %v3804_v18, %v3808_v19  ;;  %v3828_v41 = vld [vmem:[%s17344_s10 + $0x480] sm:$0xff] }
 0x67f   : > { %6814 = vmatprep.subr.bf16.mxu0 %v14030_v29  ;;  %6978 = vmatprep.subr.bf16.mxu1 %v14032_v9  ;;  %v3812_v29 = vld [vmem:[%s17344_s10 + $0x400] sm:$0xff]  ;;  %v3650_v36 = vcombine.high %v17527_v26, %v17527_v26  ;;  %v3821_v34 = vld [vmem:[%s17344_s10 + $0x448] sm:$0xff] }
 0x680   : > { %v3816_v9 = vld [vmem:[%s17344_s10 + $0x420] sm:$0xff]  ;;  %v3825_v35 = vld [vmem:[%s17344_s10 + $0x468] sm:$0xff] }
 0x681   : > { %v3832_v8 = vld [vmem:[%s17344_s10 + $0x4a0] sm:$0xff]  ;;  %v17543_v44 = vpack.c.bf16 %v3650_v36, %v3650_v36  ;;  %v3829_v14 = vld [vmem:[%s17344_s10 + $0x488] sm:$0xff] }
 0x682   : > { %6815 = vmatpush1.bf16.msra.mxu0 %v14029_v30  ;;  %6979 = vmatpush1.bf16.msra.mxu1 %v14031_v31  ;;  %v14094_v30 = vcombine.high %v3812_v29, %v3816_v9  ;;  %v14096_v31 = vcombine.high %v3813_v10, %v3817_v45  ;;  %v3833_v46 = vld [vmem:[%s17344_s10 + $0x4a8] sm:$0xff]  ;;  %v3836_v51 = vld [vmem:[%s17344_s10 + $0x4c0] sm:$0xff] }
 0x683   : > { %6816 = vmatprep.subr.bf16.mxu0 %v14038_v32  ;;  %6980 = vmatprep.subr.bf16.mxu1 %v14040_v2  ;;  %v3820_v32 = vld [vmem:[%s17344_s10 + $0x440] sm:$0xff]  ;;  %v3837_v53 = vld [vmem:[%s17344_s10 + $0x4c8] sm:$0xff] }
 0x684   : > { %v3824_v2 = vld [vmem:[%s17344_s10 + $0x460] sm:$0xff]  ;;  %v3841_v55 = vld [vmem:[%s17344_s10 + $0x4e8] sm:$0xff] }
 0x685   : > { %v3840_v52 = vld [vmem:[%s17344_s10 + $0x4e0] sm:$0xff]  ;;  %v3845_v63 = vld [vmem:[%s17344_s10 + $0x508] sm:$0xff] }
 0x686   : > { %6817 = vmatpush1.bf16.msra.mxu0 %v14037_v37  ;;  %6981 = vmatpush1.bf16.msra.mxu1 %v14039_v38  ;;  %v14093_v37 = vcombine.low %v3812_v29, %v3816_v9  ;;  %v14095_v38 = vcombine.low %v3813_v10, %v3817_v45  ;;  %v3844_v61 = vld [vmem:[%s17344_s10 + $0x500] sm:$0xff]  ;;  %v3849_v42 = vld [vmem:[%s17344_s10 + $0x528] sm:$0xff] }
 0x687   : > { %6818 = vmatprep.subr.bf16.mxu0 %v14046_v39  ;;  %6982 = vmatprep.subr.bf16.mxu1 %v14048_v40  ;;  %v14102_v39 = vcombine.high %v3820_v32, %v3824_v2  ;;  %v14104_v40 = vcombine.high %v3821_v34, %v3825_v35  ;;  %v3848_v62 = vld [vmem:[%s17344_s10 + $0x520] sm:$0xff]  ;;  %v3853_v12 = vld [vmem:[%s17344_s10 + $0x548] sm:$0xff] }
 0x688   : > { %v3852_v7 = vld [vmem:[%s17344_s10 + $0x540] sm:$0xff]  ;;  %v3857_v13 = vld [vmem:[%s17344_s10 + $0x568] sm:$0xff] }
 0x689   : > { %v3856_v11 = vld [vmem:[%s17344_s10 + $0x560] sm:$0xff]  ;;  %v3861_v20 = vld [vmem:[%s17344_s10 + $0x588] sm:$0xff] }
 0x68a   : > { %6819 = vmatpush1.bf16.msra.mxu0 %v14045_v47  ;;  %6983 = vmatpush1.bf16.msra.mxu1 %v14047_v48  ;;  %v14101_v47 = vcombine.low %v3820_v32, %v3824_v2  ;;  %v14103_v48 = vcombine.low %v3821_v34, %v3825_v35  ;;  %v3860_v18 = vld [vmem:[%s17344_s10 + $0x580] sm:$0xff]  ;;  %v3865_v21 = vld [vmem:[%s17344_s10 + $0x5a8] sm:$0xff]  ;;  %v14133_v22 = vcombine.low %v3852_v7, %v3856_v11 }
 0x68b   : > { %6820 = vmatprep.subr.bf16.mxu0 %v14054_v49  ;;  %6984 = vmatprep.subr.bf16.mxu1 %v14056_v50  ;;  %v14110_v49 = vcombine.high %v3828_v41, %v3832_v8  ;;  %v14112_v50 = vcombine.high %v3829_v14, %v3833_v46  ;;  %v3864_v19 = vld [vmem:[%s17344_s10 + $0x5a0] sm:$0xff]  ;;  %v3869_v9 = vld [vmem:[%s17344_s10 + $0x5c8] sm:$0xff] }
 0x68c   : > { %v3872_v29 = vld [vmem:[%s17344_s10 + $0x5e0] sm:$0xff]  ;;  %v3873_v10 = vld [vmem:[%s17344_s10 + $0x5e8] sm:$0xff]  ;;  %v14141_v45 = vcombine.low %v3860_v18, %v3864_v19 }
 0x68d   : > { %v3880_v32 = vld [vmem:[%s17344_s10 + $0x620] sm:$0xff]  ;;  %v3877_v2 = vld [vmem:[%s17344_s10 + $0x608] sm:$0xff]  ;;  %v14151_v35 = vcombine.low %v3869_v9, %v3873_v10 }
 0x68e   : > { %6821 = vmatpush1.bf16.msra.mxu0 %v14053_v57  ;;  %6985 = vmatpush1.bf16.msra.mxu1 %v14055_v58  ;;  %v14109_v57 = vcombine.low %v3828_v41, %v3832_v8  ;;  %v14111_v58 = vcombine.low %v3829_v14, %v3833_v46  ;;  %v3881_v36 = vld [vmem:[%s17344_s10 + $0x628] sm:$0xff] }
 0x68f   : > { %6822 = vmatprep.subr.bf16.mxu0 %v14062_v59  ;;  %6986 = vmatprep.subr.bf16.mxu1 %v14064_v60  ;;  %v14118_v59 = vcombine.high %v3836_v51, %v3840_v52  ;;  %v14120_v60 = vcombine.high %v3837_v53, %v3841_v55  ;;  %v3885_v41 = vld [vmem:[%s17344_s10 + $0x648] sm:$0xff]  ;;  %v14159_v46 = vcombine.low %v3877_v2, %v3881_v36 }
 0x690   : > { %v3889_v8 = vld [vmem:[%s17344_s10 + $0x668] sm:$0xff] }
 0x692   : > { %6823 = vmatpush1.bf16.msra.mxu0 %v14061_v1  ;;  %6987 = vmatpush1.bf16.msra.mxu1 %v14063_v4  ;;  %v14117_v1 = vcombine.low %v3836_v51, %v3840_v52  ;;  %v14119_v4 = vcombine.low %v3837_v53, %v3841_v55  ;;  %v3893_v51 = vld [vmem:[%s17344_s10 + $0x688] sm:$0xff]  ;;  %v14167_v55 = vcombine.low %v3885_v41, %v3889_v8 }
 0x693   : > { %6824 = vmatprep.subr.bf16.mxu0 %v14070_v5  ;;  %6988 = vmatprep.subr.bf16.mxu1 %v14072_v6  ;;  %v14126_v5 = vcombine.high %v3844_v61, %v3848_v62  ;;  %v14128_v6 = vcombine.high %v3845_v63, %v3849_v42  ;;  %v3897_v52 = vld [vmem:[%s17344_s10 + $0x6a8] sm:$0xff] }
 0x696   : > { %6825 = vmatpush1.bf16.msra.mxu0 %v14069_v15  ;;  %6989 = vmatpush1.bf16.msra.mxu1 %v14071_v27  ;;  %v14125_v15 = vcombine.low %v3844_v61, %v3848_v62  ;;  %v14127_v27 = vcombine.low %v3845_v63, %v3849_v42  ;;  %v3901_v61 = vld [vmem:[%s17344_s10 + $0x6c8] sm:$0xff]  ;;  %v14175_v42 = vcombine.low %v3893_v51, %v3897_v52 }
 0x697   : > { %6826 = vmatprep.subr.bf16.mxu0 %v14078_v16  ;;  %6990 = vmatprep.subr.bf16.mxu1 %v14080_v17  ;;  %v14134_v16 = vcombine.high %v3852_v7, %v3856_v11  ;;  %v14136_v17 = vcombine.high %v3853_v12, %v3857_v13  ;;  %v3905_v62 = vld [vmem:[%s17344_s10 + $0x6e8] sm:$0xff] }
 0x698   : > { %v3909_v7 = vld [vmem:[%s17344_s10 + $0x708] sm:$0xff] }
 0x699   : > { %v3913_v11 = vld [vmem:[%s17344_s10 + $0x728] sm:$0xff] }
 0x69a   : > { %6827 = vmatpush1.bf16.msra.mxu0 %v14077_v54  ;;  %6991 = vmatpush1.bf16.msra.mxu1 %v14079_v24  ;;  %v14135_v54 = vcombine.low %v3853_v12, %v3857_v13  ;;  %v14142_v24 = vcombine.high %v3860_v18, %v3864_v19  ;;  %v14183_v13 = vcombine.low %v3901_v61, %v3905_v62  ;;  %v3917_v18 = vld [vmem:[%s17344_s10 + $0x748] sm:$0xff] }
 0x69b   : > { %6828 = vmatprep.subr.bf16.mxu0 %v14086_v25  ;;  %6992 = vmatprep.subr.bf16.mxu1 %v14088_v43  ;;  %v14144_v25 = vcombine.high %v3861_v20, %v3865_v21  ;;  %v3868_v43 = vld [vmem:[%s17344_s10 + $0x5c0] sm:$0xff]  ;;  %v3921_v19 = vld [vmem:[%s17344_s10 + $0x768] sm:$0xff] }
 0x69c   : > { %v14149_v34 = vcombine.low %v3868_v43, %v3872_v29 }
 0x69e   : > { %6829 = vmatpush1.bf16.msra.mxu0 %v14085_v28  ;;  %6993 = vmatpush1.bf16.msra.mxu1 %v14087_v3  ;;  %v14143_v28 = vcombine.low %v3861_v20, %v3865_v21  ;;  %v14150_v3 = vcombine.high %v3868_v43, %v3872_v29  ;;  %v14191_v21 = vcombine.low %v3909_v7, %v3913_v11  ;;  %v3925_v43 = vld [vmem:[%s17344_s10 + $0x788] sm:$0xff] }
 0x69f   : > { %6839 = vmatprep.subr.bf16.mxu0 %v14094_v30  ;;  %7003 = vmatprep.subr.bf16.mxu1 %v14096_v31  ;;  %v14152_v30 = vcombine.high %v3869_v9, %v3873_v10  ;;  %v3876_v31 = vld [vmem:[%s17344_s10 + $0x600] sm:$0xff]  ;;  %v3929_v29 = vld [vmem:[%s17344_s10 + $0x7a8] sm:$0xff]  ;;  %v14199_v10 = vcombine.low %v3917_v18, %v3921_v19 }
 0x6a0   : > { %v14157_v14 = vcombine.low %v3876_v31, %v3880_v32 }
 0x6a1   : > { %6831 = vmatmul.mubr.bf16.vlgmr.msra.gmra.mrb[0].mxu0 %v17537_v33  ;;  %6995 = vmatmul.mubr.bf16.vlgmr.msra.gmra.mrb[0].mxu1 %v17537_v33 }
 0x6a2   : > { %6840 = vmatpush1.bf16.msra.mxu0 %v14093_v37  ;;  %7004 = vmatpush1.bf16.msra.mxu1 %v14095_v38  ;;  %v14158_v37 = vcombine.high %v3876_v31, %v3880_v32  ;;  %v14160_v38 = vcombine.high %v3877_v2, %v3881_v36  ;;  %v3933_v31 = vld [vmem:[%s17344_s10 + $0x7c8] sm:$0xff] }
 0x6a3   : > { %6841 = vmatprep.subr.bf16.mxu0 %v14102_v39  ;;  %7005 = vmatprep.subr.bf16.mxu1 %v14104_v40  ;;  %v3884_v39 = vld [vmem:[%s17344_s10 + $0x640] sm:$0xff]  ;;  %v3937_v32 = vld [vmem:[%s17344_s10 + $0x7e8] sm:$0xff] }
 0x6a4   : > { %6871 = vmatprep.mubr.bf16.mxu0 %v17543_v44  ;;  %7035 = vmatprep.mubr.bf16.mxu1 %v17543_v44  ;;  %v3888_v40 = vld [vmem:[%s17344_s10 + $0x660] sm:$0xff] }
 0x6a5   : > { %v14165_v53 = vcombine.low %v3884_v39, %v3888_v40  ;;  %v17603_v2 = vld [vmem:[#allocation2 + $0x8] sm:$0xff] }
 0x6a6   : > { %6842 = vmatpush1.bf16.msra.mxu0 %v14101_v47  ;;  %7006 = vmatpush1.bf16.msra.mxu1 %v14103_v48  ;;  %v14166_v47 = vcombine.high %v3884_v39, %v3888_v40  ;;  %v14168_v48 = vcombine.high %v3885_v41, %v3889_v8  ;;  %v3944_v39 = vld [vmem:[%s17344_s10 + $0x820] sm:$0xff]  ;;  %v17609_v40 = vrot.slane %v17603_v2, %v17470_v0  ;;  %v3941_v41 = vld [vmem:[%s17344_s10 + $0x808] sm:$0xff] }
 0x6a7   : > { %6843 = vmatprep.subr.bf16.mxu0 %v14110_v49  ;;  %7007 = vmatprep.subr.bf16.mxu1 %v14112_v50  ;;  %v3892_v49 = vld [vmem:[%s17344_s10 + $0x680] sm:$0xff]  ;;  %v3945_v8 = vld [vmem:[%s17344_s10 + $0x828] sm:$0xff] }
 0x6a8   : > { %v3896_v50 = vld [vmem:[%s17344_s10 + $0x6a0] sm:$0xff] }
 0x6a9   : > { %v14173_v63 = vcombine.low %v3892_v49, %v3896_v50 }
 0x6aa   : > { %6844 = vmatpush1.bf16.msra.mxu0 %v14109_v57  ;;  %7008 = vmatpush1.bf16.msra.mxu1 %v14111_v58  ;;  %v14174_v57 = vcombine.high %v3892_v49, %v3896_v50  ;;  %v14176_v58 = vcombine.high %v3893_v51, %v3897_v52  ;;  %v3948_v49 = vld [vmem:[%s17344_s10 + $0x840] sm:$0xff]  ;;  %v3666_v51 = vcombine.high %v17609_v40, %v17609_v40 }
 0x6ab   : > { %6845 = vmatprep.subr.bf16.mxu0 %v14118_v59  ;;  %7009 = vmatprep.subr.bf16.mxu1 %v14120_v60  ;;  %v3900_v59 = vld [vmem:[%s17344_s10 + $0x6c0] sm:$0xff]  ;;  %v17619_v52 = vpack.c.bf16 %v17527_v26, %v17527_v26  ;;  %v3957_v26 = vld [vmem:[%s17344_s10 + $0x888] sm:$0xff] }
 0x6ac   : > { %v3904_v60 = vld [vmem:[%s17344_s10 + $0x6e0] sm:$0xff] }
 0x6ad   : > { %v14181_v12 = vcombine.low %v3900_v59, %v3904_v60  ;;  %v3952_v50 = vld [vmem:[%s17344_s10 + $0x860] sm:$0xff] }
 0x6ae   : > { %6846 = vmatpush1.bf16.msra.mxu0 %v14117_v1  ;;  %7010 = vmatpush1.bf16.msra.mxu1 %v14119_v4  ;;  %v14182_v1 = vcombine.high %v3900_v59, %v3904_v60  ;;  %v14184_v4 = vcombine.high %v3901_v61, %v3905_v62  ;;  %v14230_v59 = vcombine.high %v3948_v49, %v3952_v50  ;;  %v3956_v61 = vld [vmem:[%s17344_s10 + $0x880] sm:$0xff] }
 0x6af   : > { %6847 = vmatprep.subr.bf16.mxu0 %v14126_v5  ;;  %7011 = vmatprep.subr.bf16.mxu1 %v14128_v6  ;;  %v3908_v5 = vld [vmem:[%s17344_s10 + $0x700] sm:$0xff] }
 0x6b0   : > { %v3912_v6 = vld [vmem:[%s17344_s10 + $0x720] sm:$0xff] }
 0x6b1   : > { %v14189_v20 = vcombine.low %v3908_v5, %v3912_v6  ;;  %v3960_v62 = vld [vmem:[%s17344_s10 + $0x8a0] sm:$0xff] }
 0x6b2   : > { %6848 = vmatpush1.bf16.msra.mxu0 %v14125_v15  ;;  %7012 = vmatpush1.bf16.msra.mxu1 %v14127_v27  ;;  %v14190_v15 = vcombine.high %v3908_v5, %v3912_v6  ;;  %v14192_v27 = vcombine.high %v3909_v7, %v3913_v11  ;;  %v14238_v5 = vcombine.high %v3956_v61, %v3960_v62  ;;  %v3964_v7 = vld [vmem:[%s17344_s10 + $0x8c0] sm:$0xff] }
 0x6b3   : > { %6849 = vmatprep.subr.bf16.mxu0 %v14134_v16  ;;  %7013 = vmatprep.subr.bf16.mxu1 %v14136_v17  ;;  %v3916_v16 = vld [vmem:[%s17344_s10 + $0x740] sm:$0xff] }
 0x6b4   : > { %v3920_v17 = vld [vmem:[%s17344_s10 + $0x760] sm:$0xff] }
 0x6b5   : > { %v14197_v9 = vcombine.low %v3916_v16, %v3920_v17  ;;  %v3968_v11 = vld [vmem:[%s17344_s10 + $0x8e0] sm:$0xff] }
 0x6b6   : > { %6850 = vmatpush1.bf16.msra.mxu0 %v14133_v22  ;;  %7014 = vmatpush1.bf16.msra.mxu1 %v14135_v54  ;;  %v14198_v22 = vcombine.high %v3916_v16, %v3920_v17  ;;  %v14200_v54 = vcombine.high %v3917_v18, %v3921_v19  ;;  %v14246_v16 = vcombine.high %v3964_v7, %v3968_v11  ;;  %v3972_v18 = vld [vmem:[%s17344_s10 + $0x900] sm:$0xff] }
 0x6b7   : > { %6851 = vmatprep.subr.bf16.mxu0 %v14142_v24  ;;  %7015 = vmatprep.subr.bf16.mxu1 %v14144_v25  ;;  %v3924_v24 = vld [vmem:[%s17344_s10 + $0x780] sm:$0xff] }
 0x6b8   : > { %v3928_v25 = vld [vmem:[%s17344_s10 + $0x7a0] sm:$0xff] }
 0x6b9   : > { %v14205_v36 = vcombine.low %v3924_v24, %v3928_v25  ;;  %v3976_v19 = vld [vmem:[%s17344_s10 + $0x920] sm:$0xff] }
 0x6ba   : > { %6852 = vmatpush1.bf16.msra.mxu0 %v14141_v45  ;;  %7016 = vmatpush1.bf16.msra.mxu1 %v14143_v28  ;;  %v14206_v45 = vcombine.high %v3924_v24, %v3928_v25  ;;  %v14208_v28 = vcombine.high %v3925_v43, %v3929_v29  ;;  %v14254_v24 = vcombine.high %v3972_v18, %v3976_v19 }
 0x6bb   : > { %6853 = vmatprep.subr.bf16.mxu0 %v14150_v3  ;;  %7017 = vmatprep.subr.bf16.mxu1 %v14152_v30  ;;  %v3932_v3 = vld [vmem:[%s17344_s10 + $0x7c0] sm:$0xff] }
 0x6bc   : > { %v3936_v30 = vld [vmem:[%s17344_s10 + $0x7e0] sm:$0xff] }
 0x6be   : > { %6854 = vmatpush1.bf16.msra.mxu0 %v14149_v34  ;;  %7018 = vmatpush1.bf16.msra.mxu1 %v14151_v35  ;;  %v14207_v34 = vcombine.low %v3925_v43, %v3929_v29  ;;  %v14214_v35 = vcombine.high %v3932_v3, %v3936_v30  ;;  %v3980_v43 = vld [vmem:[%s17344_s10 + $0x940] sm:$0xff] }
 0x6bf   : > { %6855 = vmatprep.subr.bf16.mxu0 %v14158_v37  ;;  %7019 = vmatprep.subr.bf16.mxu1 %v14160_v38  ;;  %v14216_v37 = vcombine.high %v3933_v31, %v3937_v32  ;;  %v3940_v38 = vld [vmem:[%s17344_s10 + $0x800] sm:$0xff] }
 0x6c0   : > { %v3984_v29 = vld [vmem:[%s17344_s10 + $0x960] sm:$0xff] }
 0x6c2   : > { %6856 = vmatpush1.bf16.msra.mxu0 %v14157_v14  ;;  %7020 = vmatpush1.bf16.msra.mxu1 %v14159_v46  ;;  %v14213_v14 = vcombine.low %v3932_v3, %v3936_v30  ;;  %v14215_v46 = vcombine.low %v3933_v31, %v3937_v32  ;;  %v14262_v3 = vcombine.high %v3980_v43, %v3984_v29  ;;  %v3988_v31 = vld [vmem:[%s17344_s10 + $0x980] sm:$0xff] }
 0x6c3   : > { %6857 = vmatprep.subr.bf16.mxu0 %v14166_v47  ;;  %7021 = vmatprep.subr.bf16.mxu1 %v14168_v48  ;;  %v14222_v47 = vcombine.high %v3940_v38, %v3944_v39  ;;  %v14224_v48 = vcombine.high %v3941_v41, %v3945_v8  ;;  %v3992_v32 = vld [vmem:[%s17344_s10 + $0x9a0] sm:$0xff] }
 0x6c6   : > { %6858 = vmatpush1.bf16.msra.mxu0 %v14165_v53  ;;  %7022 = vmatpush1.bf16.msra.mxu1 %v14167_v55  ;;  %v3949_v53 = vld [vmem:[%s17344_s10 + $0x848] sm:$0xff] }
 0x6c7   : > { %6859 = vmatprep.subr.bf16.mxu0 %v14174_v57  ;;  %7023 = vmatprep.subr.bf16.mxu1 %v14176_v58  ;;  %v3953_v55 = vld [vmem:[%s17344_s10 + $0x868] sm:$0xff]  ;;  %v14221_v57 = vcombine.low %v3940_v38, %v3944_v39  ;;  %v14223_v58 = vcombine.low %v3941_v41, %v3945_v8  ;;  %v14270_v38 = vcombine.high %v3988_v31, %v3992_v32  ;;  %v3996_v41 = vld [vmem:[%s17344_s10 + $0x9c0] sm:$0xff] }
 0x6c8   : > { %v14232_v60 = vcombine.high %v3949_v53, %v3953_v55  ;;  %v4000_v8 = vld [vmem:[%s17344_s10 + $0x9e0] sm:$0xff] }
 0x6ca   : > { %6860 = vmatpush1.bf16.msra.mxu0 %v14173_v63  ;;  %7024 = vmatpush1.bf16.msra.mxu1 %v14175_v42  ;;  %v17625_v63 = vpack.c.bf16 %v3666_v51, %v3666_v51  ;;  %v3961_v42 = vld [vmem:[%s17344_s10 + $0x8a8] sm:$0xff]  ;;  %v4004_v51 = vld [vmem:[%s17344_s10 + $0xa00] sm:$0xff] }
 0x6cb   : > { %6861 = vmatprep.subr.bf16.mxu0 %v14182_v1  ;;  %7025 = vmatprep.subr.bf16.mxu1 %v14184_v4  ;;  %v14229_v1 = vcombine.low %v3948_v49, %v3952_v50  ;;  %v14231_v4 = vcombine.low %v3949_v53, %v3953_v55  ;;  %v14240_v6 = vcombine.high %v3957_v26, %v3961_v42  ;;  %v4008_v53 = vld [vmem:[%s17344_s10 + $0xa20] sm:$0xff]  ;;  %v4005_v55 = vld [vmem:[%s17344_s10 + $0xa08] sm:$0xff] }
 0x6cc   : > { %v14278_v49 = vcombine.high %v3996_v41, %v4000_v8 }
 0x6ce   : > { %6862 = vmatpush1.bf16.msra.mxu0 %v14181_v12  ;;  %7026 = vmatpush1.bf16.msra.mxu1 %v14183_v13  ;;  %v3965_v12 = vld [vmem:[%s17344_s10 + $0x8c8] sm:$0xff] }
 0x6cf   : > { %6863 = vmatprep.subr.bf16.mxu0 %v14190_v15  ;;  %7027 = vmatprep.subr.bf16.mxu1 %v14192_v27  ;;  %v3969_v13 = vld [vmem:[%s17344_s10 + $0x8e8] sm:$0xff]  ;;  %v14237_v15 = vcombine.low %v3956_v61, %v3960_v62  ;;  %v14239_v27 = vcombine.low %v3957_v26, %v3961_v42  ;;  %v4012_v62 = vld [vmem:[%s17344_s10 + $0xa40] sm:$0xff] }
 0x6d0   : > { %v14248_v17 = vcombine.high %v3965_v12, %v3969_v13  ;;  %v4016_v26 = vld [vmem:[%s17344_s10 + $0xa60] sm:$0xff]  ;;  %v4013_v42 = vld [vmem:[%s17344_s10 + $0xa48] sm:$0xff] }
 0x6d2   : > { %6864 = vmatpush1.bf16.msra.mxu0 %v14189_v20  ;;  %7028 = vmatpush1.bf16.msra.mxu1 %v14191_v21  ;;  %v3973_v20 = vld [vmem:[%s17344_s10 + $0x908] sm:$0xff] }
 0x6d3   : > { %6865 = vmatprep.subr.bf16.mxu0 %v14198_v22  ;;  %7029 = vmatprep.subr.bf16.mxu1 %v14200_v54  ;;  %v3977_v21 = vld [vmem:[%s17344_s10 + $0x928] sm:$0xff]  ;;  %v14245_v22 = vcombine.low %v3964_v7, %v3968_v11  ;;  %v14247_v54 = vcombine.low %v3965_v12, %v3969_v13  ;;  %v4020_v11 = vld [vmem:[%s17344_s10 + $0xa80] sm:$0xff] }
 0x6d4   : > { %v14256_v25 = vcombine.high %v3973_v20, %v3977_v21  ;;  %v4024_v12 = vld [vmem:[%s17344_s10 + $0xaa0] sm:$0xff]  ;;  %v4021_v13 = vld [vmem:[%s17344_s10 + $0xa88] sm:$0xff] }
 0x6d6   : > { %6866 = vmatpush1.bf16.msra.mxu0 %v14197_v9  ;;  %7030 = vmatpush1.bf16.msra.mxu1 %v14199_v10  ;;  %v3981_v9 = vld [vmem:[%s17344_s10 + $0x948] sm:$0xff] }
 0x6d7   : > { %6867 = vmatprep.subr.bf16.mxu0 %v14206_v45  ;;  %7031 = vmatprep.subr.bf16.mxu1 %v14208_v28  ;;  %v3985_v10 = vld [vmem:[%s17344_s10 + $0x968] sm:$0xff]  ;;  %v14253_v45 = vcombine.low %v3972_v18, %v3976_v19  ;;  %v14255_v28 = vcombine.low %v3973_v20, %v3977_v21  ;;  %v4028_v19 = vld [vmem:[%s17344_s10 + $0xac0] sm:$0xff] }
 0x6d8   : > { %v14264_v30 = vcombine.high %v3981_v9, %v3985_v10  ;;  %v4032_v20 = vld [vmem:[%s17344_s10 + $0xae0] sm:$0xff]  ;;  %v4029_v21 = vld [vmem:[%s17344_s10 + $0xac8] sm:$0xff] }
 0x6da   : > { %6868 = vmatpush1.bf16.msra.mxu0 %v14205_v36  ;;  %7032 = vmatpush1.bf16.msra.mxu1 %v14207_v34  ;;  %v3989_v36 = vld [vmem:[%s17344_s10 + $0x988] sm:$0xff] }
 0x6db   : > { %6869 = vmatprep.subr.bf16.mxu0 %v14214_v35  ;;  %7033 = vmatprep.subr.bf16.mxu1 %v14216_v37  ;;  %v3993_v34 = vld [vmem:[%s17344_s10 + $0x9a8] sm:$0xff]  ;;  %v14261_v35 = vcombine.low %v3980_v43, %v3984_v29  ;;  %v14263_v37 = vcombine.low %v3981_v9, %v3985_v10  ;;  %v4036_v29 = vld [vmem:[%s17344_s10 + $0xb00] sm:$0xff] }
 0x6dc   : > { %v14272_v39 = vcombine.high %v3989_v36, %v3993_v34  ;;  %v4040_v9 = vld [vmem:[%s17344_s10 + $0xb20] sm:$0xff]  ;;  %v4037_v10 = vld [vmem:[%s17344_s10 + $0xb08] sm:$0xff] }
 0x6de   : > { %6870 = vmatpush1.bf16.msra.mxu0 %v14213_v14  ;;  %7034 = vmatpush1.bf16.msra.mxu1 %v14215_v46  ;;  %v3997_v14 = vld [vmem:[%s17344_s10 + $0x9c8] sm:$0xff] }
 0x6df   : > { %6880 = vmatprep.subr.bf16.mxu0 %v14222_v47  ;;  %7044 = vmatprep.subr.bf16.mxu1 %v14224_v48  ;;  %v4001_v46 = vld [vmem:[%s17344_s10 + $0x9e8] sm:$0xff]  ;;  %v14269_v47 = vcombine.low %v3988_v31, %v3992_v32  ;;  %v14271_v48 = vcombine.low %v3989_v36, %v3993_v34  ;;  %v4044_v32 = vld [vmem:[%s17344_s10 + $0xb40] sm:$0xff] }
 0x6e0   : > { %v14280_v50 = vcombine.high %v3997_v14, %v4001_v46  ;;  %v4048_v36 = vld [vmem:[%s17344_s10 + $0xb60] sm:$0xff]  ;;  %v4045_v34 = vld [vmem:[%s17344_s10 + $0xb48] sm:$0xff] }
 0x6e1   : > { %6872 = vmatmul.mubr.bf16.vlgmr.msra.gmra.mrb[0].mxu0 %v17619_v52  ;;  %7036 = vmatmul.mubr.bf16.vlgmr.msra.gmra.mrb[0].mxu1 %v17619_v52 }
 0x6e2   : > { %6881 = vmatpush1.bf16.msra.mxu0 %v14221_v57  ;;  %7045 = vmatpush1.bf16.msra.mxu1 %v14223_v58  ;;  %v4009_v57 = vld [vmem:[%s17344_s10 + $0xa28] sm:$0xff]  ;;  %v14277_v58 = vcombine.low %v3996_v41, %v4000_v8  ;;  %v4052_v8 = vld [vmem:[%s17344_s10 + $0xb80] sm:$0xff] }
 0x6e3   : > { %6882 = vmatprep.subr.bf16.mxu0 %v14230_v59  ;;  %7046 = vmatprep.subr.bf16.mxu1 %v14232_v60  ;;  %v14279_v59 = vcombine.low %v3997_v14, %v4001_v46  ;;  %v14286_v60 = vcombine.high %v4004_v51, %v4008_v53  ;;  %v14288_v61 = vcombine.high %v4005_v55, %v4009_v57  ;;  %v4056_v14 = vld [vmem:[%s17344_s10 + $0xba0] sm:$0xff]  ;;  %v4053_v46 = vld [vmem:[%s17344_s10 + $0xb88] sm:$0xff] }
 0x6e4   : > { %6912 = vmatprep.mubr.bf16.mxu0 %v17625_v63  ;;  %7076 = vmatprep.mubr.bf16.mxu1 %v17625_v63 }
 0x6e6   : > { %6883 = vmatpush1.bf16.msra.mxu0 %v14229_v1  ;;  %7047 = vmatpush1.bf16.msra.mxu1 %v14231_v4  ;;  %v4017_v1 = vld [vmem:[%s17344_s10 + $0xa68] sm:$0xff]  ;;  %v14285_v4 = vcombine.low %v4004_v51, %v4008_v53  ;;  %v4060_v53 = vld [vmem:[%s17344_s10 + $0xbc0] sm:$0xff] }
 0x6e7   : > { %6884 = vmatprep.subr.bf16.mxu0 %v14238_v5  ;;  %7048 = vmatprep.subr.bf16.mxu1 %v14240_v6  ;;  %v14287_v5 = vcombine.low %v4005_v55, %v4009_v57  ;;  %v14294_v6 = vcombine.high %v4012_v62, %v4016_v26  ;;  %v14296_v7 = vcombine.high %v4013_v42, %v4017_v1  ;;  %v4064_v55 = vld [vmem:[%s17344_s10 + $0xbe0] sm:$0xff] }
 0x6e8   : > { %v3651_v57 = vcombine.high %v17603_v2, %v17603_v2  ;;  %v4069_v2 = vld [vmem:[%s17344_s10 + $0xc08] sm:$0xff] }
 0x6ea   : > { %6885 = vmatpush1.bf16.msra.mxu0 %v14237_v15  ;;  %7049 = vmatpush1.bf16.msra.mxu1 %v14239_v27  ;;  %v4025_v15 = vld [vmem:[%s17344_s10 + $0xaa8] sm:$0xff]  ;;  %v14293_v27 = vcombine.low %v4012_v62, %v4016_v26  ;;  %v14342_v62 = vcombine.high %v4060_v53, %v4064_v55 }
 0x6eb   : > { %6886 = vmatprep.subr.bf16.mxu0 %v14246_v16  ;;  %7050 = vmatprep.subr.bf16.mxu1 %v14248_v17  ;;  %v14295_v16 = vcombine.low %v4013_v42, %v4017_v1  ;;  %v14302_v17 = vcombine.high %v4020_v11, %v4024_v12  ;;  %v14304_v18 = vcombine.high %v4021_v13, %v4025_v15  ;;  %v4068_v42 = vld [vmem:[%s17344_s10 + $0xc00] sm:$0xff] }
 0x6ec   : > { %v4072_v1 = vld [vmem:[%s17344_s10 + $0xc20] sm:$0xff] }
 0x6ee   : > { %6887 = vmatpush1.bf16.msra.mxu0 %v14245_v22  ;;  %7051 = vmatpush1.bf16.msra.mxu1 %v14247_v54  ;;  %v4033_v22 = vld [vmem:[%s17344_s10 + $0xae8] sm:$0xff]  ;;  %v14301_v54 = vcombine.low %v4020_v11, %v4024_v12  ;;  %v14350_v11 = vcombine.high %v4068_v42, %v4072_v1 }
 0x6ef   : > { %6888 = vmatprep.subr.bf16.mxu0 %v14254_v24  ;;  %7052 = vmatprep.subr.bf16.mxu1 %v14256_v25  ;;  %v14303_v24 = vcombine.low %v4021_v13, %v4025_v15  ;;  %v14310_v25 = vcombine.high %v4028_v19, %v4032_v20  ;;  %v14312_v43 = vcombine.high %v4029_v21, %v4033_v22  ;;  %v4076_v13 = vld [vmem:[%s17344_s10 + $0xc40] sm:$0xff] }
 0x6f0   : > { %v4080_v15 = vld [vmem:[%s17344_s10 + $0xc60] sm:$0xff] }
 0x6f2   : > { %6889 = vmatpush1.bf16.msra.mxu0 %v14253_v45  ;;  %7053 = vmatpush1.bf16.msra.mxu1 %v14255_v28  ;;  %v4041_v45 = vld [vmem:[%s17344_s10 + $0xb28] sm:$0xff]  ;;  %v14309_v28 = vcombine.low %v4028_v19, %v4032_v20  ;;  %v14349_v19 = vcombine.low %v4068_v42, %v4072_v1 }
 0x6f3   : > { %6890 = vmatprep.subr.bf16.mxu0 %v14262_v3  ;;  %7054 = vmatprep.subr.bf16.mxu1 %v14264_v30  ;;  %v14311_v3 = vcombine.low %v4029_v21, %v4033_v22  ;;  %v14318_v30 = vcombine.high %v4036_v29, %v4040_v9  ;;  %v14320_v31 = vcombine.high %v4037_v10, %v4041_v45 }
 0x6f4   : > { %v14358_v21 = vcombine.high %v4076_v13, %v4080_v15 }
 0x6f6   : > { %6891 = vmatpush1.bf16.msra.mxu0 %v14261_v35  ;;  %7055 = vmatpush1.bf16.msra.mxu1 %v14263_v37  ;;  %v4049_v35 = vld [vmem:[%s17344_s10 + $0xb68] sm:$0xff]  ;;  %v14317_v37 = vcombine.low %v4036_v29, %v4040_v9  ;;  %v14357_v29 = vcombine.low %v4076_v13, %v4080_v15 }
 0x6f7   : > { %6892 = vmatprep.subr.bf16.mxu0 %v14270_v38  ;;  %7056 = vmatprep.subr.bf16.mxu1 %v14272_v39  ;;  %v14319_v38 = vcombine.low %v4037_v10, %v4041_v45  ;;  %v14326_v39 = vcombine.high %v4044_v32, %v4048_v36  ;;  %v14328_v41 = vcombine.high %v4045_v34, %v4049_v35 }
 0x6fa   : > { %6893 = vmatpush1.bf16.msra.mxu0 %v14269_v47  ;;  %7057 = vmatpush1.bf16.msra.mxu1 %v14271_v48  ;;  %v4057_v47 = vld [vmem:[%s17344_s10 + $0xba8] sm:$0xff]  ;;  %v14325_v48 = vcombine.low %v4044_v32, %v4048_v36 }
 0x6fb   : > { %6894 = vmatprep.subr.bf16.mxu0 %v14278_v49  ;;  %7058 = vmatprep.subr.bf16.mxu1 %v14280_v50  ;;  %v14327_v49 = vcombine.low %v4045_v34, %v4049_v35  ;;  %v14334_v50 = vcombine.high %v4052_v8, %v4056_v14  ;;  %v14336_v51 = vcombine.high %v4053_v46, %v4057_v47 }
 0x6fe   : > { %6895 = vmatpush1.bf16.msra.mxu0 %v14277_v58  ;;  %7059 = vmatpush1.bf16.msra.mxu1 %v14279_v59  ;;  %v4061_v58 = vld [vmem:[%s17344_s10 + $0xbc8] sm:$0xff] }
 0x6ff   : > { %6896 = vmatprep.subr.bf16.mxu0 %v14286_v60  ;;  %7060 = vmatprep.subr.bf16.mxu1 %v14288_v61  ;;  %v4065_v59 = vld [vmem:[%s17344_s10 + $0xbe8] sm:$0xff]  ;;  %v14333_v60 = vcombine.low %v4052_v8, %v4056_v14  ;;  %v14335_v61 = vcombine.low %v4053_v46, %v4057_v47 }
 0x700   : > { %v14344_v26 = vcombine.high %v4061_v58, %v4065_v59 }
 0x702   : > { %6897 = vmatpush1.bf16.msra.mxu0 %v14285_v4  ;;  %7061 = vmatpush1.bf16.msra.mxu1 %v14287_v5  ;;  %v17690_v4 = vrot.slane %v3651_v57, %v17470_v0  ;;  %v4073_v5 = vld [vmem:[%s17344_s10 + $0xc28] sm:$0xff] }
 0x703   : > { %6898 = vmatprep.subr.bf16.mxu0 %v14294_v6  ;;  %7062 = vmatprep.subr.bf16.mxu1 %v14296_v7  ;;  %v14341_v6 = vcombine.low %v4060_v53, %v4064_v55  ;;  %v14343_v7 = vcombine.low %v4061_v58, %v4065_v59  ;;  %v14352_v12 = vcombine.high %v4069_v2, %v4073_v5  ;;  %v4116_v59 = vld [vmem:[%s17344_s10 + $0xd80] sm:$0xff] }
 0x704   : > { %v14351_v20 = vcombine.low %v4069_v2, %v4073_v5  ;;  %v4124_v5 = vld [vmem:[%s17344_s10 + $0xdc0] sm:$0xff] }
 0x706   : > { %6899 = vmatpush1.bf16.msra.mxu0 %v14293_v27  ;;  %7063 = vmatpush1.bf16.msra.mxu1 %v14295_v16  ;;  %v3667_v27 = vcombine.high %v17690_v4, %v17690_v4  ;;  %v17700_v16 = vpack.c.bf16 %v17609_v40, %v17609_v40  ;;  %v4085_v40 = vld [vmem:[%s17344_s10 + $0xc88] sm:$0xff] }
 0x707   : > { %6900 = vmatprep.subr.bf16.mxu0 %v14302_v17  ;;  %7064 = vmatprep.subr.bf16.mxu1 %v14304_v18  ;;  %v4077_v17 = vld [vmem:[%s17344_s10 + $0xc48] sm:$0xff] }
 0x708   : > { %v4081_v18 = vld [vmem:[%s17344_s10 + $0xc68] sm:$0xff] }
 0x709   : > { %v14360_v22 = vcombine.high %v4077_v17, %v4081_v18  ;;  %v14359_v9 = vcombine.low %v4077_v17, %v4081_v18  ;;  %v4132_v17 = vld [vmem:[%s17344_s10 + $0xe00] sm:$0xff] }
 0x70a   : > { %6901 = vmatpush1.bf16.msra.mxu0 %v14301_v54  ;;  %7065 = vmatpush1.bf16.msra.mxu1 %v14303_v24  ;;  %v4084_v54 = vld [vmem:[%s17344_s10 + $0xc80] sm:$0xff] }
 0x70b   : > { %6902 = vmatprep.subr.bf16.mxu0 %v14310_v25  ;;  %7066 = vmatprep.subr.bf16.mxu1 %v14312_v43  ;;  %v4088_v24 = vld [vmem:[%s17344_s10 + $0xca0] sm:$0xff]  ;;  %v17706_v25 = vpack.c.bf16 %v3667_v27, %v3667_v27  ;;  %v4089_v43 = vld [vmem:[%s17344_s10 + $0xca8] sm:$0xff] }
 0x70c   : > { %v14366_v10 = vcombine.high %v4084_v54, %v4088_v24  ;;  %v14368_v45 = vcombine.high %v4085_v40, %v4089_v43  ;;  %v14365_v32 = vcombine.low %v4084_v54, %v4088_v24  ;;  %v14367_v36 = vcombine.low %v4085_v40, %v4089_v43  ;;  %v4136_v18 = vld [vmem:[%s17344_s10 + $0xe20] sm:$0xff] }
 0x70d   : > { %v14414_v54 = vcombine.high %v4132_v17, %v4136_v18  ;;  %v4140_v40 = vld [vmem:[%s17344_s10 + $0xe40] sm:$0xff] }
 0x70e   : > { %6903 = vmatpush1.bf16.msra.mxu0 %v14309_v28  ;;  %7067 = vmatpush1.bf16.msra.mxu1 %v14311_v3  ;;  %v4092_v28 = vld [vmem:[%s17344_s10 + $0xcc0] sm:$0xff] }
 0x70f   : > { %6904 = vmatprep.subr.bf16.mxu0 %v14318_v30  ;;  %7068 = vmatprep.subr.bf16.mxu1 %v14320_v31  ;;  %v4096_v3 = vld [vmem:[%s17344_s10 + $0xce0] sm:$0xff]  ;;  %v4093_v30 = vld [vmem:[%s17344_s10 + $0xcc8] sm:$0xff] }
 0x710   : > { %v4097_v31 = vld [vmem:[%s17344_s10 + $0xce8] sm:$0xff]  ;;  %v14374_v34 = vcombine.high %v4092_v28, %v4096_v3  ;;  %v14373_v8 = vcombine.low %v4092_v28, %v4096_v3  ;;  %v4144_v43 = vld [vmem:[%s17344_s10 + $0xe60] sm:$0xff] }
 0x711   : > { %v14376_v35 = vcombine.high %v4093_v30, %v4097_v31  ;;  %v14375_v14 = vcombine.low %v4093_v30, %v4097_v31  ;;  %v14422_v28 = vcombine.high %v4140_v40, %v4144_v43  ;;  %v4148_v30 = vld [vmem:[%s17344_s10 + $0xe80] sm:$0xff] }
 0x712   : > { %6905 = vmatpush1.bf16.msra.mxu0 %v14317_v37  ;;  %7069 = vmatpush1.bf16.msra.mxu1 %v14319_v38  ;;  %v4100_v37 = vld [vmem:[%s17344_s10 + $0xd00] sm:$0xff] }
 0x713   : > { %6906 = vmatprep.subr.bf16.mxu0 %v14326_v39  ;;  %7070 = vmatprep.subr.bf16.mxu1 %v14328_v41  ;;  %v4104_v38 = vld [vmem:[%s17344_s10 + $0xd20] sm:$0xff]  ;;  %v4101_v39 = vld [vmem:[%s17344_s10 + $0xd08] sm:$0xff] }
 0x714   : > { %v4105_v41 = vld [vmem:[%s17344_s10 + $0xd28] sm:$0xff]  ;;  %v14382_v46 = vcombine.high %v4100_v37, %v4104_v38  ;;  %v14381_v53 = vcombine.low %v4100_v37, %v4104_v38  ;;  %v4152_v31 = vld [vmem:[%s17344_s10 + $0xea0] sm:$0xff] }
 0x715   : > { %v14384_v47 = vcombine.high %v4101_v39, %v4105_v41  ;;  %v14383_v55 = vcombine.low %v4101_v39, %v4105_v41  ;;  %v14430_v37 = vcombine.high %v4148_v30, %v4152_v31  ;;  %v4156_v39 = vld [vmem:[%s17344_s10 + $0xec0] sm:$0xff] }
 0x716   : > { %6907 = vmatpush1.bf16.msra.mxu0 %v14325_v48  ;;  %7071 = vmatpush1.bf16.msra.mxu1 %v14327_v49  ;;  %v4108_v48 = vld [vmem:[%s17344_s10 + $0xd40] sm:$0xff] }
 0x717   : > { %6908 = vmatprep.subr.bf16.mxu0 %v14334_v50  ;;  %7072 = vmatprep.subr.bf16.mxu1 %v14336_v51  ;;  %v4112_v49 = vld [vmem:[%s17344_s10 + $0xd60] sm:$0xff]  ;;  %v4109_v50 = vld [vmem:[%s17344_s10 + $0xd48] sm:$0xff] }
 0x718   : > { %v4113_v51 = vld [vmem:[%s17344_s10 + $0xd68] sm:$0xff]  ;;  %v14390_v57 = vcombine.high %v4108_v48, %v4112_v49  ;;  %v4160_v41 = vld [vmem:[%s17344_s10 + $0xee0] sm:$0xff] }
 0x719   : > { %v14392_v58 = vcombine.high %v4109_v50, %v4113_v51  ;;  %v14391_v42 = vcombine.low %v4109_v50, %v4113_v51  ;;  %v4164_v50 = vld [vmem:[%s17344_s10 + $0xf00] sm:$0xff] }
 0x71a   : > { %6909 = vmatpush1.bf16.msra.mxu0 %v14333_v60  ;;  %7073 = vmatpush1.bf16.msra.mxu1 %v14335_v61  ;;  %v4120_v60 = vld [vmem:[%s17344_s10 + $0xda0] sm:$0xff]  ;;  %v4117_v61 = vld [vmem:[%s17344_s10 + $0xd88] sm:$0xff] }
 0x71b   : > { %6910 = vmatprep.subr.bf16.mxu0 %v14342_v62  ;;  %7074 = vmatprep.subr.bf16.mxu1 %v14344_v26  ;;  %v4121_v62 = vld [vmem:[%s17344_s10 + $0xda8] sm:$0xff]  ;;  %v14389_v26 = vcombine.low %v4108_v48, %v4112_v49  ;;  %v14398_v1 = vcombine.high %v4116_v59, %v4120_v60  ;;  %v14438_v48 = vcombine.high %v4156_v39, %v4160_v41  ;;  %v4168_v51 = vld [vmem:[%s17344_s10 + $0xf20] sm:$0xff] }
 0x71c   : > { %v14400_v2 = vcombine.high %v4117_v61, %v4121_v62  ;;  %v14399_v13 = vcombine.low %v4117_v61, %v4121_v62  ;;  %v4172_v61 = vld [vmem:[%s17344_s10 + $0xf40] sm:$0xff] }
 0x71d   : > { %v4176_v62 = vld [vmem:[%s17344_s10 + $0xf60] sm:$0xff] }
 0x71e   : > { %6911 = vmatpush1.bf16.msra.mxu0 %v14341_v6  ;;  %7075 = vmatpush1.bf16.msra.mxu1 %v14343_v7  ;;  %v4128_v6 = vld [vmem:[%s17344_s10 + $0xde0] sm:$0xff]  ;;  %v4125_v7 = vld [vmem:[%s17344_s10 + $0xdc8] sm:$0xff] }
 0x71f   : > { %6921 = vmatprep.subr.bf16.mxu0 %v14350_v11  ;;  %7085 = vmatprep.subr.bf16.mxu1 %v14352_v12  ;;  %v4129_v11 = vld [vmem:[%s17344_s10 + $0xde8] sm:$0xff]  ;;  %v14397_v12 = vcombine.low %v4116_v59, %v4120_v60  ;;  %v14406_v15 = vcombine.high %v4124_v5, %v4128_v6  ;;  %v14446_v59 = vcombine.high %v4164_v50, %v4168_v51 }
 0x720   : > { %v14408_v27 = vcombine.high %v4125_v7, %v4129_v11 }
 0x721   : > { %6913 = vmatmul.mubr.bf16.vlgmr.msra.gmra.mrb[0].mxu0 %v17700_v16  ;;  %7077 = vmatmul.mubr.bf16.vlgmr.msra.gmra.mrb[0].mxu1 %v17700_v16 }
 0x722   : > { %6922 = vmatpush1.bf16.msra.mxu0 %v14349_v19  ;;  %7086 = vmatpush1.bf16.msra.mxu1 %v14351_v20  ;;  %v4133_v19 = vld [vmem:[%s17344_s10 + $0xe08] sm:$0xff] }
 0x723   : > { %6923 = vmatprep.subr.bf16.mxu0 %v14358_v21  ;;  %7087 = vmatprep.subr.bf16.mxu1 %v14360_v22  ;;  %v4137_v20 = vld [vmem:[%s17344_s10 + $0xe28] sm:$0xff]  ;;  %v14405_v21 = vcombine.low %v4124_v5, %v4128_v6  ;;  %v14407_v22 = vcombine.low %v4125_v7, %v4129_v11  ;;  %v14454_v5 = vcombine.high %v4172_v61, %v4176_v62  ;;  %v4180_v7 = vld [vmem:[%s17344_s10 + $0xf80] sm:$0xff] }
 0x724   : > { %6953 = vmatprep.mubr.bf16.mxu0 %v17706_v25  ;;  %7117 = vmatprep.mubr.bf16.mxu1 %v17706_v25  ;;  %v14416_v24 = vcombine.high %v4133_v19, %v4137_v20  ;;  %v4184_v11 = vld [vmem:[%s17344_s10 + $0xfa0] sm:$0xff] }
 0x726   : > { %6924 = vmatpush1.bf16.msra.mxu0 %v14357_v29  ;;  %7088 = vmatpush1.bf16.msra.mxu1 %v14359_v9  ;;  %v4141_v29 = vld [vmem:[%s17344_s10 + $0xe48] sm:$0xff] }
 0x727   : > { %6925 = vmatprep.subr.bf16.mxu0 %v14366_v10  ;;  %7089 = vmatprep.subr.bf16.mxu1 %v14368_v45  ;;  %v4145_v9 = vld [vmem:[%s17344_s10 + $0xe68] sm:$0xff]  ;;  %v14413_v10 = vcombine.low %v4132_v17, %v4136_v18  ;;  %v14415_v45 = vcombine.low %v4133_v19, %v4137_v20  ;;  %v14462_v17 = vcombine.high %v4180_v7, %v4184_v11  ;;  %v4188_v19 = vld [vmem:[%s17344_s10 + $0xfc0] sm:$0xff] }
 0x728   : > { %v14424_v3 = vcombine.high %v4141_v29, %v4145_v9  ;;  %v4192_v20 = vld [vmem:[%s17344_s10 + $0xfe0] sm:$0xff] }
 0x72a   : > { %6926 = vmatpush1.bf16.msra.mxu0 %v14365_v32  ;;  %7090 = vmatpush1.bf16.msra.mxu1 %v14367_v36  ;;  %v4149_v32 = vld [vmem:[%s17344_s10 + $0xe88] sm:$0xff] }
 0x72b   : > { %6927 = vmatprep.subr.bf16.mxu0 %v14374_v34  ;;  %7091 = vmatprep.subr.bf16.mxu1 %v14376_v35  ;;  %v4153_v36 = vld [vmem:[%s17344_s10 + $0xea8] sm:$0xff]  ;;  %v14421_v34 = vcombine.low %v4140_v40, %v4144_v43  ;;  %v14423_v35 = vcombine.low %v4141_v29, %v4145_v9  ;;  %v14470_v40 = vcombine.high %v4188_v19, %v4192_v20  ;;  %v3686_v29 = vld [vmem:[%s17344_s10 + $0x10] sm:$0xff] }
 0x72c   : > { %v14432_v38 = vcombine.high %v4149_v32, %v4153_v36  ;;  %v3690_v9 = vld [vmem:[%s17344_s10 + $0x30] sm:$0xff] }
 0x72e   : > { %6928 = vmatpush1.bf16.msra.mxu0 %v14373_v8  ;;  %7092 = vmatpush1.bf16.msra.mxu1 %v14375_v14  ;;  %v4157_v8 = vld [vmem:[%s17344_s10 + $0xec8] sm:$0xff] }
 0x72f   : > { %6929 = vmatprep.subr.bf16.mxu0 %v14382_v46  ;;  %7093 = vmatprep.subr.bf16.mxu1 %v14384_v47  ;;  %v4161_v14 = vld [vmem:[%s17344_s10 + $0xee8] sm:$0xff]  ;;  %v14429_v46 = vcombine.low %v4148_v30, %v4152_v31  ;;  %v14431_v47 = vcombine.low %v4149_v32, %v4153_v36  ;;  %v13970_v30 = vcombine.high %v3686_v29, %v3690_v9  ;;  %v3694_v32 = vld [vmem:[%s17344_s10 + $0x50] sm:$0xff] }
 0x730   : > { %v14440_v49 = vcombine.high %v4157_v8, %v4161_v14  ;;  %v3698_v36 = vld [vmem:[%s17344_s10 + $0x70] sm:$0xff] }
 0x732   : > { %6930 = vmatpush1.bf16.msra.mxu0 %v14381_v53  ;;  %7094 = vmatpush1.bf16.msra.mxu1 %v14383_v55  ;;  %v4165_v53 = vld [vmem:[%s17344_s10 + $0xf08] sm:$0xff] }
 0x733   : > { %6931 = vmatprep.subr.bf16.mxu0 %v14390_v57  ;;  %7095 = vmatprep.subr.bf16.mxu1 %v14392_v58  ;;  %v4169_v55 = vld [vmem:[%s17344_s10 + $0xf28] sm:$0xff]  ;;  %v14437_v57 = vcombine.low %v4156_v39, %v4160_v41  ;;  %v14439_v58 = vcombine.low %v4157_v8, %v4161_v14  ;;  %v13978_v41 = vcombine.high %v3694_v32, %v3698_v36  ;;  %v3702_v14 = vld [vmem:[%s17344_s10 + $0x90] sm:$0xff] }
 0x734   : > { %v14448_v60 = vcombine.high %v4165_v53, %v4169_v55 }
 0x736   : > { %6932 = vmatpush1.bf16.msra.mxu0 %v14389_v26  ;;  %7096 = vmatpush1.bf16.msra.mxu1 %v14391_v42  ;;  %v4173_v26 = vld [vmem:[%s17344_s10 + $0xf48] sm:$0xff] }
 0x737   : > { %6933 = vmatprep.subr.bf16.mxu0 %v14398_v1  ;;  %7097 = vmatprep.subr.bf16.mxu1 %v14400_v2  ;;  %v4177_v42 = vld [vmem:[%s17344_s10 + $0xf68] sm:$0xff]  ;;  %v14445_v1 = vcombine.low %v4164_v50, %v4168_v51  ;;  %v14447_v2 = vcombine.low %v4165_v53, %v4169_v55  ;;  %v3710_v53 = vld [vmem:[%s17344_s10 + $0xd0] sm:$0xff] }
 0x738   : > { %v14456_v6 = vcombine.high %v4173_v26, %v4177_v42  ;;  %v3714_v55 = vld [vmem:[%s17344_s10 + $0xf0] sm:$0xff] }
 0x73a   : > { %6934 = vmatpush1.bf16.msra.mxu0 %v14397_v12  ;;  %7098 = vmatpush1.bf16.msra.mxu1 %v14399_v13  ;;  %v4181_v12 = vld [vmem:[%s17344_s10 + $0xf88] sm:$0xff] }
 0x73b   : > { %6935 = vmatprep.subr.bf16.mxu0 %v14406_v15  ;;  %7099 = vmatprep.subr.bf16.mxu1 %v14408_v27  ;;  %v4185_v13 = vld [vmem:[%s17344_s10 + $0xfa8] sm:$0xff]  ;;  %v14453_v15 = vcombine.low %v4172_v61, %v4176_v62  ;;  %v14455_v27 = vcombine.low %v4173_v26, %v4177_v42  ;;  %v13994_v61 = vcombine.high %v3710_v53, %v3714_v55  ;;  %v3718_v26 = vld [vmem:[%s17344_s10 + $0x110] sm:$0xff] }
 0x73c   : > { %v14464_v18 = vcombine.high %v4181_v12, %v4185_v13  ;;  %v3722_v42 = vld [vmem:[%s17344_s10 + $0x130] sm:$0xff] }
 0x73e   : > { %6936 = vmatpush1.bf16.msra.mxu0 %v14405_v21  ;;  %7100 = vmatpush1.bf16.msra.mxu1 %v14407_v22  ;;  %v4189_v21 = vld [vmem:[%s17344_s10 + $0xfc8] sm:$0xff] }
 0x73f   : > { %6937 = vmatprep.subr.bf16.mxu0 %v14414_v54  ;;  %7101 = vmatprep.subr.bf16.mxu1 %v14416_v24  ;;  %v4193_v22 = vld [vmem:[%s17344_s10 + $0xfe8] sm:$0xff]  ;;  %v14461_v54 = vcombine.low %v4180_v7, %v4184_v11  ;;  %v14463_v24 = vcombine.low %v4181_v12, %v4185_v13  ;;  %v3726_v11 = vld [vmem:[%s17344_s10 + $0x150] sm:$0xff]  ;;  %v3727_v13 = vld [vmem:[%s17344_s10 + $0x158] sm:$0xff] }
 0x740   : > { %v14472_v43 = vcombine.high %v4189_v21, %v4193_v22  ;;  %v3730_v12 = vld [vmem:[%s17344_s10 + $0x170] sm:$0xff] }
 0x742   : > { %6938 = vmatpush1.bf16.msra.mxu0 %v14413_v10  ;;  %7102 = vmatpush1.bf16.msra.mxu1 %v14415_v45  ;;  %v3687_v10 = vld [vmem:[%s17344_s10 + $0x18] sm:$0xff] }
 0x743   : > { %6939 = vmatprep.subr.bf16.mxu0 %v14422_v28  ;;  %7103 = vmatprep.subr.bf16.mxu1 %v14424_v3  ;;  %v3691_v45 = vld [vmem:[%s17344_s10 + $0x38] sm:$0xff]  ;;  %v14469_v28 = vcombine.low %v4188_v19, %v4192_v20  ;;  %v14471_v3 = vcombine.low %v4189_v21, %v4193_v22  ;;  %v3734_v20 = vld [vmem:[%s17344_s10 + $0x190] sm:$0xff] }
 0x744   : > { %v13972_v31 = vcombine.high %v3687_v10, %v3691_v45  ;;  %v13971_v39 = vcombine.low %v3687_v10, %v3691_v45  ;;  %v3738_v21 = vld [vmem:[%s17344_s10 + $0x1b0] sm:$0xff]  ;;  %v3735_v22 = vld [vmem:[%s17344_s10 + $0x198] sm:$0xff] }
 0x745   : > { %v3746_v10 = vld [vmem:[%s17344_s10 + $0x1f0] sm:$0xff]  ;;  %v3743_v45 = vld [vmem:[%s17344_s10 + $0x1d8] sm:$0xff] }
 0x746   : > { %6940 = vmatpush1.bf16.msra.mxu0 %v14421_v34  ;;  %7104 = vmatpush1.bf16.msra.mxu1 %v14423_v35  ;;  %v17774_v34 = vpack.c.bf16 %v17690_v4, %v17690_v4  ;;  %v3695_v35 = vld [vmem:[%s17344_s10 + $0x58] sm:$0xff] }
 0x747   : > { %6941 = vmatprep.subr.bf16.mxu0 %v14430_v37  ;;  %7105 = vmatprep.subr.bf16.mxu1 %v14432_v38  ;;  %v3699_v37 = vld [vmem:[%s17344_s10 + $0x78] sm:$0xff]  ;;  %v13969_v38 = vcombine.low %v3686_v29, %v3690_v9  ;;  %v3742_v9 = vld [vmem:[%s17344_s10 + $0x1d0] sm:$0xff] }
 0x748   : > { %v13980_v8 = vcombine.high %v3695_v35, %v3699_v37  ;;  %v3703_v4 = vld [vmem:[%s17344_s10 + $0x98] sm:$0xff] }
 0x74a   : > { %6942 = vmatpush1.bf16.msra.mxu0 %v14429_v46  ;;  %7106 = vmatpush1.bf16.msra.mxu1 %v14431_v47  ;;  %v3706_v46 = vld [vmem:[%s17344_s10 + $0xb0] sm:$0xff]  ;;  %v3707_v47 = vld [vmem:[%s17344_s10 + $0xb8] sm:$0xff] }
 0x74b   : > { %6943 = vmatprep.subr.bf16.mxu0 %v14438_v48  ;;  %7107 = vmatprep.subr.bf16.mxu1 %v14440_v49  ;;  %v13977_v48 = vcombine.low %v3694_v32, %v3698_v36  ;;  %v13979_v49 = vcombine.low %v3695_v35, %v3699_v37  ;;  %v13986_v50 = vcombine.high %v3702_v14, %v3706_v46  ;;  %v3750_v36 = vld [vmem:[%s17344_s10 + $0x210] sm:$0xff]  ;;  %v3751_v37 = vld [vmem:[%s17344_s10 + $0x218] sm:$0xff] }
 0x74c   : > { %v13988_v51 = vcombine.high %v3703_v4, %v3707_v47  ;;  %v3754_v35 = vld [vmem:[%s17344_s10 + $0x230] sm:$0xff] }
 0x74e   : > { %6944 = vmatpush1.bf16.msra.mxu0 %v14437_v57  ;;  %7108 = vmatpush1.bf16.msra.mxu1 %v14439_v58  ;;  %v3711_v57 = vld [vmem:[%s17344_s10 + $0xd8] sm:$0xff] }
 0x74f   : > { %6945 = vmatprep.subr.bf16.mxu0 %v14446_v59  ;;  %7109 = vmatprep.subr.bf16.mxu1 %v14448_v60  ;;  %v3715_v58 = vld [vmem:[%s17344_s10 + $0xf8] sm:$0xff]  ;;  %v13985_v59 = vcombine.low %v3702_v14, %v3706_v46  ;;  %v13987_v60 = vcombine.low %v3703_v4, %v3707_v47  ;;  %v3758_v46 = vld [vmem:[%s17344_s10 + $0x250] sm:$0xff] }
 0x750   : > { %v13996_v62 = vcombine.high %v3711_v57, %v3715_v58  ;;  %v3762_v4 = vld [vmem:[%s17344_s10 + $0x270] sm:$0xff]  ;;  %v3759_v47 = vld [vmem:[%s17344_s10 + $0x258] sm:$0xff] }
 0x752   : > { %6946 = vmatpush1.bf16.msra.mxu0 %v14445_v1  ;;  %7110 = vmatpush1.bf16.msra.mxu1 %v14447_v2  ;;  %v3719_v1 = vld [vmem:[%s17344_s10 + $0x118] sm:$0xff] }
 0x753   : > { %6947 = vmatprep.subr.bf16.mxu0 %v14454_v5  ;;  %7111 = vmatprep.subr.bf16.mxu1 %v14456_v6  ;;  %v3723_v2 = vld [vmem:[%s17344_s10 + $0x138] sm:$0xff]  ;;  %v13993_v5 = vcombine.low %v3710_v53, %v3714_v55  ;;  %v14002_v6 = vcombine.high %v3718_v26, %v3722_v42  ;;  %v3766_v55 = vld [vmem:[%s17344_s10 + $0x290] sm:$0xff] }
 0x754   : > { %v14004_v7 = vcombine.high %v3719_v1, %v3723_v2 }
 0x756   : > { %6948 = vmatpush1.bf16.msra.mxu0 %v14453_v15  ;;  %7112 = vmatpush1.bf16.msra.mxu1 %v14455_v27  ;;  %v3731_v15 = vld [vmem:[%s17344_s10 + $0x178] sm:$0xff]  ;;  %v14001_v27 = vcombine.low %v3718_v26, %v3722_v42  ;;  %v3774_v42 = vld [vmem:[%s17344_s10 + $0x2d0] sm:$0xff] }
 0x757   : > { %6949 = vmatprep.subr.bf16.mxu0 %v14462_v17  ;;  %7113 = vmatprep.subr.bf16.mxu1 %v14464_v18  ;;  %v14003_v17 = vcombine.low %v3719_v1, %v3723_v2  ;;  %v14010_v18 = vcombine.high %v3726_v11, %v3730_v12  ;;  %v14012_v19 = vcombine.high %v3727_v13, %v3731_v15  ;;  %v3778_v1 = vld [vmem:[%s17344_s10 + $0x2f0] sm:$0xff]  ;;  %v3775_v2 = vld [vmem:[%s17344_s10 + $0x2d8] sm:$0xff] }
 0x75a   : > { %6950 = vmatpush1.bf16.msra.mxu0 %v14461_v54  ;;  %7114 = vmatpush1.bf16.msra.mxu1 %v14463_v24  ;;  %v3739_v54 = vld [vmem:[%s17344_s10 + $0x1b8] sm:$0xff]  ;;  %v14009_v24 = vcombine.low %v3726_v11, %v3730_v12  ;;  %v3782_v12 = vld [vmem:[%s17344_s10 + $0x310] sm:$0xff] }
 0x75b   : > { %6951 = vmatprep.subr.bf16.mxu0 %v14470_v40  ;;  %7115 = vmatprep.subr.bf16.mxu1 %v14472_v43  ;;  %v14011_v40 = vcombine.low %v3727_v13, %v3731_v15  ;;  %v14018_v43 = vcombine.high %v3734_v20, %v3738_v21  ;;  %v14020_v29 = vcombine.high %v3735_v22, %v3739_v54  ;;  %v3786_v13 = vld [vmem:[%s17344_s10 + $0x330] sm:$0xff]  ;;  %v3783_v15 = vld [vmem:[%s17344_s10 + $0x318] sm:$0xff] }
 0x75e   : > { %6952 = vmatpush1.bf16.msra.mxu0 %v14469_v28  ;;  %7116 = vmatpush1.bf16.msra.mxu1 %v14471_v3  ;;  %v3747_v28 = vld [vmem:[%s17344_s10 + $0x1f8] sm:$0xff]  ;;  %v14017_v3 = vcombine.low %v3734_v20, %v3738_v21  ;;  %v3790_v21 = vld [vmem:[%s17344_s10 + $0x350] sm:$0xff] }
 0x75f   : > { %7126 = vmatprep.subr.bf16.mxu0 %v13970_v30  ;;  %7290 = vmatprep.subr.bf16.mxu1 %v13972_v31  ;;  %v14019_v30 = vcombine.low %v3735_v22, %v3739_v54  ;;  %v14026_v31 = vcombine.high %v3742_v9, %v3746_v10  ;;  %v14028_v32 = vcombine.high %v3743_v45, %v3747_v28  ;;  %v3794_v22 = vld [vmem:[%s17344_s10 + $0x370] sm:$0xff]  ;;  %v3791_v54 = vld [vmem:[%s17344_s10 + $0x358] sm:$0xff] }
 0x761   : > { %6954 = vmatmul.mubr.bf16.vlgmr.msra.gmra.mrb[0].mxu0 %v17774_v34  ;;  %7118 = vmatmul.mubr.bf16.vlgmr.msra.gmra.mrb[0].mxu1 %v17774_v34 }
 0x762   : > { %7127 = vmatpush1.bf16.msra.mxu0 %v13969_v38  ;;  %7291 = vmatpush1.bf16.msra.mxu1 %v13971_v39  ;;  %v3755_v38 = vld [vmem:[%s17344_s10 + $0x238] sm:$0xff]  ;;  %v14025_v39 = vcombine.low %v3742_v9, %v3746_v10  ;;  %v3798_v10 = vld [vmem:[%s17344_s10 + $0x390] sm:$0xff] }
 0x763   : > { %7128 = vmatprep.subr.bf16.mxu0 %v13978_v41  ;;  %7292 = vmatprep.subr.bf16.mxu1 %v13980_v8  ;;  %v14027_v41 = vcombine.low %v3743_v45, %v3747_v28  ;;  %v14034_v8 = vcombine.high %v3750_v36, %v3754_v35  ;;  %v14036_v14 = vcombine.high %v3751_v37, %v3755_v38  ;;  %v3802_v45 = vld [vmem:[%s17344_s10 + $0x3b0] sm:$0xff]  ;;  %v3799_v28 = vld [vmem:[%s17344_s10 + $0x398] sm:$0xff] }
 0x764   : > { %7158 = vmatprep.mubr.bf16.mxu0 %v17488_v23  ;;  %7322 = vmatprep.mubr.bf16.mxu1 %v17488_v23  ;;  %v13995_v23 = vcombine.low %v3711_v57, %v3715_v58  ;;  %v3770_v57 = vld [vmem:[%s17344_s10 + $0x2b0] sm:$0xff]  ;;  %v3767_v58 = vld [vmem:[%s17344_s10 + $0x298] sm:$0xff] }
 0x766   : > { %7129 = vmatpush1.bf16.msra.mxu0 %v13977_v48  ;;  %7293 = vmatpush1.bf16.msra.mxu1 %v13979_v49  ;;  %v3763_v48 = vld [vmem:[%s17344_s10 + $0x278] sm:$0xff]  ;;  %v14033_v49 = vcombine.low %v3750_v36, %v3754_v35  ;;  %v3806_v35 = vld [vmem:[%s17344_s10 + $0x3d0] sm:$0xff] }
 0x767   : > { %7130 = vmatprep.subr.bf16.mxu0 %v13986_v50  ;;  %7294 = vmatprep.subr.bf16.mxu1 %v13988_v51  ;;  %v14035_v50 = vcombine.low %v3751_v37, %v3755_v38  ;;  %v14042_v51 = vcombine.high %v3758_v46, %v3762_v4  ;;  %v14044_v53 = vcombine.high %v3759_v47, %v3763_v48  ;;  %v3810_v37 = vld [vmem:[%s17344_s10 + $0x3f0] sm:$0xff]  ;;  %v3807_v38 = vld [vmem:[%s17344_s10 + $0x3d8] sm:$0xff] }
 0x76a   : > { %7131 = vmatpush1.bf16.msra.mxu0 %v13985_v59  ;;  %7295 = vmatpush1.bf16.msra.mxu1 %v13987_v60  ;;  %v3771_v59 = vld [vmem:[%s17344_s10 + $0x2b8] sm:$0xff]  ;;  %v14041_v60 = vcombine.low %v3758_v46, %v3762_v4  ;;  %v3814_v4 = vld [vmem:[%s17344_s10 + $0x410] sm:$0xff] }
 0x76b   : > { %7132 = vmatprep.subr.bf16.mxu0 %v13994_v61  ;;  %7296 = vmatprep.subr.bf16.mxu1 %v13996_v62  ;;  %v14043_v61 = vcombine.low %v3759_v47, %v3763_v48  ;;  %v14050_v62 = vcombine.high %v3766_v55, %v3770_v57  ;;  %v14052_v26 = vcombine.high %v3767_v58, %v3771_v59  ;;  %v3818_v47 = vld [vmem:[%s17344_s10 + $0x430] sm:$0xff]  ;;  %v3815_v48 = vld [vmem:[%s17344_s10 + $0x418] sm:$0xff] }
 0x76e   : > { %7133 = vmatpush1.bf16.msra.mxu0 %v13993_v5  ;;  %7297 = vmatpush1.bf16.msra.mxu1 %v13995_v23  ;;  %v3779_v5 = vld [vmem:[%s17344_s10 + $0x2f8] sm:$0xff]  ;;  %v14049_v23 = vcombine.low %v3766_v55, %v3770_v57  ;;  %v3822_v57 = vld [vmem:[%s17344_s10 + $0x450] sm:$0xff] }
 0x76f   : > { %7134 = vmatprep.subr.bf16.mxu0 %v14002_v6  ;;  %7298 = vmatprep.subr.bf16.mxu1 %v14004_v7  ;;  %v14051_v6 = vcombine.low %v3767_v58, %v3771_v59  ;;  %v14058_v7 = vcombine.high %v3774_v42, %v3778_v1  ;;  %v14060_v11 = vcombine.high %v3775_v2, %v3779_v5  ;;  %v3826_v58 = vld [vmem:[%s17344_s10 + $0x470] sm:$0xff]  ;;  %v3823_v59 = vld [vmem:[%s17344_s10 + $0x458] sm:$0xff] }
 0x772   : > { %7135 = vmatpush1.bf16.msra.mxu0 %v14001_v27  ;;  %7299 = vmatpush1.bf16.msra.mxu1 %v14003_v17  ;;  %v3787_v27 = vld [vmem:[%s17344_s10 + $0x338] sm:$0xff]  ;;  %v14057_v17 = vcombine.low %v3774_v42, %v3778_v1  ;;  %v3830_v1 = vld [vmem:[%s17344_s10 + $0x490] sm:$0xff] }
 0x773   : > { %7136 = vmatprep.subr.bf16.mxu0 %v14010_v18  ;;  %7300 = vmatprep.subr.bf16.mxu1 %v14012_v19  ;;  %v14059_v18 = vcombine.low %v3775_v2, %v3779_v5  ;;  %v14066_v19 = vcombine.high %v3782_v12, %v3786_v13  ;;  %v14068_v20 = vcombine.high %v3783_v15, %v3787_v27  ;;  %v3834_v2 = vld [vmem:[%s17344_s10 + $0x4b0] sm:$0xff]  ;;  %v3831_v5 = vld [vmem:[%s17344_s10 + $0x498] sm:$0xff] }
 0x776   : > { %7137 = vmatpush1.bf16.msra.mxu0 %v14009_v24  ;;  %7301 = vmatpush1.bf16.msra.mxu1 %v14011_v40  ;;  %v3795_v24 = vld [vmem:[%s17344_s10 + $0x378] sm:$0xff]  ;;  %v14065_v40 = vcombine.low %v3782_v12, %v3786_v13  ;;  %v3838_v13 = vld [vmem:[%s17344_s10 + $0x4d0] sm:$0xff] }
 0x777   : > { %7138 = vmatprep.subr.bf16.mxu0 %v14018_v43  ;;  %7302 = vmatprep.subr.bf16.mxu1 %v14020_v29  ;;  %v14067_v43 = vcombine.low %v3783_v15, %v3787_v27  ;;  %v14074_v29 = vcombine.high %v3790_v21, %v3794_v22  ;;  %v14076_v9 = vcombine.high %v3791_v54, %v3795_v24  ;;  %v3842_v15 = vld [vmem:[%s17344_s10 + $0x4f0] sm:$0xff]  ;;  %v3839_v27 = vld [vmem:[%s17344_s10 + $0x4d8] sm:$0xff] }
 0x77a   : > { %7139 = vmatpush1.bf16.msra.mxu0 %v14017_v3  ;;  %7303 = vmatpush1.bf16.msra.mxu1 %v14019_v30  ;;  %v3803_v3 = vld [vmem:[%s17344_s10 + $0x3b8] sm:$0xff]  ;;  %v14073_v30 = vcombine.low %v3790_v21, %v3794_v22  ;;  %v3846_v21 = vld [vmem:[%s17344_s10 + $0x510] sm:$0xff] }
 0x77b   : > { %7140 = vmatprep.subr.bf16.mxu0 %v14026_v31  ;;  %7304 = vmatprep.subr.bf16.mxu1 %v14028_v32  ;;  %v14075_v31 = vcombine.low %v3791_v54, %v3795_v24  ;;  %v14082_v32 = vcombine.high %v3798_v10, %v3802_v45  ;;  %v14084_v36 = vcombine.high %v3799_v28, %v3803_v3  ;;  %v3850_v22 = vld [vmem:[%s17344_s10 + $0x530] sm:$0xff]  ;;  %v3847_v54 = vld [vmem:[%s17344_s10 + $0x518] sm:$0xff] }
 0x77c   : > { %v3851_v24 = vld [vmem:[%s17344_s10 + $0x538] sm:$0xff] }
 0x77e   : > { %7141 = vmatpush1.bf16.msra.mxu0 %v14025_v39  ;;  %7305 = vmatpush1.bf16.msra.mxu1 %v14027_v41  ;;  %v3811_v39 = vld [vmem:[%s17344_s10 + $0x3f8] sm:$0xff]  ;;  %v14081_v41 = vcombine.low %v3798_v10, %v3802_v45  ;;  %v3858_v10 = vld [vmem:[%s17344_s10 + $0x570] sm:$0xff] }
 0x77f   : > { %7142 = vmatprep.subr.bf16.mxu0 %v14034_v8  ;;  %7306 = vmatprep.subr.bf16.mxu1 %v14036_v14  ;;  %v14083_v8 = vcombine.low %v3799_v28, %v3803_v3  ;;  %v14090_v14 = vcombine.high %v3806_v35, %v3810_v37  ;;  %v14092_v46 = vcombine.high %v3807_v38, %v3811_v39  ;;  %v3855_v45 = vld [vmem:[%s17344_s10 + $0x558] sm:$0xff] }
 0x780   : > { %v3859_v28 = vld [vmem:[%s17344_s10 + $0x578] sm:$0xff]  ;;  %v14129_v3 = vcombine.low %v3846_v21, %v3850_v22 }
 0x782   : > { %7143 = vmatpush1.bf16.msra.mxu0 %v14033_v49  ;;  %7307 = vmatpush1.bf16.msra.mxu1 %v14035_v50  ;;  %v3819_v49 = vld [vmem:[%s17344_s10 + $0x438] sm:$0xff]  ;;  %v14089_v50 = vcombine.low %v3806_v35, %v3810_v37  ;;  %v3866_v35 = vld [vmem:[%s17344_s10 + $0x5b0] sm:$0xff] }
 0x783   : > { %7144 = vmatprep.subr.bf16.mxu0 %v14042_v51  ;;  %7308 = vmatprep.subr.bf16.mxu1 %v14044_v53  ;;  %v14091_v51 = vcombine.low %v3807_v38, %v3811_v39  ;;  %v14098_v53 = vcombine.high %v3814_v4, %v3818_v47  ;;  %v14100_v55 = vcombine.high %v3815_v48, %v3819_v49  ;;  %v3863_v37 = vld [vmem:[%s17344_s10 + $0x598] sm:$0xff] }
 0x784   : > { %v3867_v38 = vld [vmem:[%s17344_s10 + $0x5b8] sm:$0xff] }
 0x786   : > { %7145 = vmatpush1.bf16.msra.mxu0 %v14041_v60  ;;  %7309 = vmatpush1.bf16.msra.mxu1 %v14043_v61  ;;  %v3827_v60 = vld [vmem:[%s17344_s10 + $0x478] sm:$0xff]  ;;  %v14097_v61 = vcombine.low %v3814_v4, %v3818_v47  ;;  %v3874_v4 = vld [vmem:[%s17344_s10 + $0x5f0] sm:$0xff] }
 0x787   : > { %7146 = vmatprep.subr.bf16.mxu0 %v14050_v62  ;;  %7310 = vmatprep.subr.bf16.mxu1 %v14052_v26  ;;  %v14099_v62 = vcombine.low %v3815_v48, %v3819_v49  ;;  %v14106_v26 = vcombine.high %v3822_v57, %v3826_v58  ;;  %v14108_v42 = vcombine.high %v3823_v59, %v3827_v60  ;;  %v3871_v47 = vld [vmem:[%s17344_s10 + $0x5d8] sm:$0xff] }
 0x788   : > { %v3875_v48 = vld [vmem:[%s17344_s10 + $0x5f8] sm:$0xff] }
 0x78a   : > { %7147 = vmatpush1.bf16.msra.mxu0 %v14049_v23  ;;  %7311 = vmatpush1.bf16.msra.mxu1 %v14051_v6  ;;  %v3835_v23 = vld [vmem:[%s17344_s10 + $0x4b8] sm:$0xff]  ;;  %v14105_v6 = vcombine.low %v3822_v57, %v3826_v58  ;;  %v3882_v57 = vld [vmem:[%s17344_s10 + $0x630] sm:$0xff] }
 0x78b   : > { %7148 = vmatprep.subr.bf16.mxu0 %v14058_v7  ;;  %7312 = vmatprep.subr.bf16.mxu1 %v14060_v11  ;;  %v14107_v7 = vcombine.low %v3823_v59, %v3827_v60  ;;  %v14114_v11 = vcombine.high %v3830_v1, %v3834_v2  ;;  %v14116_v12 = vcombine.high %v3831_v5, %v3835_v23  ;;  %v3879_v58 = vld [vmem:[%s17344_s10 + $0x618] sm:$0xff] }
 0x78c   : > { %v3883_v59 = vld [vmem:[%s17344_s10 + $0x638] sm:$0xff] }
 0x78e   : > { %7149 = vmatpush1.bf16.msra.mxu0 %v14057_v17  ;;  %7313 = vmatpush1.bf16.msra.mxu1 %v14059_v18  ;;  %v3843_v17 = vld [vmem:[%s17344_s10 + $0x4f8] sm:$0xff]  ;;  %v14115_v18 = vcombine.low %v3831_v5, %v3835_v23 }
 0x78f   : > { %7150 = vmatprep.subr.bf16.mxu0 %v14066_v19  ;;  %7314 = vmatprep.subr.bf16.mxu1 %v14068_v20  ;;  %v14122_v19 = vcombine.high %v3838_v13, %v3842_v15  ;;  %v14124_v20 = vcombine.high %v3839_v27, %v3843_v17  ;;  %v3891_v5 = vld [vmem:[%s17344_s10 + $0x678] sm:$0xff] }
 0x792   : > { %7151 = vmatpush1.bf16.msra.mxu0 %v14065_v40  ;;  %7315 = vmatpush1.bf16.msra.mxu1 %v14067_v43  ;;  %v14121_v40 = vcombine.low %v3838_v13, %v3842_v15  ;;  %v14130_v43 = vcombine.high %v3846_v21, %v3850_v22  ;;  %v3898_v13 = vld [vmem:[%s17344_s10 + $0x6b0] sm:$0xff]  ;;  %v3895_v15 = vld [vmem:[%s17344_s10 + $0x698] sm:$0xff] }
 0x793   : > { %7152 = vmatprep.subr.bf16.mxu0 %v14074_v29  ;;  %7316 = vmatprep.subr.bf16.mxu1 %v14076_v9  ;;  %v14132_v29 = vcombine.high %v3847_v54, %v3851_v24  ;;  %v3854_v9 = vld [vmem:[%s17344_s10 + $0x550] sm:$0xff]  ;;  %v3903_v22 = vld [vmem:[%s17344_s10 + $0x6d8] sm:$0xff] }
 0x794   : > { %v14137_v39 = vcombine.low %v3854_v9, %v3858_v10  ;;  %v3906_v21 = vld [vmem:[%s17344_s10 + $0x6f0] sm:$0xff] }
 0x796   : > { %7153 = vmatpush1.bf16.msra.mxu0 %v14073_v30  ;;  %7317 = vmatpush1.bf16.msra.mxu1 %v14075_v31  ;;  %v14131_v30 = vcombine.low %v3847_v54, %v3851_v24  ;;  %v14138_v31 = vcombine.high %v3854_v9, %v3858_v10  ;;  %v3907_v54 = vld [vmem:[%s17344_s10 + $0x6f8] sm:$0xff]  ;;  %v3914_v9 = vld [vmem:[%s17344_s10 + $0x730] sm:$0xff] }
 0x797   : > { %7154 = vmatprep.subr.bf16.mxu0 %v14082_v32  ;;  %7318 = vmatprep.subr.bf16.mxu1 %v14084_v36  ;;  %v14140_v32 = vcombine.high %v3855_v45, %v3859_v28  ;;  %v3862_v36 = vld [vmem:[%s17344_s10 + $0x590] sm:$0xff]  ;;  %v3911_v10 = vld [vmem:[%s17344_s10 + $0x718] sm:$0xff] }
 0x798   : > { %v14145_v49 = vcombine.low %v3862_v36, %v3866_v35 }
 0x79a   : > { %7155 = vmatpush1.bf16.msra.mxu0 %v14081_v41  ;;  %7319 = vmatpush1.bf16.msra.mxu1 %v14083_v8  ;;  %v14139_v41 = vcombine.low %v3855_v45, %v3859_v28  ;;  %v14146_v8 = vcombine.high %v3862_v36, %v3866_v35  ;;  %v3915_v45 = vld [vmem:[%s17344_s10 + $0x738] sm:$0xff]  ;;  %v3922_v36 = vld [vmem:[%s17344_s10 + $0x770] sm:$0xff] }
 0x79b   : > { %7156 = vmatprep.subr.bf16.mxu0 %v14090_v14  ;;  %7320 = vmatprep.subr.bf16.mxu1 %v14092_v46  ;;  %v14148_v14 = vcombine.high %v3863_v37, %v3867_v38  ;;  %v3870_v46 = vld [vmem:[%s17344_s10 + $0x5d0] sm:$0xff]  ;;  %v3919_v35 = vld [vmem:[%s17344_s10 + $0x758] sm:$0xff] }
 0x79c   : > { %v14153_v60 = vcombine.low %v3870_v46, %v3874_v4 }
 0x79e   : > { %7157 = vmatpush1.bf16.msra.mxu0 %v14089_v50  ;;  %7321 = vmatpush1.bf16.msra.mxu1 %v14091_v51  ;;  %v14147_v50 = vcombine.low %v3863_v37, %v3867_v38  ;;  %v14154_v51 = vcombine.high %v3870_v46, %v3874_v4  ;;  %v3923_v37 = vld [vmem:[%s17344_s10 + $0x778] sm:$0xff]  ;;  %v3930_v46 = vld [vmem:[%s17344_s10 + $0x7b0] sm:$0xff] }
 0x79f   : > { %7167 = vmatprep.subr.bf16.mxu0 %v14098_v53  ;;  %7331 = vmatprep.subr.bf16.mxu1 %v14100_v55  ;;  %v14156_v53 = vcombine.high %v3871_v47, %v3875_v48  ;;  %v3878_v55 = vld [vmem:[%s17344_s10 + $0x610] sm:$0xff]  ;;  %v3927_v4 = vld [vmem:[%s17344_s10 + $0x798] sm:$0xff] }
 0x7a0   : > { %v14161_v23 = vcombine.low %v3878_v55, %v3882_v57 }
 0x7a1   : > { %7159 = vmatmul.mubr.bf16.vlgmr.msra.gmra.mrb[4].mxu0 %v17537_v33  ;;  %7323 = vmatmul.mubr.bf16.vlgmr.msra.gmra.mrb[4].mxu1 %v17537_v33  ;;  %v14113_v33 = vcombine.low %v3830_v1, %v3834_v2  ;;  %v3890_v1 = vld [vmem:[%s17344_s10 + $0x670] sm:$0xff]  ;;  %v3887_v2 = vld [vmem:[%s17344_s10 + $0x658] sm:$0xff] }
 0x7a2   : > { %7168 = vmatpush1.bf16.msra.mxu0 %v14097_v61  ;;  %7332 = vmatpush1.bf16.msra.mxu1 %v14099_v62  ;;  %v14155_v61 = vcombine.low %v3871_v47, %v3875_v48  ;;  %v14162_v62 = vcombine.high %v3878_v55, %v3882_v57  ;;  %v3931_v47 = vld [vmem:[%s17344_s10 + $0x7b8] sm:$0xff]  ;;  %v3938_v55 = vld [vmem:[%s17344_s10 + $0x7f0] sm:$0xff] }
 0x7a3   : > { %7169 = vmatprep.subr.bf16.mxu0 %v14106_v26  ;;  %7333 = vmatprep.subr.bf16.mxu1 %v14108_v42  ;;  %v14164_v26 = vcombine.high %v3879_v58, %v3883_v59  ;;  %v3886_v42 = vld [vmem:[%s17344_s10 + $0x650] sm:$0xff]  ;;  %v3935_v57 = vld [vmem:[%s17344_s10 + $0x7d8] sm:$0xff] }
 0x7a4   : > { %7199 = vmatprep.mubr.bf16.mxu0 %v17543_v44  ;;  %7363 = vmatprep.mubr.bf16.mxu1 %v17543_v44  ;;  %v14123_v44 = vcombine.low %v3839_v27, %v3843_v17  ;;  %v3899_v27 = vld [vmem:[%s17344_s10 + $0x6b8] sm:$0xff]  ;;  %v14169_v17 = vcombine.low %v3886_v42, %v3890_v1 }
 0x7a6   : > { %7170 = vmatpush1.bf16.msra.mxu0 %v14105_v6  ;;  %7334 = vmatpush1.bf16.msra.mxu1 %v14107_v7  ;;  %v14163_v6 = vcombine.low %v3879_v58, %v3883_v59  ;;  %v14170_v7 = vcombine.high %v3886_v42, %v3890_v1  ;;  %v3939_v58 = vld [vmem:[%s17344_s10 + $0x7f8] sm:$0xff]  ;;  %v3946_v42 = vld [vmem:[%s17344_s10 + $0x830] sm:$0xff] }
 0x7a7   : > { %7171 = vmatprep.subr.bf16.mxu0 %v14114_v11  ;;  %7335 = vmatprep.subr.bf16.mxu1 %v14116_v12  ;;  %v14172_v11 = vcombine.high %v3887_v2, %v3891_v5  ;;  %v3894_v12 = vld [vmem:[%s17344_s10 + $0x690] sm:$0xff]  ;;  %v3943_v1 = vld [vmem:[%s17344_s10 + $0x818] sm:$0xff] }
 0x7a8   : > { %v14177_v24 = vcombine.low %v3894_v12, %v3898_v13 }
 0x7aa   : > { %7172 = vmatpush1.bf16.msra.mxu0 %v14113_v33  ;;  %7336 = vmatpush1.bf16.msra.mxu1 %v14115_v18  ;;  %v14171_v33 = vcombine.low %v3887_v2, %v3891_v5  ;;  %v14178_v18 = vcombine.high %v3894_v12, %v3898_v13  ;;  %v3947_v2 = vld [vmem:[%s17344_s10 + $0x838] sm:$0xff]  ;;  %v3954_v12 = vld [vmem:[%s17344_s10 + $0x870] sm:$0xff] }
 0x7ab   : > { %7173 = vmatprep.subr.bf16.mxu0 %v14122_v19  ;;  %7337 = vmatprep.subr.bf16.mxu1 %v14124_v20  ;;  %v14180_v19 = vcombine.high %v3895_v15, %v3899_v27  ;;  %v3902_v20 = vld [vmem:[%s17344_s10 + $0x6d0] sm:$0xff]  ;;  %v3951_v13 = vld [vmem:[%s17344_s10 + $0x858] sm:$0xff] }
 0x7ac   : > { %v14185_v28 = vcombine.low %v3902_v20, %v3906_v21 }
 0x7ae   : > { %7174 = vmatpush1.bf16.msra.mxu0 %v14121_v40  ;;  %7338 = vmatpush1.bf16.msra.mxu1 %v14123_v44  ;;  %v14179_v40 = vcombine.low %v3895_v15, %v3899_v27  ;;  %v14186_v44 = vcombine.high %v3902_v20, %v3906_v21  ;;  %v3955_v15 = vld [vmem:[%s17344_s10 + $0x878] sm:$0xff]  ;;  %v3962_v20 = vld [vmem:[%s17344_s10 + $0x8b0] sm:$0xff] }
 0x7af   : > { %7175 = vmatprep.subr.bf16.mxu0 %v14130_v43  ;;  %7339 = vmatprep.subr.bf16.mxu1 %v14132_v29  ;;  %v14188_v43 = vcombine.high %v3903_v22, %v3907_v54  ;;  %v3910_v29 = vld [vmem:[%s17344_s10 + $0x710] sm:$0xff]  ;;  %v3959_v21 = vld [vmem:[%s17344_s10 + $0x898] sm:$0xff] }
 0x7b0   : > { %v14193_v38 = vcombine.low %v3910_v29, %v3914_v9 }
 0x7b2   : > { %7176 = vmatpush1.bf16.msra.mxu0 %v14129_v3  ;;  %7340 = vmatpush1.bf16.msra.mxu1 %v14131_v30  ;;  %v14187_v3 = vcombine.low %v3903_v22, %v3907_v54  ;;  %v14194_v30 = vcombine.high %v3910_v29, %v3914_v9  ;;  %v3963_v22 = vld [vmem:[%s17344_s10 + $0x8b8] sm:$0xff]  ;;  %v3970_v29 = vld [vmem:[%s17344_s10 + $0x8f0] sm:$0xff] }
 0x7b3   : > { %7177 = vmatprep.subr.bf16.mxu0 %v14138_v31  ;;  %7341 = vmatprep.subr.bf16.mxu1 %v14140_v32  ;;  %v14196_v31 = vcombine.high %v3911_v10, %v3915_v45  ;;  %v3918_v32 = vld [vmem:[%s17344_s10 + $0x750] sm:$0xff]  ;;  %v3967_v9 = vld [vmem:[%s17344_s10 + $0x8d8] sm:$0xff] }
 0x7b4   : > { %v14201_v48 = vcombine.low %v3918_v32, %v3922_v36 }
 0x7b6   : > { %7178 = vmatpush1.bf16.msra.mxu0 %v14137_v39  ;;  %7342 = vmatpush1.bf16.msra.mxu1 %v14139_v41  ;;  %v14195_v39 = vcombine.low %v3911_v10, %v3915_v45  ;;  %v14202_v41 = vcombine.high %v3918_v32, %v3922_v36  ;;  %v3971_v10 = vld [vmem:[%s17344_s10 + $0x8f8] sm:$0xff]  ;;  %v14243_v45 = vcombine.low %v3959_v21, %v3963_v22 }
 0x7b7   : > { %7179 = vmatprep.subr.bf16.mxu0 %v14146_v8  ;;  %7343 = vmatprep.subr.bf16.mxu1 %v14148_v14  ;;  %v14204_v8 = vcombine.high %v3919_v35, %v3923_v37  ;;  %v3926_v14 = vld [vmem:[%s17344_s10 + $0x790] sm:$0xff]  ;;  %v3975_v32 = vld [vmem:[%s17344_s10 + $0x918] sm:$0xff] }
 0x7b8   : > { %v14209_v59 = vcombine.low %v3926_v14, %v3930_v46  ;;  %v3979_v36 = vld [vmem:[%s17344_s10 + $0x938] sm:$0xff] }
 0x7ba   : > { %7180 = vmatpush1.bf16.msra.mxu0 %v14145_v49  ;;  %7344 = vmatpush1.bf16.msra.mxu1 %v14147_v50  ;;  %v14203_v49 = vcombine.low %v3919_v35, %v3923_v37  ;;  %v14210_v50 = vcombine.high %v3926_v14, %v3930_v46  ;;  %v3987_v14 = vld [vmem:[%s17344_s10 + $0x978] sm:$0xff] }
 0x7bb   : > { %7181 = vmatprep.subr.bf16.mxu0 %v14154_v51  ;;  %7345 = vmatprep.subr.bf16.mxu1 %v14156_v53  ;;  %v14212_v51 = vcombine.high %v3927_v4, %v3931_v47  ;;  %v3934_v53 = vld [vmem:[%s17344_s10 + $0x7d0] sm:$0xff] }
 0x7bc   : > { %v14217_v5 = vcombine.low %v3934_v53, %v3938_v55 }
 0x7be   : > { %7182 = vmatpush1.bf16.msra.mxu0 %v14153_v60  ;;  %7346 = vmatpush1.bf16.msra.mxu1 %v14155_v61  ;;  %v14211_v60 = vcombine.low %v3927_v4, %v3931_v47  ;;  %v14218_v61 = vcombine.high %v3934_v53, %v3938_v55  ;;  %v14259_v4 = vcombine.low %v3975_v32, %v3979_v36  ;;  %v3995_v53 = vld [vmem:[%s17344_s10 + $0x9b8] sm:$0xff] }
 0x7bf   : > { %7183 = vmatprep.subr.bf16.mxu0 %v14162_v62  ;;  %7347 = vmatprep.subr.bf16.mxu1 %v14164_v26  ;;  %v14220_v62 = vcombine.high %v3935_v57, %v3939_v58  ;;  %v3942_v26 = vld [vmem:[%s17344_s10 + $0x810] sm:$0xff] }
 0x7c0   : > { %v14225_v27 = vcombine.low %v3942_v26, %v3946_v42 }
 0x7c2   : > { %7184 = vmatpush1.bf16.msra.mxu0 %v14161_v23  ;;  %7348 = vmatpush1.bf16.msra.mxu1 %v14163_v6  ;;  %v14219_v23 = vcombine.low %v3935_v57, %v3939_v58  ;;  %v14226_v6 = vcombine.high %v3942_v26, %v3946_v42  ;;  %v4003_v26 = vld [vmem:[%s17344_s10 + $0x9f8] sm:$0xff] }
 0x7c3   : > { %7185 = vmatprep.subr.bf16.mxu0 %v14170_v7  ;;  %7349 = vmatprep.subr.bf16.mxu1 %v14172_v11  ;;  %v14228_v7 = vcombine.high %v3943_v1, %v3947_v2  ;;  %v3950_v11 = vld [vmem:[%s17344_s10 + $0x850] sm:$0xff] }
 0x7c4   : > { %v14233_v54 = vcombine.low %v3950_v11, %v3954_v12 }
 0x7c6   : > { %7186 = vmatpush1.bf16.msra.mxu0 %v14169_v17  ;;  %7350 = vmatpush1.bf16.msra.mxu1 %v14171_v33  ;;  %v14227_v17 = vcombine.low %v3943_v1, %v3947_v2  ;;  %v14234_v33 = vcombine.high %v3950_v11, %v3954_v12  ;;  %v4011_v11 = vld [vmem:[%s17344_s10 + $0xa38] sm:$0xff] }
 0x7c7   : > { %7187 = vmatprep.subr.bf16.mxu0 %v14178_v18  ;;  %7351 = vmatprep.subr.bf16.mxu1 %v14180_v19  ;;  %v14236_v18 = vcombine.high %v3951_v13, %v3955_v15  ;;  %v3958_v19 = vld [vmem:[%s17344_s10 + $0x890] sm:$0xff] }
 0x7ca   : > { %7188 = vmatpush1.bf16.msra.mxu0 %v14177_v24  ;;  %7352 = vmatpush1.bf16.msra.mxu1 %v14179_v40  ;;  %v14235_v24 = vcombine.low %v3951_v13, %v3955_v15  ;;  %v14242_v40 = vcombine.high %v3958_v19, %v3962_v20 }
 0x7cb   : > { %7189 = vmatprep.subr.bf16.mxu0 %v14186_v44  ;;  %7353 = vmatprep.subr.bf16.mxu1 %v14188_v43  ;;  %v14244_v44 = vcombine.high %v3959_v21, %v3963_v22  ;;  %v3966_v43 = vld [vmem:[%s17344_s10 + $0x8d0] sm:$0xff] }
 0x7cc   : > { %v14249_v35 = vcombine.low %v3966_v43, %v3970_v29 }
 0x7ce   : > { %7190 = vmatpush1.bf16.msra.mxu0 %v14185_v28  ;;  %7354 = vmatpush1.bf16.msra.mxu1 %v14187_v3  ;;  %v14250_v28 = vcombine.high %v3966_v43, %v3970_v29  ;;  %v14252_v3 = vcombine.high %v3967_v9, %v3971_v10  ;;  %v4027_v43 = vld [vmem:[%s17344_s10 + $0xab8] sm:$0xff] }
 0x7cf   : > { %7191 = vmatprep.subr.bf16.mxu0 %v14194_v30  ;;  %7355 = vmatprep.subr.bf16.mxu1 %v14196_v31  ;;  %v3974_v30 = vld [vmem:[%s17344_s10 + $0x910] sm:$0xff] }
 0x7d0   : > { %v3978_v31 = vld [vmem:[%s17344_s10 + $0x930] sm:$0xff] }
 0x7d1   : > { %v14258_v37 = vcombine.high %v3974_v30, %v3978_v31  ;;  %v14257_v46 = vcombine.low %v3974_v30, %v3978_v31  ;;  %v4035_v30 = vld [vmem:[%s17344_s10 + $0xaf8] sm:$0xff] }
 0x7d2   : > { %7192 = vmatpush1.bf16.msra.mxu0 %v14193_v38  ;;  %7356 = vmatpush1.bf16.msra.mxu1 %v14195_v39  ;;  %v14260_v38 = vcombine.high %v3975_v32, %v3979_v36  ;;  %v3982_v39 = vld [vmem:[%s17344_s10 + $0x950] sm:$0xff] }
 0x7d3   : > { %7193 = vmatprep.subr.bf16.mxu0 %v14202_v41  ;;  %7357 = vmatprep.subr.bf16.mxu1 %v14204_v8  ;;  %v3986_v41 = vld [vmem:[%s17344_s10 + $0x970] sm:$0xff]  ;;  %v3983_v8 = vld [vmem:[%s17344_s10 + $0x958] sm:$0xff] }
 0x7d4   : > { %v14266_v47 = vcombine.high %v3982_v39, %v3986_v41  ;;  %v14265_v55 = vcombine.low %v3982_v39, %v3986_v41  ;;  %v14267_v57 = vcombine.low %v3983_v8, %v3987_v14  ;;  %v4043_v39 = vld [vmem:[%s17344_s10 + $0xb38] sm:$0xff] }
 0x7d6   : > { %7194 = vmatpush1.bf16.msra.mxu0 %v14201_v48  ;;  %7358 = vmatpush1.bf16.msra.mxu1 %v14203_v49  ;;  %v14268_v48 = vcombine.high %v3983_v8, %v3987_v14  ;;  %v3990_v49 = vld [vmem:[%s17344_s10 + $0x990] sm:$0xff] }
 0x7d7   : > { %7195 = vmatprep.subr.bf16.mxu0 %v14210_v50  ;;  %7359 = vmatprep.subr.bf16.mxu1 %v14212_v51  ;;  %v3994_v50 = vld [vmem:[%s17344_s10 + $0x9b0] sm:$0xff]  ;;  %v3991_v51 = vld [vmem:[%s17344_s10 + $0x998] sm:$0xff] }
 0x7d8   : > { %v14274_v58 = vcombine.high %v3990_v49, %v3994_v50  ;;  %v14273_v42 = vcombine.low %v3990_v49, %v3994_v50  ;;  %v14275_v1 = vcombine.low %v3991_v51, %v3995_v53  ;;  %v4051_v49 = vld [vmem:[%s17344_s10 + $0xb78] sm:$0xff] }
 0x7da   : > { %7196 = vmatpush1.bf16.msra.mxu0 %v14209_v59  ;;  %7360 = vmatpush1.bf16.msra.mxu1 %v14211_v60  ;;  %v14276_v59 = vcombine.high %v3991_v51, %v3995_v53  ;;  %v3998_v60 = vld [vmem:[%s17344_s10 + $0x9d0] sm:$0xff] }
 0x7db   : > { %7197 = vmatprep.subr.bf16.mxu0 %v14218_v61  ;;  %7361 = vmatprep.subr.bf16.mxu1 %v14220_v62  ;;  %v4002_v61 = vld [vmem:[%s17344_s10 + $0x9f0] sm:$0xff]  ;;  %v3999_v62 = vld [vmem:[%s17344_s10 + $0x9d8] sm:$0xff] }
 0x7dc   : > { %v14282_v2 = vcombine.high %v3998_v60, %v4002_v61  ;;  %v14281_v12 = vcombine.low %v3998_v60, %v4002_v61  ;;  %v14283_v13 = vcombine.low %v3999_v62, %v4003_v26  ;;  %v4059_v60 = vld [vmem:[%s17344_s10 + $0xbb8] sm:$0xff] }
 0x7de   : > { %7198 = vmatpush1.bf16.msra.mxu0 %v14217_v5  ;;  %7362 = vmatpush1.bf16.msra.mxu1 %v14219_v23  ;;  %v14284_v5 = vcombine.high %v3999_v62, %v4003_v26  ;;  %v4006_v23 = vld [vmem:[%s17344_s10 + $0xa10] sm:$0xff] }
 0x7df   : > { %7208 = vmatprep.subr.bf16.mxu0 %v14226_v6  ;;  %7372 = vmatprep.subr.bf16.mxu1 %v14228_v7  ;;  %v4010_v6 = vld [vmem:[%s17344_s10 + $0xa30] sm:$0xff]  ;;  %v4007_v7 = vld [vmem:[%s17344_s10 + $0xa18] sm:$0xff] }
 0x7e0   : > { %v14290_v15 = vcombine.high %v4006_v23, %v4010_v6  ;;  %v14291_v21 = vcombine.low %v4007_v7, %v4011_v11 }
 0x7e1   : > { %7200 = vmatmul.mubr.bf16.vlgmr.msra.gmra.mrb[4].mxu0 %v17619_v52  ;;  %7364 = vmatmul.mubr.bf16.vlgmr.msra.gmra.mrb[4].mxu1 %v17619_v52  ;;  %v14241_v52 = vcombine.low %v3958_v19, %v3962_v20  ;;  %v4019_v19 = vld [vmem:[%s17344_s10 + $0xa78] sm:$0xff]  ;;  %v14289_v20 = vcombine.low %v4006_v23, %v4010_v6 }
 0x7e2   : > { %7209 = vmatpush1.bf16.msra.mxu0 %v14225_v27  ;;  %7373 = vmatpush1.bf16.msra.mxu1 %v14227_v17  ;;  %v14292_v27 = vcombine.high %v4007_v7, %v4011_v11  ;;  %v4014_v17 = vld [vmem:[%s17344_s10 + $0xa50] sm:$0xff]  ;;  %v4067_v23 = vld [vmem:[%s17344_s10 + $0xbf8] sm:$0xff] }
 0x7e3   : > { %7210 = vmatprep.subr.bf16.mxu0 %v14234_v33  ;;  %7374 = vmatprep.subr.bf16.mxu1 %v14236_v18  ;;  %v4018_v33 = vld [vmem:[%s17344_s10 + $0xa70] sm:$0xff]  ;;  %v4015_v18 = vld [vmem:[%s17344_s10 + $0xa58] sm:$0xff] }
 0x7e4   : > { %7240 = vmatprep.mubr.bf16.mxu0 %v17625_v63  ;;  %7404 = vmatprep.mubr.bf16.mxu1 %v17625_v63  ;;  %v14251_v63 = vcombine.low %v3967_v9, %v3971_v10  ;;  %v14298_v22 = vcombine.high %v4014_v17, %v4018_v33  ;;  %v14297_v29 = vcombine.low %v4014_v17, %v4018_v33  ;;  %v4075_v17 = vld [vmem:[%s17344_s10 + $0xc38] sm:$0xff] }
 0x7e5   : > { %v14299_v9 = vcombine.low %v4015_v18, %v4019_v19 }
 0x7e6   : > { %7211 = vmatpush1.bf16.msra.mxu0 %v14233_v54  ;;  %7375 = vmatpush1.bf16.msra.mxu1 %v14235_v24  ;;  %v14300_v54 = vcombine.high %v4015_v18, %v4019_v19  ;;  %v4022_v24 = vld [vmem:[%s17344_s10 + $0xa90] sm:$0xff] }
 0x7e7   : > { %7212 = vmatprep.subr.bf16.mxu0 %v14242_v40  ;;  %7376 = vmatprep.subr.bf16.mxu1 %v14244_v44  ;;  %v4026_v40 = vld [vmem:[%s17344_s10 + $0xab0] sm:$0xff]  ;;  %v4023_v44 = vld [vmem:[%s17344_s10 + $0xa98] sm:$0xff] }
 0x7e8   : > { %v14306_v10 = vcombine.high %v4022_v24, %v4026_v40  ;;  %v14305_v31 = vcombine.low %v4022_v24, %v4026_v40  ;;  %v14307_v32 = vcombine.low %v4023_v44, %v4027_v43  ;;  %v4083_v24 = vld [vmem:[%s17344_s10 + $0xc78] sm:$0xff] }
 0x7ea   : > { %7213 = vmatpush1.bf16.msra.mxu0 %v14241_v52  ;;  %7377 = vmatpush1.bf16.msra.mxu1 %v14243_v45  ;;  %v14308_v52 = vcombine.high %v4023_v44, %v4027_v43  ;;  %v4030_v45 = vld [vmem:[%s17344_s10 + $0xad0] sm:$0xff] }
 0x7eb   : > { %7214 = vmatprep.subr.bf16.mxu0 %v14250_v28  ;;  %7378 = vmatprep.subr.bf16.mxu1 %v14252_v3  ;;  %v4034_v28 = vld [vmem:[%s17344_s10 + $0xaf0] sm:$0xff]  ;;  %v4031_v3 = vld [vmem:[%s17344_s10 + $0xad8] sm:$0xff] }
 0x7ec   : > { %v14314_v36 = vcombine.high %v4030_v45, %v4034_v28  ;;  %v14313_v41 = vcombine.low %v4030_v45, %v4034_v28  ;;  %v14315_v8 = vcombine.low %v4031_v3, %v4035_v30  ;;  %v4091_v45 = vld [vmem:[%s17344_s10 + $0xcb8] sm:$0xff] }
 0x7ee   : > { %7215 = vmatpush1.bf16.msra.mxu0 %v14249_v35  ;;  %7379 = vmatpush1.bf16.msra.mxu1 %v14251_v63  ;;  %v14316_v35 = vcombine.high %v4031_v3, %v4035_v30  ;;  %v4038_v63 = vld [vmem:[%s17344_s10 + $0xb10] sm:$0xff] }
 0x7ef   : > { %7216 = vmatprep.subr.bf16.mxu0 %v14258_v37  ;;  %7380 = vmatprep.subr.bf16.mxu1 %v14260_v38  ;;  %v4042_v37 = vld [vmem:[%s17344_s10 + $0xb30] sm:$0xff]  ;;  %v4039_v38 = vld [vmem:[%s17344_s10 + $0xb18] sm:$0xff] }
 0x7f0   : > { %v14322_v14 = vcombine.high %v4038_v63, %v4042_v37  ;;  %v14321_v50 = vcombine.low %v4038_v63, %v4042_v37  ;;  %v14323_v51 = vcombine.low %v4039_v38, %v4043_v39  ;;  %v4099_v63 = vld [vmem:[%s17344_s10 + $0xcf8] sm:$0xff] }
 0x7f2   : > { %7217 = vmatpush1.bf16.msra.mxu0 %v14257_v46  ;;  %7381 = vmatpush1.bf16.msra.mxu1 %v14259_v4  ;;  %v14324_v46 = vcombine.high %v4039_v38, %v4043_v39  ;;  %v4046_v4 = vld [vmem:[%s17344_s10 + $0xb50] sm:$0xff] }
 0x7f3   : > { %7218 = vmatprep.subr.bf16.mxu0 %v14266_v47  ;;  %7382 = vmatprep.subr.bf16.mxu1 %v14268_v48  ;;  %v4050_v47 = vld [vmem:[%s17344_s10 + $0xb70] sm:$0xff]  ;;  %v4047_v48 = vld [vmem:[%s17344_s10 + $0xb58] sm:$0xff] }
 0x7f4   : > { %v14330_v53 = vcombine.high %v4046_v4, %v4050_v47  ;;  %v14329_v61 = vcombine.low %v4046_v4, %v4050_v47  ;;  %v14331_v62 = vcombine.low %v4047_v48, %v4051_v49 }
 0x7f6   : > { %7219 = vmatpush1.bf16.msra.mxu0 %v14265_v55  ;;  %7383 = vmatpush1.bf16.msra.mxu1 %v14267_v57  ;;  %v14332_v55 = vcombine.high %v4047_v48, %v4051_v49  ;;  %v4054_v57 = vld [vmem:[%s17344_s10 + $0xb90] sm:$0xff] }
 0x7f7   : > { %7220 = vmatprep.subr.bf16.mxu0 %v14274_v58  ;;  %7384 = vmatprep.subr.bf16.mxu1 %v14276_v59  ;;  %v4058_v58 = vld [vmem:[%s17344_s10 + $0xbb0] sm:$0xff]  ;;  %v4055_v59 = vld [vmem:[%s17344_s10 + $0xb98] sm:$0xff] }
 0x7f8   : > { %v14338_v26 = vcombine.high %v4054_v57, %v4058_v58  ;;  %v14337_v6 = vcombine.low %v4054_v57, %v4058_v58  ;;  %v14339_v7 = vcombine.low %v4055_v59, %v4059_v60  ;;  %v4110_v49 = vld [vmem:[%s17344_s10 + $0xd50] sm:$0xff] }
 0x7fa   : > { %7221 = vmatpush1.bf16.msra.mxu0 %v14273_v42  ;;  %7385 = vmatpush1.bf16.msra.mxu1 %v14275_v1  ;;  %v14340_v42 = vcombine.high %v4055_v59, %v4059_v60  ;;  %v4062_v1 = vld [vmem:[%s17344_s10 + $0xbd0] sm:$0xff] }
 0x7fb   : > { %7222 = vmatprep.subr.bf16.mxu0 %v14282_v2  ;;  %7386 = vmatprep.subr.bf16.mxu1 %v14284_v5  ;;  %v4066_v2 = vld [vmem:[%s17344_s10 + $0xbf0] sm:$0xff]  ;;  %v4063_v5 = vld [vmem:[%s17344_s10 + $0xbd8] sm:$0xff] }
 0x7fc   : > { %v14346_v11 = vcombine.high %v4062_v1, %v4066_v2  ;;  %v14345_v33 = vcombine.low %v4062_v1, %v4066_v2  ;;  %v14347_v18 = vcombine.low %v4063_v5, %v4067_v23  ;;  %v4118_v60 = vld [vmem:[%s17344_s10 + $0xd90] sm:$0xff] }
 0x7fe   : > { %7223 = vmatpush1.bf16.msra.mxu0 %v14281_v12  ;;  %7387 = vmatpush1.bf16.msra.mxu1 %v14283_v13  ;;  %v14348_v12 = vcombine.high %v4063_v5, %v4067_v23  ;;  %v4070_v13 = vld [vmem:[%s17344_s10 + $0xc10] sm:$0xff] }
 0x7ff   : > { %7224 = vmatprep.subr.bf16.mxu0 %v14290_v15  ;;  %7388 = vmatprep.subr.bf16.mxu1 %v14292_v27  ;;  %v4074_v15 = vld [vmem:[%s17344_s10 + $0xc30] sm:$0xff]  ;;  %v4071_v27 = vld [vmem:[%s17344_s10 + $0xc18] sm:$0xff] }
 0x800   : > { %v14354_v19 = vcombine.high %v4070_v13, %v4074_v15  ;;  %v14353_v40 = vcombine.low %v4070_v13, %v4074_v15  ;;  %v14355_v44 = vcombine.low %v4071_v27, %v4075_v17  ;;  %v4127_v13 = vld [vmem:[%s17344_s10 + $0xdd8] sm:$0xff] }
 0x801   : > { %v4131_v15 = vld [vmem:[%s17344_s10 + $0xdf8] sm:$0xff] }
 0x802   : > { %7225 = vmatpush1.bf16.msra.mxu0 %v14289_v20  ;;  %7389 = vmatpush1.bf16.msra.mxu1 %v14291_v21  ;;  %v14356_v20 = vcombine.high %v4071_v27, %v4075_v17  ;;  %v4078_v21 = vld [vmem:[%s17344_s10 + $0xc50] sm:$0xff] }
 0x803   : > { %7226 = vmatprep.subr.bf16.mxu0 %v14298_v22  ;;  %7390 = vmatprep.subr.bf16.mxu1 %v14300_v54  ;;  %v4082_v22 = vld [vmem:[%s17344_s10 + $0xc70] sm:$0xff]  ;;  %v4079_v54 = vld [vmem:[%s17344_s10 + $0xc58] sm:$0xff] }
 0x804   : > { %v14362_v43 = vcombine.high %v4078_v21, %v4082_v22  ;;  %v14361_v28 = vcombine.low %v4078_v21, %v4082_v22  ;;  %v14363_v3 = vcombine.low %v4079_v54, %v4083_v24  ;;  %v14412_v22 = vcombine.high %v4127_v13, %v4131_v15 }
 0x806   : > { %7227 = vmatpush1.bf16.msra.mxu0 %v14297_v29  ;;  %7391 = vmatpush1.bf16.msra.mxu1 %v14299_v9  ;;  %v14364_v29 = vcombine.high %v4079_v54, %v4083_v24  ;;  %v4086_v9 = vld [vmem:[%s17344_s10 + $0xc90] sm:$0xff] }
 0x807   : > { %7228 = vmatprep.subr.bf16.mxu0 %v14306_v10  ;;  %7392 = vmatprep.subr.bf16.mxu1 %v14308_v52  ;;  %v4090_v10 = vld [vmem:[%s17344_s10 + $0xcb0] sm:$0xff]  ;;  %v4087_v52 = vld [vmem:[%s17344_s10 + $0xc98] sm:$0xff] }
 0x808   : > { %v14370_v30 = vcombine.high %v4086_v9, %v4090_v10  ;;  %v14371_v37 = vcombine.low %v4087_v52, %v4091_v45  ;;  %v4134_v54 = vld [vmem:[%s17344_s10 + $0xe10] sm:$0xff] }
 0x809   : > { %v4138_v24 = vld [vmem:[%s17344_s10 + $0xe30] sm:$0xff] }
 0x80a   : > { %7229 = vmatpush1.bf16.msra.mxu0 %v14305_v31  ;;  %7393 = vmatpush1.bf16.msra.mxu1 %v14307_v32  ;;  %v14372_v31 = vcombine.high %v4087_v52, %v4091_v45  ;;  %v4094_v32 = vld [vmem:[%s17344_s10 + $0xcd0] sm:$0xff] }
 0x80b   : > { %7230 = vmatprep.subr.bf16.mxu0 %v14314_v36  ;;  %7394 = vmatprep.subr.bf16.mxu1 %v14316_v35  ;;  %v4098_v36 = vld [vmem:[%s17344_s10 + $0xcf0] sm:$0xff]  ;;  %v4095_v35 = vld [vmem:[%s17344_s10 + $0xcd8] sm:$0xff] }
 0x80c   : > { %v14378_v38 = vcombine.high %v4094_v32, %v4098_v36  ;;  %v14380_v39 = vcombine.high %v4095_v35, %v4099_v63  ;;  %v14377_v4 = vcombine.low %v4094_v32, %v4098_v36  ;;  %v4142_v45 = vld [vmem:[%s17344_s10 + $0xe50] sm:$0xff] }
 0x80e   : > { %7231 = vmatpush1.bf16.msra.mxu0 %v14313_v41  ;;  %7395 = vmatpush1.bf16.msra.mxu1 %v14315_v8  ;;  %v4102_v41 = vld [vmem:[%s17344_s10 + $0xd10] sm:$0xff] }
 0x80f   : > { %7232 = vmatprep.subr.bf16.mxu0 %v14322_v14  ;;  %7396 = vmatprep.subr.bf16.mxu1 %v14324_v46  ;;  %v4106_v8 = vld [vmem:[%s17344_s10 + $0xd30] sm:$0xff]  ;;  %v4103_v14 = vld [vmem:[%s17344_s10 + $0xd18] sm:$0xff] }
 0x810   : > { %v4107_v46 = vld [vmem:[%s17344_s10 + $0xd38] sm:$0xff]  ;;  %v14386_v47 = vcombine.high %v4102_v41, %v4106_v8 }
 0x811   : > { %v14388_v48 = vcombine.high %v4103_v14, %v4107_v46  ;;  %v14387_v57 = vcombine.low %v4103_v14, %v4107_v46  ;;  %v4158_v46 = vld [vmem:[%s17344_s10 + $0xed0] sm:$0xff] }
 0x812   : > { %7233 = vmatpush1.bf16.msra.mxu0 %v14321_v50  ;;  %7397 = vmatpush1.bf16.msra.mxu1 %v14323_v51  ;;  %v4114_v50 = vld [vmem:[%s17344_s10 + $0xd70] sm:$0xff]  ;;  %v4111_v51 = vld [vmem:[%s17344_s10 + $0xd58] sm:$0xff] }
 0x813   : > { %7234 = vmatprep.subr.bf16.mxu0 %v14330_v53  ;;  %7398 = vmatprep.subr.bf16.mxu1 %v14332_v55  ;;  %v4115_v53 = vld [vmem:[%s17344_s10 + $0xd78] sm:$0xff]  ;;  %v14385_v55 = vcombine.low %v4102_v41, %v4106_v8  ;;  %v14394_v58 = vcombine.high %v4110_v49, %v4114_v50 }
 0x814   : > { %v14396_v59 = vcombine.high %v4111_v51, %v4115_v53  ;;  %v14395_v1 = vcombine.low %v4111_v51, %v4115_v53  ;;  %v4166_v53 = vld [vmem:[%s17344_s10 + $0xf10] sm:$0xff] }
 0x816   : > { %7235 = vmatpush1.bf16.msra.mxu0 %v14329_v61  ;;  %7399 = vmatpush1.bf16.msra.mxu1 %v14331_v62  ;;  %v4122_v61 = vld [vmem:[%s17344_s10 + $0xdb0] sm:$0xff]  ;;  %v4119_v62 = vld [vmem:[%s17344_s10 + $0xd98] sm:$0xff] }
 0x817   : > { %7236 = vmatprep.subr.bf16.mxu0 %v14338_v26  ;;  %7400 = vmatprep.subr.bf16.mxu1 %v14340_v42  ;;  %v4123_v26 = vld [vmem:[%s17344_s10 + $0xdb8] sm:$0xff]  ;;  %v14393_v42 = vcombine.low %v4110_v49, %v4114_v50  ;;  %v14402_v2 = vcombine.high %v4118_v60, %v4122_v61 }
 0x818   : > { %v14404_v23 = vcombine.high %v4119_v62, %v4123_v26 }
 0x81a   : > { %7237 = vmatpush1.bf16.msra.mxu0 %v14337_v6  ;;  %7401 = vmatpush1.bf16.msra.mxu1 %v14339_v7  ;;  %v4126_v6 = vld [vmem:[%s17344_s10 + $0xdd0] sm:$0xff] }
 0x81b   : > { %7238 = vmatprep.subr.bf16.mxu0 %v14346_v11  ;;  %7402 = vmatprep.subr.bf16.mxu1 %v14348_v12  ;;  %v4130_v7 = vld [vmem:[%s17344_s10 + $0xdf0] sm:$0xff] }
 0x81c   : > { %v14410_v21 = vcombine.high %v4126_v6, %v4130_v7 }
 0x81e   : > { %7239 = vmatpush1.bf16.msra.mxu0 %v14345_v33  ;;  %7403 = vmatpush1.bf16.msra.mxu1 %v14347_v18  ;;  %v14401_v33 = vcombine.low %v4118_v60, %v4122_v61 }
 0x81f   : > { %7249 = vmatprep.subr.bf16.mxu0 %v14354_v19  ;;  %7413 = vmatprep.subr.bf16.mxu1 %v14356_v20  ;;  %v14403_v20 = vcombine.low %v4119_v62, %v4123_v26  ;;  %v4174_v26 = vld [vmem:[%s17344_s10 + $0xf50] sm:$0xff] }
 0x821   : > { %7241 = vmatmul.mubr.bf16.vlgmr.msra.gmra.mrb[4].mxu0 %v17700_v16  ;;  %7405 = vmatmul.mubr.bf16.vlgmr.msra.gmra.mrb[4].mxu1 %v17700_v16  ;;  %v14369_v16 = vcombine.low %v4086_v9, %v4090_v10  ;;  %v14411_v9 = vcombine.low %v4127_v13, %v4131_v15  ;;  %v14418_v10 = vcombine.high %v4134_v54, %v4138_v24 }
 0x822   : > { %7250 = vmatpush1.bf16.msra.mxu0 %v14353_v40  ;;  %7414 = vmatpush1.bf16.msra.mxu1 %v14355_v44  ;;  %v4135_v44 = vld [vmem:[%s17344_s10 + $0xe18] sm:$0xff] }
 0x823   : > { %7251 = vmatprep.subr.bf16.mxu0 %v14362_v43  ;;  %7415 = vmatprep.subr.bf16.mxu1 %v14364_v29  ;;  %v4139_v43 = vld [vmem:[%s17344_s10 + $0xe38] sm:$0xff]  ;;  %v14409_v29 = vcombine.low %v4126_v6, %v4130_v7  ;;  %v18045_v7 = vld [vmem:[%s756_s26] sm:$0xff] }
 0x824   : > { %7281 = vmatprep.mubr.bf16.mxu0 %v17706_v25  ;;  %7445 = vmatprep.mubr.bf16.mxu1 %v17706_v25  ;;  %v14379_v25 = vcombine.low %v4095_v35, %v4099_v63  ;;  %v14420_v52 = vcombine.high %v4135_v44, %v4139_v43  ;;  %v14419_v32 = vcombine.low %v4135_v44, %v4139_v43  ;;  %v4150_v63 = vld [vmem:[%s17344_s10 + $0xe90] sm:$0xff] }
 0x825   : > { %v4190_v44 = vld [vmem:[%s17344_s10 + $0xfd0] sm:$0xff] }
 0x826   : > { %7252 = vmatpush1.bf16.msra.mxu0 %v14361_v28  ;;  %7416 = vmatpush1.bf16.msra.mxu1 %v14363_v3  ;;  %v4146_v28 = vld [vmem:[%s17344_s10 + $0xe70] sm:$0xff]  ;;  %v4143_v3 = vld [vmem:[%s17344_s10 + $0xe58] sm:$0xff] }
 0x827   : > { %7253 = vmatprep.subr.bf16.mxu0 %v14370_v30  ;;  %7417 = vmatprep.subr.bf16.mxu1 %v14372_v31  ;;  %v4147_v30 = vld [vmem:[%s17344_s10 + $0xe78] sm:$0xff]  ;;  %v14417_v31 = vcombine.low %v4134_v54, %v4138_v24  ;;  %v14426_v36 = vcombine.high %v4142_v45, %v4146_v28  ;;  %v4194_v43 = vld [vmem:[%s17344_s10 + $0xff0] sm:$0xff] }
 0x828   : > { %v14428_v35 = vcombine.high %v4143_v3, %v4147_v30  ;;  %v14427_v41 = vcombine.low %v4143_v3, %v4147_v30  ;;  %v7486_v30 = vld [vmem:[%s17353_s13] sm:$0xff] }
 0x82a   : > { %7254 = vmatpush1.bf16.msra.mxu0 %v14369_v16  ;;  %7418 = vmatpush1.bf16.msra.mxu1 %v14371_v37  ;;  %v4154_v16 = vld [vmem:[%s17344_s10 + $0xeb0] sm:$0xff]  ;;  %v4151_v37 = vld [vmem:[%s17344_s10 + $0xe98] sm:$0xff] }
 0x82b   : > { %7255 = vmatprep.subr.bf16.mxu0 %v14378_v38  ;;  %7419 = vmatprep.subr.bf16.mxu1 %v14380_v39  ;;  %v4155_v38 = vld [vmem:[%s17344_s10 + $0xeb8] sm:$0xff]  ;;  %v14425_v39 = vcombine.low %v4142_v45, %v4146_v28  ;;  %v14434_v8 = vcombine.high %v4150_v63, %v4154_v16  ;;  %v14474_v28 = vcombine.high %v4190_v44, %v4194_v43 }
 0x82c   : > { %v14436_v14 = vcombine.high %v4151_v37, %v4155_v38  ;;  %v14435_v49 = vcombine.low %v4151_v37, %v4155_v38  ;;  %v7494_v38 = vld [vmem:[%s17353_s13 + $0x40] sm:$0xff] }
 0x82e   : > { %7256 = vmatpush1.bf16.msra.mxu0 %v14377_v4  ;;  %7420 = vmatpush1.bf16.msra.mxu1 %v14379_v25  ;;  %v4162_v4 = vld [vmem:[%s17344_s10 + $0xef0] sm:$0xff]  ;;  %v4159_v25 = vld [vmem:[%s17344_s10 + $0xed8] sm:$0xff] }
 0x82f   : > { %7257 = vmatprep.subr.bf16.mxu0 %v14386_v47  ;;  %7421 = vmatprep.subr.bf16.mxu1 %v14388_v48  ;;  %v4163_v47 = vld [vmem:[%s17344_s10 + $0xef8] sm:$0xff]  ;;  %v14433_v48 = vcombine.low %v4150_v63, %v4154_v16  ;;  %v14442_v50 = vcombine.high %v4158_v46, %v4162_v4  ;;  %v14473_v63 = vcombine.low %v4190_v44, %v4194_v43 }
 0x830   : > { %v14444_v51 = vcombine.high %v4159_v25, %v4163_v47  ;;  %v14443_v60 = vcombine.low %v4159_v25, %v4163_v47  ;;  %v7502_v47 = vld [vmem:[%s17353_s13 + $0x80] sm:$0xff] }
 0x832   : > { %7258 = vmatpush1.bf16.msra.mxu0 %v14385_v55  ;;  %7422 = vmatpush1.bf16.msra.mxu1 %v14387_v57  ;;  %v4170_v55 = vld [vmem:[%s17344_s10 + $0xf30] sm:$0xff]  ;;  %v4167_v57 = vld [vmem:[%s17344_s10 + $0xf18] sm:$0xff] }
 0x833   : > { %7259 = vmatprep.subr.bf16.mxu0 %v14394_v58  ;;  %7423 = vmatprep.subr.bf16.mxu1 %v14396_v59  ;;  %v4171_v58 = vld [vmem:[%s17344_s10 + $0xf38] sm:$0xff]  ;;  %v14441_v59 = vcombine.low %v4158_v46, %v4162_v4  ;;  %v14450_v61 = vcombine.high %v4166_v53, %v4170_v55  ;;  %v14449_v6 = vcombine.low %v4166_v53, %v4170_v55 }
 0x834   : > { %v18006_v5 = vpop.f32.mrb[0].mxu0  ;;  %v18010_v11 = vpop.f32.mrb[0].mxu1  ;;  %v14452_v62 = vcombine.high %v4167_v57, %v4171_v58  ;;  %v14451_v13 = vcombine.low %v4167_v57, %v4171_v58  ;;  %v7499_v46 = vld [vmem:[%s17353_s13 + $0x68] sm:$0xff] }
 0x835   : > { %v18012_v12 = vpop.f32.mrb[1].mxu0  ;;  %v18016_v27 = vpop.f32.mrb[1].mxu1  ;;  %v7507_v53 = vld [vmem:[%s17353_s13 + $0xa8] sm:$0xff] }
 0x836   : > { %v6959_v17 = vpop.f32.mrb[2].mxu0  ;;  %7260 = vmatpush1.bf16.msra.mxu0 %v14393_v42  ;;  %v7123_v18 = vpop.f32.mrb[2].mxu1  ;;  %7424 = vmatpush1.bf16.msra.mxu1 %v14395_v1  ;;  %v4178_v42 = vld [vmem:[%s17344_s10 + $0xf70] sm:$0xff]  ;;  %v4175_v1 = vld [vmem:[%s17344_s10 + $0xf58] sm:$0xff] }
 0x837   : > { %v6960_v19 = vpop.f32.mrb[3].mxu0  ;;  %7261 = vmatprep.subr.bf16.mxu0 %v14402_v2  ;;  %7425 = vmatprep.subr.bf16.mxu1 %v14404_v23  ;;  %v7124_v40 = vpop.f32.mrb[3].mxu1  ;;  %v4179_v2 = vld [vmem:[%s17344_s10 + $0xf78] sm:$0xff]  ;;  %v4204_v23 = vsub.s32 1, %v17463_v56  ;;  %v14458_v15 = vcombine.high %v4174_v26, %v4178_v42  ;;  %v4186_v18 = vld [vmem:[%s17344_s10 + $0xfb0] sm:$0xff] }
 0x838   : > { %v14460_v17 = vcombine.high %v4175_v1, %v4179_v2  ;;  %v4183_v19 = vld [vmem:[%s17344_s10 + $0xf98] sm:$0xff]  ;;  %v14459_v54 = vcombine.low %v4175_v1, %v4179_v2 }
 0x83a   : > { %7262 = vmatpush1.bf16.msra.mxu0 %v14401_v33  ;;  %7426 = vmatpush1.bf16.msra.mxu1 %v14403_v20  ;;  %v4182_v33 = vld [vmem:[%s17344_s10 + $0xf90] sm:$0xff]  ;;  %v4187_v20 = vld [vmem:[%s17344_s10 + $0xfb8] sm:$0xff] }
 0x83b   : > { %7263 = vmatprep.subr.bf16.mxu0 %v14410_v21  ;;  %7427 = vmatprep.subr.bf16.mxu1 %v14412_v22  ;;  %v4205_v21 = vrot.slane %v18045_v7, %v4204_v23  ;;  %v14457_v22 = vcombine.low %v4174_v26, %v4178_v42  ;;  %v14466_v24 = vcombine.high %v4182_v33, %v4186_v18 }
 0x83c   : > { %v14468_v40 = vcombine.high %v4183_v19, %v4187_v20  ;;  %v14467_v45 = vcombine.low %v4183_v19, %v4187_v20 }
 0x83e   : > { %7264 = vmatpush1.bf16.msra.mxu0 %v14409_v29  ;;  %7428 = vmatpush1.bf16.msra.mxu1 %v14411_v9  ;;  %v4191_v29 = vld [vmem:[%s17344_s10 + $0xfd8] sm:$0xff] }
 0x83f   : > { %7265 = vmatprep.subr.bf16.mxu0 %v14418_v10  ;;  %7429 = vmatprep.subr.bf16.mxu1 %v14420_v52  ;;  %v4195_v9 = vld [vmem:[%s17344_s10 + $0xff8] sm:$0xff]  ;;  %v15296_v10 = vadd.f32 %v18012_v12, %v4205_v21  ;;  %v14465_v52 = vcombine.low %v4182_v33, %v4186_v18  ;;  %v7526_v21 = vld [vmem:[%s17353_s13 + $0x140] sm:$0xff] }
 0x840   : > { %v14476_v3 = vcombine.high %v4191_v29, %v4195_v9  ;;  %v14475_v12 = vcombine.low %v4191_v29, %v4195_v9  ;;  %v7534_v9 = vld [vmem:[%s17353_s13 + $0x180] sm:$0xff] }
 0x841   : > { %vm7455_vm1 = vcmp.ge.f32.partialorder %v15296_v10, 0.0 }
 0x842   : > { %7266 = vmatpush1.bf16.msra.mxu0 %v14417_v31  ;;  %7430 = vmatpush1.bf16.msra.mxu1 %v14419_v32  ;;  %v7490_v31 = vld [vmem:[%s17353_s13 + $0x20] sm:$0xff]  ;;  %v7487_v32 = vld [vmem:[%s17353_s13 + $0x8] sm:$0xff] }
 0x843   : > { %7267 = vmatprep.subr.bf16.mxu0 %v14426_v36  ;;  %7431 = vmatprep.subr.bf16.mxu1 %v14428_v35  ;;  %v7491_v36 = vld [vmem:[%s17353_s13 + $0x28] sm:$0xff]  ;;  %v7463_v35 = vmul.f32 0.2, %v15296_v10  ;;  %v14478_v16 = vcombine.high %v7486_v30, %v7490_v31 }
 0x844   : > { %v14480_v37 = vcombine.high %v7487_v32, %v7491_v36  ;;  %v14479_v4 = vcombine.low %v7487_v32, %v7491_v36  ;;  %v7542_v32 = vld [vmem:[%s17353_s13 + $0x1c0] sm:$0xff] }
 0x845   : > { %v7546_v36 = vld [vmem:[%s17353_s13 + $0x1e0] sm:$0xff] }
 0x846   : > { %7268 = vmatpush1.bf16.msra.mxu0 %v14425_v39  ;;  %7432 = vmatpush1.bf16.msra.mxu1 %v14427_v41  ;;  %v7498_v39 = vld [vmem:[%s17353_s13 + $0x60] sm:$0xff]  ;;  %v7471_v41 = vsel %vm7455_vm1, %v15296_v10, %v7463_v35  ;;  %v7543_v35 = vld [vmem:[%s17353_s13 + $0x1c8] sm:$0xff] }
 0x847   : > { %7269 = vmatprep.subr.bf16.mxu0 %v14434_v8  ;;  %7433 = vmatprep.subr.bf16.mxu1 %v14436_v14  ;;  %v14477_v8 = vcombine.low %v7486_v30, %v7490_v31  ;;  %v7495_v14 = vld [vmem:[%s17353_s13 + $0x48] sm:$0xff]  ;;  %v14486_v25 = vcombine.high %v7494_v38, %v7498_v39  ;;  %v14485_v55 = vcombine.low %v7494_v38, %v7498_v39  ;;  %v7538_v10 = vld [vmem:[%s17353_s13 + $0x1a0] sm:$0xff] }
 0x848   : > { %v14487_v57 = vcombine.low %v7495_v14, %v7499_v46  ;;  %v14526_v30 = vcombine.high %v7534_v9, %v7538_v10  ;;  %v7550_v39 = vld [vmem:[%s17353_s13 + $0x200] sm:$0xff] }
 0x84a   : > { %7270 = vmatpush1.bf16.msra.mxu0 %v14433_v48  ;;  %7434 = vmatpush1.bf16.msra.mxu1 %v14435_v49  ;;  %v7506_v48 = vld [vmem:[%s17353_s13 + $0xa0] sm:$0xff]  ;;  %v18069_v49 = vpack.c.bf16 %v7471_v41, %v7471_v41 }
 0x84b   : > { %7271 = vmatprep.subr.bf16.mxu0 %v14442_v50  ;;  %7435 = vmatprep.subr.bf16.mxu1 %v14444_v51  ;;  %v14488_v50 = vcombine.high %v7495_v14, %v7499_v46  ;;  %v7503_v51 = vld [vmem:[%s17353_s13 + $0x88] sm:$0xff]  ;;  %v14494_v58 = vcombine.high %v7502_v47, %v7506_v48  ;;  %v14493_v26 = vcombine.low %v7502_v47, %v7506_v48  ;;  %v7554_v41 = vld [vmem:[%s17353_s13 + $0x220] sm:$0xff] }
 0x84c   : > { %v14495_v42 = vcombine.low %v7503_v51, %v7507_v53  ;;  %v7555_v14 = vld [vmem:[%s17353_s13 + $0x228] sm:$0xff]  ;;  %v14533_v46 = vcombine.low %v7542_v32, %v7546_v36  ;;  %v7558_v48 = vld [vmem:[%s17353_s13 + $0x240] sm:$0xff] }
 0x84e   : > { %7272 = vmatpush1.bf16.msra.mxu0 %v14441_v59  ;;  %7436 = vmatpush1.bf16.msra.mxu1 %v14443_v60  ;;  %v14496_v59 = vcombine.high %v7503_v51, %v7507_v53  ;;  %v7510_v60 = vld [vmem:[%s17353_s13 + $0xc0] sm:$0xff]  ;;  %v7559_v51 = vld [vmem:[%s17353_s13 + $0x248] sm:$0xff] }
 0x84f   : > { %7273 = vmatprep.subr.bf16.mxu0 %v14450_v61  ;;  %7437 = vmatprep.subr.bf16.mxu1 %v14452_v62  ;;  %v7514_v61 = vld [vmem:[%s17353_s13 + $0xe0] sm:$0xff]  ;;  %v7511_v62 = vld [vmem:[%s17353_s13 + $0xc8] sm:$0xff] }
 0x850   : > { %v14502_v1 = vcombine.high %v7510_v60, %v7514_v61  ;;  %v14501_v33 = vcombine.low %v7510_v60, %v7514_v61  ;;  %v7563_v53 = vld [vmem:[%s17353_s13 + $0x268] sm:$0xff]  ;;  %v7566_v60 = vld [vmem:[%s17353_s13 + $0x280] sm:$0xff] }
 0x851   : > { %v7570_v61 = vld [vmem:[%s17353_s13 + $0x2a0] sm:$0xff] }
 0x852   : > { %7274 = vmatpush1.bf16.msra.mxu0 %v14449_v6  ;;  %7438 = vmatpush1.bf16.msra.mxu1 %v14451_v13  ;;  %v7518_v6 = vld [vmem:[%s17353_s13 + $0x100] sm:$0xff] }
 0x853   : > { %7275 = vmatprep.subr.bf16.mxu0 %v14458_v15  ;;  %7439 = vmatprep.subr.bf16.mxu1 %v14460_v17  ;;  %v7522_v13 = vld [vmem:[%s17353_s13 + $0x120] sm:$0xff]  ;;  %v7519_v15 = vld [vmem:[%s17353_s13 + $0x108] sm:$0xff] }
 0x854   : > { %v7523_v17 = vld [vmem:[%s17353_s13 + $0x128] sm:$0xff]  ;;  %v14510_v19 = vcombine.high %v7518_v6, %v7522_v13 }
 0x855   : > { %v14512_v20 = vcombine.high %v7519_v15, %v7523_v17  ;;  %v14511_v44 = vcombine.low %v7519_v15, %v7523_v17  ;;  %v7575_v15 = vld [vmem:[%s17353_s13 + $0x2c8] sm:$0xff] }
 0x856   : > { %7276 = vmatpush1.bf16.msra.mxu0 %v14457_v22  ;;  %7440 = vmatpush1.bf16.msra.mxu1 %v14459_v54  ;;  %v7530_v22 = vld [vmem:[%s17353_s13 + $0x160] sm:$0xff]  ;;  %v7527_v54 = vld [vmem:[%s17353_s13 + $0x148] sm:$0xff] }
 0x857   : > { %7277 = vmatprep.subr.bf16.mxu0 %v14466_v24  ;;  %7441 = vmatprep.subr.bf16.mxu1 %v14468_v40  ;;  %v7531_v24 = vld [vmem:[%s17353_s13 + $0x168] sm:$0xff]  ;;  %v14509_v40 = vcombine.low %v7518_v6, %v7522_v13  ;;  %v14518_v43 = vcombine.high %v7526_v21, %v7530_v22  ;;  %v7574_v6 = vld [vmem:[%s17353_s13 + $0x2c0] sm:$0xff] }
 0x858   : > { %v14520_v29 = vcombine.high %v7527_v54, %v7531_v24  ;;  %v7578_v13 = vld [vmem:[%s17353_s13 + $0x2e0] sm:$0xff]  ;;  %v7579_v17 = vld [vmem:[%s17353_s13 + $0x2e8] sm:$0xff] }
 0x85a   : > { %7278 = vmatpush1.bf16.msra.mxu0 %v14465_v52  ;;  %7442 = vmatpush1.bf16.msra.mxu1 %v14467_v45  ;;  %v7535_v52 = vld [vmem:[%s17353_s13 + $0x188] sm:$0xff] }
 0x85b   : > { %7279 = vmatprep.subr.bf16.mxu0 %v14474_v28  ;;  %7443 = vmatprep.subr.bf16.mxu1 %v14476_v3  ;;  %v7539_v45 = vld [vmem:[%s17353_s13 + $0x1a8] sm:$0xff]  ;;  %v14517_v28 = vcombine.low %v7526_v21, %v7530_v22  ;;  %v14519_v3 = vcombine.low %v7527_v54, %v7531_v24  ;;  %v7582_v21 = vld [vmem:[%s17353_s13 + $0x300] sm:$0xff] }
 0x85c   : > { %v14528_v31 = vcombine.high %v7535_v52, %v7539_v45  ;;  %v7586_v22 = vld [vmem:[%s17353_s13 + $0x320] sm:$0xff]  ;;  %v7583_v54 = vld [vmem:[%s17353_s13 + $0x308] sm:$0xff] }
 0x85d   : > { %v7587_v24 = vld [vmem:[%s17353_s13 + $0x328] sm:$0xff] }
 0x85e   : > { %7280 = vmatpush1.bf16.msra.mxu0 %v14473_v63  ;;  %7444 = vmatpush1.bf16.msra.mxu1 %v14475_v12  ;;  %v7547_v63 = vld [vmem:[%s17353_s13 + $0x1e8] sm:$0xff]  ;;  %v14525_v12 = vcombine.low %v7534_v9, %v7538_v10  ;;  %v14576_v9 = vcombine.high %v7583_v54, %v7587_v24  ;;  %v7590_v10 = vld [vmem:[%s17353_s13 + $0x340] sm:$0xff] }
 0x85f   : > { %10600 = vmatprep.subr.bf16.mxu0 %v14478_v16  ;;  %10764 = vmatprep.subr.bf16.mxu1 %v14480_v37  ;;  %v14527_v16 = vcombine.low %v7535_v52, %v7539_v45  ;;  %v14534_v37 = vcombine.high %v7542_v32, %v7546_v36  ;;  %v14536_v38 = vcombine.high %v7543_v35, %v7547_v63  ;;  %v7594_v52 = vld [vmem:[%s17353_s13 + $0x360] sm:$0xff]  ;;  %v7591_v45 = vld [vmem:[%s17353_s13 + $0x348] sm:$0xff] }
 0x860   : > { %v14582_v32 = vcombine.high %v7590_v10, %v7594_v52 }
 0x861   : > { %7282 = vmatmul.mubr.bf16.vlgmr.msra.gmra.mrb[4].mxu0 %v17774_v34  ;;  %7446 = vmatmul.mubr.bf16.vlgmr.msra.gmra.mrb[4].mxu1 %v17774_v34  ;;  %v7515_v34 = vld [vmem:[%s17353_s13 + $0xe8] sm:$0xff] }
 0x862   : > { %10601 = vmatpush1.bf16.msra.mxu0 %v14477_v8  ;;  %10632 = vmatprep.mubr.bf16.mxu0 %v18069_v49  ;;  %v14504_v2 = vcombine.high %v7511_v62, %v7515_v34  ;;  %v14503_v18 = vcombine.low %v7511_v62, %v7515_v34  ;;  %v7551_v8 = vld [vmem:[%s17353_s13 + $0x208] sm:$0xff] }
 0x863   : > { %10765 = vmatpush1.bf16.msra.mxu1 %v14479_v4  ;;  %10796 = vmatprep.mubr.bf16.mxu1 %v18069_v49  ;;  %v14535_v4 = vcombine.low %v7543_v35, %v7547_v63  ;;  %v14544_v47 = vcombine.high %v7551_v8, %v7555_v14  ;;  %v7567_v62 = vld [vmem:[%s17353_s13 + $0x288] sm:$0xff]  ;;  %v7598_v63 = vld [vmem:[%s17353_s13 + $0x380] sm:$0xff] }
 0x864   : > { %10602 = vmatprep.subr.bf16.mxu0 %v14486_v25  ;;  %10766 = vmatprep.subr.bf16.mxu1 %v14488_v50  ;;  %v14542_v25 = vcombine.high %v7550_v39, %v7554_v41  ;;  %v7562_v50 = vld [vmem:[%s17353_s13 + $0x260] sm:$0xff]  ;;  %v7571_v34 = vld [vmem:[%s17353_s13 + $0x2a8] sm:$0xff] }
 0x866   : > { %10603 = vmatpush1.bf16.msra.mxu0 %v14485_v55  ;;  %v14541_v55 = vcombine.low %v7550_v39, %v7554_v41  ;;  %v14581_v39 = vcombine.low %v7590_v10, %v7594_v52 }
 0x867   : > { %10767 = vmatpush1.bf16.msra.mxu1 %v14487_v57  ;;  %10604 = vmatprep.subr.bf16.mxu0 %v14494_v58  ;;  %v14543_v57 = vcombine.low %v7551_v8, %v7555_v14  ;;  %v14550_v58 = vcombine.high %v7558_v48, %v7562_v50 }
 0x868   : > { %10768 = vmatprep.subr.bf16.mxu1 %v14496_v59  ;;  %v14552_v59 = vcombine.high %v7559_v51, %v7563_v53 }
 0x86a   : > { %10605 = vmatpush1.bf16.msra.mxu0 %v14493_v26  ;;  %v14549_v26 = vcombine.low %v7558_v48, %v7562_v50  ;;  %v7611_v48 = vld [vmem:[%s17353_s13 + $0x3e8] sm:$0xff] }
 0x86b   : > { %10769 = vmatpush1.bf16.msra.mxu1 %v14495_v42  ;;  %10606 = vmatprep.subr.bf16.mxu0 %v14502_v1  ;;  %v14551_v42 = vcombine.low %v7559_v51, %v7563_v53  ;;  %v14558_v1 = vcombine.high %v7566_v60, %v7570_v61 }
 0x86c   : > { %10770 = vmatprep.subr.bf16.mxu1 %v14504_v2  ;;  %v14560_v2 = vcombine.high %v7567_v62, %v7571_v34 }
 0x86e   : > { %10607 = vmatpush1.bf16.msra.mxu0 %v14501_v33  ;;  %v14557_v33 = vcombine.low %v7566_v60, %v7570_v61  ;;  %v7615_v60 = vld [vmem:[%s17353_s13 + $0x408] sm:$0xff] }
 0x86f   : > { %10771 = vmatpush1.bf16.msra.mxu1 %v14503_v18  ;;  %10608 = vmatprep.subr.bf16.mxu0 %v14510_v19  ;;  %v14559_v18 = vcombine.low %v7567_v62, %v7571_v34  ;;  %v14566_v19 = vcombine.high %v7574_v6, %v7578_v13  ;;  %v7619_v61 = vld [vmem:[%s17353_s13 + $0x428] sm:$0xff] }
 0x870   : > { %10772 = vmatprep.subr.bf16.mxu1 %v14512_v20  ;;  %v14568_v20 = vcombine.high %v7575_v15, %v7579_v17 }
 0x872   : > { %10609 = vmatpush1.bf16.msra.mxu0 %v14509_v40  ;;  %v14565_v40 = vcombine.low %v7574_v6, %v7578_v13  ;;  %v7626_v6 = vld [vmem:[%s17353_s13 + $0x460] sm:$0xff] }
 0x873   : > { %10773 = vmatpush1.bf16.msra.mxu1 %v14511_v44  ;;  %10610 = vmatprep.subr.bf16.mxu0 %v14518_v43  ;;  %v14567_v44 = vcombine.low %v7575_v15, %v7579_v17  ;;  %v14574_v43 = vcombine.high %v7582_v21, %v7586_v22  ;;  %v7623_v17 = vld [vmem:[%s17353_s13 + $0x448] sm:$0xff] }
 0x874   : > { %10774 = vmatprep.subr.bf16.mxu1 %v14520_v29  ;;  %v4200_v29 = vsub.s32 0, %v17463_v56 }
 0x876   : > { %10611 = vmatpush1.bf16.msra.mxu0 %v14517_v28  ;;  %v7595_v28 = vld [vmem:[%s17353_s13 + $0x368] sm:$0xff]  ;;  %v4201_v36 = vrot.slane %v18045_v7, %v4200_v29 }
 0x877   : > { %10775 = vmatpush1.bf16.msra.mxu1 %v14519_v3  ;;  %10612 = vmatprep.subr.bf16.mxu0 %v14526_v30  ;;  %v4212_v3 = vsub.s32 3, %v17463_v56  ;;  %v14573_v30 = vcombine.low %v7582_v21, %v7586_v22  ;;  %v14584_v35 = vcombine.high %v7591_v45, %v7595_v28  ;;  %v14583_v41 = vcombine.low %v7591_v45, %v7595_v28  ;;  %v7630_v21 = vld [vmem:[%s17353_s13 + $0x480] sm:$0xff] }
 0x878   : > { %10776 = vmatprep.subr.bf16.mxu1 %v14528_v31  ;;  %v14575_v31 = vcombine.low %v7583_v54, %v7587_v24  ;;  %v15295_v14 = vadd.f32 %v18006_v5, %v4201_v36  ;;  %v7634_v22 = vld [vmem:[%s17353_s13 + $0x4a0] sm:$0xff] }
 0x879   : > { %v14622_v10 = vcombine.high %v7630_v21, %v7634_v22  ;;  %v7638_v45 = vld [vmem:[%s17353_s13 + $0x4c0] sm:$0xff] }
 0x87a   : > { %10613 = vmatpush1.bf16.msra.mxu0 %v14525_v12  ;;  %v7602_v12 = vld [vmem:[%s17353_s13 + $0x3a0] sm:$0xff]  ;;  %vm7454_vm2 = vcmp.ge.f32.partialorder %v15295_v14, 0.0 }
 0x87b   : > { %10777 = vmatpush1.bf16.msra.mxu1 %v14527_v16  ;;  %10614 = vmatprep.subr.bf16.mxu0 %v14534_v37  ;;  %v7599_v16 = vld [vmem:[%s17353_s13 + $0x388] sm:$0xff]  ;;  %v14590_v8 = vcombine.high %v7598_v63, %v7602_v12  ;;  %v14589_v51 = vcombine.low %v7598_v63, %v7602_v12  ;;  %v7642_v28 = vld [vmem:[%s17353_s13 + $0x4e0] sm:$0xff] }
 0x87c   : > { %10778 = vmatprep.subr.bf16.mxu1 %v14536_v38  ;;  %v7603_v37 = vld [vmem:[%s17353_s13 + $0x3a8] sm:$0xff]  ;;  %v4213_v38 = vrot.slane %v18045_v7, %v4212_v3  ;;  %v7646_v12 = vld [vmem:[%s17353_s13 + $0x500] sm:$0xff] }
 0x87d   : > { %v14591_v53 = vcombine.low %v7599_v16, %v7603_v37 }
 0x87e   : > { %10615 = vmatpush1.bf16.msra.mxu0 %v14533_v46  ;;  %v14592_v46 = vcombine.high %v7599_v16, %v7603_v37  ;;  %v15298_v50 = vadd.f32 %v18016_v27, %v4213_v38  ;;  %v7650_v16 = vld [vmem:[%s17353_s13 + $0x520] sm:$0xff]  ;;  %v7647_v37 = vld [vmem:[%s17353_s13 + $0x508] sm:$0xff] }
 0x87f   : > { %10779 = vmatpush1.bf16.msra.mxu1 %v14535_v4  ;;  %10616 = vmatprep.subr.bf16.mxu0 %v14542_v25  ;;  %v7606_v4 = vld [vmem:[%s17353_s13 + $0x3c0] sm:$0xff]  ;;  %v7651_v38 = vld [vmem:[%s17353_s13 + $0x528] sm:$0xff] }
 0x880   : > { %10780 = vmatprep.subr.bf16.mxu1 %v14544_v47  ;;  %v7610_v25 = vld [vmem:[%s17353_s13 + $0x3e0] sm:$0xff]  ;;  %v7607_v47 = vld [vmem:[%s17353_s13 + $0x3c8] sm:$0xff]  ;;  %v7465_v62 = vmul.f32 0.2, %v15298_v50  ;;  %vm7457_vm3 = vcmp.ge.f32.partialorder %v15298_v50, 0.0 }
 0x881   : > { %v14600_v5 = vcombine.high %v7607_v47, %v7611_v48  ;;  %v14597_v27 = vcombine.low %v7606_v4, %v7610_v25  ;;  %v14599_v34 = vcombine.low %v7607_v47, %v7611_v48  ;;  %v7659_v47 = vld [vmem:[%s17353_s13 + $0x568] sm:$0xff]  ;;  %v14637_v48 = vcombine.low %v7646_v12, %v7650_v16 }
 0x882   : > { %10617 = vmatpush1.bf16.msra.mxu0 %v14541_v55  ;;  %v14598_v55 = vcombine.high %v7606_v4, %v7610_v25  ;;  %v7473_v13 = vsel %vm7457_vm3, %v15298_v50, %v7465_v62  ;;  %v7658_v4 = vld [vmem:[%s17353_s13 + $0x560] sm:$0xff]  ;;  %v7655_v25 = vld [vmem:[%s17353_s13 + $0x548] sm:$0xff]  ;;  %v14639_v50 = vcombine.low %v7647_v37, %v7651_v38 }
 0x883   : > { %10781 = vmatpush1.bf16.msra.mxu1 %v14543_v57  ;;  %10618 = vmatprep.subr.bf16.mxu0 %v14550_v58  ;;  %v7462_v57 = vmul.f32 0.2, %v15295_v14  ;;  %v7614_v58 = vld [vmem:[%s17353_s13 + $0x400] sm:$0xff]  ;;  %v18151_v54 = vpack.c.bf16 %v7473_v13, %v7473_v13 }
 0x884   : > { %10782 = vmatprep.subr.bf16.mxu1 %v14552_v59  ;;  %v7618_v59 = vld [vmem:[%s17353_s13 + $0x420] sm:$0xff] }
 0x885   : > { %v14605_v15 = vcombine.low %v7614_v58, %v7618_v59 }
 0x886   : > { %10619 = vmatpush1.bf16.msra.mxu0 %v14549_v26  ;;  %v14606_v26 = vcombine.high %v7614_v58, %v7618_v59  ;;  %v7667_v58 = vld [vmem:[%s17353_s13 + $0x5a8] sm:$0xff] }
 0x887   : > { %10783 = vmatpush1.bf16.msra.mxu1 %v14551_v42  ;;  %10620 = vmatprep.subr.bf16.mxu0 %v14558_v1  ;;  %v7470_v42 = vsel %vm7454_vm2, %v15295_v14, %v7462_v57  ;;  %v14608_v1 = vcombine.high %v7615_v60, %v7619_v61  ;;  %v14640_v14 = vcombine.high %v7647_v37, %v7651_v38  ;;  %v7666_v57 = vld [vmem:[%s17353_s13 + $0x5a0] sm:$0xff] }
 0x888   : > { %10784 = vmatprep.subr.bf16.mxu1 %v14560_v2  ;;  %v7622_v2 = vld [vmem:[%s17353_s13 + $0x440] sm:$0xff] }
 0x889   : > { %v7702_v37 = vld [vmem:[%s17353_s13 + $0x6c0] sm:$0xff] }
 0x88a   : > { %10621 = vmatpush1.bf16.msra.mxu0 %v14557_v33  ;;  %v7627_v33 = vld [vmem:[%s17353_s13 + $0x468] sm:$0xff]  ;;  %v7706_v38 = vld [vmem:[%s17353_s13 + $0x6e0] sm:$0xff] }
 0x88b   : > { %10785 = vmatpush1.bf16.msra.mxu1 %v14559_v18  ;;  %10622 = vmatprep.subr.bf16.mxu0 %v14566_v19  ;;  %v18147_v18 = vpack.c.bf16 %v7470_v42, %v7470_v42  ;;  %v14607_v19 = vcombine.low %v7615_v60, %v7619_v61  ;;  %v14616_v24 = vcombine.high %v7623_v17, %v7627_v33  ;;  %v7675_v42 = vld [vmem:[%s17353_s13 + $0x5e8] sm:$0xff] }
 0x88c   : > { %10786 = vmatprep.subr.bf16.mxu1 %v14568_v20  ;;  %v14614_v20 = vcombine.high %v7622_v2, %v7626_v6  ;;  %v14647_v60 = vcombine.low %v7655_v25, %v7659_v47 }
 0x88e   : > { %10623 = vmatpush1.bf16.msra.mxu0 %v14565_v40  ;;  %v7631_v40 = vld [vmem:[%s17353_s13 + $0x488] sm:$0xff] }
 0x88f   : > { %10787 = vmatpush1.bf16.msra.mxu1 %v14567_v44  ;;  %10624 = vmatprep.subr.bf16.mxu0 %v14574_v43  ;;  %v7635_v44 = vld [vmem:[%s17353_s13 + $0x4a8] sm:$0xff]  ;;  %v14613_v43 = vcombine.low %v7622_v2, %v7626_v6 }
 0x890   : > { %10788 = vmatprep.subr.bf16.mxu1 %v14576_v9  ;;  %v14615_v9 = vcombine.low %v7623_v17, %v7627_v33  ;;  %v14624_v52 = vcombine.high %v7631_v40, %v7635_v44  ;;  %v14623_v36 = vcombine.low %v7631_v40, %v7635_v44  ;;  %v7682_v17 = vld [vmem:[%s17353_s13 + $0x620] sm:$0xff]  ;;  %v7679_v33 = vld [vmem:[%s17353_s13 + $0x608] sm:$0xff] }
 0x891   : > { %v7686_v40 = vld [vmem:[%s17353_s13 + $0x640] sm:$0xff] }
 0x892   : > { %10625 = vmatpush1.bf16.msra.mxu0 %v14573_v30  ;;  %v7639_v30 = vld [vmem:[%s17353_s13 + $0x4c8] sm:$0xff]  ;;  %v7690_v44 = vld [vmem:[%s17353_s13 + $0x660] sm:$0xff] }
 0x893   : > { %10789 = vmatpush1.bf16.msra.mxu1 %v14575_v31  ;;  %10626 = vmatprep.subr.bf16.mxu0 %v14582_v32  ;;  %v7643_v31 = vld [vmem:[%s17353_s13 + $0x4e8] sm:$0xff]  ;;  %v14621_v32 = vcombine.low %v7630_v21, %v7634_v22 }
 0x894   : > { %10790 = vmatprep.subr.bf16.mxu1 %v14584_v35  ;;  %v14630_v35 = vcombine.high %v7638_v45, %v7642_v28  ;;  %v14632_v63 = vcombine.high %v7639_v30, %v7643_v31 }
 0x896   : > { %10627 = vmatpush1.bf16.msra.mxu0 %v14581_v39  ;;  %v14629_v39 = vcombine.low %v7638_v45, %v7642_v28  ;;  %v14678_v45 = vcombine.high %v7686_v40, %v7690_v44 }
 0x897   : > { %10791 = vmatpush1.bf16.msra.mxu1 %v14583_v41  ;;  %10628 = vmatprep.subr.bf16.mxu0 %v14590_v8  ;;  %v14631_v41 = vcombine.low %v7639_v30, %v7643_v31  ;;  %v14638_v8 = vcombine.high %v7646_v12, %v7650_v16  ;;  %v7694_v30 = vld [vmem:[%s17353_s13 + $0x680] sm:$0xff] }
 0x898   : > { %10792 = vmatprep.subr.bf16.mxu1 %v14592_v46  ;;  %v7654_v46 = vld [vmem:[%s17353_s13 + $0x540] sm:$0xff] }
 0x899   : > { %v14645_v59 = vcombine.low %v7654_v46, %v7658_v4  ;;  %v7698_v31 = vld [vmem:[%s17353_s13 + $0x6a0] sm:$0xff] }
 0x89a   : > { %10629 = vmatpush1.bf16.msra.mxu0 %v14589_v51  ;;  %v14646_v51 = vcombine.high %v7654_v46, %v7658_v4  ;;  %v14686_v12 = vcombine.high %v7694_v30, %v7698_v31  ;;  %v14694_v46 = vcombine.high %v7702_v37, %v7706_v38 }
 0x89b   : > { %10793 = vmatpush1.bf16.msra.mxu1 %v14591_v53  ;;  %10630 = vmatprep.subr.bf16.mxu0 %v14598_v55  ;;  %v14648_v53 = vcombine.high %v7655_v25, %v7659_v47  ;;  %v7662_v55 = vld [vmem:[%s17353_s13 + $0x580] sm:$0xff] }
 0x89c   : > { %10794 = vmatprep.subr.bf16.mxu1 %v14600_v5  ;;  %v7663_v5 = vld [vmem:[%s17353_s13 + $0x588] sm:$0xff]  ;;  %v14654_v61 = vcombine.high %v7662_v55, %v7666_v57  ;;  %v7710_v25 = vld [vmem:[%s17353_s13 + $0x700] sm:$0xff] }
 0x89d   : > { %v14656_v62 = vcombine.high %v7663_v5, %v7667_v58  ;;  %v14655_v2 = vcombine.low %v7663_v5, %v7667_v58  ;;  %v7714_v47 = vld [vmem:[%s17353_s13 + $0x720] sm:$0xff] }
 0x89e   : > { %10631 = vmatpush1.bf16.msra.mxu0 %v14597_v27  ;;  %v7670_v27 = vld [vmem:[%s17353_s13 + $0x5c0] sm:$0xff] }
 0x89f   : > { %10795 = vmatpush1.bf16.msra.mxu1 %v14599_v34  ;;  %10641 = vmatprep.subr.bf16.mxu0 %v14606_v26  ;;  %v7674_v34 = vld [vmem:[%s17353_s13 + $0x5e0] sm:$0xff]  ;;  %v7671_v26 = vld [vmem:[%s17353_s13 + $0x5c8] sm:$0xff] }
 0x8a0   : > { %10805 = vmatprep.subr.bf16.mxu1 %v14608_v1  ;;  %v14653_v1 = vcombine.low %v7662_v55, %v7666_v57  ;;  %v14662_v6 = vcombine.high %v7670_v27, %v7674_v34  ;;  %v14664_v13 = vcombine.high %v7671_v26, %v7675_v42  ;;  %v14663_v21 = vcombine.low %v7671_v26, %v7675_v42  ;;  %v7718_v58 = vld [vmem:[%s17353_s13 + $0x740] sm:$0xff] }
 0x8a1   : > { %10633 = vmatmul.mubr.bf16.vlgmr.msra.gmra.mrb[8].mxu0 %v18147_v18  ;;  %v14702_v55 = vcombine.high %v7710_v25, %v7714_v47  ;;  %v4208_v57 = vsub.s32 2, %v17463_v56 }
 0x8a2   : > { %10797 = vmatmul.mubr.bf16.vlgmr.msra.gmra.mrb[8].mxu1 %v18147_v18  ;;  %10642 = vmatpush1.bf16.msra.mxu0 %v14605_v15  ;;  %v7678_v15 = vld [vmem:[%s17353_s13 + $0x600] sm:$0xff] }
 0x8a3   : > { %10673 = vmatprep.mubr.bf16.mxu0 %v18151_v54  ;;  %10806 = vmatpush1.bf16.msra.mxu1 %v14607_v19  ;;  %v7683_v19 = vld [vmem:[%s17353_s13 + $0x628] sm:$0xff]  ;;  %v14670_v22 = vcombine.high %v7678_v15, %v7682_v17  ;;  %v4209_v26 = vrot.slane %v18045_v7, %v4208_v57 }
 0x8a4   : > { %10837 = vmatprep.mubr.bf16.mxu1 %v18151_v54  ;;  %10643 = vmatprep.subr.bf16.mxu0 %v14614_v20  ;;  %v14661_v20 = vcombine.low %v7670_v27, %v7674_v34 }
 0x8a5   : > { %10807 = vmatprep.subr.bf16.mxu1 %v14616_v24  ;;  %v14672_v24 = vcombine.high %v7679_v33, %v7683_v19 }
 0x8a6   : > { %10644 = vmatpush1.bf16.msra.mxu0 %v14613_v43  ;;  %v7687_v43 = vld [vmem:[%s17353_s13 + $0x648] sm:$0xff] }
 0x8a7   : > { %10808 = vmatpush1.bf16.msra.mxu1 %v14615_v9  ;;  %10645 = vmatprep.subr.bf16.mxu0 %v14622_v10  ;;  %v7691_v9 = vld [vmem:[%s17353_s13 + $0x668] sm:$0xff]  ;;  %v14669_v10 = vcombine.low %v7678_v15, %v7682_v17 }
 0x8a8   : > { %10809 = vmatprep.subr.bf16.mxu1 %v14624_v52  ;;  %v14671_v52 = vcombine.low %v7679_v33, %v7683_v19  ;;  %v14680_v28 = vcombine.high %v7687_v43, %v7691_v9  ;;  %v15297_v19 = vadd.f32 %v18010_v11, %v4209_v26  ;;  %v7778_v26 = vld [vmem:[%s17353_s13 + $0x920] sm:$0xff] }
 0x8aa   : > { %10646 = vmatpush1.bf16.msra.mxu0 %v14621_v32  ;;  %v7695_v32 = vld [vmem:[%s17353_s13 + $0x688] sm:$0xff]  ;;  %vm7456_vm4 = vcmp.ge.f32.partialorder %v15297_v19, 0.0 }
 0x8ab   : > { %10810 = vmatpush1.bf16.msra.mxu1 %v14623_v36  ;;  %10647 = vmatprep.subr.bf16.mxu0 %v14630_v35  ;;  %v7699_v36 = vld [vmem:[%s17353_s13 + $0x6a8] sm:$0xff]  ;;  %v14677_v35 = vcombine.low %v7686_v40, %v7690_v44 }
 0x8ac   : > { %10811 = vmatprep.subr.bf16.mxu1 %v14632_v63  ;;  %v14679_v63 = vcombine.low %v7687_v43, %v7691_v9  ;;  %v14688_v16 = vcombine.high %v7695_v32, %v7699_v36  ;;  %v7464_v9 = vmul.f32 0.2, %v15297_v19 }
 0x8ae   : > { %10648 = vmatpush1.bf16.msra.mxu0 %v14629_v39  ;;  %v7703_v39 = vld [vmem:[%s17353_s13 + $0x6c8] sm:$0xff] }
 0x8af   : > { %10812 = vmatpush1.bf16.msra.mxu1 %v14631_v41  ;;  %10649 = vmatprep.subr.bf16.mxu0 %v14638_v8  ;;  %v7707_v41 = vld [vmem:[%s17353_s13 + $0x6e8] sm:$0xff]  ;;  %v14685_v8 = vcombine.low %v7694_v30, %v7698_v31 }
 0x8b0   : > { %10813 = vmatprep.subr.bf16.mxu1 %v14640_v14  ;;  %v14687_v14 = vcombine.low %v7695_v32, %v7699_v36  ;;  %v14696_v4 = vcombine.high %v7703_v39, %v7707_v41  ;;  %v7472_v36 = vsel %vm7456_vm4, %v15297_v19, %v7464_v9  ;;  %v7783_v19 = vld [vmem:[%s17353_s13 + $0x948] sm:$0xff] }
 0x8b1   : > { %v7795_v9 = vld [vmem:[%s17353_s13 + $0x9a8] sm:$0xff] }
 0x8b2   : > { %10650 = vmatpush1.bf16.msra.mxu0 %v14637_v48  ;;  %v7711_v48 = vld [vmem:[%s17353_s13 + $0x708] sm:$0xff] }
 0x8b3   : > { %10814 = vmatpush1.bf16.msra.mxu1 %v14639_v50  ;;  %10651 = vmatprep.subr.bf16.mxu0 %v14646_v51  ;;  %v7715_v50 = vld [vmem:[%s17353_s13 + $0x728] sm:$0xff]  ;;  %v14693_v51 = vcombine.low %v7702_v37, %v7706_v38 }
 0x8b4   : > { %10815 = vmatprep.subr.bf16.mxu1 %v14648_v53  ;;  %v14695_v53 = vcombine.low %v7703_v39, %v7707_v41  ;;  %v14704_v5 = vcombine.high %v7711_v48, %v7715_v50  ;;  %v14703_v27 = vcombine.low %v7711_v48, %v7715_v50  ;;  %v7755_v37 = vld [vmem:[%s17353_s13 + $0x868] sm:$0xff]  ;;  %v18224_v39 = vpack.c.bf16 %v7472_v36, %v7472_v36 }
 0x8b6   : > { %10652 = vmatpush1.bf16.msra.mxu0 %v14645_v59  ;;  %v7722_v59 = vld [vmem:[%s17353_s13 + $0x760] sm:$0xff] }
 0x8b7   : > { %10816 = vmatpush1.bf16.msra.mxu1 %v14647_v60  ;;  %10653 = vmatprep.subr.bf16.mxu0 %v14654_v61  ;;  %v7719_v60 = vld [vmem:[%s17353_s13 + $0x748] sm:$0xff]  ;;  %v14710_v34 = vcombine.high %v7718_v58, %v7722_v59  ;;  %v14709_v15 = vcombine.low %v7718_v58, %v7722_v59 }
 0x8b8   : > { %10817 = vmatprep.subr.bf16.mxu1 %v14656_v62  ;;  %v7723_v61 = vld [vmem:[%s17353_s13 + $0x768] sm:$0xff]  ;;  %v14701_v62 = vcombine.low %v7710_v25, %v7714_v47 }
 0x8b9   : > { %v14712_v42 = vcombine.high %v7719_v60, %v7723_v61  ;;  %v14711_v17 = vcombine.low %v7719_v60, %v7723_v61  ;;  %v7759_v25 = vld [vmem:[%s17353_s13 + $0x888] sm:$0xff] }
 0x8ba   : > { %10654 = vmatpush1.bf16.msra.mxu0 %v14653_v1  ;;  %v7726_v1 = vld [vmem:[%s17353_s13 + $0x780] sm:$0xff]  ;;  %v7763_v47 = vld [vmem:[%s17353_s13 + $0x8a8] sm:$0xff] }
 0x8bb   : > { %10818 = vmatpush1.bf16.msra.mxu1 %v14655_v2  ;;  %10655 = vmatprep.subr.bf16.mxu0 %v14662_v6  ;;  %v7730_v2 = vld [vmem:[%s17353_s13 + $0x7a0] sm:$0xff]  ;;  %v7727_v6 = vld [vmem:[%s17353_s13 + $0x788] sm:$0xff]  ;;  %v14751_v61 = vcombine.low %v7759_v25, %v7763_v47 }
 0x8bc   : > { %10819 = vmatprep.subr.bf16.mxu1 %v14664_v13  ;;  %v7731_v13 = vld [vmem:[%s17353_s13 + $0x7a8] sm:$0xff]  ;;  %v14718_v33 = vcombine.high %v7726_v1, %v7730_v2  ;;  %v14717_v40 = vcombine.low %v7726_v1, %v7730_v2 }
 0x8bd   : > { %v14720_v7 = vcombine.high %v7727_v6, %v7731_v13  ;;  %v14719_v44 = vcombine.low %v7727_v6, %v7731_v13  ;;  %v7767_v58 = vld [vmem:[%s17353_s13 + $0x8c8] sm:$0xff] }
 0x8be   : > { %10656 = vmatpush1.bf16.msra.mxu0 %v14661_v20  ;;  %v7734_v20 = vld [vmem:[%s17353_s13 + $0x7c0] sm:$0xff]  ;;  %v7771_v59 = vld [vmem:[%s17353_s13 + $0x8e8] sm:$0xff] }
 0x8bf   : > { %10820 = vmatpush1.bf16.msra.mxu1 %v14663_v21  ;;  %10657 = vmatprep.subr.bf16.mxu0 %v14670_v22  ;;  %v7738_v21 = vld [vmem:[%s17353_s13 + $0x7e0] sm:$0xff]  ;;  %v7735_v22 = vld [vmem:[%s17353_s13 + $0x7c8] sm:$0xff]  ;;  %v14759_v6 = vcombine.low %v7767_v58, %v7771_v59 }
 0x8c0   : > { %10821 = vmatprep.subr.bf16.mxu1 %v14672_v24  ;;  %v7739_v24 = vld [vmem:[%s17353_s13 + $0x7e8] sm:$0xff]  ;;  %v14726_v43 = vcombine.high %v7734_v20, %v7738_v21  ;;  %v14725_v30 = vcombine.low %v7734_v20, %v7738_v21 }
 0x8c1   : > { %v14728_v11 = vcombine.high %v7735_v22, %v7739_v24  ;;  %v14727_v31 = vcombine.low %v7735_v22, %v7739_v24  ;;  %v7779_v1 = vld [vmem:[%s17353_s13 + $0x928] sm:$0xff] }
 0x8c2   : > { %10658 = vmatpush1.bf16.msra.mxu0 %v14669_v10  ;;  %v7742_v10 = vld [vmem:[%s17353_s13 + $0x800] sm:$0xff] }
 0x8c3   : > { %10822 = vmatpush1.bf16.msra.mxu1 %v14671_v52  ;;  %10659 = vmatprep.subr.bf16.mxu0 %v14678_v45  ;;  %v7746_v52 = vld [vmem:[%s17353_s13 + $0x820] sm:$0xff]  ;;  %v7743_v45 = vld [vmem:[%s17353_s13 + $0x808] sm:$0xff] }
 0x8c4   : > { %10823 = vmatprep.subr.bf16.mxu1 %v14680_v28  ;;  %v7747_v28 = vld [vmem:[%s17353_s13 + $0x828] sm:$0xff]  ;;  %v14734_v32 = vcombine.high %v7742_v10, %v7746_v52  ;;  %v14733_v38 = vcombine.low %v7742_v10, %v7746_v52 }
 0x8c5   : > { %v14735_v41 = vcombine.low %v7743_v45, %v7747_v28 }
 0x8c6   : > { %10660 = vmatpush1.bf16.msra.mxu0 %v14677_v35  ;;  %v14736_v35 = vcombine.high %v7743_v45, %v7747_v28  ;;  %v7798_v28 = vld [vmem:[%s17353_s13 + $0x9c0] sm:$0xff] }
 0x8c7   : > { %10824 = vmatpush1.bf16.msra.mxu1 %v14679_v63  ;;  %10661 = vmatprep.subr.bf16.mxu0 %v14686_v12  ;;  %v7750_v63 = vld [vmem:[%s17353_s13 + $0x840] sm:$0xff] }
 0x8c8   : > { %10825 = vmatprep.subr.bf16.mxu1 %v14688_v16  ;;  %v7754_v12 = vld [vmem:[%s17353_s13 + $0x860] sm:$0xff]  ;;  %v7751_v16 = vld [vmem:[%s17353_s13 + $0x848] sm:$0xff] }
 0x8c9   : > { %v14741_v48 = vcombine.low %v7750_v63, %v7754_v12  ;;  %v14743_v50 = vcombine.low %v7751_v16, %v7755_v37 }
 0x8ca   : > { %10662 = vmatpush1.bf16.msra.mxu0 %v14685_v8  ;;  %v14742_v8 = vcombine.high %v7750_v63, %v7754_v12 }
 0x8cb   : > { %10826 = vmatpush1.bf16.msra.mxu1 %v14687_v14  ;;  %10663 = vmatprep.subr.bf16.mxu0 %v14694_v46  ;;  %v14744_v14 = vcombine.high %v7751_v16, %v7755_v37  ;;  %v7758_v46 = vld [vmem:[%s17353_s13 + $0x880] sm:$0xff] }
 0x8cc   : > { %10827 = vmatprep.subr.bf16.mxu1 %v14696_v4  ;;  %v7762_v4 = vld [vmem:[%s17353_s13 + $0x8a0] sm:$0xff] }
 0x8cd   : > { %v14749_v60 = vcombine.low %v7758_v46, %v7762_v4  ;;  %v7806_v16 = vld [vmem:[%s17353_s13 + $0xa00] sm:$0xff] }
 0x8ce   : > { %10664 = vmatpush1.bf16.msra.mxu0 %v14693_v51  ;;  %v14750_v51 = vcombine.high %v7758_v46, %v7762_v4  ;;  %v7810_v37 = vld [vmem:[%s17353_s13 + $0xa20] sm:$0xff] }
 0x8cf   : > { %10828 = vmatpush1.bf16.msra.mxu1 %v14695_v53  ;;  %10665 = vmatprep.subr.bf16.mxu0 %v14702_v55  ;;  %v14752_v53 = vcombine.high %v7759_v25, %v7763_v47  ;;  %v7766_v55 = vld [vmem:[%s17353_s13 + $0x8c0] sm:$0xff]  ;;  %v14798_v46 = vcombine.high %v7806_v16, %v7810_v37 }
 0x8d0   : > { %10829 = vmatprep.subr.bf16.mxu1 %v14704_v5  ;;  %v7770_v5 = vld [vmem:[%s17353_s13 + $0x8e0] sm:$0xff] }
 0x8d1   : > { %v14757_v2 = vcombine.low %v7766_v55, %v7770_v5  ;;  %v7814_v25 = vld [vmem:[%s17353_s13 + $0xa40] sm:$0xff] }
 0x8d2   : > { %10666 = vmatpush1.bf16.msra.mxu0 %v14701_v62  ;;  %v14758_v62 = vcombine.high %v7766_v55, %v7770_v5  ;;  %v7818_v47 = vld [vmem:[%s17353_s13 + $0xa60] sm:$0xff] }
 0x8d3   : > { %10830 = vmatpush1.bf16.msra.mxu1 %v14703_v27  ;;  %10667 = vmatprep.subr.bf16.mxu0 %v14710_v34  ;;  %v14760_v27 = vcombine.high %v7767_v58, %v7771_v59  ;;  %v7774_v34 = vld [vmem:[%s17353_s13 + $0x900] sm:$0xff]  ;;  %v14806_v55 = vcombine.high %v7814_v25, %v7818_v47 }
 0x8d4   : > { %10831 = vmatprep.subr.bf16.mxu1 %v14712_v42  ;;  %v7775_v42 = vld [vmem:[%s17353_s13 + $0x908] sm:$0xff]  ;;  %v14766_v13 = vcombine.high %v7774_v34, %v7778_v26  ;;  %v14765_v20 = vcombine.low %v7774_v34, %v7778_v26  ;;  %v7822_v58 = vld [vmem:[%s17353_s13 + $0xa80] sm:$0xff] }
 0x8d5   : > { %v14767_v21 = vcombine.low %v7775_v42, %v7779_v1  ;;  %v7826_v59 = vld [vmem:[%s17353_s13 + $0xaa0] sm:$0xff] }
 0x8d6   : > { %10668 = vmatpush1.bf16.msra.mxu0 %v14709_v15  ;;  %v14768_v15 = vcombine.high %v7775_v42, %v7779_v1  ;;  %v14814_v34 = vcombine.high %v7822_v58, %v7826_v59  ;;  %v7830_v42 = vld [vmem:[%s17353_s13 + $0xac0] sm:$0xff] }
 0x8d7   : > { %10832 = vmatpush1.bf16.msra.mxu1 %v14711_v17  ;;  %10669 = vmatprep.subr.bf16.mxu0 %v14718_v33  ;;  %v7782_v17 = vld [vmem:[%s17353_s13 + $0x940] sm:$0xff] }
 0x8d8   : > { %10833 = vmatprep.subr.bf16.mxu1 %v14720_v7  ;;  %v7786_v33 = vld [vmem:[%s17353_s13 + $0x960] sm:$0xff]  ;;  %v7787_v7 = vld [vmem:[%s17353_s13 + $0x968] sm:$0xff] }
 0x8d9   : > { %v14774_v22 = vcombine.high %v7782_v17, %v7786_v33  ;;  %v14776_v24 = vcombine.high %v7783_v19, %v7787_v7  ;;  %v14775_v10 = vcombine.low %v7783_v19, %v7787_v7  ;;  %v7834_v1 = vld [vmem:[%s17353_s13 + $0xae0] sm:$0xff] }
 0x8da   : > { %10670 = vmatpush1.bf16.msra.mxu0 %v14717_v40  ;;  %v7790_v40 = vld [vmem:[%s17353_s13 + $0x980] sm:$0xff] }
 0x8db   : > { %10834 = vmatpush1.bf16.msra.mxu1 %v14719_v44  ;;  %10671 = vmatprep.subr.bf16.mxu0 %v14726_v43  ;;  %v7794_v44 = vld [vmem:[%s17353_s13 + $0x9a0] sm:$0xff]  ;;  %v7791_v43 = vld [vmem:[%s17353_s13 + $0x988] sm:$0xff] }
 0x8dc   : > { %10835 = vmatprep.subr.bf16.mxu1 %v14728_v11  ;;  %v14773_v11 = vcombine.low %v7782_v17, %v7786_v33  ;;  %v14782_v52 = vcombine.high %v7790_v40, %v7794_v44  ;;  %v14784_v45 = vcombine.high %v7791_v43, %v7795_v9  ;;  %v14781_v36 = vcombine.low %v7790_v40, %v7794_v44  ;;  %v7838_v19 = vld [vmem:[%s17353_s13 + $0xb00] sm:$0xff] }
 0x8dd   : > { %v14822_v17 = vcombine.high %v7830_v42, %v7834_v1  ;;  %v7842_v7 = vld [vmem:[%s17353_s13 + $0xb20] sm:$0xff] }
 0x8de   : > { %10672 = vmatpush1.bf16.msra.mxu0 %v14725_v30  ;;  %v7802_v30 = vld [vmem:[%s17353_s13 + $0x9e0] sm:$0xff]  ;;  %v14830_v40 = vcombine.high %v7838_v19, %v7842_v7 }
 0x8df   : > { %10836 = vmatpush1.bf16.msra.mxu1 %v14727_v31  ;;  %10682 = vmatprep.subr.bf16.mxu0 %v14734_v32  ;;  %v7799_v31 = vld [vmem:[%s17353_s13 + $0x9c8] sm:$0xff]  ;;  %v14790_v63 = vcombine.high %v7798_v28, %v7802_v30 }
 0x8e0   : > { %10846 = vmatprep.subr.bf16.mxu1 %v14736_v35  ;;  %v7803_v32 = vld [vmem:[%s17353_s13 + $0x9e8] sm:$0xff]  ;;  %v14783_v35 = vcombine.low %v7791_v43, %v7795_v9  ;;  %v7846_v43 = vld [vmem:[%s17353_s13 + $0xb40] sm:$0xff] }
 0x8e1   : > { %10674 = vmatmul.mubr.bf16.vlgmr.msra.gmra.mrb[8].mxu0 %v18224_v39  ;;  %v14792_v12 = vcombine.high %v7799_v31, %v7803_v32  ;;  %v7850_v9 = vld [vmem:[%s17353_s13 + $0xb60] sm:$0xff] }
 0x8e2   : > { %10838 = vmatmul.mubr.bf16.vlgmr.msra.gmra.mrb[8].mxu1 %v18224_v39  ;;  %10683 = vmatpush1.bf16.msra.mxu0 %v14733_v38  ;;  %v7807_v38 = vld [vmem:[%s17353_s13 + $0xa08] sm:$0xff] }
 0x8e3   : > { %10847 = vmatpush1.bf16.msra.mxu1 %v14735_v41  ;;  %10684 = vmatprep.subr.bf16.mxu0 %v14742_v8  ;;  %v7811_v41 = vld [vmem:[%s17353_s13 + $0xa28] sm:$0xff]  ;;  %v14789_v8 = vcombine.low %v7798_v28, %v7802_v30  ;;  %v14838_v28 = vcombine.high %v7846_v43, %v7850_v9 }
 0x8e4   : > { %10848 = vmatprep.subr.bf16.mxu1 %v14744_v14  ;;  %v14791_v14 = vcombine.low %v7799_v31, %v7803_v32  ;;  %v14800_v4 = vcombine.high %v7807_v38, %v7811_v41  ;;  %v7854_v31 = vld [vmem:[%s17353_s13 + $0xb80] sm:$0xff] }
 0x8e5   : > { %v7858_v32 = vld [vmem:[%s17353_s13 + $0xba0] sm:$0xff] }
 0x8e6   : > { %10685 = vmatpush1.bf16.msra.mxu0 %v14741_v48  ;;  %v7815_v48 = vld [vmem:[%s17353_s13 + $0xa48] sm:$0xff] }
 0x8e7   : > { %10849 = vmatpush1.bf16.msra.mxu1 %v14743_v50  ;;  %10686 = vmatprep.subr.bf16.mxu0 %v14750_v51  ;;  %v7819_v50 = vld [vmem:[%s17353_s13 + $0xa68] sm:$0xff]  ;;  %v14797_v51 = vcombine.low %v7806_v16, %v7810_v37  ;;  %v14846_v16 = vcombine.high %v7854_v31, %v7858_v32 }
 0x8e8   : > { %10850 = vmatprep.subr.bf16.mxu1 %v14752_v53  ;;  %v14799_v53 = vcombine.low %v7807_v38, %v7811_v41  ;;  %v14808_v5 = vcombine.high %v7815_v48, %v7819_v50  ;;  %v7862_v38 = vld [vmem:[%s17353_s13 + $0xbc0] sm:$0xff] }
 0x8e9   : > { %v7866_v41 = vld [vmem:[%s17353_s13 + $0xbe0] sm:$0xff] }
 0x8ea   : > { %10687 = vmatpush1.bf16.msra.mxu0 %v14749_v60  ;;  %v7823_v60 = vld [vmem:[%s17353_s13 + $0xa88] sm:$0xff] }
 0x8eb   : > { %10851 = vmatpush1.bf16.msra.mxu1 %v14751_v61  ;;  %10688 = vmatprep.subr.bf16.mxu0 %v14758_v62  ;;  %v7827_v61 = vld [vmem:[%s17353_s13 + $0xaa8] sm:$0xff]  ;;  %v14805_v62 = vcombine.low %v7814_v25, %v7818_v47  ;;  %v14854_v25 = vcombine.high %v7862_v38, %v7866_v41 }
 0x8ec   : > { %10852 = vmatprep.subr.bf16.mxu1 %v14760_v27  ;;  %v14807_v27 = vcombine.low %v7815_v48, %v7819_v50  ;;  %v14816_v26 = vcombine.high %v7823_v60, %v7827_v61  ;;  %v7870_v48 = vld [vmem:[%s17353_s13 + $0xc00] sm:$0xff] }
 0x8ed   : > { %v7874_v50 = vld [vmem:[%s17353_s13 + $0xc20] sm:$0xff] }
 0x8ee   : > { %10689 = vmatpush1.bf16.msra.mxu0 %v14757_v2  ;;  %v7831_v2 = vld [vmem:[%s17353_s13 + $0xac8] sm:$0xff] }
 0x8ef   : > { %10853 = vmatpush1.bf16.msra.mxu1 %v14759_v6  ;;  %10690 = vmatprep.subr.bf16.mxu0 %v14766_v13  ;;  %v7835_v6 = vld [vmem:[%s17353_s13 + $0xae8] sm:$0xff]  ;;  %v14813_v13 = vcombine.low %v7822_v58, %v7826_v59  ;;  %v14862_v58 = vcombine.high %v7870_v48, %v7874_v50 }
 0x8f0   : > { %10854 = vmatprep.subr.bf16.mxu1 %v14768_v15  ;;  %v14815_v15 = vcombine.low %v7823_v60, %v7827_v61  ;;  %v14824_v33 = vcombine.high %v7831_v2, %v7835_v6  ;;  %v4216_v60 = vsub.s32 4, %v17463_v56  ;;  %v4220_v61 = vsub.s32 5, %v17463_v56 }
 0x8f2   : > { %10691 = vmatpush1.bf16.msra.mxu0 %v14765_v20  ;;  %v7839_v20 = vld [vmem:[%s17353_s13 + $0xb08] sm:$0xff] }
 0x8f3   : > { %10855 = vmatpush1.bf16.msra.mxu1 %v14767_v21  ;;  %10692 = vmatprep.subr.bf16.mxu0 %v14774_v22  ;;  %v7843_v21 = vld [vmem:[%s17353_s13 + $0xb28] sm:$0xff]  ;;  %v14821_v22 = vcombine.low %v7830_v42, %v7834_v1 }
 0x8f4   : > { %10856 = vmatprep.subr.bf16.mxu1 %v14776_v24  ;;  %v14823_v24 = vcombine.low %v7831_v2, %v7835_v6  ;;  %v14832_v44 = vcombine.high %v7839_v20, %v7843_v21 }
 0x8f6   : > { %10693 = vmatpush1.bf16.msra.mxu0 %v14773_v11  ;;  %v7847_v11 = vld [vmem:[%s17353_s13 + $0xb48] sm:$0xff] }
 0x8f7   : > { %10857 = vmatpush1.bf16.msra.mxu1 %v14775_v10  ;;  %10694 = vmatprep.subr.bf16.mxu0 %v14782_v52  ;;  %v7851_v10 = vld [vmem:[%s17353_s13 + $0xb68] sm:$0xff]  ;;  %v14829_v52 = vcombine.low %v7838_v19, %v7842_v7 }
 0x8f8   : > { %10858 = vmatprep.subr.bf16.mxu1 %v14784_v45  ;;  %v14831_v45 = vcombine.low %v7839_v20, %v7843_v21  ;;  %v14840_v30 = vcombine.high %v7847_v11, %v7851_v10 }
 0x8fa   : > { %10695 = vmatpush1.bf16.msra.mxu0 %v14781_v36  ;;  %v7855_v36 = vld [vmem:[%s17353_s13 + $0xb88] sm:$0xff] }
 0x8fb   : > { %10859 = vmatpush1.bf16.msra.mxu1 %v14783_v35  ;;  %10696 = vmatprep.subr.bf16.mxu0 %v14790_v63  ;;  %v7859_v35 = vld [vmem:[%s17353_s13 + $0xba8] sm:$0xff]  ;;  %v14837_v63 = vcombine.low %v7846_v43, %v7850_v9  ;;  %v7878_v43 = vld [vmem:[%s17353_s13 + $0xc40] sm:$0xff] }
 0x8fc   : > { %10860 = vmatprep.subr.bf16.mxu1 %v14792_v12  ;;  %v14839_v12 = vcombine.low %v7847_v11, %v7851_v10  ;;  %v14848_v37 = vcombine.high %v7855_v36, %v7859_v35  ;;  %v7882_v11 = vld [vmem:[%s17353_s13 + $0xc60] sm:$0xff]  ;;  %v7879_v10 = vld [vmem:[%s17353_s13 + $0xc48] sm:$0xff] }
 0x8fe   : > { %10697 = vmatpush1.bf16.msra.mxu0 %v14789_v8  ;;  %v7863_v8 = vld [vmem:[%s17353_s13 + $0xbc8] sm:$0xff] }
 0x8ff   : > { %10861 = vmatpush1.bf16.msra.mxu1 %v14791_v14  ;;  %10698 = vmatprep.subr.bf16.mxu0 %v14798_v46  ;;  %v7867_v14 = vld [vmem:[%s17353_s13 + $0xbe8] sm:$0xff]  ;;  %v14845_v46 = vcombine.low %v7854_v31, %v7858_v32 }
 0x900   : > { %10862 = vmatprep.subr.bf16.mxu1 %v14800_v4  ;;  %v14847_v4 = vcombine.low %v7855_v36, %v7859_v35  ;;  %v14856_v47 = vcombine.high %v7863_v8, %v7867_v14  ;;  %v7886_v36 = vld [vmem:[%s17353_s13 + $0xc80] sm:$0xff]  ;;  %v14870_v35 = vcombine.high %v7878_v43, %v7882_v11 }
 0x902   : > { %10699 = vmatpush1.bf16.msra.mxu0 %v14797_v51  ;;  %v7871_v51 = vld [vmem:[%s17353_s13 + $0xc08] sm:$0xff] }
 0x903   : > { %10863 = vmatpush1.bf16.msra.mxu1 %v14799_v53  ;;  %10700 = vmatprep.subr.bf16.mxu0 %v14806_v55  ;;  %v7875_v53 = vld [vmem:[%s17353_s13 + $0xc28] sm:$0xff]  ;;  %v14853_v55 = vcombine.low %v7862_v38, %v7866_v41  ;;  %v14869_v41 = vcombine.low %v7878_v43, %v7882_v11 }
 0x904   : > { %10864 = vmatprep.subr.bf16.mxu1 %v14808_v5  ;;  %v14855_v5 = vcombine.low %v7863_v8, %v7867_v14  ;;  %v14864_v59 = vcombine.high %v7871_v51, %v7875_v53  ;;  %v14863_v31 = vcombine.low %v7871_v51, %v7875_v53 }
 0x906   : > { %10701 = vmatpush1.bf16.msra.mxu0 %v14805_v62  ;;  %v4228_v62 = vsub.s32 7, %v17463_v56 }
 0x907   : > { %10865 = vmatpush1.bf16.msra.mxu1 %v14807_v27  ;;  %10702 = vmatprep.subr.bf16.mxu0 %v14814_v34  ;;  %v18293_v27 = vld [vmem:[%s756_s26] sm:$0xff] }
 0x908   : > { %10866 = vmatprep.subr.bf16.mxu1 %v14816_v26  ;;  %v4217_v34 = vrot.slane %v18293_v27, %v4216_v60  ;;  %v4221_v26 = vrot.slane %v18293_v27, %v4220_v61  ;;  %v4229_v42 = vrot.slane %v18293_v27, %v4228_v62 }
 0x90a   : > { %10703 = vmatpush1.bf16.msra.mxu0 %v14813_v13 }
 0x90b   : > { %10867 = vmatpush1.bf16.msra.mxu1 %v14815_v15  ;;  %10704 = vmatprep.subr.bf16.mxu0 %v14822_v17 }
 0x90c   : > { %10868 = vmatprep.subr.bf16.mxu1 %v14824_v33 }
 0x90e   : > { %10705 = vmatpush1.bf16.msra.mxu0 %v14821_v22 }
 0x90f   : > { %10869 = vmatpush1.bf16.msra.mxu1 %v14823_v24  ;;  %10706 = vmatprep.subr.bf16.mxu0 %v14830_v40 }
 0x910   : > { %10870 = vmatprep.subr.bf16.mxu1 %v14832_v44 }
 0x912   : > { %10707 = vmatpush1.bf16.msra.mxu0 %v14829_v52  ;;  %v7883_v52 = vld [vmem:[%s17353_s13 + $0xc68] sm:$0xff] }
 0x913   : > { %10871 = vmatpush1.bf16.msra.mxu1 %v14831_v45  ;;  %10708 = vmatprep.subr.bf16.mxu0 %v14838_v28  ;;  %v14871_v8 = vcombine.low %v7879_v10, %v7883_v52 }
 0x914   : > { %10872 = vmatprep.subr.bf16.mxu1 %v14840_v30  ;;  %v14861_v30 = vcombine.low %v7870_v48, %v7874_v50  ;;  %v7899_v48 = vld [vmem:[%s17353_s13 + $0xce8] sm:$0xff] }
 0x916   : > { %10709 = vmatpush1.bf16.msra.mxu0 %v14837_v63  ;;  %v14872_v63 = vcombine.high %v7879_v10, %v7883_v52  ;;  %v7926_v52 = vld [vmem:[%s17353_s13 + $0xdc0] sm:$0xff] }
 0x917   : > { %10873 = vmatpush1.bf16.msra.mxu1 %v14839_v12  ;;  %10710 = vmatprep.subr.bf16.mxu0 %v14846_v16  ;;  %v7890_v12 = vld [vmem:[%s17353_s13 + $0xca0] sm:$0xff]  ;;  %v7887_v16 = vld [vmem:[%s17353_s13 + $0xc88] sm:$0xff] }
 0x918   : > { %10874 = vmatprep.subr.bf16.mxu1 %v14848_v37  ;;  %v7891_v37 = vld [vmem:[%s17353_s13 + $0xca8] sm:$0xff]  ;;  %v14878_v14 = vcombine.high %v7886_v36, %v7890_v12  ;;  %v14877_v50 = vcombine.low %v7886_v36, %v7890_v12 }
 0x919   : > { %v14879_v51 = vcombine.low %v7887_v16, %v7891_v37 }
 0x91a   : > { %10711 = vmatpush1.bf16.msra.mxu0 %v14845_v46  ;;  %v14880_v46 = vcombine.high %v7887_v16, %v7891_v37  ;;  %v7934_v16 = vld [vmem:[%s17353_s13 + $0xe00] sm:$0xff] }
 0x91b   : > { %10875 = vmatpush1.bf16.msra.mxu1 %v14847_v4  ;;  %10712 = vmatprep.subr.bf16.mxu0 %v14854_v25  ;;  %v7894_v4 = vld [vmem:[%s17353_s13 + $0xcc0] sm:$0xff] }
 0x91c   : > { %10876 = vmatprep.subr.bf16.mxu1 %v14856_v47  ;;  %v7898_v25 = vld [vmem:[%s17353_s13 + $0xce0] sm:$0xff]  ;;  %v7895_v47 = vld [vmem:[%s17353_s13 + $0xcc8] sm:$0xff] }
 0x91d   : > { %v14886_v53 = vcombine.high %v7894_v4, %v7898_v25  ;;  %v7938_v37 = vld [vmem:[%s17353_s13 + $0xe20] sm:$0xff] }
 0x91e   : > { %10713 = vmatpush1.bf16.msra.mxu0 %v14853_v55  ;;  %v14888_v55 = vcombine.high %v7895_v47, %v7899_v48 }
 0x91f   : > { %10877 = vmatpush1.bf16.msra.mxu1 %v14855_v5  ;;  %10723 = vmatprep.subr.bf16.mxu0 %v14862_v58  ;;  %v7902_v5 = vld [vmem:[%s17353_s13 + $0xd00] sm:$0xff] }
 0x920   : > { %10887 = vmatprep.subr.bf16.mxu1 %v14864_v59  ;;  %v7906_v58 = vld [vmem:[%s17353_s13 + $0xd20] sm:$0xff]  ;;  %v7903_v59 = vld [vmem:[%s17353_s13 + $0xd08] sm:$0xff] }
 0x934   : > { %v7283_v1 = vpop.f32.mrb[4].mxu0  ;;  %v18304_v6 = vpop.f32.mrb[4].mxu1 }
 0x935   : > { %v15299_v2 = vadd.f32 %v7283_v1, %v4217_v34  ;;  %v7285_v13 = vpop.f32.mrb[5].mxu0  ;;  %v7449_v17 = vpop.f32.mrb[5].mxu1  ;;  %v7907_v34 = vld [vmem:[%s17353_s13 + $0xd28] sm:$0xff]  ;;  %v14894_v1 = vcombine.high %v7902_v5, %v7906_v58 }
 0x936   : > { %v15300_v15 = vadd.f32 %v7285_v13, %v4221_v26  ;;  %v7287_v33 = vpop.f32.mrb[6].mxu0  ;;  %v15302_v7 = vadd.f32 %v7449_v17, %v4229_v42  ;;  %v7451_v20 = vpop.f32.mrb[6].mxu1  ;;  %v14885_v26 = vcombine.low %v7894_v4, %v7898_v25  ;;  %v14887_v42 = vcombine.low %v7895_v47, %v7899_v48  ;;  %v7910_v13 = vld [vmem:[%s17353_s13 + $0xd40] sm:$0xff]  ;;  %v7911_v17 = vld [vmem:[%s17353_s13 + $0xd48] sm:$0xff] }
 0x937   : > { %vm7458_vm5 = vcmp.ge.f32.partialorder %v15299_v2, 0.0  ;;  %v7466_v19 = vmul.f32 0.2, %v15299_v2  ;;  %v7288_v21 = vpop.f32.mrb[7].mxu0  ;;  %v7452_v44 = vpop.f32.mrb[7].mxu1  ;;  %v7915_v33 = vld [vmem:[%s17353_s13 + $0xd68] sm:$0xff]  ;;  %v14926_v4 = vcombine.high %v7934_v16, %v7938_v37 }
 0x938   : > { %vm7459_vm6 = vcmp.ge.f32.partialorder %v15300_v15, 0.0  ;;  %v7467_v22 = vmul.f32 0.2, %v15300_v15  ;;  %vm7461_vm7 = vcmp.ge.f32.partialorder %v15302_v7, 0.0  ;;  %v7469_v40 = vmul.f32 0.2, %v15302_v7 }
 0x939   : > { %v7474_v24 = vsel %vm7458_vm5, %v15299_v2, %v7466_v19  ;;  %v14896_v2 = vcombine.high %v7903_v59, %v7907_v34  ;;  %v14893_v19 = vcombine.low %v7902_v5, %v7906_v58  ;;  %v14904_v21 = vcombine.high %v7911_v17, %v7915_v33  ;;  %v7923_v44 = vld [vmem:[%s17353_s13 + $0xda8] sm:$0xff]  ;;  %v7942_v47 = vld [vmem:[%s17353_s13 + $0xe40] sm:$0xff] }
 0x93a   : > { %v7475_v9 = vsel %vm7459_vm6, %v15300_v15, %v7467_v22  ;;  %v7477_v28 = vsel %vm7461_vm7, %v15302_v7, %v7469_v40  ;;  %v18312_v32 = vpack.c.bf16 %v7474_v24, %v7474_v24  ;;  %v7914_v15 = vld [vmem:[%s17353_s13 + $0xd60] sm:$0xff]  ;;  %v14895_v7 = vcombine.low %v7903_v59, %v7907_v34  ;;  %v7919_v40 = vld [vmem:[%s17353_s13 + $0xd88] sm:$0xff] }
 0x93b   : > { %v18310_v45 = vpack.c.bf16 %v7475_v9, %v7475_v9  ;;  %v18320_v38 = vpack.c.bf16 %v7477_v28, %v7477_v28  ;;  %v14902_v20 = vcombine.high %v7910_v13, %v7914_v15  ;;  %v7918_v22 = vld [vmem:[%s17353_s13 + $0xd80] sm:$0xff]  ;;  %v14901_v43 = vcombine.low %v7910_v13, %v7914_v15 }
 0x93c   : > { %v7922_v24 = vld [vmem:[%s17353_s13 + $0xda0] sm:$0xff]  ;;  %v14903_v9 = vcombine.low %v7911_v17, %v7915_v33  ;;  %v14912_v10 = vcombine.high %v7919_v40, %v7923_v44 }
 0x93d   : > { %10714 = vmatprep.mubr.bf16.mxu0 %v18310_v45  ;;  %10878 = vmatprep.mubr.bf16.mxu1 %v18310_v45  ;;  %v14910_v11 = vcombine.high %v7918_v22, %v7922_v24  ;;  %v7930_v28 = vld [vmem:[%s17353_s13 + $0xde0] sm:$0xff]  ;;  %v14909_v36 = vcombine.low %v7918_v22, %v7922_v24 }
 0x93e   : > { %10715 = vmatmul.mubr.bf16.vlgmr.msra.gmra.mrb[8].mxu0 %v18312_v32  ;;  %10879 = vmatmul.mubr.bf16.vlgmr.msra.gmra.mrb[8].mxu1 %v18312_v32  ;;  %v7946_v48 = vld [vmem:[%s17353_s13 + $0xe60] sm:$0xff] }
 0x93f   : > { %10724 = vmatpush1.bf16.msra.mxu0 %v14861_v30  ;;  %10888 = vmatpush1.bf16.msra.mxu1 %v14863_v31  ;;  %v7927_v30 = vld [vmem:[%s17353_s13 + $0xdc8] sm:$0xff]  ;;  %v14934_v5 = vcombine.high %v7942_v47, %v7946_v48  ;;  %v7950_v59 = vld [vmem:[%s17353_s13 + $0xe80] sm:$0xff] }
 0x940   : > { %10755 = vmatprep.mubr.bf16.mxu0 %v18320_v38  ;;  %10919 = vmatprep.mubr.bf16.mxu1 %v18320_v38  ;;  %v7931_v31 = vld [vmem:[%s17353_s13 + $0xde8] sm:$0xff]  ;;  %v7954_v34 = vld [vmem:[%s17353_s13 + $0xea0] sm:$0xff] }
 0x941   : > { %10725 = vmatprep.subr.bf16.mxu0 %v14870_v35  ;;  %10889 = vmatprep.subr.bf16.mxu1 %v14872_v63  ;;  %v14911_v35 = vcombine.low %v7919_v40, %v7923_v44  ;;  %v14918_v63 = vcombine.high %v7926_v52, %v7930_v28  ;;  %v14920_v12 = vcombine.high %v7927_v30, %v7931_v31  ;;  %v7958_v17 = vld [vmem:[%s17353_s13 + $0xec0] sm:$0xff] }
 0x942   : > { %v14942_v13 = vcombine.high %v7950_v59, %v7954_v34  ;;  %v7962_v33 = vld [vmem:[%s17353_s13 + $0xee0] sm:$0xff] }
 0x943   : > { %10726 = vmatpush1.bf16.msra.mxu0 %v14869_v41  ;;  %10890 = vmatpush1.bf16.msra.mxu1 %v14871_v8  ;;  %v7935_v41 = vld [vmem:[%s17353_s13 + $0xe08] sm:$0xff]  ;;  %v14950_v22 = vcombine.high %v7958_v17, %v7962_v33  ;;  %v7966_v40 = vld [vmem:[%s17353_s13 + $0xf00] sm:$0xff] }
 0x944   : > { %10727 = vmatprep.subr.bf16.mxu0 %v14878_v14  ;;  %10891 = vmatprep.subr.bf16.mxu1 %v14880_v46  ;;  %v7939_v8 = vld [vmem:[%s17353_s13 + $0xe28] sm:$0xff]  ;;  %v14917_v14 = vcombine.low %v7926_v52, %v7930_v28  ;;  %v14919_v46 = vcombine.low %v7927_v30, %v7931_v31  ;;  %v7970_v44 = vld [vmem:[%s17353_s13 + $0xf20] sm:$0xff]  ;;  %v4224_v31 = vsub.s32 6, %v17463_v56 }
 0x945   : > { %v14928_v25 = vcombine.high %v7935_v41, %v7939_v8  ;;  %v14958_v52 = vcombine.high %v7966_v40, %v7970_v44  ;;  %v7974_v30 = vld [vmem:[%s17353_s13 + $0xf40] sm:$0xff] }
 0x947   : > { %10728 = vmatpush1.bf16.msra.mxu0 %v14877_v50  ;;  %10892 = vmatpush1.bf16.msra.mxu1 %v14879_v51  ;;  %v7943_v50 = vld [vmem:[%s17353_s13 + $0xe48] sm:$0xff] }
 0x948   : > { %10729 = vmatprep.subr.bf16.mxu0 %v14886_v53  ;;  %10893 = vmatprep.subr.bf16.mxu1 %v14888_v55  ;;  %v7947_v51 = vld [vmem:[%s17353_s13 + $0xe68] sm:$0xff]  ;;  %v14925_v53 = vcombine.low %v7934_v16, %v7938_v37  ;;  %v14927_v55 = vcombine.low %v7935_v41, %v7939_v8  ;;  %v7982_v8 = vld [vmem:[%s17353_s13 + $0xf80] sm:$0xff] }
 0x949   : > { %v14936_v58 = vcombine.high %v7943_v50, %v7947_v51 }
 0x94b   : > { %10730 = vmatpush1.bf16.msra.mxu0 %v14885_v26  ;;  %10894 = vmatpush1.bf16.msra.mxu1 %v14887_v42  ;;  %v7951_v26 = vld [vmem:[%s17353_s13 + $0xe88] sm:$0xff] }
 0x94c   : > { %10731 = vmatprep.subr.bf16.mxu0 %v14894_v1  ;;  %10895 = vmatprep.subr.bf16.mxu1 %v14896_v2  ;;  %v7955_v42 = vld [vmem:[%s17353_s13 + $0xea8] sm:$0xff]  ;;  %v14933_v1 = vcombine.low %v7942_v47, %v7946_v48  ;;  %v14935_v2 = vcombine.low %v7943_v50, %v7947_v51 }
 0x94d   : > { %v14944_v15 = vcombine.high %v7951_v26, %v7955_v42 }
 0x94f   : > { %10732 = vmatpush1.bf16.msra.mxu0 %v14893_v19  ;;  %10896 = vmatpush1.bf16.msra.mxu1 %v14895_v7  ;;  %v7959_v19 = vld [vmem:[%s17353_s13 + $0xec8] sm:$0xff] }
 0x950   : > { %10733 = vmatprep.subr.bf16.mxu0 %v14902_v20  ;;  %10897 = vmatprep.subr.bf16.mxu1 %v14904_v21  ;;  %v7963_v7 = vld [vmem:[%s17353_s13 + $0xee8] sm:$0xff]  ;;  %v14941_v20 = vcombine.low %v7950_v59, %v7954_v34  ;;  %v14943_v21 = vcombine.low %v7951_v26, %v7955_v42 }
 0x951   : > { %v14952_v24 = vcombine.high %v7959_v19, %v7963_v7 }
 0x953   : > { %10734 = vmatpush1.bf16.msra.mxu0 %v14901_v43  ;;  %10898 = vmatpush1.bf16.msra.mxu1 %v14903_v9  ;;  %v7967_v43 = vld [vmem:[%s17353_s13 + $0xf08] sm:$0xff] }
 0x954   : > { %10735 = vmatprep.subr.bf16.mxu0 %v14910_v11  ;;  %10899 = vmatprep.subr.bf16.mxu1 %v14912_v10  ;;  %v7971_v9 = vld [vmem:[%s17353_s13 + $0xf28] sm:$0xff]  ;;  %v14949_v11 = vcombine.low %v7958_v17, %v7962_v33  ;;  %v14951_v10 = vcombine.low %v7959_v19, %v7963_v7 }
 0x955   : > { %v14960_v28 = vcombine.high %v7967_v43, %v7971_v9  ;;  %v14959_v16 = vcombine.low %v7967_v43, %v7971_v9 }
 0x957   : > { %10736 = vmatpush1.bf16.msra.mxu0 %v14909_v36  ;;  %10900 = vmatpush1.bf16.msra.mxu1 %v14911_v35  ;;  %v7978_v36 = vld [vmem:[%s17353_s13 + $0xf60] sm:$0xff]  ;;  %v7975_v35 = vld [vmem:[%s17353_s13 + $0xf48] sm:$0xff] }
 0x958   : > { %10737 = vmatprep.subr.bf16.mxu0 %v14918_v63  ;;  %10901 = vmatprep.subr.bf16.mxu1 %v14920_v12  ;;  %v7979_v63 = vld [vmem:[%s17353_s13 + $0xf68] sm:$0xff]  ;;  %v14957_v12 = vcombine.low %v7966_v40, %v7970_v44  ;;  %v14966_v37 = vcombine.high %v7974_v30, %v7978_v36  ;;  %v14965_v47 = vcombine.low %v7974_v30, %v7978_v36  ;;  %v7501_v40 = vld [vmem:[%s17353_s13 + $0x78] sm:$0xff] }
 0x959   : > { %v14968_v41 = vcombine.high %v7975_v35, %v7979_v63  ;;  %v14967_v48 = vcombine.low %v7975_v35, %v7979_v63  ;;  %v7505_v30 = vld [vmem:[%s17353_s13 + $0x98] sm:$0xff] }
 0x95a   : > { %v7509_v36 = vld [vmem:[%s17353_s13 + $0xb8] sm:$0xff] }
 0x95b   : > { %10738 = vmatpush1.bf16.msra.mxu0 %v14917_v14  ;;  %10902 = vmatpush1.bf16.msra.mxu1 %v14919_v46  ;;  %v4225_v14 = vrot.slane %v18293_v27, %v4224_v31  ;;  %v7986_v46 = vld [vmem:[%s17353_s13 + $0xfa0] sm:$0xff] }
 0x95c   : > { %10739 = vmatprep.subr.bf16.mxu0 %v14926_v4  ;;  %10903 = vmatprep.subr.bf16.mxu1 %v14928_v25  ;;  %v7983_v4 = vld [vmem:[%s17353_s13 + $0xf88] sm:$0xff]  ;;  %v14974_v50 = vcombine.high %v7982_v8, %v7986_v46  ;;  %v7994_v27 = vld [vmem:[%s17353_s13 + $0xfe0] sm:$0xff]  ;;  %v14973_v59 = vcombine.low %v7982_v8, %v7986_v46  ;;  %v7513_v8 = vld [vmem:[%s17353_s13 + $0xd8] sm:$0xff] }
 0x95d   : > { %v7987_v25 = vld [vmem:[%s17353_s13 + $0xfa8] sm:$0xff] }
 0x95e   : > { %v14976_v51 = vcombine.high %v7983_v4, %v7987_v25  ;;  %v14975_v34 = vcombine.low %v7983_v4, %v7987_v25  ;;  %v14499_v4 = vcombine.low %v7505_v30, %v7509_v36 }
 0x95f   : > { %10740 = vmatpush1.bf16.msra.mxu0 %v14925_v53  ;;  %10904 = vmatpush1.bf16.msra.mxu1 %v14927_v55  ;;  %v7990_v53 = vld [vmem:[%s17353_s13 + $0xfc0] sm:$0xff]  ;;  %v15301_v55 = vadd.f32 %v18304_v6, %v4225_v14  ;;  %v7489_v6 = vld [vmem:[%s17353_s13 + $0x18] sm:$0xff] }
 0x960   : > { %10741 = vmatprep.subr.bf16.mxu0 %v14934_v5  ;;  %10905 = vmatprep.subr.bf16.mxu1 %v14936_v58  ;;  %v7991_v5 = vld [vmem:[%s17353_s13 + $0xfc8] sm:$0xff]  ;;  %v14982_v26 = vcombine.high %v7990_v53, %v7994_v27  ;;  %v14981_v17 = vcombine.low %v7990_v53, %v7994_v27  ;;  %v7517_v14 = vld [vmem:[%s17353_s13 + $0xf8] sm:$0xff] }
 0x961   : > { %v7995_v58 = vld [vmem:[%s17353_s13 + $0xfe8] sm:$0xff]  ;;  %vm7460_vm8 = vcmp.ge.f32.partialorder %v15301_v55, 0.0  ;;  %v14508_v25 = vcombine.high %v7513_v8, %v7517_v14 }
 0x962   : > { %v14984_v42 = vcombine.high %v7991_v5, %v7995_v58  ;;  %v14983_v33 = vcombine.low %v7991_v5, %v7995_v58  ;;  %v7528_v58 = vld [vmem:[%s17353_s13 + $0x150] sm:$0xff] }
 0x963   : > { %10742 = vmatpush1.bf16.msra.mxu0 %v14933_v1  ;;  %10906 = vmatpush1.bf16.msra.mxu1 %v14935_v2  ;;  %v7488_v1 = vld [vmem:[%s17353_s13 + $0x10] sm:$0xff]  ;;  %v7468_v2 = vmul.f32 0.2, %v15301_v55 }
 0x964   : > { %10743 = vmatprep.subr.bf16.mxu0 %v14942_v13  ;;  %10907 = vmatprep.subr.bf16.mxu1 %v14944_v15  ;;  %v7492_v13 = vld [vmem:[%s17353_s13 + $0x30] sm:$0xff]  ;;  %v7493_v15 = vld [vmem:[%s17353_s13 + $0x38] sm:$0xff] }
 0x965   : > { %v14482_v19 = vcombine.high %v7488_v1, %v7492_v13  ;;  %v14484_v7 = vcombine.high %v7489_v6, %v7493_v15  ;;  %v14481_v44 = vcombine.low %v7488_v1, %v7492_v13  ;;  %v14483_v9 = vcombine.low %v7489_v6, %v7493_v15  ;;  %v7536_v6 = vld [vmem:[%s17353_s13 + $0x190] sm:$0xff] }
 0x966   : > { %v7540_v15 = vld [vmem:[%s17353_s13 + $0x1b0] sm:$0xff] }
 0x967   : > { %10744 = vmatpush1.bf16.msra.mxu0 %v14941_v20  ;;  %10908 = vmatpush1.bf16.msra.mxu1 %v14943_v21  ;;  %v7476_v20 = vsel %vm7460_vm8, %v15301_v55, %v7468_v2  ;;  %v7496_v21 = vld [vmem:[%s17353_s13 + $0x50] sm:$0xff]  ;;  %v14507_v55 = vcombine.low %v7513_v8, %v7517_v14  ;;  %v7561_v14 = vld [vmem:[%s17353_s13 + $0x258] sm:$0xff] }
 0x968   : > { %10745 = vmatprep.subr.bf16.mxu0 %v14950_v22  ;;  %10909 = vmatprep.subr.bf16.mxu1 %v14952_v24  ;;  %v7500_v22 = vld [vmem:[%s17353_s13 + $0x70] sm:$0xff]  ;;  %v7497_v24 = vld [vmem:[%s17353_s13 + $0x58] sm:$0xff]  ;;  %v18391_v43 = vpack.c.bf16 %v7476_v20, %v7476_v20  ;;  %v14530_v20 = vcombine.high %v7536_v6, %v7540_v15 }
 0x969   : > { %v14489_v35 = vcombine.low %v7496_v21, %v7500_v22  ;;  %v14491_v63 = vcombine.low %v7497_v24, %v7501_v40  ;;  %v7564_v8 = vld [vmem:[%s17353_s13 + $0x270] sm:$0xff] }
 0x96b   : > { %10746 = vmatpush1.bf16.msra.mxu0 %v14949_v11  ;;  %10910 = vmatpush1.bf16.msra.mxu1 %v14951_v10  ;;  %v14490_v11 = vcombine.high %v7496_v21, %v7500_v22  ;;  %v14492_v10 = vcombine.high %v7497_v24, %v7501_v40  ;;  %v7544_v22 = vld [vmem:[%s17353_s13 + $0x1d0] sm:$0xff]  ;;  %v7545_v40 = vld [vmem:[%s17353_s13 + $0x1d8] sm:$0xff] }
 0x96c   : > { %10747 = vmatprep.subr.bf16.mxu0 %v14958_v52  ;;  %10911 = vmatprep.subr.bf16.mxu1 %v14960_v28  ;;  %v7504_v52 = vld [vmem:[%s17353_s13 + $0x90] sm:$0xff] }
 0x96d   : > { %v7508_v28 = vld [vmem:[%s17353_s13 + $0xb0] sm:$0xff] }
 0x96e   : > { %v14497_v46 = vcombine.low %v7504_v52, %v7508_v28  ;;  %v7548_v24 = vld [vmem:[%s17353_s13 + $0x1f0] sm:$0xff] }
 0x96f   : > { %10748 = vmatpush1.bf16.msra.mxu0 %v14957_v12  ;;  %10912 = vmatpush1.bf16.msra.mxu1 %v14959_v16  ;;  %v14498_v12 = vcombine.high %v7504_v52, %v7508_v28  ;;  %v14500_v16 = vcombine.high %v7505_v30, %v7509_v36  ;;  %v7552_v28 = vld [vmem:[%s17353_s13 + $0x210] sm:$0xff]  ;;  %v7553_v36 = vld [vmem:[%s17353_s13 + $0x218] sm:$0xff] }
 0x970   : > { %10749 = vmatprep.subr.bf16.mxu0 %v14966_v37  ;;  %10913 = vmatprep.subr.bf16.mxu1 %v14968_v41  ;;  %v7512_v37 = vld [vmem:[%s17353_s13 + $0xd0] sm:$0xff] }
 0x971   : > { %v7516_v41 = vld [vmem:[%s17353_s13 + $0xf0] sm:$0xff] }
 0x972   : > { %v14505_v53 = vcombine.low %v7512_v37, %v7516_v41  ;;  %v7556_v30 = vld [vmem:[%s17353_s13 + $0x230] sm:$0xff] }
 0x973   : > { %10750 = vmatpush1.bf16.msra.mxu0 %v14965_v47  ;;  %10914 = vmatpush1.bf16.msra.mxu1 %v14967_v48  ;;  %v7520_v47 = vld [vmem:[%s17353_s13 + $0x110] sm:$0xff] }
 0x974   : > { %10751 = vmatprep.subr.bf16.mxu0 %v14974_v50  ;;  %10915 = vmatprep.subr.bf16.mxu1 %v14976_v51  ;;  %v7524_v48 = vld [vmem:[%s17353_s13 + $0x130] sm:$0xff]  ;;  %v7521_v50 = vld [vmem:[%s17353_s13 + $0x118] sm:$0xff] }
 0x975   : > { %v7525_v51 = vld [vmem:[%s17353_s13 + $0x138] sm:$0xff]  ;;  %v14514_v27 = vcombine.high %v7520_v47, %v7524_v48 }
 0x976   : > { %v14516_v5 = vcombine.high %v7521_v50, %v7525_v51  ;;  %v14515_v1 = vcombine.low %v7521_v50, %v7525_v51  ;;  %v7572_v50 = vld [vmem:[%s17353_s13 + $0x2b0] sm:$0xff]  ;;  %v7569_v51 = vld [vmem:[%s17353_s13 + $0x298] sm:$0xff] }
 0x977   : > { %10752 = vmatpush1.bf16.msra.mxu0 %v14973_v59  ;;  %10916 = vmatpush1.bf16.msra.mxu1 %v14975_v34  ;;  %v7532_v59 = vld [vmem:[%s17353_s13 + $0x170] sm:$0xff]  ;;  %v7529_v34 = vld [vmem:[%s17353_s13 + $0x158] sm:$0xff] }
 0x978   : > { %10753 = vmatprep.subr.bf16.mxu0 %v14982_v26  ;;  %10917 = vmatprep.subr.bf16.mxu1 %v14984_v42  ;;  %v7533_v26 = vld [vmem:[%s17353_s13 + $0x178] sm:$0xff]  ;;  %v14513_v42 = vcombine.low %v7520_v47, %v7524_v48  ;;  %v14522_v2 = vcombine.high %v7528_v58, %v7532_v59  ;;  %v7568_v48 = vld [vmem:[%s17353_s13 + $0x290] sm:$0xff] }
 0x979   : > { %v14524_v13 = vcombine.high %v7529_v34, %v7533_v26 }
 0x97b   : > { %10754 = vmatpush1.bf16.msra.mxu0 %v14981_v17  ;;  %10918 = vmatpush1.bf16.msra.mxu1 %v14983_v33  ;;  %v7537_v17 = vld [vmem:[%s17353_s13 + $0x198] sm:$0xff] }
 0x97c   : > { %10928 = vmatprep.subr.bf16.mxu0 %v14482_v19  ;;  %11092 = vmatprep.subr.bf16.mxu1 %v14484_v7  ;;  %v7541_v33 = vld [vmem:[%s17353_s13 + $0x1b8] sm:$0xff]  ;;  %v14521_v19 = vcombine.low %v7528_v58, %v7532_v59  ;;  %v14523_v7 = vcombine.low %v7529_v34, %v7533_v26  ;;  %v7576_v59 = vld [vmem:[%s17353_s13 + $0x2d0] sm:$0xff] }
 0x97d   : > { %v14532_v21 = vcombine.high %v7537_v17, %v7541_v33  ;;  %v7580_v34 = vld [vmem:[%s17353_s13 + $0x2f0] sm:$0xff]  ;;  %v7577_v26 = vld [vmem:[%s17353_s13 + $0x2d8] sm:$0xff] }
 0x97e   : > { %10756 = vmatmul.mubr.bf16.vlgmr.msra.gmra.mrb[8].mxu0 %v18391_v43  ;;  %10920 = vmatmul.mubr.bf16.vlgmr.msra.gmra.mrb[8].mxu1 %v18391_v43 }
 0x97f   : > { %10929 = vmatpush1.bf16.msra.mxu0 %v14481_v44  ;;  %10960 = vmatprep.mubr.bf16.mxu0 %v18069_v49  ;;  %v7549_v44 = vld [vmem:[%s17353_s13 + $0x1f8] sm:$0xff] }
 0x980   : > { %11093 = vmatpush1.bf16.msra.mxu1 %v14483_v9  ;;  %11124 = vmatprep.mubr.bf16.mxu1 %v18069_v49  ;;  %v14506_v49 = vcombine.high %v7512_v37, %v7516_v41  ;;  %v14529_v9 = vcombine.low %v7536_v6, %v7540_v15  ;;  %v14540_v52 = vcombine.high %v7545_v40, %v7549_v44  ;;  %v7560_v41 = vld [vmem:[%s17353_s13 + $0x250] sm:$0xff] }
 0x981   : > { %10930 = vmatprep.subr.bf16.mxu0 %v14490_v11  ;;  %11094 = vmatprep.subr.bf16.mxu1 %v14492_v10  ;;  %v14531_v11 = vcombine.low %v7537_v17, %v7541_v33  ;;  %v14538_v10 = vcombine.high %v7544_v22, %v7548_v24  ;;  %v7584_v15 = vld [vmem:[%s17353_s13 + $0x310] sm:$0xff]  ;;  %v7585_v33 = vld [vmem:[%s17353_s13 + $0x318] sm:$0xff] }
 0x982   : > { %v7588_v17 = vld [vmem:[%s17353_s13 + $0x330] sm:$0xff] }
 0x983   : > { %10931 = vmatpush1.bf16.msra.mxu0 %v14489_v35  ;;  %v7557_v35 = vld [vmem:[%s17353_s13 + $0x238] sm:$0xff] }
 0x984   : > { %11095 = vmatpush1.bf16.msra.mxu1 %v14491_v63  ;;  %10932 = vmatprep.subr.bf16.mxu0 %v14498_v12  ;;  %v14537_v63 = vcombine.low %v7544_v22, %v7548_v24  ;;  %v14539_v12 = vcombine.low %v7545_v40, %v7549_v44  ;;  %v14548_v37 = vcombine.high %v7553_v36, %v7557_v35  ;;  %v7592_v24 = vld [vmem:[%s17353_s13 + $0x350] sm:$0xff]  ;;  %v7593_v44 = vld [vmem:[%s17353_s13 + $0x358] sm:$0xff] }
 0x985   : > { %11096 = vmatprep.subr.bf16.mxu1 %v14500_v16  ;;  %v14546_v16 = vcombine.high %v7552_v28, %v7556_v30  ;;  %v7596_v40 = vld [vmem:[%s17353_s13 + $0x370] sm:$0xff] }
 0x987   : > { %10933 = vmatpush1.bf16.msra.mxu0 %v14497_v46  ;;  %v7565_v46 = vld [vmem:[%s17353_s13 + $0x278] sm:$0xff] }
 0x988   : > { %11097 = vmatpush1.bf16.msra.mxu1 %v14499_v4  ;;  %10934 = vmatprep.subr.bf16.mxu0 %v14506_v49  ;;  %v14545_v4 = vcombine.low %v7552_v28, %v7556_v30  ;;  %v14547_v49 = vcombine.low %v7553_v36, %v7557_v35  ;;  %v14556_v47 = vcombine.high %v7561_v14, %v7565_v46  ;;  %v7600_v30 = vld [vmem:[%s17353_s13 + $0x390] sm:$0xff]  ;;  %v7601_v35 = vld [vmem:[%s17353_s13 + $0x398] sm:$0xff] }
 0x989   : > { %11098 = vmatprep.subr.bf16.mxu1 %v14508_v25  ;;  %v14554_v25 = vcombine.high %v7560_v41, %v7564_v8  ;;  %v7604_v36 = vld [vmem:[%s17353_s13 + $0x3b0] sm:$0xff] }
 0x98b   : > { %10935 = vmatpush1.bf16.msra.mxu0 %v14505_v53  ;;  %v7573_v53 = vld [vmem:[%s17353_s13 + $0x2b8] sm:$0xff] }
 0x98c   : > { %11099 = vmatpush1.bf16.msra.mxu1 %v14507_v55  ;;  %10936 = vmatprep.subr.bf16.mxu0 %v14514_v27  ;;  %v14553_v55 = vcombine.low %v7560_v41, %v7564_v8  ;;  %v14555_v27 = vcombine.low %v7561_v14, %v7565_v46  ;;  %v14564_v58 = vcombine.high %v7569_v51, %v7573_v53  ;;  %v7608_v8 = vld [vmem:[%s17353_s13 + $0x3d0] sm:$0xff]  ;;  %v7609_v46 = vld [vmem:[%s17353_s13 + $0x3d8] sm:$0xff] }
 0x98d   : > { %11100 = vmatprep.subr.bf16.mxu1 %v14516_v5  ;;  %v14562_v5 = vcombine.high %v7568_v48, %v7572_v50  ;;  %v7612_v14 = vld [vmem:[%s17353_s13 + $0x3f0] sm:$0xff] }
 0x98f   : > { %10937 = vmatpush1.bf16.msra.mxu0 %v14513_v42  ;;  %v7581_v42 = vld [vmem:[%s17353_s13 + $0x2f8] sm:$0xff] }
 0x990   : > { %11101 = vmatpush1.bf16.msra.mxu1 %v14515_v1  ;;  %10938 = vmatprep.subr.bf16.mxu0 %v14522_v2  ;;  %v14561_v1 = vcombine.low %v7568_v48, %v7572_v50  ;;  %v14563_v2 = vcombine.low %v7569_v51, %v7573_v53  ;;  %v14572_v6 = vcombine.high %v7577_v26, %v7581_v42  ;;  %v7616_v50 = vld [vmem:[%s17353_s13 + $0x410] sm:$0xff]  ;;  %v7617_v53 = vld [vmem:[%s17353_s13 + $0x418] sm:$0xff] }
 0x991   : > { %11102 = vmatprep.subr.bf16.mxu1 %v14524_v13  ;;  %v14570_v13 = vcombine.high %v7576_v59, %v7580_v34  ;;  %v7620_v51 = vld [vmem:[%s17353_s13 + $0x430] sm:$0xff] }
 0x993   : > { %10939 = vmatpush1.bf16.msra.mxu0 %v14521_v19  ;;  %v7589_v19 = vld [vmem:[%s17353_s13 + $0x338] sm:$0xff] }
 0x994   : > { %11103 = vmatpush1.bf16.msra.mxu1 %v14523_v7  ;;  %10940 = vmatprep.subr.bf16.mxu0 %v14530_v20  ;;  %v14569_v7 = vcombine.low %v7576_v59, %v7580_v34  ;;  %v14571_v20 = vcombine.low %v7577_v26, %v7581_v42  ;;  %v14580_v22 = vcombine.high %v7585_v33, %v7589_v19  ;;  %v7624_v34 = vld [vmem:[%s17353_s13 + $0x450] sm:$0xff] }
 0x995   : > { %11104 = vmatprep.subr.bf16.mxu1 %v14532_v21  ;;  %v14578_v21 = vcombine.high %v7584_v15, %v7588_v17  ;;  %v7628_v26 = vld [vmem:[%s17353_s13 + $0x470] sm:$0xff]  ;;  %v14609_v42 = vcombine.low %v7616_v50, %v7620_v51 }
 0x997   : > { %10941 = vmatpush1.bf16.msra.mxu0 %v14529_v9  ;;  %v7597_v9 = vld [vmem:[%s17353_s13 + $0x378] sm:$0xff] }
 0x998   : > { %11105 = vmatpush1.bf16.msra.mxu1 %v14531_v11  ;;  %10942 = vmatprep.subr.bf16.mxu0 %v14538_v10  ;;  %v14577_v11 = vcombine.low %v7584_v15, %v7588_v17  ;;  %v14579_v10 = vcombine.low %v7585_v33, %v7589_v19  ;;  %v14588_v28 = vcombine.high %v7593_v44, %v7597_v9  ;;  %v7632_v15 = vld [vmem:[%s17353_s13 + $0x490] sm:$0xff]  ;;  %v7633_v19 = vld [vmem:[%s17353_s13 + $0x498] sm:$0xff] }
 0x999   : > { %11106 = vmatprep.subr.bf16.mxu1 %v14540_v52  ;;  %v14586_v52 = vcombine.high %v7592_v24, %v7596_v40  ;;  %v7636_v17 = vld [vmem:[%s17353_s13 + $0x4b0] sm:$0xff] }
 0x99b   : > { %10943 = vmatpush1.bf16.msra.mxu0 %v14537_v63  ;;  %v7605_v63 = vld [vmem:[%s17353_s13 + $0x3b8] sm:$0xff] }
 0x99c   : > { %11107 = vmatpush1.bf16.msra.mxu1 %v14539_v12  ;;  %10944 = vmatprep.subr.bf16.mxu0 %v14546_v16  ;;  %v14585_v12 = vcombine.low %v7592_v24, %v7596_v40  ;;  %v14587_v16 = vcombine.low %v7593_v44, %v7597_v9  ;;  %v14596_v41 = vcombine.high %v7601_v35, %v7605_v63  ;;  %v7640_v40 = vld [vmem:[%s17353_s13 + $0x4d0] sm:$0xff]  ;;  %v7641_v9 = vld [vmem:[%s17353_s13 + $0x4d8] sm:$0xff] }
 0x99d   : > { %11108 = vmatprep.subr.bf16.mxu1 %v14548_v37  ;;  %v14594_v37 = vcombine.high %v7600_v30, %v7604_v36  ;;  %v7644_v44 = vld [vmem:[%s17353_s13 + $0x4f0] sm:$0xff] }
 0x99f   : > { %10945 = vmatpush1.bf16.msra.mxu0 %v14545_v4  ;;  %v7613_v4 = vld [vmem:[%s17353_s13 + $0x3f8] sm:$0xff] }
 0x9a0   : > { %11109 = vmatpush1.bf16.msra.mxu1 %v14547_v49  ;;  %10946 = vmatprep.subr.bf16.mxu0 %v14554_v25  ;;  %v14593_v49 = vcombine.low %v7600_v30, %v7604_v36  ;;  %v14595_v25 = vcombine.low %v7601_v35, %v7605_v63  ;;  %v14604_v48 = vcombine.high %v7609_v46, %v7613_v4  ;;  %v7652_v30 = vld [vmem:[%s17353_s13 + $0x530] sm:$0xff]  ;;  %v7649_v36 = vld [vmem:[%s17353_s13 + $0x518] sm:$0xff] }
 0x9a1   : > { %11110 = vmatprep.subr.bf16.mxu1 %v14556_v47  ;;  %v14602_v47 = vcombine.high %v7608_v8, %v7612_v14  ;;  %v7653_v35 = vld [vmem:[%s17353_s13 + $0x538] sm:$0xff]  ;;  %v14633_v63 = vcombine.low %v7640_v40, %v7644_v44 }
 0x9a3   : > { %10947 = vmatpush1.bf16.msra.mxu0 %v14553_v55  ;;  %v7621_v55 = vld [vmem:[%s17353_s13 + $0x438] sm:$0xff] }
 0x9a4   : > { %11111 = vmatpush1.bf16.msra.mxu1 %v14555_v27  ;;  %10948 = vmatprep.subr.bf16.mxu0 %v14562_v5  ;;  %v14601_v27 = vcombine.low %v7608_v8, %v7612_v14  ;;  %v14603_v5 = vcombine.low %v7609_v46, %v7613_v4  ;;  %v14612_v59 = vcombine.high %v7617_v53, %v7621_v55  ;;  %v7660_v8 = vld [vmem:[%s17353_s13 + $0x570] sm:$0xff]  ;;  %v7657_v14 = vld [vmem:[%s17353_s13 + $0x558] sm:$0xff] }
 0x9a5   : > { %11112 = vmatprep.subr.bf16.mxu1 %v14564_v58  ;;  %v14610_v58 = vcombine.high %v7616_v50, %v7620_v51  ;;  %v7661_v46 = vld [vmem:[%s17353_s13 + $0x578] sm:$0xff]  ;;  %v7668_v50 = vld [vmem:[%s17353_s13 + $0x5b0] sm:$0xff] }
 0x9a6   : > { %v7665_v51 = vld [vmem:[%s17353_s13 + $0x598] sm:$0xff] }
 0x9a7   : > { %10949 = vmatpush1.bf16.msra.mxu0 %v14561_v1  ;;  %v7625_v1 = vld [vmem:[%s17353_s13 + $0x458] sm:$0xff] }
 0x9a8   : > { %11113 = vmatpush1.bf16.msra.mxu1 %v14563_v2  ;;  %10950 = vmatprep.subr.bf16.mxu0 %v14570_v13  ;;  %v7629_v2 = vld [vmem:[%s17353_s13 + $0x478] sm:$0xff]  ;;  %v14611_v13 = vcombine.low %v7617_v53, %v7621_v55 }
 0x9a9   : > { %11114 = vmatprep.subr.bf16.mxu1 %v14572_v6  ;;  %v14618_v6 = vcombine.high %v7624_v34, %v7628_v26  ;;  %v14620_v33 = vcombine.high %v7625_v1, %v7629_v2  ;;  %v7669_v53 = vld [vmem:[%s17353_s13 + $0x5b8] sm:$0xff] }
 0x9ab   : > { %10951 = vmatpush1.bf16.msra.mxu0 %v14569_v7  ;;  %v7637_v7 = vld [vmem:[%s17353_s13 + $0x4b8] sm:$0xff] }
 0x9ac   : > { %11115 = vmatpush1.bf16.msra.mxu1 %v14571_v20  ;;  %10952 = vmatprep.subr.bf16.mxu0 %v14578_v21  ;;  %v14617_v20 = vcombine.low %v7624_v34, %v7628_v26  ;;  %v14619_v21 = vcombine.low %v7625_v1, %v7629_v2  ;;  %v14628_v24 = vcombine.high %v7633_v19, %v7637_v7  ;;  %v7676_v34 = vld [vmem:[%s17353_s13 + $0x5f0] sm:$0xff]  ;;  %v7673_v26 = vld [vmem:[%s17353_s13 + $0x5d8] sm:$0xff] }
 0x9ad   : > { %11116 = vmatprep.subr.bf16.mxu1 %v14580_v22  ;;  %v14626_v22 = vcombine.high %v7632_v15, %v7636_v17  ;;  %v14659_v2 = vcombine.low %v7665_v51, %v7669_v53 }
 0x9af   : > { %10953 = vmatpush1.bf16.msra.mxu0 %v14577_v11  ;;  %v14625_v11 = vcombine.low %v7632_v15, %v7636_v17  ;;  %v7680_v15 = vld [vmem:[%s17353_s13 + $0x610] sm:$0xff] }
 0x9b0   : > { %11117 = vmatpush1.bf16.msra.mxu1 %v14579_v10  ;;  %10954 = vmatprep.subr.bf16.mxu0 %v14586_v52  ;;  %v14627_v10 = vcombine.low %v7633_v19, %v7637_v7  ;;  %v14634_v52 = vcombine.high %v7640_v40, %v7644_v44  ;;  %v7684_v17 = vld [vmem:[%s17353_s13 + $0x630] sm:$0xff]  ;;  %v7685_v19 = vld [vmem:[%s17353_s13 + $0x638] sm:$0xff] }
 0x9b1   : > { %11118 = vmatprep.subr.bf16.mxu1 %v14588_v28  ;;  %v7648_v28 = vld [vmem:[%s17353_s13 + $0x510] sm:$0xff]  ;;  %v7689_v44 = vld [vmem:[%s17353_s13 + $0x658] sm:$0xff] }
 0x9b2   : > { %v14641_v4 = vcombine.low %v7648_v28, %v7652_v30  ;;  %v7692_v40 = vld [vmem:[%s17353_s13 + $0x670] sm:$0xff] }
 0x9b3   : > { %10955 = vmatpush1.bf16.msra.mxu0 %v14585_v12 }
 0x9b4   : > { %11119 = vmatpush1.bf16.msra.mxu1 %v14587_v16  ;;  %10956 = vmatprep.subr.bf16.mxu0 %v14594_v37  ;;  %v14642_v16 = vcombine.high %v7648_v28, %v7652_v30  ;;  %v14644_v37 = vcombine.high %v7649_v36, %v7653_v35  ;;  %v7700_v28 = vld [vmem:[%s17353_s13 + $0x6b0] sm:$0xff]  ;;  %v7697_v30 = vld [vmem:[%s17353_s13 + $0x698] sm:$0xff] }
 0x9b5   : > { %11120 = vmatprep.subr.bf16.mxu1 %v14596_v41  ;;  %v7656_v41 = vld [vmem:[%s17353_s13 + $0x550] sm:$0xff] }
 0x9b6   : > { %v14649_v55 = vcombine.low %v7656_v41, %v7660_v8 }
 0x9b7   : > { %10957 = vmatpush1.bf16.msra.mxu0 %v14593_v49  ;;  %v14643_v49 = vcombine.low %v7649_v36, %v7653_v35  ;;  %v7701_v36 = vld [vmem:[%s17353_s13 + $0x6b8] sm:$0xff] }
 0x9b8   : > { %11121 = vmatpush1.bf16.msra.mxu1 %v14595_v25  ;;  %10958 = vmatprep.subr.bf16.mxu0 %v14602_v47  ;;  %v14650_v25 = vcombine.high %v7656_v41, %v7660_v8  ;;  %v14652_v47 = vcombine.high %v7657_v14, %v7661_v46  ;;  %v7708_v41 = vld [vmem:[%s17353_s13 + $0x6f0] sm:$0xff]  ;;  %v7705_v8 = vld [vmem:[%s17353_s13 + $0x6d8] sm:$0xff] }
 0x9b9   : > { %11122 = vmatprep.subr.bf16.mxu1 %v14604_v48  ;;  %v7664_v48 = vld [vmem:[%s17353_s13 + $0x590] sm:$0xff] }
 0x9ba   : > { %v14657_v1 = vcombine.low %v7664_v48, %v7668_v50 }
 0x9bb   : > { %10959 = vmatpush1.bf16.msra.mxu0 %v14601_v27  ;;  %v14651_v27 = vcombine.low %v7657_v14, %v7661_v46  ;;  %v7709_v14 = vld [vmem:[%s17353_s13 + $0x6f8] sm:$0xff] }
 0x9bc   : > { %11123 = vmatpush1.bf16.msra.mxu1 %v14603_v5  ;;  %10969 = vmatprep.subr.bf16.mxu0 %v14610_v58  ;;  %v14658_v5 = vcombine.high %v7664_v48, %v7668_v50  ;;  %v14660_v58 = vcombine.high %v7665_v51, %v7669_v53  ;;  %v7716_v48 = vld [vmem:[%s17353_s13 + $0x730] sm:$0xff]  ;;  %v7713_v50 = vld [vmem:[%s17353_s13 + $0x718] sm:$0xff] }
 0x9bd   : > { %11133 = vmatprep.subr.bf16.mxu1 %v14612_v59  ;;  %v7672_v59 = vld [vmem:[%s17353_s13 + $0x5d0] sm:$0xff]  ;;  %v7717_v51 = vld [vmem:[%s17353_s13 + $0x738] sm:$0xff] }
 0x9be   : > { %10961 = vmatmul.mubr.bf16.vlgmr.msra.gmra.mrb[12].mxu0 %v18147_v18  ;;  %v14665_v7 = vcombine.low %v7672_v59, %v7676_v34 }
 0x9bf   : > { %11125 = vmatmul.mubr.bf16.vlgmr.msra.gmra.mrb[12].mxu1 %v18147_v18  ;;  %10970 = vmatpush1.bf16.msra.mxu0 %v14609_v42  ;;  %v7645_v18 = vld [vmem:[%s17353_s13 + $0x4f8] sm:$0xff] }
 0x9c0   : > { %11001 = vmatprep.mubr.bf16.mxu0 %v18151_v54  ;;  %11134 = vmatpush1.bf16.msra.mxu1 %v14611_v13  ;;  %v14635_v12 = vcombine.low %v7641_v9, %v7645_v18  ;;  %v7677_v42 = vld [vmem:[%s17353_s13 + $0x5f8] sm:$0xff]  ;;  %v14666_v13 = vcombine.high %v7672_v59, %v7676_v34  ;;  %v7724_v59 = vld [vmem:[%s17353_s13 + $0x770] sm:$0xff] }
 0x9c1   : > { %11165 = vmatprep.mubr.bf16.mxu1 %v18151_v54  ;;  %10971 = vmatprep.subr.bf16.mxu0 %v14618_v6  ;;  %v14636_v54 = vcombine.high %v7641_v9, %v7645_v18  ;;  %v14668_v6 = vcombine.high %v7673_v26, %v7677_v42  ;;  %v7693_v9 = vld [vmem:[%s17353_s13 + $0x678] sm:$0xff]  ;;  %v14673_v18 = vcombine.low %v7680_v15, %v7684_v17 }
 0x9c2   : > { %11135 = vmatprep.subr.bf16.mxu1 %v14620_v33  ;;  %v7681_v33 = vld [vmem:[%s17353_s13 + $0x618] sm:$0xff] }
 0x9c3   : > { %10972 = vmatpush1.bf16.msra.mxu0 %v14617_v20  ;;  %v14667_v20 = vcombine.low %v7673_v26, %v7677_v42  ;;  %v7721_v34 = vld [vmem:[%s17353_s13 + $0x758] sm:$0xff] }
 0x9c4   : > { %11136 = vmatpush1.bf16.msra.mxu1 %v14619_v21  ;;  %10973 = vmatprep.subr.bf16.mxu0 %v14626_v22  ;;  %v14674_v21 = vcombine.high %v7680_v15, %v7684_v17  ;;  %v14676_v22 = vcombine.high %v7681_v33, %v7685_v19  ;;  %v7725_v26 = vld [vmem:[%s17353_s13 + $0x778] sm:$0xff]  ;;  %v7732_v15 = vld [vmem:[%s17353_s13 + $0x7b0] sm:$0xff] }
 0x9c5   : > { %11137 = vmatprep.subr.bf16.mxu1 %v14628_v24  ;;  %v7688_v24 = vld [vmem:[%s17353_s13 + $0x650] sm:$0xff]  ;;  %v7729_v17 = vld [vmem:[%s17353_s13 + $0x798] sm:$0xff] }
 0x9c6   : > { %v14681_v35 = vcombine.low %v7688_v24, %v7692_v40 }
 0x9c7   : > { %10974 = vmatpush1.bf16.msra.mxu0 %v14625_v11  ;;  %v14675_v11 = vcombine.low %v7681_v33, %v7685_v19  ;;  %v7733_v33 = vld [vmem:[%s17353_s13 + $0x7b8] sm:$0xff] }
 0x9c8   : > { %11138 = vmatpush1.bf16.msra.mxu1 %v14627_v10  ;;  %10975 = vmatprep.subr.bf16.mxu0 %v14634_v52  ;;  %v14682_v10 = vcombine.high %v7688_v24, %v7692_v40  ;;  %v14684_v52 = vcombine.high %v7689_v44, %v7693_v9  ;;  %v7740_v24 = vld [vmem:[%s17353_s13 + $0x7f0] sm:$0xff]  ;;  %v7737_v40 = vld [vmem:[%s17353_s13 + $0x7d8] sm:$0xff] }
 0x9c9   : > { %11139 = vmatprep.subr.bf16.mxu1 %v14636_v54  ;;  %v7696_v54 = vld [vmem:[%s17353_s13 + $0x690] sm:$0xff] }
 0x9ca   : > { %v14689_v46 = vcombine.low %v7696_v54, %v7700_v28 }
 0x9cb   : > { %10976 = vmatpush1.bf16.msra.mxu0 %v14633_v63  ;;  %v14683_v63 = vcombine.low %v7689_v44, %v7693_v9  ;;  %v7741_v44 = vld [vmem:[%s17353_s13 + $0x7f8] sm:$0xff] }
 0x9cc   : > { %11140 = vmatpush1.bf16.msra.mxu1 %v14635_v12  ;;  %10977 = vmatprep.subr.bf16.mxu0 %v14642_v16  ;;  %v14690_v12 = vcombine.high %v7696_v54, %v7700_v28  ;;  %v14692_v16 = vcombine.high %v7697_v30, %v7701_v36  ;;  %v7748_v54 = vld [vmem:[%s17353_s13 + $0x830] sm:$0xff]  ;;  %v7745_v28 = vld [vmem:[%s17353_s13 + $0x818] sm:$0xff] }
 0x9cd   : > { %11141 = vmatprep.subr.bf16.mxu1 %v14644_v37  ;;  %v7704_v37 = vld [vmem:[%s17353_s13 + $0x6d0] sm:$0xff] }
 0x9ce   : > { %v14697_v53 = vcombine.low %v7704_v37, %v7708_v41 }
 0x9cf   : > { %10978 = vmatpush1.bf16.msra.mxu0 %v14641_v4  ;;  %v14691_v4 = vcombine.low %v7697_v30, %v7701_v36  ;;  %v7749_v30 = vld [vmem:[%s17353_s13 + $0x838] sm:$0xff] }
 0x9d0   : > { %11142 = vmatpush1.bf16.msra.mxu1 %v14643_v49  ;;  %10979 = vmatprep.subr.bf16.mxu0 %v14650_v25  ;;  %v14698_v49 = vcombine.high %v7704_v37, %v7708_v41  ;;  %v14700_v25 = vcombine.high %v7705_v8, %v7709_v14  ;;  %v7756_v37 = vld [vmem:[%s17353_s13 + $0x870] sm:$0xff] }
 0x9d1   : > { %11143 = vmatprep.subr.bf16.mxu1 %v14652_v47  ;;  %v7712_v47 = vld [vmem:[%s17353_s13 + $0x710] sm:$0xff] }
 0x9d2   : > { %v14705_v42 = vcombine.low %v7712_v47, %v7716_v48 }
 0x9d3   : > { %10980 = vmatpush1.bf16.msra.mxu0 %v14649_v55  ;;  %v14699_v55 = vcombine.low %v7705_v8, %v7709_v14  ;;  %v7753_v8 = vld [vmem:[%s17353_s13 + $0x858] sm:$0xff] }
 0x9d4   : > { %11144 = vmatpush1.bf16.msra.mxu1 %v14651_v27  ;;  %10981 = vmatprep.subr.bf16.mxu0 %v14658_v5  ;;  %v14706_v27 = vcombine.high %v7712_v47, %v7716_v48  ;;  %v14708_v5 = vcombine.high %v7713_v50, %v7717_v51  ;;  %v7757_v14 = vld [vmem:[%s17353_s13 + $0x878] sm:$0xff] }
 0x9d5   : > { %11145 = vmatprep.subr.bf16.mxu1 %v14660_v58  ;;  %v7720_v58 = vld [vmem:[%s17353_s13 + $0x750] sm:$0xff]  ;;  %v14748_v47 = vcombine.high %v7753_v8, %v7757_v14  ;;  %v7761_v48 = vld [vmem:[%s17353_s13 + $0x898] sm:$0xff] }
 0x9d6   : > { %v14713_v19 = vcombine.low %v7720_v58, %v7724_v59 }
 0x9d7   : > { %10982 = vmatpush1.bf16.msra.mxu0 %v14657_v1  ;;  %v14707_v1 = vcombine.low %v7713_v50, %v7717_v51  ;;  %v7765_v50 = vld [vmem:[%s17353_s13 + $0x8b8] sm:$0xff] }
 0x9d8   : > { %11146 = vmatpush1.bf16.msra.mxu1 %v14659_v2  ;;  %10983 = vmatprep.subr.bf16.mxu0 %v14666_v13  ;;  %v14714_v2 = vcombine.high %v7720_v58, %v7724_v59  ;;  %v14716_v13 = vcombine.high %v7721_v34, %v7725_v26  ;;  %v7772_v58 = vld [vmem:[%s17353_s13 + $0x8f0] sm:$0xff]  ;;  %v7769_v59 = vld [vmem:[%s17353_s13 + $0x8d8] sm:$0xff] }
 0x9d9   : > { %11147 = vmatprep.subr.bf16.mxu1 %v14668_v6  ;;  %v7728_v6 = vld [vmem:[%s17353_s13 + $0x790] sm:$0xff] }
 0x9da   : > { %v14721_v9 = vcombine.low %v7728_v6, %v7732_v15 }
 0x9db   : > { %10984 = vmatpush1.bf16.msra.mxu0 %v14665_v7  ;;  %v14715_v7 = vcombine.low %v7721_v34, %v7725_v26  ;;  %v14755_v26 = vcombine.low %v7761_v48, %v7765_v50 }
 0x9dc   : > { %11148 = vmatpush1.bf16.msra.mxu1 %v14667_v20  ;;  %10985 = vmatprep.subr.bf16.mxu0 %v14674_v21  ;;  %v14722_v20 = vcombine.high %v7728_v6, %v7732_v15  ;;  %v14724_v21 = vcombine.high %v7729_v17, %v7733_v33  ;;  %v7781_v6 = vld [vmem:[%s17353_s13 + $0x938] sm:$0xff] }
 0x9dd   : > { %11149 = vmatprep.subr.bf16.mxu1 %v14676_v22  ;;  %v7736_v22 = vld [vmem:[%s17353_s13 + $0x7d0] sm:$0xff] }
 0x9de   : > { %v14729_v36 = vcombine.low %v7736_v22, %v7740_v24 }
 0x9df   : > { %10986 = vmatpush1.bf16.msra.mxu0 %v14673_v18  ;;  %v14723_v18 = vcombine.low %v7729_v17, %v7733_v33 }
 0x9e0   : > { %11150 = vmatpush1.bf16.msra.mxu1 %v14675_v11  ;;  %10987 = vmatprep.subr.bf16.mxu0 %v14682_v10  ;;  %v14730_v11 = vcombine.high %v7736_v22, %v7740_v24  ;;  %v14732_v10 = vcombine.high %v7737_v40, %v7741_v44  ;;  %v7789_v22 = vld [vmem:[%s17353_s13 + $0x978] sm:$0xff] }
 0x9e1   : > { %11151 = vmatprep.subr.bf16.mxu1 %v14684_v52  ;;  %v7744_v52 = vld [vmem:[%s17353_s13 + $0x810] sm:$0xff] }
 0x9e2   : > { %v14737_v41 = vcombine.low %v7744_v52, %v7748_v54 }
 0x9e3   : > { %10988 = vmatpush1.bf16.msra.mxu0 %v14681_v35  ;;  %v14731_v35 = vcombine.low %v7737_v40, %v7741_v44 }
 0x9e4   : > { %11152 = vmatpush1.bf16.msra.mxu1 %v14683_v63  ;;  %10989 = vmatprep.subr.bf16.mxu0 %v14690_v12  ;;  %v14738_v63 = vcombine.high %v7744_v52, %v7748_v54  ;;  %v14740_v12 = vcombine.high %v7745_v28, %v7749_v30  ;;  %v7797_v52 = vld [vmem:[%s17353_s13 + $0x9b8] sm:$0xff] }
 0x9e5   : > { %11153 = vmatprep.subr.bf16.mxu1 %v14692_v16  ;;  %v7752_v16 = vld [vmem:[%s17353_s13 + $0x850] sm:$0xff] }
 0x9e6   : > { %v14745_v51 = vcombine.low %v7752_v16, %v7756_v37 }
 0x9e7   : > { %10990 = vmatpush1.bf16.msra.mxu0 %v14689_v46  ;;  %v14739_v46 = vcombine.low %v7745_v28, %v7749_v30 }
 0x9e8   : > { %11154 = vmatpush1.bf16.msra.mxu1 %v14691_v4  ;;  %10991 = vmatprep.subr.bf16.mxu0 %v14698_v49  ;;  %v14746_v4 = vcombine.high %v7752_v16, %v7756_v37  ;;  %v7760_v49 = vld [vmem:[%s17353_s13 + $0x890] sm:$0xff]  ;;  %v7805_v16 = vld [vmem:[%s17353_s13 + $0x9f8] sm:$0xff] }
 0x9e9   : > { %11155 = vmatprep.subr.bf16.mxu1 %v14700_v25  ;;  %v7764_v25 = vld [vmem:[%s17353_s13 + $0x8b0] sm:$0xff] }
 0x9ea   : > { %v14753_v34 = vcombine.low %v7760_v49, %v7764_v25 }
 0x9eb   : > { %10992 = vmatpush1.bf16.msra.mxu0 %v14697_v53  ;;  %v14747_v53 = vcombine.low %v7753_v8, %v7757_v14 }
 0x9ec   : > { %11156 = vmatpush1.bf16.msra.mxu1 %v14699_v55  ;;  %10993 = vmatprep.subr.bf16.mxu0 %v14706_v27  ;;  %v14754_v55 = vcombine.high %v7760_v49, %v7764_v25  ;;  %v14756_v27 = vcombine.high %v7761_v48, %v7765_v50  ;;  %v7809_v49 = vld [vmem:[%s17353_s13 + $0xa18] sm:$0xff] }
 0x9ed   : > { %11157 = vmatprep.subr.bf16.mxu1 %v14708_v5  ;;  %v7768_v5 = vld [vmem:[%s17353_s13 + $0x8d0] sm:$0xff]  ;;  %v7813_v25 = vld [vmem:[%s17353_s13 + $0xa38] sm:$0xff] }
 0x9ee   : > { %v14761_v15 = vcombine.low %v7768_v5, %v7772_v58 }
 0x9ef   : > { %10994 = vmatpush1.bf16.msra.mxu0 %v14705_v42  ;;  %v14762_v42 = vcombine.high %v7768_v5, %v7772_v58  ;;  %v7821_v5 = vld [vmem:[%s17353_s13 + $0xa78] sm:$0xff] }
 0x9f0   : > { %11158 = vmatpush1.bf16.msra.mxu1 %v14707_v1  ;;  %10995 = vmatprep.subr.bf16.mxu0 %v14714_v2  ;;  %v7776_v1 = vld [vmem:[%s17353_s13 + $0x910] sm:$0xff] }
 0x9f1   : > { %11159 = vmatprep.subr.bf16.mxu1 %v14716_v13  ;;  %v7780_v2 = vld [vmem:[%s17353_s13 + $0x930] sm:$0xff]  ;;  %v7777_v13 = vld [vmem:[%s17353_s13 + $0x918] sm:$0xff] }
 0x9f2   : > { %v14770_v33 = vcombine.high %v7776_v1, %v7780_v2  ;;  %v14769_v24 = vcombine.low %v7776_v1, %v7780_v2  ;;  %v14771_v40 = vcombine.low %v7777_v13, %v7781_v6  ;;  %v7829_v1 = vld [vmem:[%s17353_s13 + $0xab8] sm:$0xff] }
 0x9f3   : > { %10996 = vmatpush1.bf16.msra.mxu0 %v14713_v19  ;;  %v14772_v19 = vcombine.high %v7777_v13, %v7781_v6 }
 0x9f4   : > { %11160 = vmatpush1.bf16.msra.mxu1 %v14715_v7  ;;  %10997 = vmatprep.subr.bf16.mxu0 %v14722_v20  ;;  %v7784_v7 = vld [vmem:[%s17353_s13 + $0x950] sm:$0xff] }
 0x9f5   : > { %11161 = vmatprep.subr.bf16.mxu1 %v14724_v21  ;;  %v7788_v20 = vld [vmem:[%s17353_s13 + $0x970] sm:$0xff]  ;;  %v7785_v21 = vld [vmem:[%s17353_s13 + $0x958] sm:$0xff] }
 0x9f6   : > { %v14778_v44 = vcombine.high %v7784_v7, %v7788_v20  ;;  %v14777_v54 = vcombine.low %v7784_v7, %v7788_v20  ;;  %v14779_v28 = vcombine.low %v7785_v21, %v7789_v22  ;;  %v7837_v7 = vld [vmem:[%s17353_s13 + $0xaf8] sm:$0xff] }
 0x9f7   : > { %10998 = vmatpush1.bf16.msra.mxu0 %v14721_v9  ;;  %v14780_v9 = vcombine.high %v7785_v21, %v7789_v22 }
 0x9f8   : > { %11162 = vmatpush1.bf16.msra.mxu1 %v14723_v18  ;;  %10999 = vmatprep.subr.bf16.mxu0 %v14730_v11  ;;  %v7792_v18 = vld [vmem:[%s17353_s13 + $0x990] sm:$0xff] }
 0x9f9   : > { %11163 = vmatprep.subr.bf16.mxu1 %v14732_v10  ;;  %v7796_v11 = vld [vmem:[%s17353_s13 + $0x9b0] sm:$0xff]  ;;  %v7793_v10 = vld [vmem:[%s17353_s13 + $0x998] sm:$0xff] }
 0x9fa   : > { %v14786_v30 = vcombine.high %v7792_v18, %v7796_v11  ;;  %v14785_v37 = vcombine.low %v7792_v18, %v7796_v11  ;;  %v7845_v18 = vld [vmem:[%s17353_s13 + $0xb38] sm:$0xff] }
 0x9fb   : > { %11000 = vmatpush1.bf16.msra.mxu0 %v14729_v36  ;;  %v14788_v36 = vcombine.high %v7793_v10, %v7797_v52 }
 0x9fc   : > { %11164 = vmatpush1.bf16.msra.mxu1 %v14731_v35  ;;  %11010 = vmatprep.subr.bf16.mxu0 %v14738_v63  ;;  %v7800_v35 = vld [vmem:[%s17353_s13 + $0x9d0] sm:$0xff] }
 0x9fd   : > { %11174 = vmatprep.subr.bf16.mxu1 %v14740_v12  ;;  %v7804_v63 = vld [vmem:[%s17353_s13 + $0x9f0] sm:$0xff]  ;;  %v7801_v12 = vld [vmem:[%s17353_s13 + $0x9d8] sm:$0xff] }
 0x9fe   : > { %11002 = vmatmul.mubr.bf16.vlgmr.msra.gmra.mrb[12].mxu0 %v18224_v39  ;;  %v14794_v8 = vcombine.high %v7800_v35, %v7804_v63  ;;  %v14796_v14 = vcombine.high %v7801_v12, %v7805_v16  ;;  %v14795_v48 = vcombine.low %v7801_v12, %v7805_v16 }
 0x9ff   : > { %11166 = vmatmul.mubr.bf16.vlgmr.msra.gmra.mrb[12].mxu1 %v18224_v39  ;;  %11011 = vmatpush1.bf16.msra.mxu0 %v14737_v41  ;;  %v7773_v39 = vld [vmem:[%s17353_s13 + $0x8f8] sm:$0xff]  ;;  %v14787_v41 = vcombine.low %v7793_v10, %v7797_v52 }
 0xa00   : > { %11042 = vmatprep.mubr.bf16.mxu0 %v18310_v45  ;;  %11175 = vmatpush1.bf16.msra.mxu1 %v14739_v46  ;;  %v14763_v17 = vcombine.low %v7769_v59, %v7773_v39  ;;  %v7808_v46 = vld [vmem:[%s17353_s13 + $0xa10] sm:$0xff] }
 0xa01   : > { %11206 = vmatprep.mubr.bf16.mxu1 %v18310_v45  ;;  %11012 = vmatprep.subr.bf16.mxu0 %v14746_v4  ;;  %v14764_v45 = vcombine.high %v7769_v59, %v7773_v39  ;;  %v7812_v4 = vld [vmem:[%s17353_s13 + $0xa30] sm:$0xff]  ;;  %v14803_v59 = vcombine.low %v7809_v49, %v7813_v25 }
 0xa02   : > { %11176 = vmatprep.subr.bf16.mxu1 %v14748_v47  ;;  %v14793_v47 = vcombine.low %v7800_v35, %v7804_v63  ;;  %v14802_v50 = vcombine.high %v7808_v46, %v7812_v4  ;;  %v14801_v58 = vcombine.low %v7808_v46, %v7812_v4  ;;  %v7853_v35 = vld [vmem:[%s17353_s13 + $0xb78] sm:$0xff] }
 0xa03   : > { %11013 = vmatpush1.bf16.msra.mxu0 %v14745_v51  ;;  %v14804_v51 = vcombine.high %v7809_v49, %v7813_v25  ;;  %v7861_v46 = vld [vmem:[%s17353_s13 + $0xbb8] sm:$0xff] }
 0xa04   : > { %11177 = vmatpush1.bf16.msra.mxu1 %v14747_v53  ;;  %11014 = vmatprep.subr.bf16.mxu0 %v14754_v55  ;;  %v7816_v53 = vld [vmem:[%s17353_s13 + $0xa50] sm:$0xff] }
 0xa05   : > { %11178 = vmatprep.subr.bf16.mxu1 %v14756_v27  ;;  %v7820_v55 = vld [vmem:[%s17353_s13 + $0xa70] sm:$0xff]  ;;  %v7817_v27 = vld [vmem:[%s17353_s13 + $0xa58] sm:$0xff] }
 0xa06   : > { %v14810_v39 = vcombine.high %v7816_v53, %v7820_v55  ;;  %v14809_v2 = vcombine.low %v7816_v53, %v7820_v55  ;;  %v14811_v13 = vcombine.low %v7817_v27, %v7821_v5  ;;  %v7869_v53 = vld [vmem:[%s17353_s13 + $0xbf8] sm:$0xff] }
 0xa07   : > { %11015 = vmatpush1.bf16.msra.mxu0 %v14753_v34  ;;  %v14812_v34 = vcombine.high %v7817_v27, %v7821_v5 }
 0xa08   : > { %11179 = vmatpush1.bf16.msra.mxu1 %v14755_v26  ;;  %11016 = vmatprep.subr.bf16.mxu0 %v14762_v42  ;;  %v7824_v26 = vld [vmem:[%s17353_s13 + $0xa90] sm:$0xff] }
 0xa09   : > { %11180 = vmatprep.subr.bf16.mxu1 %v14764_v45  ;;  %v7828_v42 = vld [vmem:[%s17353_s13 + $0xab0] sm:$0xff]  ;;  %v7825_v45 = vld [vmem:[%s17353_s13 + $0xa98] sm:$0xff] }
 0xa0a   : > { %v14818_v6 = vcombine.high %v7824_v26, %v7828_v42  ;;  %v14817_v20 = vcombine.low %v7824_v26, %v7828_v42  ;;  %v14819_v21 = vcombine.low %v7825_v45, %v7829_v1  ;;  %v7877_v26 = vld [vmem:[%s17353_s13 + $0xc38] sm:$0xff] }
 0xa0b   : > { %11017 = vmatpush1.bf16.msra.mxu0 %v14761_v15  ;;  %v14820_v15 = vcombine.high %v7825_v45, %v7829_v1 }
 0xa0c   : > { %11181 = vmatpush1.bf16.msra.mxu1 %v14763_v17  ;;  %11018 = vmatprep.subr.bf16.mxu0 %v14770_v33  ;;  %v7832_v17 = vld [vmem:[%s17353_s13 + $0xad0] sm:$0xff] }
 0xa0d   : > { %11182 = vmatprep.subr.bf16.mxu1 %v14772_v19  ;;  %v7836_v33 = vld [vmem:[%s17353_s13 + $0xaf0] sm:$0xff]  ;;  %v7833_v19 = vld [vmem:[%s17353_s13 + $0xad8] sm:$0xff] }
 0xa0e   : > { %v14826_v22 = vcombine.high %v7832_v17, %v7836_v33  ;;  %v14825_v11 = vcombine.low %v7832_v17, %v7836_v33  ;;  %v14827_v10 = vcombine.low %v7833_v19, %v7837_v7  ;;  %v7881_v17 = vld [vmem:[%s17353_s13 + $0xc58] sm:$0xff] }
 0xa0f   : > { %11019 = vmatpush1.bf16.msra.mxu0 %v14769_v24  ;;  %v14828_v24 = vcombine.high %v7833_v19, %v7837_v7  ;;  %v7885_v33 = vld [vmem:[%s17353_s13 + $0xc78] sm:$0xff] }
 0xa10   : > { %11183 = vmatpush1.bf16.msra.mxu1 %v14771_v40  ;;  %11020 = vmatprep.subr.bf16.mxu0 %v14778_v44  ;;  %v7840_v40 = vld [vmem:[%s17353_s13 + $0xb10] sm:$0xff] }
 0xa11   : > { %11184 = vmatprep.subr.bf16.mxu1 %v14780_v9  ;;  %v7844_v44 = vld [vmem:[%s17353_s13 + $0xb30] sm:$0xff]  ;;  %v7841_v9 = vld [vmem:[%s17353_s13 + $0xb18] sm:$0xff] }
 0xa12   : > { %v14834_v52 = vcombine.high %v7840_v40, %v7844_v44  ;;  %v14833_v63 = vcombine.low %v7840_v40, %v7844_v44  ;;  %v14835_v12 = vcombine.low %v7841_v9, %v7845_v18  ;;  %v7893_v40 = vld [vmem:[%s17353_s13 + $0xcb8] sm:$0xff] }
 0xa13   : > { %11021 = vmatpush1.bf16.msra.mxu0 %v14777_v54  ;;  %v14836_v54 = vcombine.high %v7841_v9, %v7845_v18  ;;  %v14875_v9 = vcombine.low %v7881_v17, %v7885_v33 }
 0xa14   : > { %11185 = vmatpush1.bf16.msra.mxu1 %v14779_v28  ;;  %11022 = vmatprep.subr.bf16.mxu0 %v14786_v30  ;;  %v7848_v28 = vld [vmem:[%s17353_s13 + $0xb50] sm:$0xff] }
 0xa15   : > { %11186 = vmatprep.subr.bf16.mxu1 %v14788_v36  ;;  %v7852_v30 = vld [vmem:[%s17353_s13 + $0xb70] sm:$0xff]  ;;  %v7849_v36 = vld [vmem:[%s17353_s13 + $0xb58] sm:$0xff] }
 0xa16   : > { %v14842_v16 = vcombine.high %v7848_v28, %v7852_v30  ;;  %v14841_v4 = vcombine.low %v7848_v28, %v7852_v30  ;;  %v14843_v49 = vcombine.low %v7849_v36, %v7853_v35 }
 0xa17   : > { %11023 = vmatpush1.bf16.msra.mxu0 %v14785_v37  ;;  %v14844_v37 = vcombine.high %v7849_v36, %v7853_v35  ;;  %v7904_v35 = vld [vmem:[%s17353_s13 + $0xd10] sm:$0xff] }
 0xa18   : > { %11187 = vmatpush1.bf16.msra.mxu1 %v14787_v41  ;;  %11024 = vmatprep.subr.bf16.mxu0 %v14794_v8  ;;  %v7856_v41 = vld [vmem:[%s17353_s13 + $0xb90] sm:$0xff] }
 0xa19   : > { %11188 = vmatprep.subr.bf16.mxu1 %v14796_v14  ;;  %v7860_v8 = vld [vmem:[%s17353_s13 + $0xbb0] sm:$0xff]  ;;  %v7857_v14 = vld [vmem:[%s17353_s13 + $0xb98] sm:$0xff] }
 0xa1a   : > { %v14850_v25 = vcombine.high %v7856_v41, %v7860_v8  ;;  %v14849_v55 = vcombine.low %v7856_v41, %v7860_v8  ;;  %v14851_v27 = vcombine.low %v7857_v14, %v7861_v46 }
 0xa1b   : > { %11025 = vmatpush1.bf16.msra.mxu0 %v14793_v47  ;;  %v14852_v47 = vcombine.high %v7857_v14, %v7861_v46  ;;  %v7912_v46 = vld [vmem:[%s17353_s13 + $0xd50] sm:$0xff] }
 0xa1c   : > { %11189 = vmatpush1.bf16.msra.mxu1 %v14795_v48  ;;  %11026 = vmatprep.subr.bf16.mxu0 %v14802_v50  ;;  %v7864_v48 = vld [vmem:[%s17353_s13 + $0xbd0] sm:$0xff] }
 0xa1d   : > { %11190 = vmatprep.subr.bf16.mxu1 %v14804_v51  ;;  %v7868_v50 = vld [vmem:[%s17353_s13 + $0xbf0] sm:$0xff]  ;;  %v7865_v51 = vld [vmem:[%s17353_s13 + $0xbd8] sm:$0xff] }
 0xa1e   : > { %v14858_v5 = vcombine.high %v7864_v48, %v7868_v50  ;;  %v14857_v42 = vcombine.low %v7864_v48, %v7868_v50  ;;  %v14859_v45 = vcombine.low %v7865_v51, %v7869_v53  ;;  %v18619_v48 = vld [vmem:[%s774_s9] sm:$0xff] }
 0xa1f   : > { %11027 = vmatpush1.bf16.msra.mxu0 %v14801_v58  ;;  %v14860_v58 = vcombine.high %v7865_v51, %v7869_v53 }
 0xa20   : > { %11191 = vmatpush1.bf16.msra.mxu1 %v14803_v59  ;;  %11028 = vmatprep.subr.bf16.mxu0 %v14810_v39  ;;  %v7872_v59 = vld [vmem:[%s17353_s13 + $0xc10] sm:$0xff] }
 0xa21   : > { %11192 = vmatprep.subr.bf16.mxu1 %v14812_v34  ;;  %v7876_v39 = vld [vmem:[%s17353_s13 + $0xc30] sm:$0xff]  ;;  %v7873_v34 = vld [vmem:[%s17353_s13 + $0xc18] sm:$0xff] }
 0xa22   : > { %v14866_v1 = vcombine.high %v7872_v59, %v7876_v39  ;;  %v14867_v19 = vcombine.low %v7873_v34, %v7877_v26 }
 0xa23   : > { %11029 = vmatpush1.bf16.msra.mxu0 %v14809_v2  ;;  %v14868_v2 = vcombine.high %v7873_v34, %v7877_v26  ;;  %v8007_v34 = vrot.slane %v18619_v48, %v4204_v23  ;;  %v8015_v26 = vrot.slane %v18619_v48, %v4212_v3 }
 0xa24   : > { %11193 = vmatpush1.bf16.msra.mxu1 %v14811_v13  ;;  %11030 = vmatprep.subr.bf16.mxu0 %v14818_v6  ;;  %v7880_v13 = vld [vmem:[%s17353_s13 + $0xc50] sm:$0xff] }
 0xa25   : > { %11194 = vmatprep.subr.bf16.mxu1 %v14820_v15  ;;  %v7884_v6 = vld [vmem:[%s17353_s13 + $0xc70] sm:$0xff]  ;;  %v14865_v15 = vcombine.low %v7872_v59, %v7876_v39  ;;  %v7921_v59 = vld [vmem:[%s17353_s13 + $0xd98] sm:$0xff] }
 0xa26   : > { %v14874_v7 = vcombine.high %v7880_v13, %v7884_v6  ;;  %v14873_v44 = vcombine.low %v7880_v13, %v7884_v6  ;;  %v7925_v39 = vld [vmem:[%s17353_s13 + $0xdb8] sm:$0xff]  ;;  %v7928_v13 = vld [vmem:[%s17353_s13 + $0xdd0] sm:$0xff] }
 0xa27   : > { %11031 = vmatpush1.bf16.msra.mxu0 %v14817_v20  ;;  %v7888_v20 = vld [vmem:[%s17353_s13 + $0xc90] sm:$0xff] }
 0xa28   : > { %11195 = vmatpush1.bf16.msra.mxu1 %v14819_v21  ;;  %11032 = vmatprep.subr.bf16.mxu0 %v14826_v22  ;;  %v7892_v21 = vld [vmem:[%s17353_s13 + $0xcb0] sm:$0xff]  ;;  %v14876_v22 = vcombine.high %v7881_v17, %v7885_v33 }
 0xa29   : > { %11196 = vmatprep.subr.bf16.mxu1 %v14828_v24  ;;  %v7889_v24 = vld [vmem:[%s17353_s13 + $0xc98] sm:$0xff]  ;;  %v14882_v18 = vcombine.high %v7888_v20, %v7892_v21  ;;  %v14881_v28 = vcombine.low %v7888_v20, %v7892_v21  ;;  %v7932_v6 = vld [vmem:[%s17353_s13 + $0xdf0] sm:$0xff] }
 0xa2a   : > { %v14883_v30 = vcombine.low %v7889_v24, %v7893_v40 }
 0xa2b   : > { %11033 = vmatpush1.bf16.msra.mxu0 %v14825_v11  ;;  %v14884_v11 = vcombine.high %v7889_v24, %v7893_v40 }
 0xa2c   : > { %11197 = vmatpush1.bf16.msra.mxu1 %v14827_v10  ;;  %11034 = vmatprep.subr.bf16.mxu0 %v14834_v52  ;;  %v7896_v10 = vld [vmem:[%s17353_s13 + $0xcd0] sm:$0xff] }
 0xa2d   : > { %11198 = vmatprep.subr.bf16.mxu1 %v14836_v54  ;;  %v7900_v52 = vld [vmem:[%s17353_s13 + $0xcf0] sm:$0xff]  ;;  %v7897_v54 = vld [vmem:[%s17353_s13 + $0xcd8] sm:$0xff] }
 0xa2e   : > { %v14890_v36 = vcombine.high %v7896_v10, %v7900_v52 }
 0xa2f   : > { %11035 = vmatpush1.bf16.msra.mxu0 %v14833_v63  ;;  %v7908_v63 = vld [vmem:[%s17353_s13 + $0xd30] sm:$0xff] }
 0xa30   : > { %11199 = vmatpush1.bf16.msra.mxu1 %v14835_v12  ;;  %11036 = vmatprep.subr.bf16.mxu0 %v14842_v16  ;;  %v7905_v12 = vld [vmem:[%s17353_s13 + $0xd18] sm:$0xff]  ;;  %v14898_v8 = vcombine.high %v7904_v35, %v7908_v63 }
 0xa31   : > { %11200 = vmatprep.subr.bf16.mxu1 %v14844_v37  ;;  %v7909_v16 = vld [vmem:[%s17353_s13 + $0xd38] sm:$0xff]  ;;  %v14889_v37 = vcombine.low %v7896_v10, %v7900_v52 }
 0xa32   : > { %v14900_v14 = vcombine.high %v7905_v12, %v7909_v16  ;;  %v14899_v50 = vcombine.low %v7905_v12, %v7909_v16 }
 0xa33   : > { %11037 = vmatpush1.bf16.msra.mxu0 %v14841_v4  ;;  %v7916_v4 = vld [vmem:[%s17353_s13 + $0xd70] sm:$0xff] }
 0xa34   : > { %11201 = vmatpush1.bf16.msra.mxu1 %v14843_v49  ;;  %11038 = vmatprep.subr.bf16.mxu0 %v14850_v25  ;;  %v7913_v49 = vld [vmem:[%s17353_s13 + $0xd58] sm:$0xff]  ;;  %v14906_v51 = vcombine.high %v7912_v46, %v7916_v4 }
 0xa35   : > { %11202 = vmatprep.subr.bf16.mxu1 %v14852_v47  ;;  %v7917_v25 = vld [vmem:[%s17353_s13 + $0xd78] sm:$0xff]  ;;  %v14897_v47 = vcombine.low %v7904_v35, %v7908_v63  ;;  %v14921_v35 = vcombine.low %v7928_v13, %v7932_v6 }
 0xa36   : > { %v14908_v53 = vcombine.high %v7913_v49, %v7917_v25 }
 0xa37   : > { %11039 = vmatpush1.bf16.msra.mxu0 %v14849_v55  ;;  %v7920_v55 = vld [vmem:[%s17353_s13 + $0xd90] sm:$0xff] }
 0xa38   : > { %11203 = vmatpush1.bf16.msra.mxu1 %v14851_v27  ;;  %11040 = vmatprep.subr.bf16.mxu0 %v14858_v5  ;;  %v7924_v27 = vld [vmem:[%s17353_s13 + $0xdb0] sm:$0xff]  ;;  %v8003_v5 = vrot.slane %v18619_v48, %v4200_v29  ;;  %v14907_v29 = vcombine.low %v7913_v49, %v7917_v25 }
 0xa39   : > { %11204 = vmatprep.subr.bf16.mxu1 %v14860_v58  ;;  %v8011_v58 = vrot.slane %v18619_v48, %v4208_v57  ;;  %v14913_v24 = vcombine.low %v7920_v55, %v7924_v27 }
 0xa3b   : > { %11041 = vmatpush1.bf16.msra.mxu0 %v14857_v42  ;;  %v14905_v42 = vcombine.low %v7912_v46, %v7916_v4  ;;  %v7949_v46 = vld [vmem:[%s17353_s13 + $0xe78] sm:$0xff]  ;;  %v15756_v4 = vld [vmem:[#allocation2] sm:$0xff] }
 0xa3c   : > { %11205 = vmatpush1.bf16.msra.mxu1 %v14859_v45  ;;  %11051 = vmatprep.subr.bf16.mxu0 %v14866_v1  ;;  %v14914_v45 = vcombine.high %v7920_v55, %v7924_v27  ;;  %v7952_v55 = vld [vmem:[%s17353_s13 + $0xe90] sm:$0xff] }
 0xa3d   : > { %11215 = vmatprep.subr.bf16.mxu1 %v14868_v2  ;;  %v14916_v2 = vcombine.high %v7921_v59, %v7925_v39  ;;  %v7956_v27 = vld [vmem:[%s17353_s13 + $0xeb0] sm:$0xff] }
 0xa3e   : > { %11043 = vmatmul.mubr.bf16.vlgmr.msra.gmra.mrb[12].mxu0 %v18312_v32 }
 0xa3f   : > { %11207 = vmatmul.mubr.bf16.vlgmr.msra.gmra.mrb[12].mxu1 %v18312_v32  ;;  %11052 = vmatpush1.bf16.msra.mxu0 %v14865_v15  ;;  %v7901_v32 = vld [vmem:[%s17353_s13 + $0xcf8] sm:$0xff] }
 0xa40   : > { %11083 = vmatprep.mubr.bf16.mxu0 %v18320_v38  ;;  %11216 = vmatpush1.bf16.msra.mxu1 %v14867_v19  ;;  %v14891_v41 = vcombine.low %v7897_v54, %v7901_v32  ;;  %v7929_v19 = vld [vmem:[%s17353_s13 + $0xdd8] sm:$0xff] }
 0xa41   : > { %11247 = vmatprep.mubr.bf16.mxu1 %v18320_v38  ;;  %11053 = vmatprep.subr.bf16.mxu0 %v14874_v7  ;;  %v14892_v38 = vcombine.high %v7897_v54, %v7901_v32  ;;  %v7933_v7 = vld [vmem:[%s17353_s13 + $0xdf8] sm:$0xff]  ;;  %v7936_v54 = vld [vmem:[%s17353_s13 + $0xe10] sm:$0xff] }
 0xa42   : > { %11217 = vmatprep.subr.bf16.mxu1 %v14876_v22  ;;  %v14924_v52 = vcombine.high %v7929_v19, %v7933_v7  ;;  %v7940_v32 = vld [vmem:[%s17353_s13 + $0xe30] sm:$0xff]  ;;  %v14923_v63 = vcombine.low %v7929_v19, %v7933_v7  ;;  %v7973_v19 = vld [vmem:[%s17353_s13 + $0xf38] sm:$0xff] }
 0xa43   : > { %11054 = vmatpush1.bf16.msra.mxu0 %v14873_v44  ;;  %v14930_v12 = vcombine.high %v7936_v54, %v7940_v32  ;;  %v14929_v25 = vcombine.low %v7936_v54, %v7940_v32  ;;  %v7988_v54 = vld [vmem:[%s17353_s13 + $0xfb0] sm:$0xff]  ;;  %v7985_v32 = vld [vmem:[%s17353_s13 + $0xf98] sm:$0xff] }
 0xa44   : > { %11218 = vmatpush1.bf16.msra.mxu1 %v14875_v9  ;;  %11055 = vmatprep.subr.bf16.mxu0 %v14882_v18  ;;  %v14915_v9 = vcombine.low %v7921_v59, %v7925_v39  ;;  %v14922_v18 = vcombine.high %v7928_v13, %v7932_v6 }
 0xa45   : > { %11219 = vmatprep.subr.bf16.mxu1 %v14884_v11 }
 0xa47   : > { %11056 = vmatpush1.bf16.msra.mxu0 %v14881_v28  ;;  %v7937_v28 = vld [vmem:[%s17353_s13 + $0xe18] sm:$0xff] }
 0xa48   : > { %11220 = vmatpush1.bf16.msra.mxu1 %v14883_v30  ;;  %11057 = vmatprep.subr.bf16.mxu0 %v14890_v36  ;;  %v7941_v30 = vld [vmem:[%s17353_s13 + $0xe38] sm:$0xff] }
 0xa49   : > { %11221 = vmatprep.subr.bf16.mxu1 %v14892_v38 }
 0xa4b   : > { %11058 = vmatpush1.bf16.msra.mxu0 %v14889_v37  ;;  %v14932_v37 = vcombine.high %v7937_v28, %v7941_v30 }
 0xa4c   : > { %11222 = vmatpush1.bf16.msra.mxu1 %v14891_v41  ;;  %11059 = vmatprep.subr.bf16.mxu0 %v14898_v8  ;;  %v7944_v41 = vld [vmem:[%s17353_s13 + $0xe50] sm:$0xff] }
 0xa4d   : > { %11223 = vmatprep.subr.bf16.mxu1 %v14900_v14  ;;  %v7948_v8 = vld [vmem:[%s17353_s13 + $0xe70] sm:$0xff]  ;;  %v7945_v14 = vld [vmem:[%s17353_s13 + $0xe58] sm:$0xff] }
 0xa4e   : > { %v14937_v39 = vcombine.low %v7944_v41, %v7948_v8 }
 0xa4f   : > { %11060 = vmatpush1.bf16.msra.mxu0 %v14897_v47  ;;  %v14931_v47 = vcombine.low %v7937_v28, %v7941_v30  ;;  %v7989_v28 = vld [vmem:[%s17353_s13 + $0xfb8] sm:$0xff] }
 0xa50   : > { %11224 = vmatpush1.bf16.msra.mxu1 %v14899_v50  ;;  %11061 = vmatprep.subr.bf16.mxu0 %v14906_v51  ;;  %v14938_v50 = vcombine.high %v7944_v41, %v7948_v8  ;;  %v14979_v8 = vcombine.low %v7985_v32, %v7989_v28 }
 0xa51   : > { %v10757_v57 = vpop.f32.mrb[8].mxu0  ;;  %v10921_v1 = vpop.f32.mrb[8].mxu1  ;;  %11225 = vmatprep.subr.bf16.mxu1 %v14908_v53  ;;  %v14940_v53 = vcombine.high %v7945_v14, %v7949_v46 }
 0xa52   : > { %v15303_v15 = vadd.f32 %v10757_v57, %v8003_v5  ;;  %v15305_v17 = vadd.f32 %v10921_v1, %v8011_v58  ;;  %v10759_v23 = vpop.f32.mrb[9].mxu0  ;;  %v10923_v33 = vpop.f32.mrb[9].mxu1  ;;  %v7953_v5 = vld [vmem:[%s17353_s13 + $0xe98] sm:$0xff] }
 0xa53   : > { %v15304_v3 = vadd.f32 %v10759_v23, %v8007_v34  ;;  %v15306_v20 = vadd.f32 %v10923_v33, %v8015_v26  ;;  %v10761_v21 = vpop.f32.mrb[10].mxu0  ;;  %v10925_v22 = vpop.f32.mrb[10].mxu1  ;;  %11062 = vmatpush1.bf16.msra.mxu0 %v14905_v42  ;;  %v7957_v58 = vld [vmem:[%s17353_s13 + $0xeb8] sm:$0xff]  ;;  %v14939_v34 = vcombine.low %v7945_v14, %v7949_v46  ;;  %v14946_v26 = vcombine.high %v7952_v55, %v7956_v27  ;;  %v7972_v23 = vld [vmem:[%s17353_s13 + $0xf30] sm:$0xff] }
 0xa54   : > { %11226 = vmatpush1.bf16.msra.mxu1 %v14907_v29  ;;  %v10762_v40 = vpop.f32.mrb[11].mxu0  ;;  %v10926_v44 = vpop.f32.mrb[11].mxu1  ;;  %11063 = vmatprep.subr.bf16.mxu0 %v14914_v45  ;;  %v14948_v42 = vcombine.high %v7953_v5, %v7957_v58  ;;  %v7960_v29 = vld [vmem:[%s17353_s13 + $0xed0] sm:$0xff]  ;;  %v7961_v57 = vld [vmem:[%s17353_s13 + $0xed8] sm:$0xff]  ;;  %v14947_v13 = vcombine.low %v7953_v5, %v7957_v58 }
 0xa55   : > { %v11264_v11 = vcombine.low %v15303_v15, %v15304_v3  ;;  %v11265_v10 = vcombine.low %v15305_v17, %v15306_v20  ;;  %11227 = vmatprep.subr.bf16.mxu1 %v14916_v2  ;;  %v7964_v45 = vld [vmem:[%s17353_s13 + $0xef0] sm:$0xff]  ;;  %v7965_v1 = vld [vmem:[%s17353_s13 + $0xef8] sm:$0xff]  ;;  %v14945_v2 = vcombine.low %v7952_v55, %v7956_v27 }
 0xa56   : > { %v14954_v6 = vcombine.high %v7960_v29, %v7964_v45  ;;  %v14956_v15 = vcombine.high %v7961_v57, %v7965_v1  ;;  %v7968_v17 = vld [vmem:[%s17353_s13 + $0xf10] sm:$0xff]  ;;  %v7969_v33 = vld [vmem:[%s17353_s13 + $0xf18] sm:$0xff]  ;;  %v14953_v7 = vcombine.low %v7960_v29, %v7964_v45  ;;  %v14955_v3 = vcombine.low %v7961_v57, %v7965_v1 }
 0xa57   : > { %v11272_v36 = vrot.slane %v11264_v11, %v17470_v0  ;;  %v11279_v38 = vrot.slane %v11265_v10, %v17470_v0  ;;  %11064 = vmatpush1.bf16.msra.mxu0 %v14913_v24  ;;  %v14962_v20 = vcombine.high %v7968_v17, %v7972_v23  ;;  %v14964_v21 = vcombine.high %v7969_v33, %v7973_v19  ;;  %v7976_v22 = vld [vmem:[%s17353_s13 + $0xf50] sm:$0xff]  ;;  %v7977_v40 = vld [vmem:[%s17353_s13 + $0xf58] sm:$0xff] }
 0xa58   : > { %11228 = vmatpush1.bf16.msra.mxu1 %v14915_v9  ;;  %11065 = vmatprep.subr.bf16.mxu0 %v14922_v18  ;;  %v7980_v24 = vld [vmem:[%s17353_s13 + $0xf70] sm:$0xff]  ;;  %v7981_v44 = vld [vmem:[%s17353_s13 + $0xf78] sm:$0xff]  ;;  %v14961_v9 = vcombine.low %v7968_v17, %v7972_v23  ;;  %v14963_v18 = vcombine.low %v7969_v33, %v7973_v19 }
 0xa59   : > { %v11280_v16 = vcombine.low %v11272_v36, %v11279_v38  ;;  %11229 = vmatprep.subr.bf16.mxu1 %v14924_v52  ;;  %v14970_v11 = vcombine.high %v7976_v22, %v7980_v24  ;;  %v14972_v10 = vcombine.high %v7977_v40, %v7981_v44  ;;  %v7984_v52 = vld [vmem:[%s17353_s13 + $0xf90] sm:$0xff]  ;;  %v14969_v30 = vcombine.low %v7976_v22, %v7980_v24 }
 0xa5a   : > { %v14971_v36 = vcombine.low %v7977_v40, %v7981_v44  ;;  %v14978_v38 = vcombine.high %v7984_v52, %v7988_v54  ;;  %v14977_v41 = vcombine.low %v7984_v52, %v7988_v54 }
 0xa5b   : > { %v11300_v49 = vadd.f32 %v15756_v4, %v11280_v16  ;;  %11066 = vmatpush1.bf16.msra.mxu0 %v14921_v35  ;;  %v14980_v35 = vcombine.high %v7985_v32, %v7989_v28  ;;  %v7993_v16 = vld [vmem:[%s17353_s13 + $0xfd8] sm:$0xff] }
 0xa5c   : > { %11230 = vmatpush1.bf16.msra.mxu1 %v14923_v63  ;;  %11067 = vmatprep.subr.bf16.mxu0 %v14930_v12  ;;  %v7992_v63 = vld [vmem:[%s17353_s13 + $0xfd0] sm:$0xff] }
 0xa5d   : > { %vm11302_vm9 = vcmp.ge.f32.partialorder %v11300_v49, 0.0  ;;  %v11304_v51 = vmul.f32 0.2, %v11300_v49  ;;  %11231 = vmatprep.subr.bf16.mxu1 %v14932_v37  ;;  %v7996_v12 = vld [vmem:[%s17353_s13 + $0xff0] sm:$0xff]  ;;  %v7997_v37 = vld [vmem:[%s17353_s13 + $0xff8] sm:$0xff] }
 0xa5e   : > { %v14986_v14 = vcombine.high %v7992_v63, %v7996_v12  ;;  %v14988_v46 = vcombine.high %v7993_v16, %v7997_v37  ;;  %v14985_v4 = vcombine.low %v7992_v63, %v7996_v12 }
 0xa5f   : > { %v11306_v59 = vsel %vm11302_vm9, %v11300_v49, %v11304_v51  ;;  %11068 = vmatpush1.bf16.msra.mxu0 %v14929_v25  ;;  %v14987_v49 = vcombine.low %v7993_v16, %v7997_v37  ;;  %v8019_v25 = vrot.slane %v18619_v48, %v4216_v60  ;;  %v8031_v51 = vrot.slane %v18619_v48, %v4228_v62  ;;  %v15757_v62 = vld [vmem:[#allocation2 + $0x8] sm:$0xff] }
 0xa60   : > { %11308 = vst [vmem:[#allocation2] sm:$0xff] %v11306_v59  ;;  %11232 = vmatpush1.bf16.msra.mxu1 %v14931_v47  ;;  %11069 = vmatprep.subr.bf16.mxu0 %v14938_v50  ;;  %v8027_v47 = vrot.slane %v18619_v48, %v4224_v31  ;;  %v8023_v50 = vrot.slane %v18619_v48, %v4220_v61 }
 0xa61   : > { %11233 = vmatprep.subr.bf16.mxu1 %v14940_v53 }
 0xa63   : > { %11070 = vmatpush1.bf16.msra.mxu0 %v14937_v39 }
 0xa64   : > { %11234 = vmatpush1.bf16.msra.mxu1 %v14939_v34  ;;  %11071 = vmatprep.subr.bf16.mxu0 %v14946_v26 }
 0xa65   : > { %11235 = vmatprep.subr.bf16.mxu1 %v14948_v42 }
 0xa67   : > { %11072 = vmatpush1.bf16.msra.mxu0 %v14945_v2 }
 0xa68   : > { %11236 = vmatpush1.bf16.msra.mxu1 %v14947_v13  ;;  %11073 = vmatprep.subr.bf16.mxu0 %v14954_v6 }
 0xa69   : > { %11237 = vmatprep.subr.bf16.mxu1 %v14956_v15 }
 0xa6b   : > { %11074 = vmatpush1.bf16.msra.mxu0 %v14953_v7 }
 0xa6c   : > { %11238 = vmatpush1.bf16.msra.mxu1 %v14955_v3  ;;  %11075 = vmatprep.subr.bf16.mxu0 %v14962_v20 }
 0xa6d   : > { %11239 = vmatprep.subr.bf16.mxu1 %v14964_v21 }
 0xa6f   : > { %11076 = vmatpush1.bf16.msra.mxu0 %v14961_v9 }
 0xa70   : > { %11240 = vmatpush1.bf16.msra.mxu1 %v14963_v18  ;;  %11077 = vmatprep.subr.bf16.mxu0 %v14970_v11 }
 0xa71   : > { %11241 = vmatprep.subr.bf16.mxu1 %v14972_v10 }
 0xa73   : > { %11078 = vmatpush1.bf16.msra.mxu0 %v14969_v30 }
 0xa74   : > { %11242 = vmatpush1.bf16.msra.mxu1 %v14971_v36  ;;  %11079 = vmatprep.subr.bf16.mxu0 %v14978_v38 }
 0xa75   : > { %11243 = vmatprep.subr.bf16.mxu1 %v14980_v35 }
 0xa77   : > { %11080 = vmatpush1.bf16.msra.mxu0 %v14977_v41 }
 0xa78   : > { %11244 = vmatpush1.bf16.msra.mxu1 %v14979_v8  ;;  %11081 = vmatprep.subr.bf16.mxu0 %v14986_v14 }
 0xa79   : > { %11245 = vmatprep.subr.bf16.mxu1 %v14988_v46 }
 0xa7b   : > { %11082 = vmatpush1.bf16.msra.mxu0 %v14985_v4 }
 0xa7c   : > { %11246 = vmatpush1.bf16.msra.mxu1 %v14987_v49 }
 0xa7e   : > { %11084 = vmatmul.mubr.bf16.vlgmr.msra.gmra.mrb[12].mxu0 %v18391_v43 }
 0xa7f   : > { %11248 = vmatmul.mubr.bf16.vlgmr.msra.gmra.mrb[12].mxu1 %v18391_v43 }
 0xb51   : > { %v11085_v53 = vpop.f32.mrb[12].mxu0 }
 0xb52   : > { %v15307_v55 = vadd.f32 %v11085_v53, %v8019_v25  ;;  %v11249_v27 = vpop.f32.mrb[12].mxu1  ;;  %v11087_v43 = vpop.f32.mrb[13].mxu0 }
 0xb53   : > { %v15309_v5 = vadd.f32 %v11249_v27, %v8027_v47  ;;  %v15308_v58 = vadd.f32 %v11087_v43, %v8023_v50  ;;  %v11251_v59 = vpop.f32.mrb[13].mxu1  ;;  %v11089_v60 = vpop.f32.mrb[14].mxu0 }
 0xb54   : > { %v15310_v39 = vadd.f32 %v11251_v59, %v8031_v51  ;;  %v11253_v34 = vpop.f32.mrb[14].mxu1  ;;  %v11090_v26 = vpop.f32.mrb[15].mxu0 }
 0xb55   : > { %v11281_v31 = vcombine.low %v15307_v55, %v15308_v58  ;;  %v11254_v42 = vpop.f32.mrb[15].mxu1 }
 0xb56   : > { %v11282_v29 = vcombine.low %v15309_v5, %v15310_v39 }
 0xb57   : > { %v11289_v61 = vrot.slane %v11281_v31, %v17470_v0 }
 0xb58   : > { %v11296_v56 = vrot.slane %v11282_v29, %v17470_v0 }
 0xb5a   : > { %v11297_v45 = vcombine.low %v11289_v61, %v11296_v56 }
 0xb5c   : > { %v11301_v48 = vadd.f32 %v15757_v62, %v11297_v45 }
 0xb5e   : > { %vm11303_vm10 = vcmp.ge.f32.partialorder %v11301_v48, 0.0  ;;  %v11305_v57 = vmul.f32 0.2, %v11301_v48 }
 0xb60   : > { %v11307_v1 = vsel %vm11303_vm10, %v11301_v48, %v11305_v57 }
 0xb61   : > { %11309 = vst [vmem:[#allocation2 + $0x8] sm:$0xff] %v11307_v1 }
 0xb62 PF: > { %p14989_p1 = scmp.lt.s32.totalorder %s16818_s27, 6 }
 0xb63   : > { %v15758_v0 = vld [vmem:[%s17361_s15 + $0x4] ss:$16 sps:$4 sm:$0xff] (!%p14989_p1)   ;;  %v15760_v2 = vld [vmem:[%s17361_s15 + $0xc] ss:$16 sps:$4 sm:$0xff] (!%p14989_p1)   ;;  %v15762_v13 = vld [vmem:[%s17361_s15] ss:$16 sps:$4 sm:$0xff] (!%p14989_p1)   ;;  %v11322_v49 = vlaneseq (!%p14989_p1) }
 0xb64   : > { %11313 = sbr.rel (%p14989_p1) target bundleno = 3410 (0xd52), region = 152  ;;  %12926 = vmatprep.subr.bf16.mxu0 (!%p14989_p1), %v15758_v0  ;;  %v15763_v6 = vld [vmem:[%s17361_s15 + $0x8] ss:$16 sps:$4 sm:$0xff] (!%p14989_p1)   ;;  %13090 = vmatprep.subr.bf16.mxu1 (!%p14989_p1), %v15760_v2  ;;  %v15764_v15 = vld [vmem:[%s17361_s15 + $0x24] ss:$16 sps:$4 sm:$0xff] (!%p14989_p1)  }
 0xb65   : > { %12927 = vmatpush1.bf16.msra.mxu0 (!%p14989_p1), %v15762_v13  ;;  %13091 = vmatpush1.bf16.msra.mxu1 (!%p14989_p1), %v15763_v6  ;;  %v15766_v17 = vld [vmem:[%s17361_s15 + $0x2c] ss:$16 sps:$4 sm:$0xff] (!%p14989_p1)   ;;  %v15768_v23 = vld [vmem:[%s17361_s15 + $0x20] ss:$16 sps:$4 sm:$0xff] (!%p14989_p1)   ;;  %v15769_v33 = vld [vmem:[%s17361_s15 + $0x28] ss:$16 sps:$4 sm:$0xff] (!%p14989_p1)  }
 0xb66   : > { %12928 = vmatprep.subr.bf16.mxu0 (!%p14989_p1), %v15764_v15  ;;  %13092 = vmatprep.subr.bf16.mxu1 (!%p14989_p1), %v15766_v17  ;;  %v15770_v19 = vld [vmem:[%s17361_s15 + $0x44] ss:$16 sps:$4 sm:$0xff] (!%p14989_p1)   ;;  %v15772_v7 = vld [vmem:[%s17361_s15 + $0x4c] ss:$16 sps:$4 sm:$0xff] (!%p14989_p1)   ;;  %v15774_v3 = vld [vmem:[%s17361_s15 + $0x40] ss:$16 sps:$4 sm:$0xff] (!%p14989_p1)  }
 0xb67   : > { %v15775_v20 = vld [vmem:[%s17361_s15 + $0x48] ss:$16 sps:$4 sm:$0xff] (!%p14989_p1)   ;;  %v15776_v21 = vld [vmem:[%s17361_s15 + $0x64] ss:$16 sps:$4 sm:$0xff] (!%p14989_p1)   ;;  %v15778_v22 = vld [vmem:[%s17361_s15 + $0x6c] ss:$16 sps:$4 sm:$0xff] (!%p14989_p1)  }
 0xb68   : > { %v15780_v24 = vld [vmem:[%s17361_s15 + $0x60] ss:$16 sps:$4 sm:$0xff] (!%p14989_p1)   ;;  %v15781_v40 = vld [vmem:[%s17361_s15 + $0x68] ss:$16 sps:$4 sm:$0xff] (!%p14989_p1)   ;;  %v15782_v44 = vld [vmem:[%s17361_s15 + $0x84] ss:$16 sps:$4 sm:$0xff] (!%p14989_p1)  }
 0xb69   : > { %12929 = vmatpush1.bf16.msra.mxu0 (!%p14989_p1), %v15768_v23  ;;  %13093 = vmatpush1.bf16.msra.mxu1 (!%p14989_p1), %v15769_v33  ;;  %v15784_v9 = vld [vmem:[%s17361_s15 + $0x8c] ss:$16 sps:$4 sm:$0xff] (!%p14989_p1)   ;;  %v15786_v18 = vld [vmem:[%s17361_s15 + $0x80] ss:$16 sps:$4 sm:$0xff] (!%p14989_p1)   ;;  %v15787_v11 = vld [vmem:[%s17361_s15 + $0x88] ss:$16 sps:$4 sm:$0xff] (!%p14989_p1)  }
 0xb6a   : > { %12930 = vmatprep.subr.bf16.mxu0 (!%p14989_p1), %v15770_v19  ;;  %13094 = vmatprep.subr.bf16.mxu1 (!%p14989_p1), %v15772_v7  ;;  %v15788_v10 = vld [vmem:[%s17361_s15 + $0xa4] ss:$16 sps:$4 sm:$0xff] (!%p14989_p1)   ;;  %v15790_v52 = vld [vmem:[%s17361_s15 + $0xac] ss:$16 sps:$4 sm:$0xff] (!%p14989_p1)   ;;  %v15792_v54 = vld [vmem:[%s17361_s15 + $0xa0] ss:$16 sps:$4 sm:$0xff] (!%p14989_p1)  }
 0xb6b   : > { %v15793_v32 = vld [vmem:[%s17361_s15 + $0xa8] ss:$16 sps:$4 sm:$0xff]   ;;  %v15794_v28 = vld [vmem:[%s17361_s15 + $0xc4] ss:$16 sps:$4 sm:$0xff]   ;;  %v15796_v30 = vld [vmem:[%s17361_s15 + $0xcc] ss:$16 sps:$4 sm:$0xff]  }
 0xb6c   : > { %v15798_v36 = vld [vmem:[%s17361_s15 + $0xc0] ss:$16 sps:$4 sm:$0xff]   ;;  %v15799_v38 = vld [vmem:[%s17361_s15 + $0xc8] ss:$16 sps:$4 sm:$0xff]   ;;  %v15800_v35 = vld [vmem:[%s17361_s15 + $0xe4] ss:$16 sps:$4 sm:$0xff]  }
 0xb6d   : > { %12931 = vmatpush1.bf16.msra.mxu0 %v15774_v3  ;;  %13095 = vmatpush1.bf16.msra.mxu1 %v15775_v20  ;;  %v15802_v63 = vld [vmem:[%s17361_s15 + $0xec] ss:$16 sps:$4 sm:$0xff]   ;;  %v15804_v12 = vld [vmem:[%s17361_s15 + $0xe0] ss:$16 sps:$4 sm:$0xff]   ;;  %v15805_v16 = vld [vmem:[%s17361_s15 + $0xe8] ss:$16 sps:$4 sm:$0xff]  }
 0xb6e   : > { %12932 = vmatprep.subr.bf16.mxu0 %v15776_v21  ;;  %13096 = vmatprep.subr.bf16.mxu1 %v15778_v22  ;;  %v15806_v37 = vld [vmem:[%s17361_s15 + $0x104] ss:$16 sps:$4 sm:$0xff]   ;;  %v15808_v41 = vld [vmem:[%s17361_s15 + $0x10c] ss:$16 sps:$4 sm:$0xff]   ;;  %v15810_v8 = vld [vmem:[%s17361_s15 + $0x100] ss:$16 sps:$4 sm:$0xff]  }
 0xb6f   : > { %v15811_v14 = vld [vmem:[%s17361_s15 + $0x108] ss:$16 sps:$4 sm:$0xff]   ;;  %v16701_v46 = vmov 1983009808   ;;  %v15812_v25 = vld [vmem:[%s17361_s15 + $0x124] ss:$16 sps:$4 sm:$0xff]  }
 0xb70   : > { %v11320_v4 = vunpack.c.l.s4 %v16701_v46  ;;  %v15814_v47 = vld [vmem:[%s17361_s15 + $0x12c] ss:$16 sps:$4 sm:$0xff]   ;;  %v15816_v50 = vld [vmem:[%s17361_s15 + $0x120] ss:$16 sps:$4 sm:$0xff]   ;;  %v18731_v53 = vshrl.u32 %v11322_v49, 7 }
 0xb71   : > { %12933 = vmatpush1.bf16.msra.mxu0 %v15780_v24  ;;  %13097 = vmatpush1.bf16.msra.mxu1 %v15781_v40  ;;  %v15817_v55 = vld [vmem:[%s17361_s15 + $0x128] ss:$16 sps:$4 sm:$0xff]   ;;  %v15818_v27 = vld [vmem:[%s17361_s15 + $0x144] ss:$16 sps:$4 sm:$0xff]   ;;  %v15820_v43 = vld [vmem:[%s17361_s15 + $0x14c] ss:$16 sps:$4 sm:$0xff]  }
 0xb72   : > { %12934 = vmatprep.subr.bf16.mxu0 %v15782_v44  ;;  %13098 = vmatprep.subr.bf16.mxu1 %v15784_v9  ;;  %v11321_v51 = vunpack.c.0.s8 %v11320_v4  ;;  %v15822_v5 = vld [vmem:[%s17361_s15 + $0x140] ss:$16 sps:$4 sm:$0xff]   ;;  %v15823_v58 = vld [vmem:[%s17361_s15 + $0x148] ss:$16 sps:$4 sm:$0xff]   ;;  %v15824_v60 = vld [vmem:[%s17361_s15 + $0x164] ss:$16 sps:$4 sm:$0xff]  }
 0xb73   : > { %v15826_v39 = vld [vmem:[%s17361_s15 + $0x16c] ss:$16 sps:$4 sm:$0xff]   ;;  %v15828_v26 = vld [vmem:[%s17361_s15 + $0x160] ss:$16 sps:$4 sm:$0xff]   ;;  %v15829_v42 = vld [vmem:[%s17361_s15 + $0x168] ss:$16 sps:$4 sm:$0xff]  }
 0xb74   : > { %v18739_v59 = vsub.s32 %v11321_v51, %v18731_v53  ;;  %v11314_v34 = vld [vmem:[#allocation2] sm:$0xff]  ;;  %v15835_v48 = vld [vmem:[%s17361_s15 + $0x188] ss:$16 sps:$4 sm:$0xff]  }
 0xb75   : > { %12935 = vmatpush1.bf16.msra.mxu0 %v15786_v18  ;;  %13099 = vmatpush1.bf16.msra.mxu1 %v15787_v11  ;;  %v15830_v29 = vld [vmem:[%s17361_s15 + $0x184] ss:$16 sps:$4 sm:$0xff]   ;;  %v15832_v61 = vld [vmem:[%s17361_s15 + $0x18c] ss:$16 sps:$4 sm:$0xff]   ;;  %v15834_v45 = vld [vmem:[%s17361_s15 + $0x180] ss:$16 sps:$4 sm:$0xff]   ;;  %v11318_v15 = vcombine.high %v11314_v34, %v11314_v34 }
 0xb76   : > { %12936 = vmatprep.subr.bf16.mxu0 %v15788_v10  ;;  %13100 = vmatprep.subr.bf16.mxu1 %v15790_v52  ;;  %v11325_v31 = vrot.slane %v11314_v34, %v18739_v59  ;;  %v15836_v57 = vld [vmem:[%s17361_s15 + $0x1a4] ss:$16 sps:$4 sm:$0xff]   ;;  %v15838_v1 = vld [vmem:[%s17361_s15 + $0x1ac] ss:$16 sps:$4 sm:$0xff]   ;;  %v15840_v0 = vld [vmem:[%s17361_s15 + $0x1a0] ss:$16 sps:$4 sm:$0xff]  }
 0xb77   : > { %v15841_v2 = vld [vmem:[%s17361_s15 + $0x1a8] ss:$16 sps:$4 sm:$0xff]   ;;  %v15842_v13 = vld [vmem:[%s17361_s15 + $0x1c4] ss:$16 sps:$4 sm:$0xff]   ;;  %v15844_v6 = vld [vmem:[%s17361_s15 + $0x1cc] ss:$16 sps:$4 sm:$0xff]   ;;  %v18761_v7 = vrot.slane %v11318_v15, %v18739_v59 }
 0xb78   : > { %v11333_v56 = vcombine.high %v11325_v31, %v11325_v31  ;;  %v15846_v17 = vld [vmem:[%s17361_s15 + $0x1c0] ss:$16 sps:$4 sm:$0xff]   ;;  %v15847_v23 = vld [vmem:[%s17361_s15 + $0x1c8] ss:$16 sps:$4 sm:$0xff]   ;;  %v15848_v33 = vld [vmem:[%s17361_s15 + $0x1e4] ss:$16 sps:$4 sm:$0xff]   ;;  %v11360_v44 = vpack.c.bf16 %v11325_v31, %v11325_v31 }
 0xb79   : > { %12937 = vmatpush1.bf16.msra.mxu0 %v15792_v54  ;;  %13101 = vmatpush1.bf16.msra.mxu1 %v15793_v32  ;;  %v15850_v19 = vld [vmem:[%s17361_s15 + $0x1ec] ss:$16 sps:$4 sm:$0xff]   ;;  %v15852_v3 = vld [vmem:[%s17361_s15 + $0x1e0] ss:$16 sps:$4 sm:$0xff]   ;;  %v15853_v20 = vld [vmem:[%s17361_s15 + $0x1e8] ss:$16 sps:$4 sm:$0xff]   ;;  %v11334_v24 = vcombine.high %v18761_v7, %v18761_v7 }
 0xb7a   : > { %12938 = vmatprep.subr.bf16.mxu0 %v15794_v28  ;;  %13102 = vmatprep.subr.bf16.mxu1 %v15796_v30  ;;  %v11361_v62 = vpack.c.bf16 %v11333_v56, %v11333_v56  ;;  %v15857_v21 = vld [vmem:[%s17361_s15 + $0x204] ss:$16 sps:$4 sm:$0xff]   ;;  %v15860_v22 = vld [vmem:[%s17361_s15 + $0x20c] ss:$16 sps:$4 sm:$0xff]   ;;  %v15855_v40 = vld [vmem:[%s17361_s15 + $0x200] ss:$16 sps:$4 sm:$0xff]  }
 0xb7b   : > { %v15858_v9 = vld [vmem:[%s17361_s15 + $0x208] ss:$16 sps:$4 sm:$0xff]   ;;  %v15863_v18 = vld [vmem:[%s17361_s15 + $0x224] ss:$16 sps:$4 sm:$0xff]   ;;  %v15866_v11 = vld [vmem:[%s17361_s15 + $0x22c] ss:$16 sps:$4 sm:$0xff]   ;;  %v11363_v10 = vpack.c.bf16 %v11334_v24, %v11334_v24 }
 0xb7c   : > { %12958 = vmatprep.mubr.bf16.mxu0 %v11361_v62  ;;  %13122 = vmatprep.mubr.bf16.mxu1 %v11361_v62  ;;  %v15861_v52 = vld [vmem:[%s17361_s15 + $0x220] ss:$16 sps:$4 sm:$0xff]   ;;  %v15864_v54 = vld [vmem:[%s17361_s15 + $0x228] ss:$16 sps:$4 sm:$0xff]   ;;  %v15869_v32 = vld [vmem:[%s17361_s15 + $0x244] ss:$16 sps:$4 sm:$0xff]  }
 0xb7d   : > { %12939 = vmatpush1.bf16.msra.mxu0 %v15798_v36  ;;  %13103 = vmatpush1.bf16.msra.mxu1 %v15799_v38  ;;  %v15872_v28 = vld [vmem:[%s17361_s15 + $0x24c] ss:$16 sps:$4 sm:$0xff]   ;;  %v15867_v30 = vld [vmem:[%s17361_s15 + $0x240] ss:$16 sps:$4 sm:$0xff]   ;;  %v15870_v36 = vld [vmem:[%s17361_s15 + $0x248] ss:$16 sps:$4 sm:$0xff]  }
 0xb7e   : > { %12940 = vmatprep.subr.bf16.mxu0 %v15800_v35  ;;  %13104 = vmatprep.subr.bf16.mxu1 %v15802_v63  ;;  %v15875_v38 = vld [vmem:[%s17361_s15 + $0x264] ss:$16 sps:$4 sm:$0xff]   ;;  %v15878_v35 = vld [vmem:[%s17361_s15 + $0x26c] ss:$16 sps:$4 sm:$0xff]   ;;  %v15873_v63 = vld [vmem:[%s17361_s15 + $0x260] ss:$16 sps:$4 sm:$0xff]  }
 0xb7f   : > { %v15890_v46 = vld [vmem:[%s17361_s15 + $0x2ac] ss:$16 sps:$4 sm:$0xff]   ;;  %v15885_v4 = vld [vmem:[%s17361_s15 + $0x2a0] ss:$16 sps:$4 sm:$0xff]   ;;  %v15888_v49 = vld [vmem:[%s17361_s15 + $0x2a8] ss:$16 sps:$4 sm:$0xff]  }
 0xb80   : > { %v15894_v51 = vld [vmem:[%s17361_s15 + $0x2c8] ss:$16 sps:$4 sm:$0xff]   ;;  %v15914_v31 = vld [vmem:[%s17361_s15 + $0x32c] ss:$16 sps:$4 sm:$0xff]   ;;  %v15947_v24 = vld [vmem:[%s17361_s15 + $0x3e4] ss:$16 sps:$4 sm:$0xff]  }
 0xb81   : > { %12941 = vmatpush1.bf16.msra.mxu0 %v15804_v12  ;;  %13105 = vmatpush1.bf16.msra.mxu1 %v15805_v16  ;;  %v15876_v12 = vld [vmem:[%s17361_s15 + $0x268] ss:$16 sps:$4 sm:$0xff]   ;;  %v15881_v16 = vld [vmem:[%s17361_s15 + $0x284] ss:$16 sps:$4 sm:$0xff]   ;;  %v15920_v56 = vld [vmem:[%s17361_s15 + $0x34c] ss:$16 sps:$4 sm:$0xff]  }
 0xb82   : > { %12942 = vmatprep.subr.bf16.mxu0 %v15806_v37  ;;  %13106 = vmatprep.subr.bf16.mxu1 %v15808_v41  ;;  %v15884_v37 = vld [vmem:[%s17361_s15 + $0x28c] ss:$16 sps:$4 sm:$0xff]   ;;  %v15879_v41 = vld [vmem:[%s17361_s15 + $0x280] ss:$16 sps:$4 sm:$0xff]   ;;  %v15906_v34 = vld [vmem:[%s17361_s15 + $0x308] ss:$16 sps:$4 sm:$0xff]  }
 0xb83   : > { %v15918_v62 = vld [vmem:[%s17361_s15 + $0x348] ss:$16 sps:$4 sm:$0xff]  }
 0xb84   : > { %v15930_v15 = vld [vmem:[%s17361_s15 + $0x388] ss:$16 sps:$4 sm:$0xff]  }
 0xb85   : > { %12943 = vmatpush1.bf16.msra.mxu0 %v15810_v8  ;;  %13107 = vmatpush1.bf16.msra.mxu1 %v15811_v14  ;;  %v15882_v8 = vld [vmem:[%s17361_s15 + $0x288] ss:$16 sps:$4 sm:$0xff]   ;;  %v15887_v14 = vld [vmem:[%s17361_s15 + $0x2a4] ss:$16 sps:$4 sm:$0xff]  }
 0xb86   : > { %12944 = vmatprep.subr.bf16.mxu0 %v15812_v25  ;;  %13108 = vmatprep.subr.bf16.mxu1 %v15814_v47  ;;  %v15893_v25 = vld [vmem:[%s17361_s15 + $0x2c4] ss:$16 sps:$4 sm:$0xff]   ;;  %v15896_v47 = vld [vmem:[%s17361_s15 + $0x2cc] ss:$16 sps:$4 sm:$0xff]  }
 0xb89   : > { %12945 = vmatpush1.bf16.msra.mxu0 %v15816_v50  ;;  %13109 = vmatpush1.bf16.msra.mxu1 %v15817_v55  ;;  %v15891_v50 = vld [vmem:[%s17361_s15 + $0x2c0] ss:$16 sps:$4 sm:$0xff]   ;;  %v15899_v55 = vld [vmem:[%s17361_s15 + $0x2e4] ss:$16 sps:$4 sm:$0xff]  }
 0xb8a   : > { %12946 = vmatprep.subr.bf16.mxu0 %v15818_v27  ;;  %13110 = vmatprep.subr.bf16.mxu1 %v15820_v43  ;;  %v15902_v27 = vld [vmem:[%s17361_s15 + $0x2ec] ss:$16 sps:$4 sm:$0xff]   ;;  %v15897_v43 = vld [vmem:[%s17361_s15 + $0x2e0] ss:$16 sps:$4 sm:$0xff]  }
 0xb8d   : > { %12947 = vmatpush1.bf16.msra.mxu0 %v15822_v5  ;;  %13111 = vmatpush1.bf16.msra.mxu1 %v15823_v58  ;;  %v15900_v5 = vld [vmem:[%s17361_s15 + $0x2e8] ss:$16 sps:$4 sm:$0xff]   ;;  %v15905_v58 = vld [vmem:[%s17361_s15 + $0x304] ss:$16 sps:$4 sm:$0xff]  }
 0xb8e   : > { %12948 = vmatprep.subr.bf16.mxu0 %v15824_v60  ;;  %13112 = vmatprep.subr.bf16.mxu1 %v15826_v39  ;;  %v15908_v60 = vld [vmem:[%s17361_s15 + $0x30c] ss:$16 sps:$4 sm:$0xff]   ;;  %v15903_v39 = vld [vmem:[%s17361_s15 + $0x300] ss:$16 sps:$4 sm:$0xff]  }
 0xb91   : > { %12949 = vmatpush1.bf16.msra.mxu0 %v15828_v26  ;;  %13113 = vmatpush1.bf16.msra.mxu1 %v15829_v42  ;;  %v15911_v26 = vld [vmem:[%s17361_s15 + $0x324] ss:$16 sps:$4 sm:$0xff]   ;;  %v15909_v42 = vld [vmem:[%s17361_s15 + $0x320] ss:$16 sps:$4 sm:$0xff]  }
 0xb92   : > { %12950 = vmatprep.subr.bf16.mxu0 %v15830_v29  ;;  %13114 = vmatprep.subr.bf16.mxu1 %v15832_v61  ;;  %v15912_v29 = vld [vmem:[%s17361_s15 + $0x328] ss:$16 sps:$4 sm:$0xff]   ;;  %v15917_v61 = vld [vmem:[%s17361_s15 + $0x344] ss:$16 sps:$4 sm:$0xff]  }
 0xb95   : > { %12951 = vmatpush1.bf16.msra.mxu0 %v15834_v45  ;;  %13115 = vmatpush1.bf16.msra.mxu1 %v15835_v48  ;;  %v15915_v45 = vld [vmem:[%s17361_s15 + $0x340] ss:$16 sps:$4 sm:$0xff]   ;;  %v15923_v48 = vld [vmem:[%s17361_s15 + $0x364] ss:$16 sps:$4 sm:$0xff]  }
 0xb96   : > { %12952 = vmatprep.subr.bf16.mxu0 %v15836_v57  ;;  %13116 = vmatprep.subr.bf16.mxu1 %v15838_v1  ;;  %v15926_v57 = vld [vmem:[%s17361_s15 + $0x36c] ss:$16 sps:$4 sm:$0xff]   ;;  %v15921_v1 = vld [vmem:[%s17361_s15 + $0x360] ss:$16 sps:$4 sm:$0xff]  }
 0xb99   : > { %12953 = vmatpush1.bf16.msra.mxu0 %v15840_v0  ;;  %13117 = vmatpush1.bf16.msra.mxu1 %v15841_v2  ;;  %v15924_v0 = vld [vmem:[%s17361_s15 + $0x368] ss:$16 sps:$4 sm:$0xff]   ;;  %v15929_v2 = vld [vmem:[%s17361_s15 + $0x384] ss:$16 sps:$4 sm:$0xff]  }
 0xb9a   : > { %12954 = vmatprep.subr.bf16.mxu0 %v15842_v13  ;;  %13118 = vmatprep.subr.bf16.mxu1 %v15844_v6  ;;  %v15932_v13 = vld [vmem:[%s17361_s15 + $0x38c] ss:$16 sps:$4 sm:$0xff]   ;;  %v15927_v6 = vld [vmem:[%s17361_s15 + $0x380] ss:$16 sps:$4 sm:$0xff]  }
 0xb9d   : > { %12955 = vmatpush1.bf16.msra.mxu0 %v15846_v17  ;;  %13119 = vmatpush1.bf16.msra.mxu1 %v15847_v23  ;;  %v15935_v17 = vld [vmem:[%s17361_s15 + $0x3a4] ss:$16 sps:$4 sm:$0xff]   ;;  %v15938_v23 = vld [vmem:[%s17361_s15 + $0x3ac] ss:$16 sps:$4 sm:$0xff]  }
 0xb9e   : > { %12956 = vmatprep.subr.bf16.mxu0 %v15848_v33  ;;  %13120 = vmatprep.subr.bf16.mxu1 %v15850_v19  ;;  %v15933_v33 = vld [vmem:[%s17361_s15 + $0x3a0] ss:$16 sps:$4 sm:$0xff]   ;;  %v15936_v19 = vld [vmem:[%s17361_s15 + $0x3a8] ss:$16 sps:$4 sm:$0xff]  }
 0xba1   : > { %12957 = vmatpush1.bf16.msra.mxu0 %v15852_v3  ;;  %13121 = vmatpush1.bf16.msra.mxu1 %v15853_v20  ;;  %v15941_v3 = vld [vmem:[%s17361_s15 + $0x3c4] ss:$16 sps:$4 sm:$0xff]   ;;  %v15944_v20 = vld [vmem:[%s17361_s15 + $0x3cc] ss:$16 sps:$4 sm:$0xff]  }
 0xba2   : > { %12967 = vmatprep.subr.bf16.mxu0 %v15857_v21  ;;  %13131 = vmatprep.subr.bf16.mxu1 %v15860_v22  ;;  %v15939_v21 = vld [vmem:[%s17361_s15 + $0x3c0] ss:$16 sps:$4 sm:$0xff]   ;;  %v15942_v22 = vld [vmem:[%s17361_s15 + $0x3c8] ss:$16 sps:$4 sm:$0xff]  }
 0xba4   : > { %12959 = vmatmul.mubr.bf16.vlgmr.msra.gmra.mrb[0].mxu0 %v11360_v44  ;;  %13123 = vmatmul.mubr.bf16.vlgmr.msra.gmra.mrb[0].mxu1 %v11360_v44  ;;  %v15945_v44 = vld [vmem:[%s17361_s15 + $0x3e0] ss:$16 sps:$4 sm:$0xff]  }
 0xba5   : > { %12968 = vmatpush1.bf16.msra.mxu0 %v15855_v40  ;;  %13132 = vmatpush1.bf16.msra.mxu1 %v15858_v9  ;;  %v15950_v40 = vld [vmem:[%s17361_s15 + $0x3ec] ss:$16 sps:$4 sm:$0xff]   ;;  %v15948_v9 = vld [vmem:[%s17361_s15 + $0x3e8] ss:$16 sps:$4 sm:$0xff]  }
 0xba6   : > { %12969 = vmatprep.subr.bf16.mxu0 %v15863_v18  ;;  %13133 = vmatprep.subr.bf16.mxu1 %v15866_v11  ;;  %v15953_v18 = vld [vmem:[%s17361_s15 + $0x404] ss:$16 sps:$4 sm:$0xff]   ;;  %v15956_v11 = vld [vmem:[%s17361_s15 + $0x40c] ss:$16 sps:$4 sm:$0xff]  }
 0xba7   : > { %12999 = vmatprep.mubr.bf16.mxu0 %v11363_v10  ;;  %13163 = vmatprep.mubr.bf16.mxu1 %v11363_v10  ;;  %v15951_v10 = vld [vmem:[%s17361_s15 + $0x400] ss:$16 sps:$4 sm:$0xff]  }
 0xba9   : > { %12970 = vmatpush1.bf16.msra.mxu0 %v15861_v52  ;;  %13134 = vmatpush1.bf16.msra.mxu1 %v15864_v54  ;;  %v11362_v52 = vpack.c.bf16 %v18761_v7, %v18761_v7  ;;  %v15954_v54 = vld [vmem:[%s17361_s15 + $0x408] ss:$16 sps:$4 sm:$0xff]  }
 0xbaa   : > { %12971 = vmatprep.subr.bf16.mxu0 %v15869_v32  ;;  %13135 = vmatprep.subr.bf16.mxu1 %v15872_v28  ;;  %v18837_v32 = vld [vmem:[#allocation2 + $0x8] sm:$0xff] }
 0xbab   : > { %v15959_v28 = vld [vmem:[%s17361_s15 + $0x424] ss:$16 sps:$4 sm:$0xff]  }
 0xbad   : > { %12972 = vmatpush1.bf16.msra.mxu0 %v15867_v30  ;;  %13136 = vmatpush1.bf16.msra.mxu1 %v15870_v36  ;;  %v15962_v30 = vld [vmem:[%s17361_s15 + $0x42c] ss:$16 sps:$4 sm:$0xff]   ;;  %v18843_v36 = vrot.slane %v18837_v32, %v18739_v59 }
 0xbae   : > { %12973 = vmatprep.subr.bf16.mxu0 %v15875_v38  ;;  %13137 = vmatprep.subr.bf16.mxu1 %v15878_v35  ;;  %v15957_v38 = vld [vmem:[%s17361_s15 + $0x420] ss:$16 sps:$4 sm:$0xff]   ;;  %v15960_v35 = vld [vmem:[%s17361_s15 + $0x428] ss:$16 sps:$4 sm:$0xff]  }
 0xbaf   : > { %v11350_v7 = vcombine.high %v18843_v36, %v18843_v36 }
 0xbb1   : > { %12974 = vmatpush1.bf16.msra.mxu0 %v15873_v63  ;;  %13138 = vmatpush1.bf16.msra.mxu1 %v15876_v12  ;;  %v15965_v63 = vld [vmem:[%s17361_s15 + $0x444] ss:$16 sps:$4 sm:$0xff]   ;;  %v15968_v12 = vld [vmem:[%s17361_s15 + $0x44c] ss:$16 sps:$4 sm:$0xff]  }
 0xbb2   : > { %12975 = vmatprep.subr.bf16.mxu0 %v15881_v16  ;;  %13139 = vmatprep.subr.bf16.mxu1 %v15884_v37  ;;  %v11365_v16 = vpack.c.bf16 %v11350_v7, %v11350_v7  ;;  %v15963_v37 = vld [vmem:[%s17361_s15 + $0x440] ss:$16 sps:$4 sm:$0xff]   ;;  %v16044_v7 = vld [vmem:[%s17361_s15 + $0x5e8] ss:$16 sps:$4 sm:$0xff]  }
 0xbb5   : > { %12976 = vmatpush1.bf16.msra.mxu0 %v15879_v41  ;;  %13140 = vmatpush1.bf16.msra.mxu1 %v15882_v8  ;;  %v15966_v41 = vld [vmem:[%s17361_s15 + $0x448] ss:$16 sps:$4 sm:$0xff]   ;;  %v15971_v8 = vld [vmem:[%s17361_s15 + $0x464] ss:$16 sps:$4 sm:$0xff]  }
 0xbb6   : > { %12977 = vmatprep.subr.bf16.mxu0 %v15887_v14  ;;  %13141 = vmatprep.subr.bf16.mxu1 %v15890_v46  ;;  %v15974_v14 = vld [vmem:[%s17361_s15 + $0x46c] ss:$16 sps:$4 sm:$0xff]   ;;  %v15969_v46 = vld [vmem:[%s17361_s15 + $0x460] ss:$16 sps:$4 sm:$0xff]  }
 0xbb9   : > { %12978 = vmatpush1.bf16.msra.mxu0 %v15885_v4  ;;  %13142 = vmatpush1.bf16.msra.mxu1 %v15888_v49  ;;  %v15972_v4 = vld [vmem:[%s17361_s15 + $0x468] ss:$16 sps:$4 sm:$0xff]   ;;  %v15977_v49 = vld [vmem:[%s17361_s15 + $0x484] ss:$16 sps:$4 sm:$0xff]  }
 0xbba   : > { %12979 = vmatprep.subr.bf16.mxu0 %v15893_v25  ;;  %13143 = vmatprep.subr.bf16.mxu1 %v15896_v47  ;;  %v15980_v25 = vld [vmem:[%s17361_s15 + $0x48c] ss:$16 sps:$4 sm:$0xff]   ;;  %v15975_v47 = vld [vmem:[%s17361_s15 + $0x480] ss:$16 sps:$4 sm:$0xff]  }
 0xbbd   : > { %12980 = vmatpush1.bf16.msra.mxu0 %v15891_v50  ;;  %13144 = vmatpush1.bf16.msra.mxu1 %v15894_v51  ;;  %v15978_v50 = vld [vmem:[%s17361_s15 + $0x488] ss:$16 sps:$4 sm:$0xff]   ;;  %v15983_v51 = vld [vmem:[%s17361_s15 + $0x4a4] ss:$16 sps:$4 sm:$0xff]  }
 0xbbe   : > { %12981 = vmatprep.subr.bf16.mxu0 %v15899_v55  ;;  %13145 = vmatprep.subr.bf16.mxu1 %v15902_v27  ;;  %v15986_v55 = vld [vmem:[%s17361_s15 + $0x4ac] ss:$16 sps:$4 sm:$0xff]   ;;  %v15981_v27 = vld [vmem:[%s17361_s15 + $0x4a0] ss:$16 sps:$4 sm:$0xff]  }
 0xbc1   : > { %12982 = vmatpush1.bf16.msra.mxu0 %v15897_v43  ;;  %13146 = vmatpush1.bf16.msra.mxu1 %v15900_v5  ;;  %v15984_v43 = vld [vmem:[%s17361_s15 + $0x4a8] ss:$16 sps:$4 sm:$0xff]   ;;  %v15989_v5 = vld [vmem:[%s17361_s15 + $0x4c4] ss:$16 sps:$4 sm:$0xff]  }
 0xbc2   : > { %12983 = vmatprep.subr.bf16.mxu0 %v15905_v58  ;;  %13147 = vmatprep.subr.bf16.mxu1 %v15908_v60  ;;  %v15992_v58 = vld [vmem:[%s17361_s15 + $0x4cc] ss:$16 sps:$4 sm:$0xff]   ;;  %v15987_v60 = vld [vmem:[%s17361_s15 + $0x4c0] ss:$16 sps:$4 sm:$0xff]  }
 0xbc5   : > { %12984 = vmatpush1.bf16.msra.mxu0 %v15903_v39  ;;  %13148 = vmatpush1.bf16.msra.mxu1 %v15906_v34  ;;  %v15990_v39 = vld [vmem:[%s17361_s15 + $0x4c8] ss:$16 sps:$4 sm:$0xff]   ;;  %v15995_v34 = vld [vmem:[%s17361_s15 + $0x4e4] ss:$16 sps:$4 sm:$0xff]  }
 0xbc6   : > { %12985 = vmatprep.subr.bf16.mxu0 %v15911_v26  ;;  %13149 = vmatprep.subr.bf16.mxu1 %v15914_v31  ;;  %v15998_v26 = vld [vmem:[%s17361_s15 + $0x4ec] ss:$16 sps:$4 sm:$0xff]   ;;  %v15993_v31 = vld [vmem:[%s17361_s15 + $0x4e0] ss:$16 sps:$4 sm:$0xff]  }
 0xbc9   : > { %12986 = vmatpush1.bf16.msra.mxu0 %v15909_v42  ;;  %13150 = vmatpush1.bf16.msra.mxu1 %v15912_v29  ;;  %v15996_v42 = vld [vmem:[%s17361_s15 + $0x4e8] ss:$16 sps:$4 sm:$0xff]   ;;  %v16001_v29 = vld [vmem:[%s17361_s15 + $0x504] ss:$16 sps:$4 sm:$0xff]  }
 0xbca   : > { %12987 = vmatprep.subr.bf16.mxu0 %v15917_v61  ;;  %13151 = vmatprep.subr.bf16.mxu1 %v15920_v56  ;;  %v16004_v61 = vld [vmem:[%s17361_s15 + $0x50c] ss:$16 sps:$4 sm:$0xff]   ;;  %v15999_v56 = vld [vmem:[%s17361_s15 + $0x500] ss:$16 sps:$4 sm:$0xff]  }
 0xbcd   : > { %12988 = vmatpush1.bf16.msra.mxu0 %v15915_v45  ;;  %13152 = vmatpush1.bf16.msra.mxu1 %v15918_v62  ;;  %v16002_v45 = vld [vmem:[%s17361_s15 + $0x508] ss:$16 sps:$4 sm:$0xff]   ;;  %v16007_v62 = vld [vmem:[%s17361_s15 + $0x524] ss:$16 sps:$4 sm:$0xff]  }
 0xbce   : > { %12989 = vmatprep.subr.bf16.mxu0 %v15923_v48  ;;  %13153 = vmatprep.subr.bf16.mxu1 %v15926_v57  ;;  %v16010_v48 = vld [vmem:[%s17361_s15 + $0x52c] ss:$16 sps:$4 sm:$0xff]   ;;  %v16005_v57 = vld [vmem:[%s17361_s15 + $0x520] ss:$16 sps:$4 sm:$0xff]  }
 0xbd1   : > { %12990 = vmatpush1.bf16.msra.mxu0 %v15921_v1  ;;  %13154 = vmatpush1.bf16.msra.mxu1 %v15924_v0  ;;  %v16008_v1 = vld [vmem:[%s17361_s15 + $0x528] ss:$16 sps:$4 sm:$0xff]   ;;  %v16013_v0 = vld [vmem:[%s17361_s15 + $0x544] ss:$16 sps:$4 sm:$0xff]  }
 0xbd2   : > { %12991 = vmatprep.subr.bf16.mxu0 %v15929_v2  ;;  %13155 = vmatprep.subr.bf16.mxu1 %v15932_v13  ;;  %v16016_v2 = vld [vmem:[%s17361_s15 + $0x54c] ss:$16 sps:$4 sm:$0xff]   ;;  %v16011_v13 = vld [vmem:[%s17361_s15 + $0x540] ss:$16 sps:$4 sm:$0xff]  }
 0xbd5   : > { %12992 = vmatpush1.bf16.msra.mxu0 %v15927_v6  ;;  %13156 = vmatpush1.bf16.msra.mxu1 %v15930_v15  ;;  %v16014_v6 = vld [vmem:[%s17361_s15 + $0x548] ss:$16 sps:$4 sm:$0xff]   ;;  %v16019_v15 = vld [vmem:[%s17361_s15 + $0x564] ss:$16 sps:$4 sm:$0xff]  }
 0xbd6   : > { %12993 = vmatprep.subr.bf16.mxu0 %v15935_v17  ;;  %13157 = vmatprep.subr.bf16.mxu1 %v15938_v23  ;;  %v16022_v17 = vld [vmem:[%s17361_s15 + $0x56c] ss:$16 sps:$4 sm:$0xff]   ;;  %v16017_v23 = vld [vmem:[%s17361_s15 + $0x560] ss:$16 sps:$4 sm:$0xff]  }
 0xbd9   : > { %12994 = vmatpush1.bf16.msra.mxu0 %v15933_v33  ;;  %13158 = vmatpush1.bf16.msra.mxu1 %v15936_v19  ;;  %v16020_v33 = vld [vmem:[%s17361_s15 + $0x568] ss:$16 sps:$4 sm:$0xff]   ;;  %v16025_v19 = vld [vmem:[%s17361_s15 + $0x584] ss:$16 sps:$4 sm:$0xff]  }
 0xbda   : > { %12995 = vmatprep.subr.bf16.mxu0 %v15941_v3  ;;  %13159 = vmatprep.subr.bf16.mxu1 %v15944_v20  ;;  %v16028_v3 = vld [vmem:[%s17361_s15 + $0x58c] ss:$16 sps:$4 sm:$0xff]   ;;  %v16023_v20 = vld [vmem:[%s17361_s15 + $0x580] ss:$16 sps:$4 sm:$0xff]  }
 0xbdd   : > { %12996 = vmatpush1.bf16.msra.mxu0 %v15939_v21  ;;  %13160 = vmatpush1.bf16.msra.mxu1 %v15942_v22  ;;  %v16026_v21 = vld [vmem:[%s17361_s15 + $0x588] ss:$16 sps:$4 sm:$0xff]   ;;  %v16031_v22 = vld [vmem:[%s17361_s15 + $0x5a4] ss:$16 sps:$4 sm:$0xff]  }
 0xbde   : > { %12997 = vmatprep.subr.bf16.mxu0 %v15947_v24  ;;  %13161 = vmatprep.subr.bf16.mxu1 %v15950_v40  ;;  %v16034_v24 = vld [vmem:[%s17361_s15 + $0x5ac] ss:$16 sps:$4 sm:$0xff]   ;;  %v16029_v40 = vld [vmem:[%s17361_s15 + $0x5a0] ss:$16 sps:$4 sm:$0xff]  }
 0xbe1   : > { %12998 = vmatpush1.bf16.msra.mxu0 %v15945_v44  ;;  %13162 = vmatpush1.bf16.msra.mxu1 %v15948_v9  ;;  %v16032_v44 = vld [vmem:[%s17361_s15 + $0x5a8] ss:$16 sps:$4 sm:$0xff]   ;;  %v16037_v9 = vld [vmem:[%s17361_s15 + $0x5c4] ss:$16 sps:$4 sm:$0xff]  }
 0xbe2   : > { %13008 = vmatprep.subr.bf16.mxu0 %v15953_v18  ;;  %13172 = vmatprep.subr.bf16.mxu1 %v15956_v11  ;;  %v16040_v18 = vld [vmem:[%s17361_s15 + $0x5cc] ss:$16 sps:$4 sm:$0xff]   ;;  %v11335_v11 = vcombine.high %v18837_v32, %v18837_v32  ;;  %v16041_v32 = vld [vmem:[%s17361_s15 + $0x5e0] ss:$16 sps:$4 sm:$0xff]  }
 0xbe4   : > { %13000 = vmatmul.mubr.bf16.vlgmr.msra.gmra.mrb[0].mxu0 %v11362_v52  ;;  %13164 = vmatmul.mubr.bf16.vlgmr.msra.gmra.mrb[0].mxu1 %v11362_v52  ;;  %v16038_v52 = vld [vmem:[%s17361_s15 + $0x5c8] ss:$16 sps:$4 sm:$0xff]  }
 0xbe5   : > { %13009 = vmatpush1.bf16.msra.mxu0 %v15951_v10  ;;  %13173 = vmatpush1.bf16.msra.mxu1 %v15954_v54  ;;  %v16035_v10 = vld [vmem:[%s17361_s15 + $0x5c0] ss:$16 sps:$4 sm:$0xff]   ;;  %v16043_v54 = vld [vmem:[%s17361_s15 + $0x5e4] ss:$16 sps:$4 sm:$0xff]  }
 0xbe6   : > { %13010 = vmatprep.subr.bf16.mxu0 %v15959_v28  ;;  %13174 = vmatprep.subr.bf16.mxu1 %v15962_v30  ;;  %v16046_v28 = vld [vmem:[%s17361_s15 + $0x5ec] ss:$16 sps:$4 sm:$0xff]   ;;  %v18906_v30 = vrot.slane %v11335_v11, %v18739_v59  ;;  %v16122_v11 = vld [vmem:[%s17361_s15 + $0x788] ss:$16 sps:$4 sm:$0xff]  }
 0xbe7   : > { %13040 = vmatprep.mubr.bf16.mxu0 %v11365_v16  ;;  %13204 = vmatprep.mubr.bf16.mxu1 %v11365_v16  ;;  %v16047_v16 = vld [vmem:[%s17361_s15 + $0x600] ss:$16 sps:$4 sm:$0xff]  }
 0xbe9   : > { %13011 = vmatpush1.bf16.msra.mxu0 %v15957_v38  ;;  %13175 = vmatpush1.bf16.msra.mxu1 %v15960_v35  ;;  %v16049_v38 = vld [vmem:[%s17361_s15 + $0x604] ss:$16 sps:$4 sm:$0xff]   ;;  %v16052_v35 = vld [vmem:[%s17361_s15 + $0x60c] ss:$16 sps:$4 sm:$0xff]  }
 0xbea   : > { %13012 = vmatprep.subr.bf16.mxu0 %v15965_v63  ;;  %13176 = vmatprep.subr.bf16.mxu1 %v15968_v12  ;;  %v11351_v63 = vcombine.high %v18906_v30, %v18906_v30  ;;  %v11364_v12 = vpack.c.bf16 %v18843_v36, %v18843_v36  ;;  %v16053_v36 = vld [vmem:[%s17361_s15 + $0x620] ss:$16 sps:$4 sm:$0xff]  }
 0xbed   : > { %13013 = vmatpush1.bf16.msra.mxu0 %v15963_v37  ;;  %13177 = vmatpush1.bf16.msra.mxu1 %v15966_v41  ;;  %v16050_v37 = vld [vmem:[%s17361_s15 + $0x608] ss:$16 sps:$4 sm:$0xff]   ;;  %v16055_v41 = vld [vmem:[%s17361_s15 + $0x624] ss:$16 sps:$4 sm:$0xff]  }
 0xbee   : > { %13014 = vmatprep.subr.bf16.mxu0 %v15971_v8  ;;  %13178 = vmatprep.subr.bf16.mxu1 %v15974_v14  ;;  %v16058_v8 = vld [vmem:[%s17361_s15 + $0x62c] ss:$16 sps:$4 sm:$0xff]   ;;  %v11367_v14 = vpack.c.bf16 %v11351_v63, %v11351_v63  ;;  %v16139_v63 = vld [vmem:[%s17361_s15 + $0x7e4] ss:$16 sps:$4 sm:$0xff]  }
 0xbf1   : > { %13015 = vmatpush1.bf16.msra.mxu0 %v15969_v46  ;;  %13179 = vmatpush1.bf16.msra.mxu1 %v15972_v4  ;;  %v16056_v46 = vld [vmem:[%s17361_s15 + $0x628] ss:$16 sps:$4 sm:$0xff]   ;;  %v16061_v4 = vld [vmem:[%s17361_s15 + $0x644] ss:$16 sps:$4 sm:$0xff]  }
 0xbf2   : > { %13016 = vmatprep.subr.bf16.mxu0 %v15977_v49  ;;  %13180 = vmatprep.subr.bf16.mxu1 %v15980_v25  ;;  %v16064_v49 = vld [vmem:[%s17361_s15 + $0x64c] ss:$16 sps:$4 sm:$0xff]   ;;  %v16059_v25 = vld [vmem:[%s17361_s15 + $0x640] ss:$16 sps:$4 sm:$0xff]  }
 0xbf5   : > { %13017 = vmatpush1.bf16.msra.mxu0 %v15975_v47  ;;  %13181 = vmatpush1.bf16.msra.mxu1 %v15978_v50  ;;  %v16062_v47 = vld [vmem:[%s17361_s15 + $0x648] ss:$16 sps:$4 sm:$0xff]   ;;  %v16067_v50 = vld [vmem:[%s17361_s15 + $0x664] ss:$16 sps:$4 sm:$0xff]  }
 0xbf6   : > { %13018 = vmatprep.subr.bf16.mxu0 %v15983_v51  ;;  %13182 = vmatprep.subr.bf16.mxu1 %v15986_v55  ;;  %v16070_v51 = vld [vmem:[%s17361_s15 + $0x66c] ss:$16 sps:$4 sm:$0xff]   ;;  %v16065_v55 = vld [vmem:[%s17361_s15 + $0x660] ss:$16 sps:$4 sm:$0xff]  }
 0xbf9   : > { %13019 = vmatpush1.bf16.msra.mxu0 %v15981_v27  ;;  %13183 = vmatpush1.bf16.msra.mxu1 %v15984_v43  ;;  %v16068_v27 = vld [vmem:[%s17361_s15 + $0x668] ss:$16 sps:$4 sm:$0xff]   ;;  %v16073_v43 = vld [vmem:[%s17361_s15 + $0x684] ss:$16 sps:$4 sm:$0xff]  }
 0xbfa   : > { %13020 = vmatprep.subr.bf16.mxu0 %v15989_v5  ;;  %13184 = vmatprep.subr.bf16.mxu1 %v15992_v58  ;;  %v16076_v5 = vld [vmem:[%s17361_s15 + $0x68c] ss:$16 sps:$4 sm:$0xff]   ;;  %v16071_v58 = vld [vmem:[%s17361_s15 + $0x680] ss:$16 sps:$4 sm:$0xff]  }
 0xbfd   : > { %13021 = vmatpush1.bf16.msra.mxu0 %v15987_v60  ;;  %13185 = vmatpush1.bf16.msra.mxu1 %v15990_v39  ;;  %v16074_v60 = vld [vmem:[%s17361_s15 + $0x688] ss:$16 sps:$4 sm:$0xff]   ;;  %v16079_v39 = vld [vmem:[%s17361_s15 + $0x6a4] ss:$16 sps:$4 sm:$0xff]  }
 0xbfe   : > { %13022 = vmatprep.subr.bf16.mxu0 %v15995_v34  ;;  %13186 = vmatprep.subr.bf16.mxu1 %v15998_v26  ;;  %v16082_v34 = vld [vmem:[%s17361_s15 + $0x6ac] ss:$16 sps:$4 sm:$0xff]   ;;  %v16077_v26 = vld [vmem:[%s17361_s15 + $0x6a0] ss:$16 sps:$4 sm:$0xff]  }
 0xc01   : > { %13023 = vmatpush1.bf16.msra.mxu0 %v15993_v31  ;;  %13187 = vmatpush1.bf16.msra.mxu1 %v15996_v42  ;;  %v16080_v31 = vld [vmem:[%s17361_s15 + $0x6a8] ss:$16 sps:$4 sm:$0xff]   ;;  %v16085_v42 = vld [vmem:[%s17361_s15 + $0x6c4] ss:$16 sps:$4 sm:$0xff]  }
 0xc02   : > { %13024 = vmatprep.subr.bf16.mxu0 %v16001_v29  ;;  %13188 = vmatprep.subr.bf16.mxu1 %v16004_v61  ;;  %v16088_v29 = vld [vmem:[%s17361_s15 + $0x6cc] ss:$16 sps:$4 sm:$0xff]   ;;  %v16083_v61 = vld [vmem:[%s17361_s15 + $0x6c0] ss:$16 sps:$4 sm:$0xff]  }
 0xc05   : > { %13025 = vmatpush1.bf16.msra.mxu0 %v15999_v56  ;;  %13189 = vmatpush1.bf16.msra.mxu1 %v16002_v45  ;;  %v16086_v56 = vld [vmem:[%s17361_s15 + $0x6c8] ss:$16 sps:$4 sm:$0xff]   ;;  %v16091_v45 = vld [vmem:[%s17361_s15 + $0x6e4] ss:$16 sps:$4 sm:$0xff]  }
 0xc06   : > { %13026 = vmatprep.subr.bf16.mxu0 %v16007_v62  ;;  %13190 = vmatprep.subr.bf16.mxu1 %v16010_v48  ;;  %v16094_v62 = vld [vmem:[%s17361_s15 + $0x6ec] ss:$16 sps:$4 sm:$0xff]   ;;  %v16089_v48 = vld [vmem:[%s17361_s15 + $0x6e0] ss:$16 sps:$4 sm:$0xff]  }
 0xc09   : > { %13027 = vmatpush1.bf16.msra.mxu0 %v16005_v57  ;;  %13191 = vmatpush1.bf16.msra.mxu1 %v16008_v1  ;;  %v16092_v57 = vld [vmem:[%s17361_s15 + $0x6e8] ss:$16 sps:$4 sm:$0xff]   ;;  %v16097_v1 = vld [vmem:[%s17361_s15 + $0x704] ss:$16 sps:$4 sm:$0xff]  }
 0xc0a   : > { %13028 = vmatprep.subr.bf16.mxu0 %v16013_v0  ;;  %13192 = vmatprep.subr.bf16.mxu1 %v16016_v2  ;;  %v16100_v0 = vld [vmem:[%s17361_s15 + $0x70c] ss:$16 sps:$4 sm:$0xff]   ;;  %v16095_v2 = vld [vmem:[%s17361_s15 + $0x700] ss:$16 sps:$4 sm:$0xff]  }
 0xc0d   : > { %13029 = vmatpush1.bf16.msra.mxu0 %v16011_v13  ;;  %13193 = vmatpush1.bf16.msra.mxu1 %v16014_v6  ;;  %v16098_v13 = vld [vmem:[%s17361_s15 + $0x708] ss:$16 sps:$4 sm:$0xff]   ;;  %v16103_v6 = vld [vmem:[%s17361_s15 + $0x724] ss:$16 sps:$4 sm:$0xff]  }
 0xc0e   : > { %13030 = vmatprep.subr.bf16.mxu0 %v16019_v15  ;;  %13194 = vmatprep.subr.bf16.mxu1 %v16022_v17  ;;  %v16106_v15 = vld [vmem:[%s17361_s15 + $0x72c] ss:$16 sps:$4 sm:$0xff]   ;;  %v16101_v17 = vld [vmem:[%s17361_s15 + $0x720] ss:$16 sps:$4 sm:$0xff]  }
 0xc11   : > { %13031 = vmatpush1.bf16.msra.mxu0 %v16017_v23  ;;  %13195 = vmatpush1.bf16.msra.mxu1 %v16020_v33  ;;  %v16104_v23 = vld [vmem:[%s17361_s15 + $0x728] ss:$16 sps:$4 sm:$0xff]   ;;  %v16109_v33 = vld [vmem:[%s17361_s15 + $0x744] ss:$16 sps:$4 sm:$0xff]  }
 0xc12   : > { %13032 = vmatprep.subr.bf16.mxu0 %v16025_v19  ;;  %13196 = vmatprep.subr.bf16.mxu1 %v16028_v3  ;;  %v16112_v19 = vld [vmem:[%s17361_s15 + $0x74c] ss:$16 sps:$4 sm:$0xff]   ;;  %v16107_v3 = vld [vmem:[%s17361_s15 + $0x740] ss:$16 sps:$4 sm:$0xff]  }
 0xc15   : > { %13033 = vmatpush1.bf16.msra.mxu0 %v16023_v20  ;;  %13197 = vmatpush1.bf16.msra.mxu1 %v16026_v21  ;;  %v16110_v20 = vld [vmem:[%s17361_s15 + $0x748] ss:$16 sps:$4 sm:$0xff]   ;;  %v16115_v21 = vld [vmem:[%s17361_s15 + $0x764] ss:$16 sps:$4 sm:$0xff]  }
 0xc16   : > { %13034 = vmatprep.subr.bf16.mxu0 %v16031_v22  ;;  %13198 = vmatprep.subr.bf16.mxu1 %v16034_v24  ;;  %v16118_v22 = vld [vmem:[%s17361_s15 + $0x76c] ss:$16 sps:$4 sm:$0xff]   ;;  %v16113_v24 = vld [vmem:[%s17361_s15 + $0x760] ss:$16 sps:$4 sm:$0xff]  }
 0xc19   : > { %13035 = vmatpush1.bf16.msra.mxu0 %v16029_v40  ;;  %13199 = vmatpush1.bf16.msra.mxu1 %v16032_v44  ;;  %v16116_v40 = vld [vmem:[%s17361_s15 + $0x768] ss:$16 sps:$4 sm:$0xff]   ;;  %v16121_v44 = vld [vmem:[%s17361_s15 + $0x784] ss:$16 sps:$4 sm:$0xff]  }
 0xc1a   : > { %13036 = vmatprep.subr.bf16.mxu0 %v16037_v9  ;;  %13200 = vmatprep.subr.bf16.mxu1 %v16040_v18  ;;  %v16124_v9 = vld [vmem:[%s17361_s15 + $0x78c] ss:$16 sps:$4 sm:$0xff]   ;;  %v16119_v18 = vld [vmem:[%s17361_s15 + $0x780] ss:$16 sps:$4 sm:$0xff]  }
 0xc1d   : > { %13037 = vmatpush1.bf16.msra.mxu0 %v16035_v10  ;;  %13201 = vmatpush1.bf16.msra.mxu1 %v16038_v52  ;;  %v16127_v10 = vld [vmem:[%s17361_s15 + $0x7a4] ss:$16 sps:$4 sm:$0xff]   ;;  %v16130_v52 = vld [vmem:[%s17361_s15 + $0x7ac] ss:$16 sps:$4 sm:$0xff]  }
 0xc1e   : > { %13038 = vmatprep.subr.bf16.mxu0 %v16043_v54  ;;  %13202 = vmatprep.subr.bf16.mxu1 %v16046_v28  ;;  %v16125_v54 = vld [vmem:[%s17361_s15 + $0x7a0] ss:$16 sps:$4 sm:$0xff]   ;;  %v16128_v28 = vld [vmem:[%s17361_s15 + $0x7a8] ss:$16 sps:$4 sm:$0xff]  }
 0xc21   : > { %13039 = vmatpush1.bf16.msra.mxu0 %v16041_v32  ;;  %13203 = vmatpush1.bf16.msra.mxu1 %v16044_v7  ;;  %v16133_v32 = vld [vmem:[%s17361_s15 + $0x7c4] ss:$16 sps:$4 sm:$0xff]   ;;  %v16136_v7 = vld [vmem:[%s17361_s15 + $0x7cc] ss:$16 sps:$4 sm:$0xff]  }
 0xc22   : > { %13049 = vmatprep.subr.bf16.mxu0 %v16049_v38  ;;  %13213 = vmatprep.subr.bf16.mxu1 %v16052_v35  ;;  %v16131_v38 = vld [vmem:[%s17361_s15 + $0x7c0] ss:$16 sps:$4 sm:$0xff]   ;;  %v16134_v35 = vld [vmem:[%s17361_s15 + $0x7c8] ss:$16 sps:$4 sm:$0xff]  }
 0xc24   : > { %13041 = vmatmul.mubr.bf16.vlgmr.msra.gmra.mrb[0].mxu0 %v11364_v12  ;;  %13205 = vmatmul.mubr.bf16.vlgmr.msra.gmra.mrb[0].mxu1 %v11364_v12  ;;  %v16142_v12 = vld [vmem:[%s17361_s15 + $0x7ec] ss:$16 sps:$4 sm:$0xff]  }
 0xc25   : > { %13050 = vmatpush1.bf16.msra.mxu0 %v16047_v16  ;;  %13214 = vmatpush1.bf16.msra.mxu1 %v16050_v37  ;;  %v16137_v16 = vld [vmem:[%s17361_s15 + $0x7e0] ss:$16 sps:$4 sm:$0xff]   ;;  %v16140_v37 = vld [vmem:[%s17361_s15 + $0x7e8] ss:$16 sps:$4 sm:$0xff]  }
 0xc26   : > { %13051 = vmatprep.subr.bf16.mxu0 %v16055_v41  ;;  %13215 = vmatprep.subr.bf16.mxu1 %v16058_v8  ;;  %v11366_v41 = vpack.c.bf16 %v18906_v30, %v18906_v30  ;;  %v11628_v8 = vsub.s32 0, %v18731_v53 }
 0xc27   : > { %13081 = vmatprep.mubr.bf16.mxu0 %v11367_v14  ;;  %13245 = vmatprep.mubr.bf16.mxu1 %v11367_v14  ;;  %v11636_v14 = vsub.s32 2, %v18731_v53 }
 0xc29   : > { %13052 = vmatpush1.bf16.msra.mxu0 %v16053_v36  ;;  %13216 = vmatpush1.bf16.msra.mxu1 %v16056_v46  ;;  %v11624_v36 = vld [vmem:[%s792_s24] sm:$0xf]  ;;  %v11632_v46 = vsub.s32 1, %v18731_v53 }
 0xc2a   : > { %13053 = vmatprep.subr.bf16.mxu0 %v16061_v4  ;;  %13217 = vmatprep.subr.bf16.mxu1 %v16064_v49  ;;  %v11640_v4 = vsub.s32 3, %v18731_v53  ;;  %v11629_v49 = vrot.slane %v11624_v36, %v11628_v8 }
 0xc2d   : > { %13054 = vmatpush1.bf16.msra.mxu0 %v16059_v25  ;;  %13218 = vmatpush1.bf16.msra.mxu1 %v16062_v47  ;;  %v11637_v25 = vrot.slane %v11624_v36, %v11636_v14  ;;  %v11633_v47 = vrot.slane %v11624_v36, %v11632_v46 }
 0xc2e   : > { %13055 = vmatprep.subr.bf16.mxu0 %v16067_v50  ;;  %13219 = vmatprep.subr.bf16.mxu1 %v16070_v51  ;;  %v11641_v50 = vrot.slane %v11624_v36, %v11640_v4 }
 0xc31   : > { %13056 = vmatpush1.bf16.msra.mxu0 %v16065_v55  ;;  %13220 = vmatpush1.bf16.msra.mxu1 %v16068_v27 }
 0xc32   : > { %13057 = vmatprep.subr.bf16.mxu0 %v16073_v43  ;;  %13221 = vmatprep.subr.bf16.mxu1 %v16076_v5 }
 0xc35   : > { %13058 = vmatpush1.bf16.msra.mxu0 %v16071_v58  ;;  %13222 = vmatpush1.bf16.msra.mxu1 %v16074_v60 }
 0xc36   : > { %13059 = vmatprep.subr.bf16.mxu0 %v16079_v39  ;;  %13223 = vmatprep.subr.bf16.mxu1 %v16082_v34 }
 0xc39   : > { %13060 = vmatpush1.bf16.msra.mxu0 %v16077_v26  ;;  %13224 = vmatpush1.bf16.msra.mxu1 %v16080_v31 }
 0xc3a   : > { %13061 = vmatprep.subr.bf16.mxu0 %v16085_v42  ;;  %13225 = vmatprep.subr.bf16.mxu1 %v16088_v29 }
 0xc3d   : > { %13062 = vmatpush1.bf16.msra.mxu0 %v16083_v61  ;;  %13226 = vmatpush1.bf16.msra.mxu1 %v16086_v56 }
 0xc3e   : > { %13063 = vmatprep.subr.bf16.mxu0 %v16091_v45  ;;  %13227 = vmatprep.subr.bf16.mxu1 %v16094_v62 }
 0xc41   : > { %13064 = vmatpush1.bf16.msra.mxu0 %v16089_v48  ;;  %13228 = vmatpush1.bf16.msra.mxu1 %v16092_v57 }
 0xc42   : > { %13065 = vmatprep.subr.bf16.mxu0 %v16097_v1  ;;  %13229 = vmatprep.subr.bf16.mxu1 %v16100_v0 }
 0xc45   : > { %13066 = vmatpush1.bf16.msra.mxu0 %v16095_v2  ;;  %13230 = vmatpush1.bf16.msra.mxu1 %v16098_v13 }
 0xc46   : > { %13067 = vmatprep.subr.bf16.mxu0 %v16103_v6  ;;  %13231 = vmatprep.subr.bf16.mxu1 %v16106_v15 }
 0xc49   : > { %13068 = vmatpush1.bf16.msra.mxu0 %v16101_v17  ;;  %13232 = vmatpush1.bf16.msra.mxu1 %v16104_v23 }
 0xc4a   : > { %13069 = vmatprep.subr.bf16.mxu0 %v16109_v33  ;;  %13233 = vmatprep.subr.bf16.mxu1 %v16112_v19 }
 0xc4d   : > { %13070 = vmatpush1.bf16.msra.mxu0 %v16107_v3  ;;  %13234 = vmatpush1.bf16.msra.mxu1 %v16110_v20 }
 0xc4e   : > { %13071 = vmatprep.subr.bf16.mxu0 %v16115_v21  ;;  %13235 = vmatprep.subr.bf16.mxu1 %v16118_v22 }
 0xc51   : > { %13072 = vmatpush1.bf16.msra.mxu0 %v16113_v24  ;;  %13236 = vmatpush1.bf16.msra.mxu1 %v16116_v40 }
 0xc52   : > { %13073 = vmatprep.subr.bf16.mxu0 %v16121_v44  ;;  %13237 = vmatprep.subr.bf16.mxu1 %v16124_v9 }
 0xc55   : > { %13074 = vmatpush1.bf16.msra.mxu0 %v16119_v18  ;;  %13238 = vmatpush1.bf16.msra.mxu1 %v16122_v11 }
 0xc56   : > { %13075 = vmatprep.subr.bf16.mxu0 %v16127_v10  ;;  %13239 = vmatprep.subr.bf16.mxu1 %v16130_v52 }
 0xc59   : > { %13076 = vmatpush1.bf16.msra.mxu0 %v16125_v54  ;;  %13240 = vmatpush1.bf16.msra.mxu1 %v16128_v28 }
 0xc5a   : > { %13077 = vmatprep.subr.bf16.mxu0 %v16133_v32  ;;  %13241 = vmatprep.subr.bf16.mxu1 %v16136_v7 }
 0xc5d   : > { %13078 = vmatpush1.bf16.msra.mxu0 %v16131_v38  ;;  %13242 = vmatpush1.bf16.msra.mxu1 %v16134_v35 }
 0xc5e   : > { %13079 = vmatprep.subr.bf16.mxu0 %v16139_v63  ;;  %13243 = vmatprep.subr.bf16.mxu1 %v16142_v12 }
 0xc61   : > { %13080 = vmatpush1.bf16.msra.mxu0 %v16137_v16  ;;  %13244 = vmatpush1.bf16.msra.mxu1 %v16140_v37 }
 0xc64   : > { %13082 = vmatmul.mubr.bf16.vlgmr.msra.gmra.mrb[0].mxu0 %v11366_v41  ;;  %13246 = vmatmul.mubr.bf16.vlgmr.msra.gmra.mrb[0].mxu1 %v11366_v41 }
 0xd37   : > { %v13083_v51 = vpop.f32.mrb[0].mxu0  ;;  %v13247_v30 = vpop.f32.mrb[0].mxu1 }
 0xd38   : > { %v15407_v55 = vadd.f32 %v13083_v51, %v11629_v49  ;;  %v15409_v27 = vadd.f32 %v13247_v30, %v11637_v25  ;;  %v13085_v43 = vpop.f32.mrb[1].mxu0  ;;  %v13249_v5 = vpop.f32.mrb[1].mxu1 }
 0xd39   : > { %v15408_v58 = vadd.f32 %v13085_v43, %v11633_v47  ;;  %v15410_v60 = vadd.f32 %v13249_v5, %v11641_v50  ;;  %v13087_v39 = vpop.f32.mrb[2].mxu0  ;;  %v13251_v34 = vpop.f32.mrb[2].mxu1 }
 0xd3a   : > { %vm13254_vm11 = vcmp.ge.f32.partialorder %v15407_v55, 0.0  ;;  %v13258_v26 = vmul.f32 0.2, %v15407_v55  ;;  %vm13256_vm12 = vcmp.ge.f32.partialorder %v15409_v27, 0.0  ;;  %v13260_v31 = vmul.f32 0.2, %v15409_v27 }
 0xd3b   : > { %vm13255_vm13 = vcmp.ge.f32.partialorder %v15408_v58, 0.0  ;;  %v13259_v53 = vmul.f32 0.2, %v15408_v58  ;;  %vm13257_vm14 = vcmp.ge.f32.partialorder %v15410_v60, 0.0  ;;  %v13261_v42 = vmul.f32 0.2, %v15410_v60 }
 0xd3c   : > { %v13262_v29 = vsel %vm13254_vm11, %v15407_v55, %v13258_v26  ;;  %v13264_v61 = vsel %vm13256_vm12, %v15409_v27, %v13260_v31  ;;  %v13088_v56 = vpop.f32.mrb[3].mxu0  ;;  %v13252_v45 = vpop.f32.mrb[3].mxu1 }
 0xd3d   : > { %16144 = vtanh.f32 %v13262_v29  ;;  %v13263_v62 = vsel %vm13255_vm13, %v15408_v58, %v13259_v53  ;;  %v13265_v48 = vsel %vm13257_vm14, %v15410_v60, %v13261_v42 }
 0xd3e   : > { %16146 = vtanh.f32 %v13264_v61 }
 0xd3f   : > { %16148 = vtanh.f32 %v13263_v62 }
 0xd40   : > { %16150 = vtanh.f32 %v13265_v48 }
 0xd47   : > { %v16145_v57 = vpop.eup %16144 }
 0xd48   : > { %v16147_v1 = vpop.eup %16146 }
 0xd49   : > { %v16149_v0 = vpop.eup %16148 }
 0xd4a   : > { %v16151_v2 = vpop.eup %16150  ;;  %v13274_v13 = vcombine.low %v16145_v57, %v16149_v0 }
 0xd4b   : > { %v13275_v6 = vcombine.low %v16147_v1, %v16151_v2 }
 0xd4c   : > { %v13282_v15 = vrot.slane %v13274_v13, %v18739_v59 }
 0xd4d   : > { %v13289_v17 = vrot.slane %v13275_v6, %v18739_v59 }
 0xd4f   : > { %v13290_v23 = vcombine.low %v13282_v15, %v13289_v17 }
 0xd51   : > { %13292 = vst [vmem:[%s17373_s2] sm:$0xff] %v13290_v23 }
 0xd52 PF: > { %s19154_s27 = sld [smem:[#allocation38_spill]]  ;;  %s19155_s21 = sld [smem:[#allocation34_spill]] }
 0xd53   : > { %s19156_s17 = sld [smem:[#allocation37_spill]]  ;;  %p36_p7 = scmp.ge.s32.totalorder %s16938_s12, 14  }
 0xd54   : > { %s19157_s18 = smov %s16650_s19  ;;  %s19158_s19 = smov %s16654_s20 }
 0xd55   : > { %s19160_s22 = smov %s16666_s23  ;;  %s19162_s24 = smov %s16938_s12 }
 0xd56   :  { %38 = sbr.rel (!%p36_p7) target bundleno = 31 (0x1f), region = 228 }
 0xd58   : > { %s19159_s20 = smov %s19154_s27 }
 0xd59   : > { %s19161_s23 = smov %s19156_s17 }
 0xd5d   :  { %13324 = vsyncpa [#allocation4], 1 }
 0xd5e   :  { %13326 = vsyncpa [#allocation4 + $0x1], 1 }
 0xd5f   :  { %13327 = vsyncpa [#allocation6], 1 }
 0xd60   :  { %13328 = vsyncpa [#allocation9], 1 }
 0xd61   :  { %13329 = vsyncpa [#allocation12], 1 }
 0xd62   :  { %13330 = vsyncpa [#allocation15], 1 }
 0xd63   :  { %13331 = vsyncpa [#allocation18], 1 }
 0xd64   :  { %13333 = vsyncpa [#allocation18 + $0x1], 1 }
 0xd65   :  { %13334 = vsyncpa [#allocation21], 1 }
 0xd66   :  { %13336 = vsyncpa [#allocation21 + $0x1], 1 }
 0xd67   :  { %13337 = vsyncpa [#allocation24], 1 }
 0xd68   :  { %13339 = vsyncpa [#allocation24 + $0x1], 1 }

</bundles_post_ra>
